<compile_context>
chip_gen: v7x
topology: tpu7x:2x2x1
jax: 0.10.0
libtpu: 0.0.40
codegen_flags: <defaults>
</compile_context>

<pallas_src>
import functools

import jax
import jax.numpy as jnp
from jax.experimental import pallas as pl
from jax.experimental.pallas import tpu as pltpu

NDF = 128
LRELU_SLOPE = 0.2
BN_EPS = 1e-5
CIN_PAD = 8                      # conv1 input channels padded 3 -> 8  (K = 4*4*8 = 128)

_A_TILE_BUDGET = 4 << 20         # max bf16 bytes per A tile (x2 for double buffering)
_BN_FUSE_A_BUDGET = 4 << 20      # max A-tile bytes allowed for the fused full-M BN path


def _round_up(x, m):
    return (x + m - 1) // m * m


def _core_split():
    """(tiles, semantics) for the grid axis sharded across TensorCores.

    v5e/v6e have one TensorCore: the grid is a serial loop, so one tile per
    layer is optimal.  v7x has 2 TCs: split one axis in two and mark it
    CORE_PARALLEL so both cores are fed.
    """
    try:
        kind = jax.devices()[0].device_kind.lower()
    except Exception:
        kind = ""
    if "v7" in kind:
        return 2, pltpu.CORE_PARALLEL
    return 1, "arbitrary"


# ----------------------------------------------------------------------------
# Pallas kernels (all single-K-step: dot -> epilogue -> one store)
# ----------------------------------------------------------------------------
def _matmul_epilogue_kernel(a_ref, b_ref, o_ref, *, apply_lrelu, slope):
    """bf16 x bf16 -> f32 dot, optional LeakyReLU, single store (bf16/f32)."""
    y = jnp.dot(a_ref[...], b_ref[...], preferred_element_type=jnp.float32)
    if apply_lrelu:
        y = jnp.where(y > 0, y, slope * y)
    o_ref[...] = y.astype(o_ref.dtype)


def _matmul_bn_lrelu_kernel(a_ref, b_ref, g_ref, bias_ref, o_ref,
                            *, count, eps, slope):
    """Single-K matmul fused with training-mode BatchNorm + LeakyReLU.

    Requires the full M extent (N*Ho*Wo rows, zero-padded to Mp) in this tile
    so per-channel (per-column) batch statistics are local.  Two-pass centered
    variance; all epilogue math in f32 (v5e-safe).
    """
    y = jnp.dot(a_ref[...], b_ref[...], preferred_element_type=jnp.float32)
    tm = y.shape[0]
    row_ids = jax.lax.broadcasted_iota(jnp.int32, (tm, 1), 0)
    valid = row_ids < count                              # mask zero-padded rows
    inv_count = 1.0 / count
    mean = jnp.sum(y, axis=0, keepdims=True) * inv_count  # pad rows are exactly 0
    centered = jnp.where(valid, y - mean, 0.0)
    var = jnp.sum(centered * centered, axis=0, keepdims=True) * inv_count
    inv_std = jax.lax.rsqrt(var + eps)
    scale = g_ref[...] * inv_std                          # (1, tn)
    shift = bias_ref[...] - mean * scale                  # (1, tn)
    z = y * scale + shift
    o_ref[...] = jnp.where(z > 0, z, slope * z).astype(o_ref.dtype)


def _final_conv_kernel(a_ref, w_ref, o_ref, *, chunk):
    """Final 1-output-channel conv: chunked per-row dot (bounded live vregs)."""
    nchunks = a_ref.shape[1] // chunk

    def body(c, acc):
        off = pl.multiple_of(c * chunk, chunk)
        a = a_ref[:, pl.ds(off, chunk)].astype(jnp.float32)   # (Mp, chunk)
        w = w_ref[:, pl.ds(off, chunk)].astype(jnp.float32)   # (1,  chunk)
        return acc + jnp.sum(a * w, axis=1, keepdims=True)

    acc0 = jnp.zeros((a_ref.shape[0], 1), jnp.float32)
    o_ref[...] = jax.lax.fori_loop(0, nchunks, body, acc0, unroll=True)


# ----------------------------------------------------------------------------
# Pallas wrappers
# ----------------------------------------------------------------------------
def pallas_matmul_lrelu(a, b, *, apply_lrelu=True, slope=LRELU_SLOPE,
                        out_dtype=jnp.bfloat16):
    """(M,K) bf16 @ (K,N) bf16 with optional fused LeakyReLU. Single K block."""
    M, K = a.shape
    K2, Nc = b.shape
    assert K == K2 and K % 128 == 0 and Nc % 128 == 0
    Mp = _round_up(M, 8)
    a_p = a if Mp == M else jnp.pad(a, ((0, Mp - M), (0, 0)))

    n_tiles, core_sem = _core_split()
    tm = Mp
    if n_tiles > 1 and Mp % (8 * n_tiles) == 0:
        tm = Mp // n_tiles
    while tm * K * 2 > _A_TILE_BUDGET and tm % 16 == 0:
        tm //= 2
    grid_m = Mp // tm
    sem = core_sem if (n_tiles > 1 and grid_m > 1) else "arbitrary"

    kernel = functools.partial(_matmul_epilogue_kernel,
                               apply_lrelu=apply_lrelu, slope=slope)
    out = pl.pallas_call(
        kernel,
        out_shape=jax.ShapeDtypeStruct((Mp, Nc), out_dtype),
        grid_spec=pltpu.PrefetchScalarGridSpec(
            num_scalar_prefetch=0,
            grid=(grid_m,),
            in_specs=[
                pl.BlockSpec((tm, K), lambda i: (i, 0)),
                pl.BlockSpec((K, Nc), lambda i: (0, 0)),
            ],
            out_specs=pl.BlockSpec((tm, Nc), lambda i: (i, 0)),
        ),
        compiler_params=pltpu.CompilerParams(dimension_semantics=(sem,)),
    )(a_p, b)
    return out[:M]


def pallas_matmul_bn_lrelu(a, b, gamma, beta, *, eps=BN_EPS, slope=LRELU_SLOPE,
                           out_dtype=jnp.bfloat16):
    """(M,K) bf16 @ (K,N) bf16 with fused batch-stats BatchNorm + LeakyReLU."""
    M, K = a.shape
    K2, Nc = b.shape
    assert K == K2 and K % 128 == 0 and Nc % 128 == 0
    Mp = _round_up(M, 8)
    a_p = a if Mp == M else jnp.pad(a, ((0, Mp - M), (0, 0)))

    n_tiles, core_sem = _core_split()
    tn = Nc
    if n_tiles > 1 and Nc % (128 * n_tiles) == 0:
        tn = Nc // n_tiles
    grid_n = Nc // tn
    sem = core_sem if grid_n > 1 else "arbitrary"

    g = gamma.reshape(1, Nc).astype(jnp.float32)
    bb = beta.reshape(1, Nc).astype(jnp.float32)

    kernel = functools.partial(_matmul_bn_lrelu_kernel, count=M, eps=eps,
                               slope=slope)
    out = pl.pallas_call(
        kernel,
        out_shape=jax.ShapeDtypeStruct((Mp, Nc), out_dtype),
        grid_spec=pltpu.PrefetchScalarGridSpec(
            num_scalar_prefetch=0,
            grid=(grid_n,),
            in_specs=[
                pl.BlockSpec((Mp, K), lambda j: (0, 0)),
                pl.BlockSpec((K, tn), lambda j: (0, j)),
                pl.BlockSpec((1, tn), lambda j: (0, j)),
                pl.BlockSpec((1, tn), lambda j: (0, j)),
            ],
            out_specs=pl.BlockSpec((Mp, tn), lambda j: (0, j)),
        ),
        compiler_params=pltpu.CompilerParams(dimension_semantics=(sem,)),
    )(a_p, b, g, bb)
    return out[:M]


def pallas_final_conv(a, w_row, *, chunk=1024):
    """a: (M,K) bf16, w_row: (1,K) bf16 -> (M,) f32 (single output channel)."""
    M, K = a.shape
    Mp = _round_up(M, 8)
    chunk = min(chunk, _round_up(K, 128))
    Kp = _round_up(K, chunk)
    a_p = jnp.pad(a, ((0, Mp - M), (0, Kp - K))) if (Mp != M or Kp != K) else a
    w_p = jnp.pad(w_row, ((0, 0), (0, Kp - K))) if Kp != K else w_row

    out = pl.pallas_call(
        functools.partial(_final_conv_kernel, chunk=chunk),
        out_shape=jax.ShapeDtypeStruct((Mp, 1), jnp.float32),
        grid_spec=pltpu.PrefetchScalarGridSpec(
            num_scalar_prefetch=0,
            grid=(1,),
            in_specs=[
                pl.BlockSpec((Mp, Kp), lambda i: (0, 0)),
                pl.BlockSpec((1, Kp), lambda i: (0, 0)),
            ],
            out_specs=pl.BlockSpec((Mp, 1), lambda i: (0, 0)),
        ),
        compiler_params=pltpu.CompilerParams(dimension_semantics=("arbitrary",)),
    )(a_p, w_p)
    return out[:M, 0]


# ----------------------------------------------------------------------------
# im2col glue (NHWC, data-movement only; conv arithmetic is in Pallas)
# ----------------------------------------------------------------------------
def im2col_nhwc(x, k, stride, pad):
    """x: (N,H,W,C) -> (N*Ho*Wo, k*k*C), columns ordered (kh, kw, Cin)."""
    N, H, W, C = x.shape
    xp = jnp.pad(x, ((0, 0), (pad, pad), (pad, pad), (0, 0)))
    Ho = (H + 2 * pad - k) // stride + 1
    Wo = (W + 2 * pad - k) // stride + 1
    taps = []
    for i in range(k):
        for j in range(k):
            taps.append(xp[:, i:i + stride * Ho:stride,
                           j:j + stride * Wo:stride, :])
    col = jnp.stack(taps, axis=3).reshape(N * Ho * Wo, k * k * C)
    return col, Ho, Wo


def conv2d_lrelu(x_nhwc, w_mat, k, stride, pad):
    N = x_nhwc.shape[0]
    col, Ho, Wo = im2col_nhwc(x_nhwc, k, stride, pad)
    out = pallas_matmul_lrelu(col, w_mat, apply_lrelu=True)
    return out.reshape(N, Ho, Wo, -1)


def conv2d_bn_lrelu(x_nhwc, w_mat, gamma, beta, k, stride, pad):
    N = x_nhwc.shape[0]
    col, Ho, Wo = im2col_nhwc(x_nhwc, k, stride, pad)
    M, K = col.shape
    if _round_up(M, 8) * K * 2 <= _BN_FUSE_A_BUDGET:
        out = pallas_matmul_bn_lrelu(col, w_mat, gamma, beta)
    else:
        # Whole-M-in-one-tile BN fusion would overflow scoped VMEM (matters on
        # v7x's 64 MiB): fall back to a Pallas matmul + plain-JAX batch-stat BN.
        # TODO(synk): split-M Pallas BN with a reduction grid axis for big batches.
        y = pallas_matmul_lrelu(col, w_mat, apply_lrelu=False,
                                out_dtype=jnp.float32)
        mean = jnp.mean(y, axis=0, keepdims=True)
        var = jnp.mean(jnp.square(y - mean), axis=0, keepdims=True)
        z = (y - mean) * (gamma[None, :] * jax.lax.rsqrt(var + BN_EPS)) + beta[None, :]
        out = jnp.where(z > 0, z, LRELU_SLOPE * z).astype(jnp.bfloat16)
    return out.reshape(N, Ho, Wo, -1)


# ----------------------------------------------------------------------------
# Full forward pass (matches PhotoDiscriminator.forward, training-mode BN)
# Note: matmuls run in bf16 (f32 accumulation); outputs differ from an f32
# PyTorch reference by typical bf16 tolerance (~1e-2 relative).
# ----------------------------------------------------------------------------
def photo_discriminator_forward(x_nchw, params):
    # NCHW -> NHWC once, cast bf16 once, zero-pad Cin 3 -> 8 so conv1 K = 128.
    x = jnp.transpose(x_nchw, (0, 2, 3, 1)).astype(jnp.bfloat16)
    x = jnp.pad(x, ((0, 0), (0, 0), (0, 0), (0, CIN_PAD - x.shape[-1])))
    # Conv(3 -> ndf, 4, 2, 1) + LeakyReLU(0.2)                   [fused epilogue]
    h = conv2d_lrelu(x, params["w1"], 4, 2, 1)
    # Conv(ndf -> 2ndf, 4, 2, 1) + BatchNorm + LeakyReLU(0.2)    [fully fused]
    h = conv2d_bn_lrelu(h, params["w2"], params["g2"], params["b2"], 4, 2, 1)
    # Conv(2ndf -> 4ndf, 4, 2, 1) + BatchNorm + LeakyReLU(0.2)   [fully fused]
    h = conv2d_bn_lrelu(h, params["w3"], params["g3"], params["b3"], 4, 2, 1)
    # Conv(4ndf -> 1, 4, 1, 0): chunked per-row dot kernel.
    col, _, _ = im2col_nhwc(h, 4, 1, 0)
    out = pallas_final_conv(col, params["w4"])          # (N*Ho*Wo,) f32
    # output.view(-1, 1).squeeze(1)
    return out.reshape(-1)


# ----------------------------------------------------------------------------
# Parameter init (weights reshaped/transposed/padded/cast to bf16 once)
# ----------------------------------------------------------------------------
def _prep_weight(w, cin_pad=None):
    """(Cout, Cin, kh, kw) -> (kh*kw*Cin, Cout) bf16 matrix for im2col matmul."""
    cout, cin, kh, kw = w.shape
    if cin_pad is not None and cin_pad > cin:
        w = jnp.pad(w, ((0, 0), (0, cin_pad - cin), (0, 0), (0, 0)))
        cin = cin_pad
    return jnp.transpose(w, (2, 3, 1, 0)).reshape(kh * kw * cin,
                                                  cout).astype(jnp.bfloat16)


def init_params(key):
    ks = jax.random.split(key, 4)

    def w(k_, cout, cin, ksz=4):
        # DCGAN-style deterministic init: N(0, 0.02)
        return 0.02 * jax.random.normal(k_, (cout, cin, ksz, ksz), jnp.float32)

    w1 = w(ks[0], NDF, 3)
    w2 = w(ks[1], 2 * NDF, NDF)
    w3 = w(ks[2], 4 * NDF, 2 * NDF)
    w4 = w(ks[3], 1, 4 * NDF)
    return {
        "w1": _prep_weight(w1, cin_pad=CIN_PAD),        # (128, 128)
        "w2": _prep_weight(w2),                         # (2048, 256)
        "g2": jnp.ones((2 * NDF,), jnp.float32),
        "b2": jnp.zeros((2 * NDF,), jnp.float32),
        "w3": _prep_weight(w3),                         # (4096, 512)
        "g3": jnp.ones((4 * NDF,), jnp.float32),
        "b3": jnp.zeros((4 * NDF,), jnp.float32),
        "w4": _prep_weight(w4).T,                       # (1, 8192) row vector
    }


if __name__ == "__main__":
    key = jax.random.PRNGKey(0)
    pkey, xkey = jax.random.split(key)
    params = init_params(pkey)
    # 32x32 is the smallest spatial size compatible with the final 4x4 valid conv.
    x = jax.random.normal(xkey, (2, 3, 32, 32), jnp.float32)

    fwd = jax.jit(photo_discriminator_forward)
    out = fwd(x, params)
    jax.block_until_ready(out)
    assert out.shape == (2,) and out.dtype == jnp.float32
    assert bool(jnp.all(jnp.isfinite(out)))
    print("KERNEL_OK")
</pallas_src>

<mosaic_0001>
module attributes {stable_mosaic.version = 11 : i64} {
  func.func @_matmul_epilogue_kernel(%arg0: i32, %arg1: memref<512x128xbf16, #tpu.memory_space<vmem>>, %arg2: memref<128x128xbf16, #tpu.memory_space<vmem>>, %arg3: memref<512x128xbf16, #tpu.memory_space<vmem>>) attributes {dimension_semantics = [#tpu.dimension_semantics<arbitrary>], iteration_bounds = array<i64: 1>, scalar_prefetch = 0 : i64, scratch_operands = 0 : i64, tpu.core_type = #tpu.core_type<tc>, window_params = [{transform_indices = @transform_0, window_bounds = array<i64: 512, 128>}, {pipeline_mode = #tpu.pipeline_mode<synchronous>, transform_indices = @transform_1, window_bounds = array<i64: 128, 128>}, {transform_indices = @transform_2, window_bounds = array<i64: 512, 128>}]} {
    %c0 = arith.constant 0 : index
    %c0_0 = arith.constant 0 : index
    %0 = vector.load %arg1[%c0, %c0_0] : memref<512x128xbf16, #tpu.memory_space<vmem>>, vector<512x128xbf16>
    %c0_1 = arith.constant 0 : index
    %c0_2 = arith.constant 0 : index
    %1 = vector.load %arg2[%c0_1, %c0_2] : memref<128x128xbf16, #tpu.memory_space<vmem>>, vector<128x128xbf16>
    %cst = arith.constant dense<0.000000e+00> : vector<512x128xf32>
    %2 = tpu.matmul %0, %1, %cst {dimension_numbers = #tpu.dot_dimension_numbers<[1], [0], [0], [1], [0, 0, 1, 1], [], []>} : vector<512x128xbf16>, vector<128x128xbf16>, vector<512x128xf32> -> vector<512x128xf32>
    %cst_3 = arith.constant 0.000000e+00 : f32
    %3 = vector.broadcast %cst_3 : f32 to vector<512x128xf32>
    %4 = arith.cmpf ogt, %2, %3 : vector<512x128xf32>
    %cst_4 = arith.constant 2.000000e-01 : f32
    %5 = vector.broadcast %cst_4 : f32 to vector<512x128xf32>
    %6 = arith.mulf %5, %2 : vector<512x128xf32>
    %7 = arith.select %4, %2, %6 : vector<512x128xi1>, vector<512x128xf32>
    %8 = arith.truncf %7 : vector<512x128xf32> to vector<512x128xbf16>
    %c0_5 = arith.constant 0 : index
    %c0_6 = arith.constant 0 : index
    %9 = vector.load %arg3[%c0_5, %c0_6] : memref<512x128xbf16, #tpu.memory_space<vmem>>, vector<512x128xbf16>
    tpu.vector_store %arg3[%c0_5, %c0_6], %8 {strides = array<i32>} : memref<512x128xbf16, #tpu.memory_space<vmem>>, vector<512x128xbf16>,
    return
  }
  func.func @transform_0(%arg0: i32) -> (i32, i32) {
    %c0_i32 = arith.constant 0 : i32
    %c0_i32_0 = arith.constant 0 : i32
    return %arg0, %c0_i32 : i32, i32
  }
  func.func @transform_1(%arg0: i32) -> (i32, i32) {
    %c0_i32 = arith.constant 0 : i32
    %c0_i32_0 = arith.constant 0 : i32
    %c0_i32_1 = arith.constant 0 : i32
    return %c0_i32, %c0_i32_0 : i32, i32
  }
  func.func @transform_2(%arg0: i32) -> (i32, i32) {
    %c0_i32 = arith.constant 0 : i32
    %c0_i32_0 = arith.constant 0 : i32
    return %arg0, %c0_i32 : i32, i32
  }
}

module attributes {stable_mosaic.version = 11 : i64} {
  func.func @_matmul_bn_lrelu_kernel(%arg0: i32, %arg1: memref<128x2048xbf16, #tpu.memory_space<vmem>>, %arg2: memref<2048x256xbf16, #tpu.memory_space<vmem>>, %arg3: memref<1x256xf32, #tpu.memory_space<vmem>>, %arg4: memref<1x256xf32, #tpu.memory_space<vmem>>, %arg5: memref<128x256xbf16, #tpu.memory_space<vmem>>) attributes {dimension_semantics = [#tpu.dimension_semantics<arbitrary>], iteration_bounds = array<i64: 1>, scalar_prefetch = 0 : i64, scratch_operands = 0 : i64, tpu.core_type = #tpu.core_type<tc>, window_params = [{pipeline_mode = #tpu.pipeline_mode<synchronous>, transform_indices = @transform_0, window_bounds = array<i64: 128, 2048>}, {transform_indices = @transform_1, window_bounds = array<i64: 2048, 256>}, {transform_indices = @transform_2, window_bounds = array<i64: 1, 256>}, {transform_indices = @transform_3, window_bounds = array<i64: 1, 256>}, {transform_indices = @transform_4, window_bounds = array<i64: 128, 256>}]} {
    %c0 = arith.constant 0 : index
    %c0_0 = arith.constant 0 : index
    %0 = vector.load %arg1[%c0, %c0_0] : memref<128x2048xbf16, #tpu.memory_space<vmem>>, vector<128x2048xbf16>
    %c0_1 = arith.constant 0 : index
    %c0_2 = arith.constant 0 : index
    %1 = vector.load %arg2[%c0_1, %c0_2] : memref<2048x256xbf16, #tpu.memory_space<vmem>>, vector<2048x256xbf16>
    %cst = arith.constant dense<0.000000e+00> : vector<128x256xf32>
    %2 = tpu.matmul %0, %1, %cst {dimension_numbers = #tpu.dot_dimension_numbers<[1], [0], [0], [1], [0, 0, 1, 1], [], []>} : vector<128x2048xbf16>, vector<2048x256xbf16>, vector<128x256xf32> -> vector<128x256xf32>
    %3 = tpu.iota {dimensions = array<i32: 0>} : vector<128x1xi32>
    %c128_i32 = arith.constant 128 : i32
    %4 = vector.broadcast %c128_i32 : i32 to vector<128x1xi32>
    %5 = arith.cmpi slt, %3, %4 : vector<128x1xi32>
    %cst_3 = arith.constant dense<0.000000e+00> : vector<256xf32>
    %6 = vector.multi_reduction <add>, %2, %cst_3 [0] : vector<128x256xf32> to vector<256xf32>
    %7 = vector.shape_cast %6 : vector<256xf32> to vector<1x256xf32>
    %cst_4 = arith.constant 7.812500e-03 : f32
    %8 = vector.broadcast %cst_4 : f32 to vector<1x256xf32>
    %9 = arith.mulf %7, %8 : vector<1x256xf32>
    %10 = vector.broadcast %9 : vector<1x256xf32> to vector<128x256xf32>
    %11 = arith.subf %2, %10 : vector<128x256xf32>
    %cst_5 = arith.constant 0.000000e+00 : f32
    %12 = vector.shape_cast %5 : vector<128x1xi1> to vector<128x1xi1>
    %13 = vector.broadcast %12 : vector<128x1xi1> to vector<128x256xi1>
    %14 = vector.broadcast %cst_5 : f32 to vector<128x256xf32>
    %15 = arith.select %13, %11, %14 : vector<128x256xi1>, vector<128x256xf32>
    %16 = arith.mulf %15, %15 : vector<128x256xf32>
    %cst_6 = arith.constant dense<0.000000e+00> : vector<256xf32>
    %17 = vector.multi_reduction <add>, %16, %cst_6 [0] : vector<128x256xf32> to vector<256xf32>
    %18 = vector.shape_cast %17 : vector<256xf32> to vector<1x256xf32>
    %cst_7 = arith.constant 7.812500e-03 : f32
    %19 = vector.broadcast %cst_7 : f32 to vector<1x256xf32>
    %20 = arith.mulf %18, %19 : vector<1x256xf32>
    %cst_8 = arith.constant 9.99999974E-6 : f32
    %21 = vector.broadcast %cst_8 : f32 to vector<1x256xf32>
    %22 = arith.addf %20, %21 : vector<1x256xf32>
    %23 = math.rsqrt %22 : vector<1x256xf32>
    %c0_9 = arith.constant 0 : index
    %c0_10 = arith.constant 0 : index
    %24 = vector.load %arg3[%c0_9, %c0_10] : memref<1x256xf32, #tpu.memory_space<vmem>>, vector<1x256xf32>
    %25 = arith.mulf %24, %23 : vector<1x256xf32>
    %c0_11 = arith.constant 0 : index
    %c0_12 = arith.constant 0 : index
    %26 = vector.load %arg4[%c0_11, %c0_12] : memref<1x256xf32, #tpu.memory_space<vmem>>, vector<1x256xf32>
    %27 = arith.mulf %9, %25 : vector<1x256xf32>
    %28 = arith.subf %26, %27 : vector<1x256xf32>
    %29 = vector.broadcast %25 : vector<1x256xf32> to vector<128x256xf32>
    %30 = arith.mulf %2, %29 : vector<128x256xf32>
    %31 = vector.broadcast %28 : vector<1x256xf32> to vector<128x256xf32>
    %32 = arith.addf %30, %31 : vector<128x256xf32>
    %cst_13 = arith.constant 0.000000e+00 : f32
    %33 = vector.broadcast %cst_13 : f32 to vector<128x256xf32>
    %34 = arith.cmpf ogt, %32, %33 : vector<128x256xf32>
    %cst_14 = arith.constant 2.000000e-01 : f32
    %35 = vector.broadcast %cst_14 : f32 to vector<128x256xf32>
    %36 = arith.mulf %35, %32 : vector<128x256xf32>
    %37 = arith.select %34, %32, %36 : vector<128x256xi1>, vector<128x256xf32>
    %38 = arith.truncf %37 : vector<128x256xf32> to vector<128x256xbf16>
    %c0_15 = arith.constant 0 : index
    %c0_16 = arith.constant 0 : index
    %39 = vector.load %arg5[%c0_15, %c0_16] : memref<128x256xbf16, #tpu.memory_space<vmem>>, vector<128x256xbf16>
    tpu.vector_store %arg5[%c0_15, %c0_16], %38 {strides = array<i32>} : memref<128x256xbf16, #tpu.memory_space<vmem>>, vector<128x256xbf16>,
    return
  }
  func.func @transform_0(%arg0: i32) -> (i32, i32) {
    %c0_i32 = arith.constant 0 : i32
    %c0_i32_0 = arith.constant 0 : i32
    %c0_i32_1 = arith.constant 0 : i32
    return %c0_i32, %c0_i32_0 : i32, i32
  }
  func.func @transform_1(%arg0: i32) -> (i32, i32) {
    %c0_i32 = arith.constant 0 : i32
    %c0_i32_0 = arith.constant 0 : i32
    return %c0_i32, %arg0 : i32, i32
  }
  func.func @transform_2(%arg0: i32) -> (i32, i32) {
    %c0_i32 = arith.constant 0 : i32
    %c0_i32_0 = arith.constant 0 : i32
    return %c0_i32, %arg0 : i32, i32
  }
  func.func @transform_3(%arg0: i32) -> (i32, i32) {
    %c0_i32 = arith.constant 0 : i32
    %c0_i32_0 = arith.constant 0 : i32
    return %c0_i32, %arg0 : i32, i32
  }
  func.func @transform_4(%arg0: i32) -> (i32, i32) {
    %c0_i32 = arith.constant 0 : i32
    %c0_i32_0 = arith.constant 0 : i32
    return %c0_i32, %arg0 : i32, i32
  }
}

module attributes {stable_mosaic.version = 11 : i64} {
  func.func @_matmul_bn_lrelu_kernel(%arg0: i32, %arg1: memref<32x4096xbf16, #tpu.memory_space<vmem>>, %arg2: memref<4096x512xbf16, #tpu.memory_space<vmem>>, %arg3: memref<1x512xf32, #tpu.memory_space<vmem>>, %arg4: memref<1x512xf32, #tpu.memory_space<vmem>>, %arg5: memref<32x512xbf16, #tpu.memory_space<vmem>>) attributes {dimension_semantics = [#tpu.dimension_semantics<arbitrary>], iteration_bounds = array<i64: 1>, scalar_prefetch = 0 : i64, scratch_operands = 0 : i64, tpu.core_type = #tpu.core_type<tc>, window_params = [{pipeline_mode = #tpu.pipeline_mode<synchronous>, transform_indices = @transform_0, window_bounds = array<i64: 32, 4096>}, {transform_indices = @transform_1, window_bounds = array<i64: 4096, 512>}, {transform_indices = @transform_2, window_bounds = array<i64: 1, 512>}, {transform_indices = @transform_3, window_bounds = array<i64: 1, 512>}, {transform_indices = @transform_4, window_bounds = array<i64: 32, 512>}]} {
    %c0 = arith.constant 0 : index
    %c0_0 = arith.constant 0 : index
    %0 = vector.load %arg1[%c0, %c0_0] : memref<32x4096xbf16, #tpu.memory_space<vmem>>, vector<32x4096xbf16>
    %c0_1 = arith.constant 0 : index
    %c0_2 = arith.constant 0 : index
    %1 = vector.load %arg2[%c0_1, %c0_2] : memref<4096x512xbf16, #tpu.memory_space<vmem>>, vector<4096x512xbf16>
    %cst = arith.constant dense<0.000000e+00> : vector<32x512xf32>
    %2 = tpu.matmul %0, %1, %cst {dimension_numbers = #tpu.dot_dimension_numbers<[1], [0], [0], [1], [0, 0, 1, 1], [], []>} : vector<32x4096xbf16>, vector<4096x512xbf16>, vector<32x512xf32> -> vector<32x512xf32>
    %3 = tpu.iota {dimensions = array<i32: 0>} : vector<32x1xi32>
    %c32_i32 = arith.constant 32 : i32
    %4 = vector.broadcast %c32_i32 : i32 to vector<32x1xi32>
    %5 = arith.cmpi slt, %3, %4 : vector<32x1xi32>
    %cst_3 = arith.constant dense<0.000000e+00> : vector<512xf32>
    %6 = vector.multi_reduction <add>, %2, %cst_3 [0] : vector<32x512xf32> to vector<512xf32>
    %7 = vector.shape_cast %6 : vector<512xf32> to vector<1x512xf32>
    %cst_4 = arith.constant 3.125000e-02 : f32
    %8 = vector.broadcast %cst_4 : f32 to vector<1x512xf32>
    %9 = arith.mulf %7, %8 : vector<1x512xf32>
    %10 = vector.broadcast %9 : vector<1x512xf32> to vector<32x512xf32>
    %11 = arith.subf %2, %10 : vector<32x512xf32>
    %cst_5 = arith.constant 0.000000e+00 : f32
    %12 = vector.shape_cast %5 : vector<32x1xi1> to vector<32x1xi1>
    %13 = vector.broadcast %12 : vector<32x1xi1> to vector<32x512xi1>
    %14 = vector.broadcast %cst_5 : f32 to vector<32x512xf32>
    %15 = arith.select %13, %11, %14 : vector<32x512xi1>, vector<32x512xf32>
    %16 = arith.mulf %15, %15 : vector<32x512xf32>
    %cst_6 = arith.constant dense<0.000000e+00> : vector<512xf32>
    %17 = vector.multi_reduction <add>, %16, %cst_6 [0] : vector<32x512xf32> to vector<512xf32>
    %18 = vector.shape_cast %17 : vector<512xf32> to vector<1x512xf32>
    %cst_7 = arith.constant 3.125000e-02 : f32
    %19 = vector.broadcast %cst_7 : f32 to vector<1x512xf32>
    %20 = arith.mulf %18, %19 : vector<1x512xf32>
    %cst_8 = arith.constant 9.99999974E-6 : f32
    %21 = vector.broadcast %cst_8 : f32 to vector<1x512xf32>
    %22 = arith.addf %20, %21 : vector<1x512xf32>
    %23 = math.rsqrt %22 : vector<1x512xf32>
    %c0_9 = arith.constant 0 : index
    %c0_10 = arith.constant 0 : index
    %24 = vector.load %arg3[%c0_9, %c0_10] : memref<1x512xf32, #tpu.memory_space<vmem>>, vector<1x512xf32>
    %25 = arith.mulf %24, %23 : vector<1x512xf32>
    %c0_11 = arith.constant 0 : index
    %c0_12 = arith.constant 0 : index
    %26 = vector.load %arg4[%c0_11, %c0_12] : memref<1x512xf32, #tpu.memory_space<vmem>>, vector<1x512xf32>
    %27 = arith.mulf %9, %25 : vector<1x512xf32>
    %28 = arith.subf %26, %27 : vector<1x512xf32>
    %29 = vector.broadcast %25 : vector<1x512xf32> to vector<32x512xf32>
    %30 = arith.mulf %2, %29 : vector<32x512xf32>
    %31 = vector.broadcast %28 : vector<1x512xf32> to vector<32x512xf32>
    %32 = arith.addf %30, %31 : vector<32x512xf32>
    %cst_13 = arith.constant 0.000000e+00 : f32
    %33 = vector.broadcast %cst_13 : f32 to vector<32x512xf32>
    %34 = arith.cmpf ogt, %32, %33 : vector<32x512xf32>
    %cst_14 = arith.constant 2.000000e-01 : f32
    %35 = vector.broadcast %cst_14 : f32 to vector<32x512xf32>
    %36 = arith.mulf %35, %32 : vector<32x512xf32>
    %37 = arith.select %34, %32, %36 : vector<32x512xi1>, vector<32x512xf32>
    %38 = arith.truncf %37 : vector<32x512xf32> to vector<32x512xbf16>
    %c0_15 = arith.constant 0 : index
    %c0_16 = arith.constant 0 : index
    %39 = vector.load %arg5[%c0_15, %c0_16] : memref<32x512xbf16, #tpu.memory_space<vmem>>, vector<32x512xbf16>
    tpu.vector_store %arg5[%c0_15, %c0_16], %38 {strides = array<i32>} : memref<32x512xbf16, #tpu.memory_space<vmem>>, vector<32x512xbf16>,
    return
  }
  func.func @transform_0(%arg0: i32) -> (i32, i32) {
    %c0_i32 = arith.constant 0 : i32
    %c0_i32_0 = arith.constant 0 : i32
    %c0_i32_1 = arith.constant 0 : i32
    return %c0_i32, %c0_i32_0 : i32, i32
  }
  func.func @transform_1(%arg0: i32) -> (i32, i32) {
    %c0_i32 = arith.constant 0 : i32
    %c0_i32_0 = arith.constant 0 : i32
    return %c0_i32, %arg0 : i32, i32
  }
  func.func @transform_2(%arg0: i32) -> (i32, i32) {
    %c0_i32 = arith.constant 0 : i32
    %c0_i32_0 = arith.constant 0 : i32
    return %c0_i32, %arg0 : i32, i32
  }
  func.func @transform_3(%arg0: i32) -> (i32, i32) {
    %c0_i32 = arith.constant 0 : i32
    %c0_i32_0 = arith.constant 0 : i32
    return %c0_i32, %arg0 : i32, i32
  }
  func.func @transform_4(%arg0: i32) -> (i32, i32) {
    %c0_i32 = arith.constant 0 : i32
    %c0_i32_0 = arith.constant 0 : i32
    return %c0_i32, %arg0 : i32, i32
  }
}

module attributes {stable_mosaic.version = 11 : i64} {
  func.func @_final_conv_kernel(%arg0: i32, %arg1: memref<8x8192xbf16, #tpu.memory_space<vmem>>, %arg2: memref<1x8192xbf16, #tpu.memory_space<vmem>>, %arg3: memref<8x1xf32, #tpu.memory_space<vmem>>) attributes {dimension_semantics = [#tpu.dimension_semantics<arbitrary>], iteration_bounds = array<i64: 1>, scalar_prefetch = 0 : i64, scratch_operands = 0 : i64, tpu.core_type = #tpu.core_type<tc>, window_params = [{pipeline_mode = #tpu.pipeline_mode<synchronous>, transform_indices = @transform_0, window_bounds = array<i64: 8, 8192>}, {pipeline_mode = #tpu.pipeline_mode<synchronous>, transform_indices = @transform_1, window_bounds = array<i64: 1, 8192>}, {pipeline_mode = #tpu.pipeline_mode<synchronous>, transform_indices = @transform_2, window_bounds = array<i64: 8, 1>}]} {
    %cst = arith.constant 0.000000e+00 : f32
    %0 = vector.broadcast %cst : f32 to vector<8x1xf32>
    %c0_i32 = arith.constant 0 : i32
    %c1024_i32 = arith.constant 1024 : i32
    %1 = arith.muli %c0_i32, %c1024_i32 : i32
    %2 = tpu.assume_multiple %1, 1024 : i32
    %c0 = arith.constant 0 : index
    %3 = arith.index_cast %2 : i32 to index
    %4 = vector.load %arg1[%c0, %3] : memref<8x8192xbf16, #tpu.memory_space<vmem>>, vector<8x1024xbf16>
    %5 = arith.extf %4 : vector<8x1024xbf16> to vector<8x1024xf32>
    %c0_0 = arith.constant 0 : index
    %6 = arith.index_cast %2 : i32 to index
    %7 = vector.load %arg2[%c0_0, %6] : memref<1x8192xbf16, #tpu.memory_space<vmem>>, vector<1x1024xbf16>
    %8 = arith.extf %7 : vector<1x1024xbf16> to vector<1x1024xf32>
    %9 = vector.broadcast %8 : vector<1x1024xf32> to vector<8x1024xf32>
    %10 = arith.mulf %5, %9 : vector<8x1024xf32>
    %cst_1 = arith.constant dense<0.000000e+00> : vector<8xf32>
    %11 = vector.multi_reduction <add>, %10, %cst_1 [1] : vector<8x1024xf32> to vector<8xf32>
    %12 = vector.shape_cast %11 : vector<8xf32> to vector<8x1xf32>
    %13 = arith.addf %0, %12 : vector<8x1xf32>
    %c1_i32 = arith.constant 1 : i32
    %c1024_i32_2 = arith.constant 1024 : i32
    %14 = arith.muli %c1_i32, %c1024_i32_2 : i32
    %15 = tpu.assume_multiple %14, 1024 : i32
    %c0_3 = arith.constant 0 : index
    %16 = arith.index_cast %15 : i32 to index
    %17 = vector.load %arg1[%c0_3, %16] : memref<8x8192xbf16, #tpu.memory_space<vmem>>, vector<8x1024xbf16>
    %18 = arith.extf %17 : vector<8x1024xbf16> to vector<8x1024xf32>
    %c0_4 = arith.constant 0 : index
    %19 = arith.index_cast %15 : i32 to index
    %20 = vector.load %arg2[%c0_4, %19] : memref<1x8192xbf16, #tpu.memory_space<vmem>>, vector<1x1024xbf16>
    %21 = arith.extf %20 : vector<1x1024xbf16> to vector<1x1024xf32>
    %22 = vector.broadcast %21 : vector<1x1024xf32> to vector<8x1024xf32>
    %23 = arith.mulf %18, %22 : vector<8x1024xf32>
    %cst_5 = arith.constant dense<0.000000e+00> : vector<8xf32>
    %24 = vector.multi_reduction <add>, %23, %cst_5 [1] : vector<8x1024xf32> to vector<8xf32>
    %25 = vector.shape_cast %24 : vector<8xf32> to vector<8x1xf32>
    %26 = arith.addf %13, %25 : vector<8x1xf32>
    %c2_i32 = arith.constant 2 : i32
    %c1024_i32_6 = arith.constant 1024 : i32
    %27 = arith.muli %c2_i32, %c1024_i32_6 : i32
    %28 = tpu.assume_multiple %27, 1024 : i32
    %c0_7 = arith.constant 0 : index
    %29 = arith.index_cast %28 : i32 to index
    %30 = vector.load %arg1[%c0_7, %29] : memref<8x8192xbf16, #tpu.memory_space<vmem>>, vector<8x1024xbf16>
    %31 = arith.extf %30 : vector<8x1024xbf16> to vector<8x1024xf32>
    %c0_8 = arith.constant 0 : index
    %32 = arith.index_cast %28 : i32 to index
    %33 = vector.load %arg2[%c0_8, %32] : memref<1x8192xbf16, #tpu.memory_space<vmem>>, vector<1x1024xbf16>
    %34 = arith.extf %33 : vector<1x1024xbf16> to vector<1x1024xf32>
    %35 = vector.broadcast %34 : vector<1x1024xf32> to vector<8x1024xf32>
    %36 = arith.mulf %31, %35 : vector<8x1024xf32>
    %cst_9 = arith.constant dense<0.000000e+00> : vector<8xf32>
    %37 = vector.multi_reduction <add>, %36, %cst_9 [1] : vector<8x1024xf32> to vector<8xf32>
    %38 = vector.shape_cast %37 : vector<8xf32> to vector<8x1xf32>
    %39 = arith.addf %26, %38 : vector<8x1xf32>
    %c3_i32 = arith.constant 3 : i32
    %c1024_i32_10 = arith.constant 1024 : i32
    %40 = arith.muli %c3_i32, %c1024_i32_10 : i32
    %41 = tpu.assume_multiple %40, 1024 : i32
    %c0_11 = arith.constant 0 : index
    %42 = arith.index_cast %41 : i32 to index
    %43 = vector.load %arg1[%c0_11, %42] : memref<8x8192xbf16, #tpu.memory_space<vmem>>, vector<8x1024xbf16>
    %44 = arith.extf %43 : vector<8x1024xbf16> to vector<8x1024xf32>
    %c0_12 = arith.constant 0 : index
    %45 = arith.index_cast %41 : i32 to index
    %46 = vector.load %arg2[%c0_12, %45] : memref<1x8192xbf16, #tpu.memory_space<vmem>>, vector<1x1024xbf16>
    %47 = arith.extf %46 : vector<1x1024xbf16> to vector<1x1024xf32>
    %48 = vector.broadcast %47 : vector<1x1024xf32> to vector<8x1024xf32>
    %49 = arith.mulf %44, %48 : vector<8x1024xf32>
    %cst_13 = arith.constant dense<0.000000e+00> : vector<8xf32>
    %50 = vector.multi_reduction <add>, %49, %cst_13 [1] : vector<8x1024xf32> to vector<8xf32>
    %51 = vector.shape_cast %50 : vector<8xf32> to vector<8x1xf32>
    %52 = arith.addf %39, %51 : vector<8x1xf32>
    %c4_i32 = arith.constant 4 : i32
    %c1024_i32_14 = arith.constant 1024 : i32
    %53 = arith.muli %c4_i32, %c1024_i32_14 : i32
    %54 = tpu.assume_multiple %53, 1024 : i32
    %c0_15 = arith.constant 0 : index
    %55 = arith.index_cast %54 : i32 to index
    %56 = vector.load %arg1[%c0_15, %55] : memref<8x8192xbf16, #tpu.memory_space<vmem>>, vector<8x1024xbf16>
    %57 = arith.extf %56 : vector<8x1024xbf16> to vector<8x1024xf32>
    %c0_16 = arith.constant 0 : index
    %58 = arith.index_cast %54 : i32 to index
    %59 = vector.load %arg2[%c0_16, %58] : memref<1x8192xbf16, #tpu.memory_space<vmem>>, vector<1x1024xbf16>
    %60 = arith.extf %59 : vector<1x1024xbf16> to vector<1x1024xf32>
    %61 = vector.broadcast %60 : vector<1x1024xf32> to vector<8x1024xf32>
    %62 = arith.mulf %57, %61 : vector<8x1024xf32>
    %cst_17 = arith.constant dense<0.000000e+00> : vector<8xf32>
    %63 = vector.multi_reduction <add>, %62, %cst_17 [1] : vector<8x1024xf32> to vector<8xf32>
    %64 = vector.shape_cast %63 : vector<8xf32> to vector<8x1xf32>
    %65 = arith.addf %52, %64 : vector<8x1xf32>
    %c5_i32 = arith.constant 5 : i32
    %c1024_i32_18 = arith.constant 1024 : i32
    %66 = arith.muli %c5_i32, %c1024_i32_18 : i32
    %67 = tpu.assume_multiple %66, 1024 : i32
    %c0_19 = arith.constant 0 : index
    %68 = arith.index_cast %67 : i32 to index
    %69 = vector.load %arg1[%c0_19, %68] : memref<8x8192xbf16, #tpu.memory_space<vmem>>, vector<8x1024xbf16>
    %70 = arith.extf %69 : vector<8x1024xbf16> to vector<8x1024xf32>
    %c0_20 = arith.constant 0 : index
    %71 = arith.index_cast %67 : i32 to index
    %72 = vector.load %arg2[%c0_20, %71] : memref<1x8192xbf16, #tpu.memory_space<vmem>>, vector<1x1024xbf16>
    %73 = arith.extf %72 : vector<1x1024xbf16> to vector<1x1024xf32>
    %74 = vector.broadcast %73 : vector<1x1024xf32> to vector<8x1024xf32>
    %75 = arith.mulf %70, %74 : vector<8x1024xf32>
    %cst_21 = arith.constant dense<0.000000e+00> : vector<8xf32>
    %76 = vector.multi_reduction <add>, %75, %cst_21 [1] : vector<8x1024xf32> to vector<8xf32>
    %77 = vector.shape_cast %76 : vector<8xf32> to vector<8x1xf32>
    %78 = arith.addf %65, %77 : vector<8x1xf32>
    %c6_i32 = arith.constant 6 : i32
    %c1024_i32_22 = arith.constant 1024 : i32
    %79 = arith.muli %c6_i32, %c1024_i32_22 : i32
    %80 = tpu.assume_multiple %79, 1024 : i32
    %c0_23 = arith.constant 0 : index
    %81 = arith.index_cast %80 : i32 to index
    %82 = vector.load %arg1[%c0_23, %81] : memref<8x8192xbf16, #tpu.memory_space<vmem>>, vector<8x1024xbf16>
    %83 = arith.extf %82 : vector<8x1024xbf16> to vector<8x1024xf32>
    %c0_24 = arith.constant 0 : index
    %84 = arith.index_cast %80 : i32 to index
    %85 = vector.load %arg2[%c0_24, %84] : memref<1x8192xbf16, #tpu.memory_space<vmem>>, vector<1x1024xbf16>
    %86 = arith.extf %85 : vector<1x1024xbf16> to vector<1x1024xf32>
    %87 = vector.broadcast %86 : vector<1x1024xf32> to vector<8x1024xf32>
    %88 = arith.mulf %83, %87 : vector<8x1024xf32>
    %cst_25 = arith.constant dense<0.000000e+00> : vector<8xf32>
    %89 = vector.multi_reduction <add>, %88, %cst_25 [1] : vector<8x1024xf32> to vector<8xf32>
    %90 = vector.shape_cast %89 : vector<8xf32> to vector<8x1xf32>
    %91 = arith.addf %78, %90 : vector<8x1xf32>
    %c7_i32 = arith.constant 7 : i32
    %c1024_i32_26 = arith.constant 1024 : i32
    %92 = arith.muli %c7_i32, %c1024_i32_26 : i32
    %93 = tpu.assume_multiple %92, 1024 : i32
    %c0_27 = arith.constant 0 : index
    %94 = arith.index_cast %93 : i32 to index
    %95 = vector.load %arg1[%c0_27, %94] : memref<8x8192xbf16, #tpu.memory_space<vmem>>, vector<8x1024xbf16>
    %96 = arith.extf %95 : vector<8x1024xbf16> to vector<8x1024xf32>
    %c0_28 = arith.constant 0 : index
    %97 = arith.index_cast %93 : i32 to index
    %98 = vector.load %arg2[%c0_28, %97] : memref<1x8192xbf16, #tpu.memory_space<vmem>>, vector<1x1024xbf16>
    %99 = arith.extf %98 : vector<1x1024xbf16> to vector<1x1024xf32>
    %100 = vector.broadcast %99 : vector<1x1024xf32> to vector<8x1024xf32>
    %101 = arith.mulf %96, %100 : vector<8x1024xf32>
    %cst_29 = arith.constant dense<0.000000e+00> : vector<8xf32>
    %102 = vector.multi_reduction <add>, %101, %cst_29 [1] : vector<8x1024xf32> to vector<8xf32>
    %103 = vector.shape_cast %102 : vector<8xf32> to vector<8x1xf32>
    %104 = arith.addf %91, %103 : vector<8x1xf32>
    %c8_i32 = arith.constant 8 : i32
    %c0_30 = arith.constant 0 : index
    %c0_31 = arith.constant 0 : index
    %105 = vector.load %arg3[%c0_30, %c0_31] : memref<8x1xf32, #tpu.memory_space<vmem>>, vector<8x1xf32>
    tpu.vector_store %arg3[%c0_30, %c0_31], %104 {strides = array<i32>} : memref<8x1xf32, #tpu.memory_space<vmem>>, vector<8x1xf32>,
    return
  }
  func.func @transform_0(%arg0: i32) -> (i32, i32) {
    %c0_i32 = arith.constant 0 : i32
    %c0_i32_0 = arith.constant 0 : i32
    %c0_i32_1 = arith.constant 0 : i32
    return %c0_i32, %c0_i32_0 : i32, i32
  }
  func.func @transform_1(%arg0: i32) -> (i32, i32) {
    %c0_i32 = arith.constant 0 : i32
    %c0_i32_0 = arith.constant 0 : i32
    %c0_i32_1 = arith.constant 0 : i32
    return %c0_i32, %c0_i32_0 : i32, i32
  }
  func.func @transform_2(%arg0: i32) -> (i32, i32) {
    %c0_i32 = arith.constant 0 : i32
    %c0_i32_0 = arith.constant 0 : i32
    %c0_i32_1 = arith.constant 0 : i32
    return %c0_i32, %c0_i32_0 : i32, i32
  }
}

</mosaic_0001>

<bundles_post_ra>
// kernel: photo_discriminator_forward.4
= control target key start
LH: loop header
LB: loop body
LE: loop exit
PB: predicated region body
PF: predicated region fallthrough
CT: control target
= control target key end

     0   :  { %s1910_s1 = inlined_call_operand.vmem [shape: bf16[128,128], index: 1, kind: input, shape index: {}]   ;;  %s1911_s0 = inlined_call_operand.vmem [shape: bf16[512,128], index: 0, kind: input, shape index: {}]   ;;  %s1912_s2 = inlined_call_operand.vmem [shape: bf16[512,128], index: 2, kind: output, shape index: {}]  }
   0x1   :  { %v1632_v0 = vld [vmem:[%s1910_s1] sm:$0xff]   ;;  %v1633_v1 = vld [vmem:[%s1910_s1 + $0x8] sm:$0xff]   ;;  %v1634_v2 = vld [vmem:[%s1910_s1 + $0x10] sm:$0xff]  }
   0x2   :  { %1536 = vmatprep.subr.bf16.mxu0 %v1632_v0  ;;  %1616 = vmatprep.subr.bf16.mxu1 %v1632_v0  ;;  %v1635_v3 = vld [vmem:[%s1910_s1 + $0x18] sm:$0xff]   ;;  %v1640_v4 = vld [vmem:[%s1911_s0] sm:$0xff]   ;;  %v1637_v7 = vld [vmem:[%s1910_s1 + $0x28] sm:$0xff]  }
   0x3   :  { %1537 = vmatpush3.bf16.msra.mxu0 %v1632_v0  ;;  %1624 = vmatpush3.bf16.msra.mxu1 %v1632_v0  ;;  %v1641_v5 = vld [vmem:[%s1911_s0 + $0x80] sm:$0xff]   ;;  %v1638_v8 = vld [vmem:[%s1910_s1 + $0x30] sm:$0xff]   ;;  %v1639_v9 = vld [vmem:[%s1910_s1 + $0x38] sm:$0xff]  }
   0x4   :  { %1538 = vmatprep.subr.bf16.mxu0 %v1633_v1  ;;  %1617 = vmatprep.subr.bf16.mxu1 %v1633_v1  ;;  %v1636_v6 = vld [vmem:[%s1910_s1 + $0x20] sm:$0xff]   ;;  %v1642_v10 = vld [vmem:[%s1911_s0 + $0x8] sm:$0xff]   ;;  %v1644_v12 = vld [vmem:[%s1911_s0 + $0x10] sm:$0xff]  }
   0x5   :  { %1552 = vmatprep.mubr.bf16.mxu0 %v1640_v4  ;;  %1584 = vmatprep.mubr.bf16.mxu1 %v1641_v5  ;;  %v1643_v11 = vld [vmem:[%s1911_s0 + $0x88] sm:$0xff]   ;;  %v1645_v13 = vld [vmem:[%s1911_s0 + $0x90] sm:$0xff]   ;;  %v1646_v14 = vld [vmem:[%s1911_s0 + $0x18] sm:$0xff]  }
   0x6   :  { %v1647_v15 = vld [vmem:[%s1911_s0 + $0x98] sm:$0xff]   ;;  %v1648_v16 = vld [vmem:[%s1911_s0 + $0x20] sm:$0xff]   ;;  %v1650_v18 = vld [vmem:[%s1911_s0 + $0x28] sm:$0xff]  }
   0x7   :  { %1539 = vmatpush3.bf16.msra.mxu0 %v1633_v1  ;;  %1625 = vmatpush3.bf16.msra.mxu1 %v1633_v1  ;;  %v1649_v17 = vld [vmem:[%s1911_s0 + $0xa0] sm:$0xff]   ;;  %v1651_v19 = vld [vmem:[%s1911_s0 + $0xa8] sm:$0xff]   ;;  %v1652_v20 = vld [vmem:[%s1911_s0 + $0x30] sm:$0xff]  }
   0x8   :  { %1540 = vmatprep.subr.bf16.mxu0 %v1634_v2  ;;  %1618 = vmatprep.subr.bf16.mxu1 %v1634_v2  ;;  %v1653_v21 = vld [vmem:[%s1911_s0 + $0xb0] sm:$0xff]   ;;  %v1654_v22 = vld [vmem:[%s1911_s0 + $0x38] sm:$0xff]   ;;  %v1656_v24 = vld [vmem:[%s1911_s0 + $0x40] sm:$0xff]  }
   0x9   :  { %v1655_v23 = vld [vmem:[%s1911_s0 + $0xb8] sm:$0xff]   ;;  %v1657_v25 = vld [vmem:[%s1911_s0 + $0xc0] sm:$0xff]   ;;  %v1658_v26 = vld [vmem:[%s1911_s0 + $0x48] sm:$0xff]  }
   0xa   :  { %v1659_v27 = vld [vmem:[%s1911_s0 + $0xc8] sm:$0xff]   ;;  %v1660_v28 = vld [vmem:[%s1911_s0 + $0x50] sm:$0xff]   ;;  %v1662_v30 = vld [vmem:[%s1911_s0 + $0x58] sm:$0xff]  }
   0xb   :  { %1541 = vmatpush3.bf16.msra.mxu0 %v1634_v2  ;;  %1626 = vmatpush3.bf16.msra.mxu1 %v1634_v2  ;;  %v1661_v29 = vld [vmem:[%s1911_s0 + $0xd0] sm:$0xff]   ;;  %v1663_v31 = vld [vmem:[%s1911_s0 + $0xd8] sm:$0xff]   ;;  %v1664_v32 = vld [vmem:[%s1911_s0 + $0x60] sm:$0xff]  }
   0xc   :  { %1542 = vmatprep.subr.bf16.mxu0 %v1635_v3  ;;  %1619 = vmatprep.subr.bf16.mxu1 %v1635_v3  ;;  %v1665_v33 = vld [vmem:[%s1911_s0 + $0xe0] sm:$0xff]   ;;  %v1666_v34 = vld [vmem:[%s1911_s0 + $0x68] sm:$0xff]   ;;  %v1668_v36 = vld [vmem:[%s1911_s0 + $0x70] sm:$0xff]  }
   0xd   :  { %v1667_v35 = vld [vmem:[%s1911_s0 + $0xe8] sm:$0xff]   ;;  %v1669_v37 = vld [vmem:[%s1911_s0 + $0xf0] sm:$0xff]   ;;  %v1670_v38 = vld [vmem:[%s1911_s0 + $0x78] sm:$0xff]  }
   0xe   :  { %v1671_v39 = vld [vmem:[%s1911_s0 + $0xf8] sm:$0xff]  }
   0xf   :  { %1543 = vmatpush3.bf16.msra.mxu0 %v1635_v3  ;;  %1627 = vmatpush3.bf16.msra.mxu1 %v1635_v3 }
  0x10   :  { %1544 = vmatprep.subr.bf16.mxu0 %v1636_v6  ;;  %1620 = vmatprep.subr.bf16.mxu1 %v1636_v6 }
  0x13   :  { %1545 = vmatpush3.bf16.msra.mxu0 %v1636_v6  ;;  %1628 = vmatpush3.bf16.msra.mxu1 %v1636_v6 }
  0x14   :  { %1546 = vmatprep.subr.bf16.mxu0 %v1637_v7  ;;  %1621 = vmatprep.subr.bf16.mxu1 %v1637_v7 }
  0x17   :  { %1547 = vmatpush3.bf16.msra.mxu0 %v1637_v7  ;;  %1629 = vmatpush3.bf16.msra.mxu1 %v1637_v7 }
  0x18   :  { %1548 = vmatprep.subr.bf16.mxu0 %v1638_v8  ;;  %1622 = vmatprep.subr.bf16.mxu1 %v1638_v8 }
  0x1b   :  { %1549 = vmatpush3.bf16.msra.mxu0 %v1638_v8  ;;  %1630 = vmatpush3.bf16.msra.mxu1 %v1638_v8 }
  0x1c   :  { %1550 = vmatprep.subr.bf16.mxu0 %v1639_v9  ;;  %1623 = vmatprep.subr.bf16.mxu1 %v1639_v9 }
  0x1f   :  { %1551 = vmatpush3.bf16.msra.mxu0 %v1639_v9  ;;  %1631 = vmatpush3.bf16.msra.mxu1 %v1639_v9 }
  0x22   :  { %1553 = vmatmul.mubr.bf16.vlgmr.msra.gmra.mrb[0].mxu0 %v1642_v10  ;;  %1585 = vmatmul.mubr.bf16.vlgmr.msra.gmra.mrb[0].mxu1 %v1643_v11 }
  0x23   :  { %1556 = vmatprep.mubr.bf16.mxu0 %v1644_v12  ;;  %1588 = vmatprep.mubr.bf16.mxu1 %v1645_v13 }
  0x2a   :  { %1557 = vmatmul.mubr.bf16.gmra.mrb[4].mxu0 %v1646_v14  ;;  %1589 = vmatmul.mubr.bf16.gmra.mrb[4].mxu1 %v1647_v15 }
  0x2b   :  { %1560 = vmatprep.mubr.bf16.mxu0 %v1648_v16  ;;  %1592 = vmatprep.mubr.bf16.mxu1 %v1649_v17 }
  0x32   :  { %1561 = vmatmul.mubr.bf16.gmra.mrb[8].mxu0 %v1650_v18  ;;  %1593 = vmatmul.mubr.bf16.gmra.mrb[8].mxu1 %v1651_v19 }
  0x33   :  { %1564 = vmatprep.mubr.bf16.mxu0 %v1652_v20  ;;  %1596 = vmatprep.mubr.bf16.mxu1 %v1653_v21 }
  0x3a   :  { %1565 = vmatmul.mubr.bf16.gmra.mrb[12].mxu0 %v1654_v22  ;;  %1597 = vmatmul.mubr.bf16.gmra.mrb[12].mxu1 %v1655_v23 }
  0x3b   :  { %1568 = vmatprep.mubr.bf16.mxu0 %v1656_v24  ;;  %1600 = vmatprep.mubr.bf16.mxu1 %v1657_v25 }
  0x42   :  { %1569 = vmatmul.mubr.bf16.gmra.mrb[16].mxu0 %v1658_v26  ;;  %1601 = vmatmul.mubr.bf16.gmra.mrb[16].mxu1 %v1659_v27 }
  0x43   :  { %1572 = vmatprep.mubr.bf16.mxu0 %v1660_v28  ;;  %1604 = vmatprep.mubr.bf16.mxu1 %v1661_v29 }
  0x4a   :  { %1573 = vmatmul.mubr.bf16.gmra.mrb[20].mxu0 %v1662_v30  ;;  %1605 = vmatmul.mubr.bf16.gmra.mrb[20].mxu1 %v1663_v31 }
  0x4b   :  { %1576 = vmatprep.mubr.bf16.mxu0 %v1664_v32  ;;  %1608 = vmatprep.mubr.bf16.mxu1 %v1665_v33 }
  0x52   :  { %1577 = vmatmul.mubr.bf16.gmra.mrb[24].mxu0 %v1666_v34  ;;  %1609 = vmatmul.mubr.bf16.gmra.mrb[24].mxu1 %v1667_v35 }
  0x53   :  { %1580 = vmatprep.mubr.bf16.mxu0 %v1668_v36  ;;  %1612 = vmatprep.mubr.bf16.mxu1 %v1669_v37 }
  0x5a   :  { %1581 = vmatmul.mubr.bf16.gmra.mrb[28].mxu0 %v1670_v38  ;;  %1613 = vmatmul.mubr.bf16.gmra.mrb[28].mxu1 %v1671_v39 }
  0xf5   :  { %v1554_v40 = vpop.f32.mrb[0].mxu0  ;;  %v1586_v41 = vpop.f32.mrb[0].mxu1 }
  0xf6   :  { %vm623_vm0 = vcmp.gt.f32.partialorder %v1554_v40, 0.0  ;;  %v687_v42 = vmul.f32 0.2, %v1554_v40  ;;  %v719_v43 = vmul.f32 0.2, %v1586_v41  ;;  %vm655_vm1 = vcmp.gt.f32.partialorder %v1586_v41, 0.0 }
  0xf7   :  { %v366_v44 = vpop.f32.mrb[1].mxu0  ;;  %v494_v45 = vpop.f32.mrb[1].mxu1 }
  0xf8   :  { %v685_v46 = vmul.f32 0.2, %v366_v44  ;;  %v1555_v47 = vpop.f32.mrb[2].mxu0  ;;  %v1587_v48 = vpop.f32.mrb[2].mxu1  ;;  %v751_v49 = vsel %vm623_vm0, %v1554_v40, %v687_v42  ;;  %v717_v50 = vmul.f32 0.2, %v494_v45  ;;  %v783_v52 = vsel %vm655_vm1, %v1586_v41, %v719_v43 }
  0xf9   :  { %vm624_vm2 = vcmp.gt.f32.partialorder %v1555_v47, 0.0  ;;  %v688_v51 = vmul.f32 0.2, %v1555_v47  ;;  %vm621_vm3 = vcmp.gt.f32.partialorder %v366_v44, 0.0  ;;  %vm656_vm4 = vcmp.gt.f32.partialorder %v1587_v48, 0.0  ;;  %v369_v54 = vpop.f32.mrb[3].mxu0 }
  0xfa   :  { %v720_v53 = vmul.f32 0.2, %v1587_v48  ;;  %v497_v55 = vpop.f32.mrb[3].mxu1  ;;  %vm653_vm5 = vcmp.gt.f32.partialorder %v494_v45, 0.0  ;;  %vm622_vm6 = vcmp.gt.f32.partialorder %v369_v54, 0.0  ;;  %v749_v61 = vsel %vm621_vm3, %v366_v44, %v685_v46 }
  0xfb   :  { %v752_v56 = vsel %vm624_vm2, %v1555_v47, %v688_v51  ;;  %v686_v57 = vmul.f32 0.2, %v369_v54  ;;  %vm654_vm7 = vcmp.gt.f32.partialorder %v497_v55, 0.0  ;;  %v718_v60 = vmul.f32 0.2, %v497_v55 }
  0xfc   :  { %v1313_v58 = vpack.c.bf16 %v752_v56, %v751_v49  ;;  %v784_v59 = vsel %vm656_vm4, %v1587_v48, %v720_v53  ;;  %v781_v2 = vsel %vm653_vm5, %v494_v45, %v717_v50 }
  0xfd   :  { %v1393_v62 = vpack.c.bf16 %v784_v59, %v783_v52  ;;  %v750_v63 = vsel %vm622_vm6, %v369_v54, %v686_v57  ;;  %v1558_v0 = vpop.f32.mrb[4].mxu0  ;;  %v1590_v1 = vpop.f32.mrb[4].mxu1  ;;  %v782_v4 = vsel %vm654_vm7, %v497_v55, %v718_v60 }
  0xfe   :  { %1465 = vst [vmem:[%s1912_s2 + $0x8] sm:$0xff] %v1313_v58   ;;  %v1308_v3 = vpack.c.bf16 %v750_v63, %v749_v61  ;;  %v691_v5 = vmul.f32 0.2, %v1558_v0  ;;  %v382_v6 = vpop.f32.mrb[5].mxu0  ;;  %v510_v7 = vpop.f32.mrb[5].mxu1  ;;  %v1388_v8 = vpack.c.bf16 %v782_v4, %v781_v2  ;;  %vm627_vm8 = vcmp.gt.f32.partialorder %v1558_v0, 0.0 }
  0xff   :  { %1481 = vst [vmem:[%s1912_s2 + $0x88] sm:$0xff] %v1393_v62   ;;  %v723_v9 = vmul.f32 0.2, %v1590_v1  ;;  %v1559_v10 = vpop.f32.mrb[6].mxu0  ;;  %v1591_v11 = vpop.f32.mrb[6].mxu1  ;;  %vm659_vm9 = vcmp.gt.f32.partialorder %v1590_v1, 0.0 }
 0x100   :  { %1309 = vst [vmem:[%s1912_s2] sm:$0xff] %v1308_v3   ;;  %v689_v12 = vmul.f32 0.2, %v382_v6  ;;  %v721_v13 = vmul.f32 0.2, %v510_v7  ;;  %v385_v14 = vpop.f32.mrb[7].mxu0  ;;  %1480 = vst [vmem:[%s1912_s2 + $0x80] sm:$0xff] %v1388_v8   ;;  %v755_v17 = vsel %vm627_vm8, %v1558_v0, %v691_v5 }
 0x101   :  { %vm625_vm10 = vcmp.gt.f32.partialorder %v382_v6, 0.0  ;;  %vm628_vm11 = vcmp.gt.f32.partialorder %v1559_v10, 0.0  ;;  %v692_v15 = vmul.f32 0.2, %v1559_v10  ;;  %vm660_vm12 = vcmp.gt.f32.partialorder %v1591_v11, 0.0  ;;  %v513_v16 = vpop.f32.mrb[7].mxu1 }
 0x102   :  { %vm657_vm13 = vcmp.gt.f32.partialorder %v510_v7, 0.0  ;;  %v724_v18 = vmul.f32 0.2, %v1591_v11  ;;  %vm626_vm14 = vcmp.gt.f32.partialorder %v385_v14, 0.0  ;;  %v690_v20 = vmul.f32 0.2, %v385_v14 }
 0x103   :  { %v756_v19 = vsel %vm628_vm11, %v1559_v10, %v692_v15  ;;  %vm658_vm15 = vcmp.gt.f32.partialorder %v513_v16, 0.0  ;;  %v722_v21 = vmul.f32 0.2, %v513_v16  ;;  %v787_v22 = vsel %vm659_vm9, %v1590_v1, %v723_v9 }
 0x104   :  { %v753_v23 = vsel %vm625_vm10, %v382_v6, %v689_v12  ;;  %v1323_v24 = vpack.c.bf16 %v756_v19, %v755_v17  ;;  %v788_v25 = vsel %vm660_vm12, %v1591_v11, %v724_v18  ;;  %v785_v26 = vsel %vm657_vm13, %v510_v7, %v721_v13 }
 0x105   :  { %v1403_v27 = vpack.c.bf16 %v788_v25, %v787_v22  ;;  %v754_v28 = vsel %vm626_vm14, %v385_v14, %v690_v20  ;;  %v786_v29 = vsel %vm658_vm15, %v513_v16, %v722_v21  ;;  %v1562_v30 = vpop.f32.mrb[8].mxu0  ;;  %v1594_v31 = vpop.f32.mrb[8].mxu1 }
 0x106   :  { %1467 = vst [vmem:[%s1912_s2 + $0x18] sm:$0xff] %v1323_v24   ;;  %v1318_v32 = vpack.c.bf16 %v754_v28, %v753_v23  ;;  %v1398_v33 = vpack.c.bf16 %v786_v29, %v785_v26  ;;  %vm631_vm0 = vcmp.gt.f32.partialorder %v1562_v30, 0.0  ;;  %v695_v34 = vmul.f32 0.2, %v1562_v30  ;;  %v398_v35 = vpop.f32.mrb[9].mxu0  ;;  %v526_v36 = vpop.f32.mrb[9].mxu1 }
 0x107   :  { %1483 = vst [vmem:[%s1912_s2 + $0x98] sm:$0xff] %v1403_v27   ;;  %vm663_vm1 = vcmp.gt.f32.partialorder %v1594_v31, 0.0  ;;  %v727_v37 = vmul.f32 0.2, %v1594_v31  ;;  %v693_v38 = vmul.f32 0.2, %v398_v35 }
 0x108   :  { %1466 = vst [vmem:[%s1912_s2 + $0x10] sm:$0xff] %v1318_v32   ;;  %1482 = vst [vmem:[%s1912_s2 + $0x90] sm:$0xff] %v1398_v33   ;;  %v725_v39 = vmul.f32 0.2, %v526_v36  ;;  %v1563_v40 = vpop.f32.mrb[10].mxu0  ;;  %v1595_v41 = vpop.f32.mrb[10].mxu1  ;;  %v759_v42 = vsel %vm631_vm0, %v1562_v30, %v695_v34 }
 0x109   :  { %vm629_vm2 = vcmp.gt.f32.partialorder %v398_v35, 0.0  ;;  %vm632_vm3 = vcmp.gt.f32.partialorder %v1563_v40, 0.0  ;;  %v696_v43 = vmul.f32 0.2, %v1563_v40  ;;  %v401_v44 = vpop.f32.mrb[11].mxu0  ;;  %v529_v45 = vpop.f32.mrb[11].mxu1  ;;  %v791_v50 = vsel %vm663_vm1, %v1594_v31, %v727_v37 }
 0x10a   :  { %vm661_vm4 = vcmp.gt.f32.partialorder %v526_v36, 0.0  ;;  %vm664_vm5 = vcmp.gt.f32.partialorder %v1595_v41, 0.0  ;;  %v728_v46 = vmul.f32 0.2, %v1595_v41  ;;  %vm630_vm6 = vcmp.gt.f32.partialorder %v401_v44, 0.0 }
 0x10b   :  { %v760_v47 = vsel %vm632_vm3, %v1563_v40, %v696_v43  ;;  %v694_v48 = vmul.f32 0.2, %v401_v44  ;;  %vm662_vm7 = vcmp.gt.f32.partialorder %v529_v45, 0.0  ;;  %v726_v49 = vmul.f32 0.2, %v529_v45 }
 0x10c   :  { %v757_v51 = vsel %vm629_vm2, %v398_v35, %v693_v38  ;;  %v1333_v52 = vpack.c.bf16 %v760_v47, %v759_v42  ;;  %v792_v53 = vsel %vm664_vm5, %v1595_v41, %v728_v46  ;;  %v789_v54 = vsel %vm661_vm4, %v526_v36, %v725_v39 }
 0x10d   :  { %v1413_v55 = vpack.c.bf16 %v792_v53, %v791_v50  ;;  %v758_v56 = vsel %vm630_vm6, %v401_v44, %v694_v48  ;;  %v790_v57 = vsel %vm662_vm7, %v529_v45, %v726_v49  ;;  %v1566_v58 = vpop.f32.mrb[12].mxu0  ;;  %v1598_v59 = vpop.f32.mrb[12].mxu1 }
 0x10e   :  { %1469 = vst [vmem:[%s1912_s2 + $0x28] sm:$0xff] %v1333_v52   ;;  %v1328_v60 = vpack.c.bf16 %v758_v56, %v757_v51  ;;  %v1408_v61 = vpack.c.bf16 %v790_v57, %v789_v54  ;;  %vm635_vm8 = vcmp.gt.f32.partialorder %v1566_v58, 0.0  ;;  %v699_v62 = vmul.f32 0.2, %v1566_v58  ;;  %v414_v63 = vpop.f32.mrb[13].mxu0  ;;  %v542_v0 = vpop.f32.mrb[13].mxu1 }
 0x10f   :  { %1485 = vst [vmem:[%s1912_s2 + $0xa8] sm:$0xff] %v1413_v55   ;;  %vm667_vm9 = vcmp.gt.f32.partialorder %v1598_v59, 0.0  ;;  %v731_v1 = vmul.f32 0.2, %v1598_v59  ;;  %v697_v2 = vmul.f32 0.2, %v414_v63 }
 0x110   :  { %1468 = vst [vmem:[%s1912_s2 + $0x20] sm:$0xff] %v1328_v60   ;;  %1484 = vst [vmem:[%s1912_s2 + $0xa0] sm:$0xff] %v1408_v61   ;;  %v729_v3 = vmul.f32 0.2, %v542_v0  ;;  %v1567_v4 = vpop.f32.mrb[14].mxu0  ;;  %v1599_v5 = vpop.f32.mrb[14].mxu1  ;;  %v763_v6 = vsel %vm635_vm8, %v1566_v58, %v699_v62 }
 0x111   :  { %vm633_vm10 = vcmp.gt.f32.partialorder %v414_v63, 0.0  ;;  %vm636_vm11 = vcmp.gt.f32.partialorder %v1567_v4, 0.0  ;;  %v700_v7 = vmul.f32 0.2, %v1567_v4  ;;  %v417_v8 = vpop.f32.mrb[15].mxu0  ;;  %v545_v9 = vpop.f32.mrb[15].mxu1  ;;  %v795_v14 = vsel %vm667_vm9, %v1598_v59, %v731_v1 }
 0x112   :  { %vm665_vm12 = vcmp.gt.f32.partialorder %v542_v0, 0.0  ;;  %vm668_vm13 = vcmp.gt.f32.partialorder %v1599_v5, 0.0  ;;  %v732_v10 = vmul.f32 0.2, %v1599_v5  ;;  %vm634_vm14 = vcmp.gt.f32.partialorder %v417_v8, 0.0 }
 0x113   :  { %v764_v11 = vsel %vm636_vm11, %v1567_v4, %v700_v7  ;;  %v698_v12 = vmul.f32 0.2, %v417_v8  ;;  %vm666_vm15 = vcmp.gt.f32.partialorder %v545_v9, 0.0  ;;  %v730_v13 = vmul.f32 0.2, %v545_v9 }
 0x114   :  { %v761_v15 = vsel %vm633_vm10, %v414_v63, %v697_v2  ;;  %v1343_v16 = vpack.c.bf16 %v764_v11, %v763_v6  ;;  %v796_v17 = vsel %vm668_vm13, %v1599_v5, %v732_v10  ;;  %v793_v18 = vsel %vm665_vm12, %v542_v0, %v729_v3 }
 0x115   :  { %v1423_v19 = vpack.c.bf16 %v796_v17, %v795_v14  ;;  %v762_v20 = vsel %vm634_vm14, %v417_v8, %v698_v12  ;;  %v794_v21 = vsel %vm666_vm15, %v545_v9, %v730_v13  ;;  %v1570_v22 = vpop.f32.mrb[16].mxu0  ;;  %v1602_v23 = vpop.f32.mrb[16].mxu1 }
 0x116   :  { %1471 = vst [vmem:[%s1912_s2 + $0x38] sm:$0xff] %v1343_v16   ;;  %v1338_v24 = vpack.c.bf16 %v762_v20, %v761_v15  ;;  %v1418_v25 = vpack.c.bf16 %v794_v21, %v793_v18  ;;  %vm639_vm0 = vcmp.gt.f32.partialorder %v1570_v22, 0.0  ;;  %v703_v26 = vmul.f32 0.2, %v1570_v22  ;;  %v430_v27 = vpop.f32.mrb[17].mxu0  ;;  %v558_v28 = vpop.f32.mrb[17].mxu1 }
 0x117   :  { %1487 = vst [vmem:[%s1912_s2 + $0xb8] sm:$0xff] %v1423_v19   ;;  %vm671_vm1 = vcmp.gt.f32.partialorder %v1602_v23, 0.0  ;;  %v735_v29 = vmul.f32 0.2, %v1602_v23  ;;  %v701_v30 = vmul.f32 0.2, %v430_v27 }
 0x118   :  { %1470 = vst [vmem:[%s1912_s2 + $0x30] sm:$0xff] %v1338_v24   ;;  %1486 = vst [vmem:[%s1912_s2 + $0xb0] sm:$0xff] %v1418_v25   ;;  %v733_v31 = vmul.f32 0.2, %v558_v28  ;;  %v1571_v32 = vpop.f32.mrb[18].mxu0  ;;  %v1603_v33 = vpop.f32.mrb[18].mxu1  ;;  %v767_v34 = vsel %vm639_vm0, %v1570_v22, %v703_v26 }
 0x119   :  { %vm637_vm2 = vcmp.gt.f32.partialorder %v430_v27, 0.0  ;;  %vm640_vm3 = vcmp.gt.f32.partialorder %v1571_v32, 0.0  ;;  %v704_v35 = vmul.f32 0.2, %v1571_v32  ;;  %v433_v36 = vpop.f32.mrb[19].mxu0  ;;  %v561_v37 = vpop.f32.mrb[19].mxu1  ;;  %v799_v42 = vsel %vm671_vm1, %v1602_v23, %v735_v29 }
 0x11a   :  { %vm669_vm4 = vcmp.gt.f32.partialorder %v558_v28, 0.0  ;;  %vm672_vm5 = vcmp.gt.f32.partialorder %v1603_v33, 0.0  ;;  %v736_v38 = vmul.f32 0.2, %v1603_v33  ;;  %vm638_vm6 = vcmp.gt.f32.partialorder %v433_v36, 0.0 }
 0x11b   :  { %v768_v39 = vsel %vm640_vm3, %v1571_v32, %v704_v35  ;;  %v702_v40 = vmul.f32 0.2, %v433_v36  ;;  %vm670_vm7 = vcmp.gt.f32.partialorder %v561_v37, 0.0  ;;  %v734_v41 = vmul.f32 0.2, %v561_v37 }
 0x11c   :  { %v765_v43 = vsel %vm637_vm2, %v430_v27, %v701_v30  ;;  %v1353_v44 = vpack.c.bf16 %v768_v39, %v767_v34  ;;  %v800_v45 = vsel %vm672_vm5, %v1603_v33, %v736_v38  ;;  %v797_v46 = vsel %vm669_vm4, %v558_v28, %v733_v31 }
 0x11d   :  { %v1433_v47 = vpack.c.bf16 %v800_v45, %v799_v42  ;;  %v766_v48 = vsel %vm638_vm6, %v433_v36, %v702_v40  ;;  %v798_v49 = vsel %vm670_vm7, %v561_v37, %v734_v41  ;;  %v1574_v50 = vpop.f32.mrb[20].mxu0  ;;  %v1606_v51 = vpop.f32.mrb[20].mxu1 }
 0x11e   :  { %1473 = vst [vmem:[%s1912_s2 + $0x48] sm:$0xff] %v1353_v44   ;;  %v1348_v52 = vpack.c.bf16 %v766_v48, %v765_v43  ;;  %v1428_v53 = vpack.c.bf16 %v798_v49, %v797_v46  ;;  %vm643_vm8 = vcmp.gt.f32.partialorder %v1574_v50, 0.0  ;;  %v707_v54 = vmul.f32 0.2, %v1574_v50  ;;  %v446_v55 = vpop.f32.mrb[21].mxu0  ;;  %v574_v56 = vpop.f32.mrb[21].mxu1 }
 0x11f   :  { %1489 = vst [vmem:[%s1912_s2 + $0xc8] sm:$0xff] %v1433_v47   ;;  %vm675_vm9 = vcmp.gt.f32.partialorder %v1606_v51, 0.0  ;;  %v739_v57 = vmul.f32 0.2, %v1606_v51  ;;  %v705_v58 = vmul.f32 0.2, %v446_v55 }
 0x120   :  { %1472 = vst [vmem:[%s1912_s2 + $0x40] sm:$0xff] %v1348_v52   ;;  %1488 = vst [vmem:[%s1912_s2 + $0xc0] sm:$0xff] %v1428_v53   ;;  %v737_v59 = vmul.f32 0.2, %v574_v56  ;;  %v1575_v60 = vpop.f32.mrb[22].mxu0  ;;  %v1607_v61 = vpop.f32.mrb[22].mxu1  ;;  %v771_v62 = vsel %vm643_vm8, %v1574_v50, %v707_v54 }
 0x121   :  { %vm641_vm10 = vcmp.gt.f32.partialorder %v446_v55, 0.0  ;;  %vm644_vm11 = vcmp.gt.f32.partialorder %v1575_v60, 0.0  ;;  %v708_v63 = vmul.f32 0.2, %v1575_v60  ;;  %v449_v0 = vpop.f32.mrb[23].mxu0  ;;  %v577_v1 = vpop.f32.mrb[23].mxu1  ;;  %v803_v6 = vsel %vm675_vm9, %v1606_v51, %v739_v57 }
 0x122   :  { %vm673_vm12 = vcmp.gt.f32.partialorder %v574_v56, 0.0  ;;  %vm676_vm13 = vcmp.gt.f32.partialorder %v1607_v61, 0.0  ;;  %v740_v2 = vmul.f32 0.2, %v1607_v61  ;;  %vm642_vm14 = vcmp.gt.f32.partialorder %v449_v0, 0.0 }
 0x123   :  { %v772_v3 = vsel %vm644_vm11, %v1575_v60, %v708_v63  ;;  %v706_v4 = vmul.f32 0.2, %v449_v0  ;;  %vm674_vm15 = vcmp.gt.f32.partialorder %v577_v1, 0.0  ;;  %v738_v5 = vmul.f32 0.2, %v577_v1 }
 0x124   :  { %v769_v7 = vsel %vm641_vm10, %v446_v55, %v705_v58  ;;  %v1363_v8 = vpack.c.bf16 %v772_v3, %v771_v62  ;;  %v804_v9 = vsel %vm676_vm13, %v1607_v61, %v740_v2  ;;  %v801_v10 = vsel %vm673_vm12, %v574_v56, %v737_v59 }
 0x125   :  { %v1443_v11 = vpack.c.bf16 %v804_v9, %v803_v6  ;;  %v770_v12 = vsel %vm642_vm14, %v449_v0, %v706_v4  ;;  %v802_v13 = vsel %vm674_vm15, %v577_v1, %v738_v5  ;;  %v1578_v14 = vpop.f32.mrb[24].mxu0  ;;  %v1610_v15 = vpop.f32.mrb[24].mxu1 }
 0x126   :  { %1475 = vst [vmem:[%s1912_s2 + $0x58] sm:$0xff] %v1363_v8   ;;  %v1358_v16 = vpack.c.bf16 %v770_v12, %v769_v7  ;;  %v1438_v17 = vpack.c.bf16 %v802_v13, %v801_v10  ;;  %vm647_vm0 = vcmp.gt.f32.partialorder %v1578_v14, 0.0  ;;  %v711_v18 = vmul.f32 0.2, %v1578_v14  ;;  %v462_v19 = vpop.f32.mrb[25].mxu0  ;;  %v590_v20 = vpop.f32.mrb[25].mxu1 }
 0x127   :  { %1491 = vst [vmem:[%s1912_s2 + $0xd8] sm:$0xff] %v1443_v11   ;;  %vm679_vm1 = vcmp.gt.f32.partialorder %v1610_v15, 0.0  ;;  %v743_v21 = vmul.f32 0.2, %v1610_v15  ;;  %v709_v22 = vmul.f32 0.2, %v462_v19 }
 0x128   :  { %1474 = vst [vmem:[%s1912_s2 + $0x50] sm:$0xff] %v1358_v16   ;;  %1490 = vst [vmem:[%s1912_s2 + $0xd0] sm:$0xff] %v1438_v17   ;;  %v741_v23 = vmul.f32 0.2, %v590_v20  ;;  %v1579_v24 = vpop.f32.mrb[26].mxu0  ;;  %v1611_v25 = vpop.f32.mrb[26].mxu1  ;;  %v775_v26 = vsel %vm647_vm0, %v1578_v14, %v711_v18 }
 0x129   :  { %vm645_vm2 = vcmp.gt.f32.partialorder %v462_v19, 0.0  ;;  %vm648_vm3 = vcmp.gt.f32.partialorder %v1579_v24, 0.0  ;;  %v712_v27 = vmul.f32 0.2, %v1579_v24  ;;  %v465_v28 = vpop.f32.mrb[27].mxu0  ;;  %v593_v29 = vpop.f32.mrb[27].mxu1  ;;  %v807_v34 = vsel %vm679_vm1, %v1610_v15, %v743_v21 }
 0x12a   :  { %vm677_vm4 = vcmp.gt.f32.partialorder %v590_v20, 0.0  ;;  %vm680_vm5 = vcmp.gt.f32.partialorder %v1611_v25, 0.0  ;;  %v744_v30 = vmul.f32 0.2, %v1611_v25  ;;  %vm646_vm6 = vcmp.gt.f32.partialorder %v465_v28, 0.0 }
 0x12b   :  { %v776_v31 = vsel %vm648_vm3, %v1579_v24, %v712_v27  ;;  %v710_v32 = vmul.f32 0.2, %v465_v28  ;;  %vm678_vm7 = vcmp.gt.f32.partialorder %v593_v29, 0.0  ;;  %v742_v33 = vmul.f32 0.2, %v593_v29 }
 0x12c   :  { %v773_v35 = vsel %vm645_vm2, %v462_v19, %v709_v22  ;;  %v1373_v36 = vpack.c.bf16 %v776_v31, %v775_v26  ;;  %v808_v37 = vsel %vm680_vm5, %v1611_v25, %v744_v30  ;;  %v805_v38 = vsel %vm677_vm4, %v590_v20, %v741_v23 }
 0x12d   :  { %v1453_v39 = vpack.c.bf16 %v808_v37, %v807_v34  ;;  %v774_v40 = vsel %vm646_vm6, %v465_v28, %v710_v32  ;;  %v806_v41 = vsel %vm678_vm7, %v593_v29, %v742_v33  ;;  %v1582_v42 = vpop.f32.mrb[28].mxu0  ;;  %v1614_v43 = vpop.f32.mrb[28].mxu1 }
 0x12e   :  { %1477 = vst [vmem:[%s1912_s2 + $0x68] sm:$0xff] %v1373_v36   ;;  %v1368_v44 = vpack.c.bf16 %v774_v40, %v773_v35  ;;  %v1448_v45 = vpack.c.bf16 %v806_v41, %v805_v38  ;;  %vm651_vm8 = vcmp.gt.f32.partialorder %v1582_v42, 0.0  ;;  %v715_v46 = vmul.f32 0.2, %v1582_v42  ;;  %v478_v47 = vpop.f32.mrb[29].mxu0  ;;  %v606_v48 = vpop.f32.mrb[29].mxu1 }
 0x12f   :  { %1493 = vst [vmem:[%s1912_s2 + $0xe8] sm:$0xff] %v1453_v39   ;;  %vm683_vm9 = vcmp.gt.f32.partialorder %v1614_v43, 0.0  ;;  %v747_v49 = vmul.f32 0.2, %v1614_v43  ;;  %v713_v50 = vmul.f32 0.2, %v478_v47 }
 0x130   :  { %1476 = vst [vmem:[%s1912_s2 + $0x60] sm:$0xff] %v1368_v44   ;;  %1492 = vst [vmem:[%s1912_s2 + $0xe0] sm:$0xff] %v1448_v45   ;;  %v745_v51 = vmul.f32 0.2, %v606_v48  ;;  %v1583_v52 = vpop.f32.mrb[30].mxu0  ;;  %v1615_v53 = vpop.f32.mrb[30].mxu1  ;;  %v779_v54 = vsel %vm651_vm8, %v1582_v42, %v715_v46 }
 0x131   :  { %vm649_vm10 = vcmp.gt.f32.partialorder %v478_v47, 0.0  ;;  %vm652_vm11 = vcmp.gt.f32.partialorder %v1583_v52, 0.0  ;;  %v716_v55 = vmul.f32 0.2, %v1583_v52  ;;  %v481_v56 = vpop.f32.mrb[31].mxu0  ;;  %v609_v57 = vpop.f32.mrb[31].mxu1  ;;  %v811_v62 = vsel %vm683_vm9, %v1614_v43, %v747_v49 }
 0x132   :  { %vm681_vm12 = vcmp.gt.f32.partialorder %v606_v48, 0.0  ;;  %vm684_vm13 = vcmp.gt.f32.partialorder %v1615_v53, 0.0  ;;  %v748_v58 = vmul.f32 0.2, %v1615_v53  ;;  %vm650_vm14 = vcmp.gt.f32.partialorder %v481_v56, 0.0 }
 0x133   :  { %v780_v59 = vsel %vm652_vm11, %v1583_v52, %v716_v55  ;;  %v714_v60 = vmul.f32 0.2, %v481_v56  ;;  %vm682_vm15 = vcmp.gt.f32.partialorder %v609_v57, 0.0  ;;  %v746_v61 = vmul.f32 0.2, %v609_v57 }
 0x134   :  { %v777_v63 = vsel %vm649_vm10, %v478_v47, %v713_v50  ;;  %v1383_v0 = vpack.c.bf16 %v780_v59, %v779_v54  ;;  %v812_v1 = vsel %vm684_vm13, %v1615_v53, %v748_v58  ;;  %v809_v2 = vsel %vm681_vm12, %v606_v48, %v745_v51 }
 0x135   :  { %v1463_v3 = vpack.c.bf16 %v812_v1, %v811_v62  ;;  %v778_v4 = vsel %vm650_vm14, %v481_v56, %v714_v60  ;;  %v810_v5 = vsel %vm682_vm15, %v609_v57, %v746_v61 }
 0x136   :  { %1479 = vst [vmem:[%s1912_s2 + $0x78] sm:$0xff] %v1383_v0   ;;  %v1378_v6 = vpack.c.bf16 %v778_v4, %v777_v63  ;;  %v1458_v7 = vpack.c.bf16 %v810_v5, %v809_v2 }
 0x137   :  { %1495 = vst [vmem:[%s1912_s2 + $0xf8] sm:$0xff] %v1463_v3  }
 0x138   :  { %1478 = vst [vmem:[%s1912_s2 + $0x70] sm:$0xff] %v1378_v6   ;;  %1494 = vst [vmem:[%s1912_s2 + $0xf0] sm:$0xff] %v1458_v7  }

// kernel: photo_discriminator_forward.5
= control target key start
LH: loop header
LB: loop body
LE: loop exit
PB: predicated region body
PF: predicated region fallthrough
CT: control target
= control target key end

     0   :  { %s6507_s1 = inlined_call_operand.vmem [shape: bf16[2048,256], index: 1, kind: input, shape index: {}]   ;;  %s6508_s0 = inlined_call_operand.vmem [shape: bf16[128,2048], index: 0, kind: input, shape index: {}]   ;;  %s6509_s2 = inlined_call_operand.vmem [shape: f32[1,256], index: 2, kind: input, shape index: {}]   ;;  %s6510_s3 = inlined_call_operand.vmem [shape: f32[1,256], index: 3, kind: input, shape index: {}]   ;;  %s6511_s4 = inlined_call_operand.vmem [shape: bf16[128,256], index: 4, kind: output, shape index: {}]  }
   0x1   :  { %v4459_v0 = vld [vmem:[%s6507_s1 + $0x4] ss:$8 sps:$4 sm:$0xff]   ;;  %v4463_v2 = vld [vmem:[%s6507_s1] ss:$8 sps:$4 sm:$0xff]   ;;  %v4465_v4 = vld [vmem:[%s6507_s1 + $0x14] ss:$8 sps:$4 sm:$0xff]  }
   0x2   :  { %v4461_v1 = vld [vmem:[%s6507_s1 + $0x404] ss:$8 sps:$4 sm:$0xff]   ;;  %2321 = vmatprep.subr.bf16.mxu1 %v4459_v0  ;;  %v4464_v3 = vld [vmem:[%s6507_s1 + $0x400] ss:$8 sps:$4 sm:$0xff]   ;;  %v4467_v5 = vld [vmem:[%s6507_s1 + $0x414] ss:$8 sps:$4 sm:$0xff]  }
   0x3   :  { %2773 = vmatprep.subr.bf16.mxu0 %v4461_v1  ;;  %2322 = vmatpush1.bf16.msra.mxu1 %v4463_v2  ;;  %v4469_v6 = vld [vmem:[%s6507_s1 + $0x10] ss:$8 sps:$4 sm:$0xff]   ;;  %v4471_v8 = vld [vmem:[%s6507_s1 + $0x24] ss:$8 sps:$4 sm:$0xff]   ;;  %v4475_v10 = vld [vmem:[%s6507_s1 + $0x20] ss:$8 sps:$4 sm:$0xff]  }
   0x4   :  { %2774 = vmatpush1.bf16.msra.mxu0 %v4464_v3  ;;  %2323 = vmatprep.subr.bf16.mxu1 %v4465_v4  ;;  %v4470_v7 = vld [vmem:[%s6507_s1 + $0x410] ss:$8 sps:$4 sm:$0xff]   ;;  %v4473_v9 = vld [vmem:[%s6507_s1 + $0x424] ss:$8 sps:$4 sm:$0xff]   ;;  %v4476_v11 = vld [vmem:[%s6507_s1 + $0x420] ss:$8 sps:$4 sm:$0xff]  }
   0x5   :  { %2775 = vmatprep.subr.bf16.mxu0 %v4467_v5  ;;  %v4477_v12 = vld [vmem:[%s6507_s1 + $0x34] ss:$8 sps:$4 sm:$0xff]   ;;  %v4481_v14 = vld [vmem:[%s6507_s1 + $0x30] ss:$8 sps:$4 sm:$0xff]   ;;  %v4483_v16 = vld [vmem:[%s6507_s1 + $0x44] ss:$8 sps:$4 sm:$0xff]  }
   0x6   :  { %v4479_v13 = vld [vmem:[%s6507_s1 + $0x434] ss:$8 sps:$4 sm:$0xff]   ;;  %v4482_v15 = vld [vmem:[%s6507_s1 + $0x430] ss:$8 sps:$4 sm:$0xff]   ;;  %v4485_v17 = vld [vmem:[%s6507_s1 + $0x444] ss:$8 sps:$4 sm:$0xff]  }
   0x7   :  { %2324 = vmatpush1.bf16.msra.mxu1 %v4469_v6  ;;  %v4487_v18 = vld [vmem:[%s6507_s1 + $0x40] ss:$8 sps:$4 sm:$0xff]   ;;  %v4489_v20 = vld [vmem:[%s6507_s1 + $0x54] ss:$8 sps:$4 sm:$0xff]   ;;  %v4493_v22 = vld [vmem:[%s6507_s1 + $0x50] ss:$8 sps:$4 sm:$0xff]  }
   0x8   :  { %2776 = vmatpush1.bf16.msra.mxu0 %v4470_v7  ;;  %2325 = vmatprep.subr.bf16.mxu1 %v4471_v8  ;;  %v4488_v19 = vld [vmem:[%s6507_s1 + $0x440] ss:$8 sps:$4 sm:$0xff]   ;;  %v4491_v21 = vld [vmem:[%s6507_s1 + $0x454] ss:$8 sps:$4 sm:$0xff]   ;;  %v4494_v23 = vld [vmem:[%s6507_s1 + $0x450] ss:$8 sps:$4 sm:$0xff]  }
   0x9   :  { %2777 = vmatprep.subr.bf16.mxu0 %v4473_v9  ;;  %v4495_v24 = vld [vmem:[%s6507_s1 + $0x64] ss:$8 sps:$4 sm:$0xff]   ;;  %v4499_v26 = vld [vmem:[%s6507_s1 + $0x60] ss:$8 sps:$4 sm:$0xff]   ;;  %v4501_v28 = vld [vmem:[%s6507_s1 + $0x74] ss:$8 sps:$4 sm:$0xff]  }
   0xa   :  { %v4497_v25 = vld [vmem:[%s6507_s1 + $0x464] ss:$8 sps:$4 sm:$0xff]   ;;  %v4500_v27 = vld [vmem:[%s6507_s1 + $0x460] ss:$8 sps:$4 sm:$0xff]   ;;  %v4503_v29 = vld [vmem:[%s6507_s1 + $0x474] ss:$8 sps:$4 sm:$0xff]  }
   0xb   :  { %2326 = vmatpush1.bf16.msra.mxu1 %v4475_v10  ;;  %v4505_v30 = vld [vmem:[%s6507_s1 + $0x70] ss:$8 sps:$4 sm:$0xff]   ;;  %v4507_v32 = vld [vmem:[%s6507_s1 + $0x84] ss:$8 sps:$4 sm:$0xff]   ;;  %v4511_v34 = vld [vmem:[%s6507_s1 + $0x80] ss:$8 sps:$4 sm:$0xff]  }
   0xc   :  { %2778 = vmatpush1.bf16.msra.mxu0 %v4476_v11  ;;  %2327 = vmatprep.subr.bf16.mxu1 %v4477_v12  ;;  %v4506_v31 = vld [vmem:[%s6507_s1 + $0x470] ss:$8 sps:$4 sm:$0xff]   ;;  %v4509_v33 = vld [vmem:[%s6507_s1 + $0x484] ss:$8 sps:$4 sm:$0xff]   ;;  %v4512_v35 = vld [vmem:[%s6507_s1 + $0x480] ss:$8 sps:$4 sm:$0xff]  }
   0xd   :  { %2779 = vmatprep.subr.bf16.mxu0 %v4479_v13  ;;  %v4513_v36 = vld [vmem:[%s6507_s1 + $0x94] ss:$8 sps:$4 sm:$0xff]   ;;  %v4517_v38 = vld [vmem:[%s6507_s1 + $0x90] ss:$8 sps:$4 sm:$0xff]   ;;  %v4519_v40 = vld [vmem:[%s6507_s1 + $0xa4] ss:$8 sps:$4 sm:$0xff]  }
   0xe   :  { %v4515_v37 = vld [vmem:[%s6507_s1 + $0x494] ss:$8 sps:$4 sm:$0xff]   ;;  %v4518_v39 = vld [vmem:[%s6507_s1 + $0x490] ss:$8 sps:$4 sm:$0xff]   ;;  %v4521_v41 = vld [vmem:[%s6507_s1 + $0x4a4] ss:$8 sps:$4 sm:$0xff]  }
   0xf   :  { %2328 = vmatpush1.bf16.msra.mxu1 %v4481_v14  ;;  %v4523_v42 = vld [vmem:[%s6507_s1 + $0xa0] ss:$8 sps:$4 sm:$0xff]   ;;  %v4525_v44 = vld [vmem:[%s6507_s1 + $0xb4] ss:$8 sps:$4 sm:$0xff]   ;;  %v4529_v46 = vld [vmem:[%s6507_s1 + $0xb0] ss:$8 sps:$4 sm:$0xff]  }
  0x10   :  { %2780 = vmatpush1.bf16.msra.mxu0 %v4482_v15  ;;  %2329 = vmatprep.subr.bf16.mxu1 %v4483_v16  ;;  %v4524_v43 = vld [vmem:[%s6507_s1 + $0x4a0] ss:$8 sps:$4 sm:$0xff]   ;;  %v4527_v45 = vld [vmem:[%s6507_s1 + $0x4b4] ss:$8 sps:$4 sm:$0xff]   ;;  %v4530_v47 = vld [vmem:[%s6507_s1 + $0x4b0] ss:$8 sps:$4 sm:$0xff]  }
  0x11   :  { %2781 = vmatprep.subr.bf16.mxu0 %v4485_v17  ;;  %v17_v48 = vld [vmem:[%s6508_s0] sm:$0xff]  ;;  %v4537_v58 = vld [vmem:[%s6507_s1 + $0xd4] ss:$8 sps:$4 sm:$0xff]   ;;  %v4541_v60 = vld [vmem:[%s6507_s1 + $0xd0] ss:$8 sps:$4 sm:$0xff]  }
  0x12   :  { %v25_v49 = vld [vmem:[%s6508_s0 + $0x40] sm:$0xff]  ;;  %v4539_v59 = vld [vmem:[%s6507_s1 + $0x4d4] ss:$8 sps:$4 sm:$0xff]   ;;  %v4542_v61 = vld [vmem:[%s6507_s1 + $0x4d0] ss:$8 sps:$4 sm:$0xff]  }
  0x13   :  { %2330 = vmatpush1.bf16.msra.mxu1 %v4487_v18  ;;  %v21_v50 = vld [vmem:[%s6508_s0 + $0x20] sm:$0xff]  ;;  %v3819_v53 = vcombine.high %v17_v48, %v25_v49  ;;  %v4549_v2 = vld [vmem:[%s6507_s1 + $0xf4] ss:$8 sps:$4 sm:$0xff]   ;;  %v4553_v4 = vld [vmem:[%s6507_s1 + $0xf0] ss:$8 sps:$4 sm:$0xff]   ;;  %v3818_v11 = vcombine.low %v17_v48, %v25_v49 }
  0x14   :  { %2782 = vmatpush1.bf16.msra.mxu0 %v4488_v19  ;;  %2331 = vmatprep.subr.bf16.mxu1 %v4489_v20  ;;  %v29_v51 = vld [vmem:[%s6508_s0 + $0x60] sm:$0xff]  ;;  %v4551_v3 = vld [vmem:[%s6507_s1 + $0x4f4] ss:$8 sps:$4 sm:$0xff]   ;;  %v4554_v5 = vld [vmem:[%s6507_s1 + $0x4f0] ss:$8 sps:$4 sm:$0xff]  }
  0x15   :  { %2783 = vmatprep.subr.bf16.mxu0 %v4491_v21  ;;  %v4531_v52 = vld [vmem:[%s6507_s1 + $0xc4] ss:$8 sps:$4 sm:$0xff]   ;;  %v3827_v55 = vcombine.high %v21_v50, %v29_v51  ;;  %2353 = vmatprep.mubr.bf16.mxu1 %v3819_v53  ;;  %v4535_v56 = vld [vmem:[%s6507_s1 + $0xc0] ss:$8 sps:$4 sm:$0xff]   ;;  %v3826_v12 = vcombine.low %v21_v50, %v29_v51  ;;  %v4563_v16 = vld [vmem:[%s6507_s1 + $0x114] ss:$8 sps:$4 sm:$0xff]  }
  0x16   :  { %v4533_v54 = vld [vmem:[%s6507_s1 + $0x4c4] ss:$8 sps:$4 sm:$0xff]   ;;  %v4536_v57 = vld [vmem:[%s6507_s1 + $0x4c0] ss:$8 sps:$4 sm:$0xff]   ;;  %v4566_v17 = vld [vmem:[%s6507_s1 + $0x514] ss:$8 sps:$4 sm:$0xff]  }
  0x17   :  { %2332 = vmatpush1.bf16.msra.mxu1 %v4493_v22  ;;  %2805 = vmatprep.mubr.bf16.mxu0 %v3827_v55  ;;  %v4543_v62 = vld [vmem:[%s6507_s1 + $0xe4] ss:$8 sps:$4 sm:$0xff]   ;;  %v4547_v0 = vld [vmem:[%s6507_s1 + $0xe0] ss:$8 sps:$4 sm:$0xff]   ;;  %v4561_v20 = vld [vmem:[%s6507_s1 + $0x110] ss:$8 sps:$4 sm:$0xff]  }
  0x18   :  { %2784 = vmatpush1.bf16.msra.mxu0 %v4494_v23  ;;  %2333 = vmatprep.subr.bf16.mxu1 %v4495_v24  ;;  %v4545_v63 = vld [vmem:[%s6507_s1 + $0x4e4] ss:$8 sps:$4 sm:$0xff]   ;;  %v4548_v1 = vld [vmem:[%s6507_s1 + $0x4e0] ss:$8 sps:$4 sm:$0xff]   ;;  %v4564_v21 = vld [vmem:[%s6507_s1 + $0x510] ss:$8 sps:$4 sm:$0xff]  }
  0x19   :  { %2785 = vmatprep.subr.bf16.mxu0 %v4497_v25  ;;  %v4557_v6 = vld [vmem:[%s6507_s1 + $0x104] ss:$8 sps:$4 sm:$0xff]   ;;  %v4555_v8 = vld [vmem:[%s6507_s1 + $0x100] ss:$8 sps:$4 sm:$0xff]   ;;  %v4587_v48 = vld [vmem:[%s6507_s1 + $0x154] ss:$8 sps:$4 sm:$0xff]  }
  0x1a   :  { %v4560_v7 = vld [vmem:[%s6507_s1 + $0x504] ss:$8 sps:$4 sm:$0xff]   ;;  %v4558_v9 = vld [vmem:[%s6507_s1 + $0x500] ss:$8 sps:$4 sm:$0xff]   ;;  %v4590_v49 = vld [vmem:[%s6507_s1 + $0x554] ss:$8 sps:$4 sm:$0xff]  }
  0x1b   :  { %2334 = vmatpush1.bf16.msra.mxu1 %v4499_v26  ;;  %v33_v10 = vld [vmem:[%s6508_s0 + $0x80] sm:$0xff]  ;;  %v4588_v53 = vld [vmem:[%s6507_s1 + $0x550] ss:$8 sps:$4 sm:$0xff]  }
  0x1c   :  { %2786 = vmatpush1.bf16.msra.mxu0 %v4500_v27  ;;  %2335 = vmatprep.subr.bf16.mxu1 %v4501_v28  ;;  %v41_v13 = vld [vmem:[%s6508_s0 + $0xc0] sm:$0xff] }
  0x1d   :  { %2787 = vmatprep.subr.bf16.mxu0 %v4503_v29  ;;  %v37_v14 = vld [vmem:[%s6508_s0 + $0xa0] sm:$0xff]  ;;  %v3835_v18 = vcombine.high %v33_v10, %v41_v13  ;;  %v3834_v28 = vcombine.low %v33_v10, %v41_v13 }
  0x1e   :  { %v45_v15 = vld [vmem:[%s6508_s0 + $0xe0] sm:$0xff] }
  0x1f   :  { %2336 = vmatpush1.bf16.msra.mxu1 %v4505_v30  ;;  %v3843_v19 = vcombine.high %v37_v14, %v45_v15  ;;  %v4569_v22 = vld [vmem:[%s6507_s1 + $0x124] ss:$8 sps:$4 sm:$0xff]   ;;  %v4567_v24 = vld [vmem:[%s6507_s1 + $0x120] ss:$8 sps:$4 sm:$0xff]   ;;  %v3842_v29 = vcombine.low %v37_v14, %v45_v15 }
  0x20   :  { %2788 = vmatpush1.bf16.msra.mxu0 %v4506_v31  ;;  %2337 = vmatprep.subr.bf16.mxu1 %v4507_v32  ;;  %v4572_v23 = vld [vmem:[%s6507_s1 + $0x524] ss:$8 sps:$4 sm:$0xff]   ;;  %v4570_v25 = vld [vmem:[%s6507_s1 + $0x520] ss:$8 sps:$4 sm:$0xff]   ;;  %v4575_v32 = vld [vmem:[%s6507_s1 + $0x134] ss:$8 sps:$4 sm:$0xff]  }
  0x21   :  { %2789 = vmatprep.subr.bf16.mxu0 %v4509_v33  ;;  %v49_v26 = vld [vmem:[%s6508_s0 + $0x100] sm:$0xff]  ;;  %v4578_v33 = vld [vmem:[%s6507_s1 + $0x534] ss:$8 sps:$4 sm:$0xff]  }
  0x22   :  { %v57_v27 = vld [vmem:[%s6508_s0 + $0x140] sm:$0xff] }
  0x23   :  { %2338 = vmatpush1.bf16.msra.mxu1 %v4511_v34  ;;  %v53_v30 = vld [vmem:[%s6508_s0 + $0x120] sm:$0xff]  ;;  %v3851_v34 = vcombine.high %v49_v26, %v57_v27 }
  0x24   :  { %2790 = vmatpush1.bf16.msra.mxu0 %v4512_v35  ;;  %2339 = vmatprep.subr.bf16.mxu1 %v4513_v36  ;;  %v61_v31 = vld [vmem:[%s6508_s0 + $0x160] sm:$0xff]  ;;  %v4573_v36 = vld [vmem:[%s6507_s1 + $0x130] ss:$8 sps:$4 sm:$0xff]  }
  0x25   :  { %2791 = vmatprep.subr.bf16.mxu0 %v4515_v37  ;;  %v3859_v35 = vcombine.high %v53_v30, %v61_v31  ;;  %v4576_v37 = vld [vmem:[%s6507_s1 + $0x530] ss:$8 sps:$4 sm:$0xff]   ;;  %v4596_v55 = vld [vmem:[%s6507_s1 + $0x564] ss:$8 sps:$4 sm:$0xff]   ;;  %v4603_v14 = vld [vmem:[%s6507_s1 + $0x180] ss:$8 sps:$4 sm:$0xff]  }
  0x26   :  { %v109_v13 = vld [vmem:[%s6508_s0 + $0x2e0] sm:$0xff] }
  0x27   :  { %2340 = vmatpush1.bf16.msra.mxu1 %v4517_v38  ;;  %v4581_v38 = vld [vmem:[%s6507_s1 + $0x144] ss:$8 sps:$4 sm:$0xff]   ;;  %v4606_v15 = vld [vmem:[%s6507_s1 + $0x580] ss:$8 sps:$4 sm:$0xff]  }
  0x28   :  { %2792 = vmatpush1.bf16.msra.mxu0 %v4518_v39  ;;  %2341 = vmatprep.subr.bf16.mxu1 %v4519_v40  ;;  %v4584_v39 = vld [vmem:[%s6507_s1 + $0x544] ss:$8 sps:$4 sm:$0xff]   ;;  %v4579_v40 = vld [vmem:[%s6507_s1 + $0x140] ss:$8 sps:$4 sm:$0xff]  }
  0x29   :  { %2793 = vmatprep.subr.bf16.mxu0 %v4521_v41  ;;  %v4582_v41 = vld [vmem:[%s6507_s1 + $0x540] ss:$8 sps:$4 sm:$0xff]  }
  0x2b   :  { %2342 = vmatpush1.bf16.msra.mxu1 %v4523_v42  ;;  %v65_v42 = vld [vmem:[%s6508_s0 + $0x180] sm:$0xff] }
  0x2c   :  { %2794 = vmatpush1.bf16.msra.mxu0 %v4524_v43  ;;  %2343 = vmatprep.subr.bf16.mxu1 %v4525_v44  ;;  %v73_v43 = vld [vmem:[%s6508_s0 + $0x1c0] sm:$0xff]  ;;  %v3850_v44 = vcombine.low %v49_v26, %v57_v27 }
  0x2d   :  { %2795 = vmatprep.subr.bf16.mxu0 %v4527_v45  ;;  %v3858_v45 = vcombine.low %v53_v30, %v61_v31  ;;  %v3867_v50 = vcombine.high %v65_v42, %v73_v43  ;;  %v113_v26 = vld [vmem:[%s6508_s0 + $0x300] sm:$0xff] }
  0x2e   :  { %v117_v30 = vld [vmem:[%s6508_s0 + $0x320] sm:$0xff] }
  0x2f   :  { %2344 = vmatpush1.bf16.msra.mxu1 %v4529_v46  ;;  %v69_v46 = vld [vmem:[%s6508_s0 + $0x1a0] sm:$0xff] }
  0x30   :  { %2796 = vmatpush1.bf16.msra.mxu0 %v4530_v47  ;;  %2345 = vmatprep.subr.bf16.mxu1 %v4531_v52  ;;  %v77_v47 = vld [vmem:[%s6508_s0 + $0x1e0] sm:$0xff]  ;;  %v4585_v52 = vld [vmem:[%s6507_s1 + $0x150] ss:$8 sps:$4 sm:$0xff]  }
  0x31   :  { %2797 = vmatprep.subr.bf16.mxu0 %v4533_v54  ;;  %v3875_v51 = vcombine.high %v69_v46, %v77_v47  ;;  %v4593_v54 = vld [vmem:[%s6507_s1 + $0x164] ss:$8 sps:$4 sm:$0xff]  }
  0x32   :  { %v125_v31 = vld [vmem:[%s6508_s0 + $0x360] sm:$0xff] }
  0x33   :  { %2346 = vmatpush1.bf16.msra.mxu1 %v4535_v56  ;;  %v4591_v56 = vld [vmem:[%s6507_s1 + $0x160] ss:$8 sps:$4 sm:$0xff]  }
  0x34   :  { %2798 = vmatpush1.bf16.msra.mxu0 %v4536_v57  ;;  %2347 = vmatprep.subr.bf16.mxu1 %v4537_v58  ;;  %v81_v57 = vld [vmem:[%s6508_s0 + $0x200] sm:$0xff] }
  0x35   :  { %2799 = vmatprep.subr.bf16.mxu0 %v4539_v59  ;;  %v89_v58 = vld [vmem:[%s6508_s0 + $0x240] sm:$0xff]  ;;  %v3866_v59 = vcombine.low %v65_v42, %v73_v43 }
  0x36   :  { %v3882_v10 = vcombine.low %v81_v57, %v89_v58  ;;  %v129_v42 = vld [vmem:[%s6508_s0 + $0x380] sm:$0xff] }
  0x37   :  { %2348 = vmatpush1.bf16.msra.mxu1 %v4541_v60  ;;  %v3874_v60 = vcombine.low %v69_v46, %v77_v47  ;;  %v137_v43 = vld [vmem:[%s6508_s0 + $0x3c0] sm:$0xff] }
  0x38   :  { %2800 = vmatpush1.bf16.msra.mxu0 %v4542_v61  ;;  %2349 = vmatprep.subr.bf16.mxu1 %v4543_v62  ;;  %v85_v61 = vld [vmem:[%s6508_s0 + $0x220] sm:$0xff] }
  0x39   :  { %2801 = vmatprep.subr.bf16.mxu0 %v4545_v63  ;;  %v93_v62 = vld [vmem:[%s6508_s0 + $0x260] sm:$0xff] }
  0x3a   :  { %v4594_v63 = vld [vmem:[%s6507_s1 + $0x560] ss:$8 sps:$4 sm:$0xff]  }
  0x3b   :  { %2350 = vmatpush1.bf16.msra.mxu1 %v4547_v0  ;;  %v4599_v0 = vld [vmem:[%s6507_s1 + $0x174] ss:$8 sps:$4 sm:$0xff]   ;;  %v133_v46 = vld [vmem:[%s6508_s0 + $0x3a0] sm:$0xff] }
  0x3c   :  { %2802 = vmatpush1.bf16.msra.mxu0 %v4548_v1  ;;  %2351 = vmatprep.subr.bf16.mxu1 %v4549_v2  ;;  %v4602_v1 = vld [vmem:[%s6507_s1 + $0x574] ss:$8 sps:$4 sm:$0xff]   ;;  %v3883_v2 = vcombine.high %v81_v57, %v89_v58  ;;  %v141_v47 = vld [vmem:[%s6508_s0 + $0x3e0] sm:$0xff]  ;;  %v18_v58 = vld [vmem:[%s6508_s0 + $0x8] sm:$0xff] }
  0x3d   :  { %2803 = vmatprep.subr.bf16.mxu0 %v4551_v3  ;;  %v3891_v3 = vcombine.high %v85_v61, %v93_v62  ;;  %v4642_v57 = vld [vmem:[%s6507_s1 + $0x5e0] ss:$8 sps:$4 sm:$0xff]  }
  0x3f   :  { %2352 = vmatpush1.bf16.msra.mxu1 %v4553_v4  ;;  %v4597_v4 = vld [vmem:[%s6507_s1 + $0x170] ss:$8 sps:$4 sm:$0xff]  }
  0x40   :  { %2804 = vmatpush1.bf16.msra.mxu0 %v4554_v5  ;;  %2434 = vmatprep.subr.bf16.mxu1 %v4557_v6  ;;  %v4600_v5 = vld [vmem:[%s6507_s1 + $0x570] ss:$8 sps:$4 sm:$0xff]   ;;  %v4605_v6 = vld [vmem:[%s6507_s1 + $0x184] ss:$8 sps:$4 sm:$0xff]  }
  0x41   :  { %2886 = vmatprep.subr.bf16.mxu0 %v4560_v7  ;;  %v4608_v7 = vld [vmem:[%s6507_s1 + $0x584] ss:$8 sps:$4 sm:$0xff]  }
  0x42   :  { %2354 = vmatmul.mubr.bf16.vlgmr.msra.gmra.mrb[0].mxu1 %v3818_v11  ;;  %v3890_v11 = vcombine.low %v85_v61, %v93_v62  ;;  %v3938_v61 = vcombine.low %v133_v46, %v141_v47  ;;  %v22_v62 = vld [vmem:[%s6508_s0 + $0x28] sm:$0xff] }
  0x43   :  { %2806 = vmatmul.mubr.bf16.vlgmr.msra.gmra.mrb[0].mxu0 %v3826_v12  ;;  %2435 = vmatpush1.bf16.msra.mxu1 %v4555_v8  ;;  %v97_v8 = vld [vmem:[%s6508_s0 + $0x280] sm:$0xff] }
  0x44   :  { %2887 = vmatpush1.bf16.msra.mxu0 %v4558_v9  ;;  %2436 = vmatprep.subr.bf16.mxu1 %v4563_v16  ;;  %v105_v9 = vld [vmem:[%s6508_s0 + $0x2c0] sm:$0xff]  ;;  %v4611_v16 = vld [vmem:[%s6507_s1 + $0x194] ss:$8 sps:$4 sm:$0xff]  }
  0x45   :  { %2888 = vmatprep.subr.bf16.mxu0 %v4566_v17  ;;  %2363 = vmatprep.mubr.bf16.mxu1 %v3835_v18  ;;  %v101_v12 = vld [vmem:[%s6508_s0 + $0x2a0] sm:$0xff]  ;;  %v4614_v17 = vld [vmem:[%s6507_s1 + $0x594] ss:$8 sps:$4 sm:$0xff]   ;;  %v3899_v18 = vcombine.high %v97_v8, %v105_v9  ;;  %v3898_v27 = vcombine.low %v97_v8, %v105_v9  ;;  %v34_v9 = vld [vmem:[%s6508_s0 + $0x88] sm:$0xff] }
  0x46   :  { %2815 = vmatprep.mubr.bf16.mxu0 %v3843_v19  ;;  %v3907_v19 = vcombine.high %v101_v12, %v109_v13  ;;  %v4651_v8 = vld [vmem:[%s6507_s1 + $0x200] ss:$8 sps:$4 sm:$0xff]  }
  0x47   :  { %2437 = vmatpush1.bf16.msra.mxu1 %v4561_v20  ;;  %v4609_v20 = vld [vmem:[%s6507_s1 + $0x190] ss:$8 sps:$4 sm:$0xff]  }
  0x48   :  { %2889 = vmatpush1.bf16.msra.mxu0 %v4564_v21  ;;  %2438 = vmatprep.subr.bf16.mxu1 %v4569_v22  ;;  %v4612_v21 = vld [vmem:[%s6507_s1 + $0x590] ss:$8 sps:$4 sm:$0xff]   ;;  %v4617_v22 = vld [vmem:[%s6507_s1 + $0x1a4] ss:$8 sps:$4 sm:$0xff]  }
  0x49   :  { %2890 = vmatprep.subr.bf16.mxu0 %v4572_v23  ;;  %v4620_v23 = vld [vmem:[%s6507_s1 + $0x5a4] ss:$8 sps:$4 sm:$0xff]  }
  0x4a   :  { %2364 = vmatmul.mubr.bf16.gmra.mrb[4].mxu1 %v3834_v28  ;;  %v3906_v28 = vcombine.low %v101_v12, %v109_v13  ;;  %v38_v13 = vld [vmem:[%s6508_s0 + $0xa8] sm:$0xff] }
  0x4b   :  { %2816 = vmatmul.mubr.bf16.gmra.mrb[4].mxu0 %v3842_v29  ;;  %2439 = vmatpush1.bf16.msra.mxu1 %v4567_v24  ;;  %v4615_v24 = vld [vmem:[%s6507_s1 + $0x1a0] ss:$8 sps:$4 sm:$0xff]  }
  0x4c   :  { %2891 = vmatpush1.bf16.msra.mxu0 %v4570_v25  ;;  %2440 = vmatprep.subr.bf16.mxu1 %v4575_v32  ;;  %v4618_v25 = vld [vmem:[%s6507_s1 + $0x5a0] ss:$8 sps:$4 sm:$0xff]   ;;  %v4623_v32 = vld [vmem:[%s6507_s1 + $0x1b4] ss:$8 sps:$4 sm:$0xff]  }
  0x4d   :  { %2892 = vmatprep.subr.bf16.mxu0 %v4578_v33  ;;  %2373 = vmatprep.mubr.bf16.mxu1 %v3851_v34  ;;  %v121_v29 = vld [vmem:[%s6508_s0 + $0x340] sm:$0xff]  ;;  %v4626_v33 = vld [vmem:[%s6507_s1 + $0x5b4] ss:$8 sps:$4 sm:$0xff]  }
  0x4e   :  { %2825 = vmatprep.mubr.bf16.mxu0 %v3859_v35  ;;  %v3915_v34 = vcombine.high %v113_v26, %v121_v29  ;;  %v3923_v35 = vcombine.high %v117_v30, %v125_v31 }
  0x4f   :  { %2441 = vmatpush1.bf16.msra.mxu1 %v4573_v36  ;;  %v4621_v36 = vld [vmem:[%s6507_s1 + $0x1b0] ss:$8 sps:$4 sm:$0xff]  }
  0x50   :  { %2893 = vmatpush1.bf16.msra.mxu0 %v4576_v37  ;;  %2442 = vmatprep.subr.bf16.mxu1 %v4581_v38  ;;  %v4624_v37 = vld [vmem:[%s6507_s1 + $0x5b0] ss:$8 sps:$4 sm:$0xff]   ;;  %v4629_v38 = vld [vmem:[%s6507_s1 + $0x1c4] ss:$8 sps:$4 sm:$0xff]  }
  0x51   :  { %2894 = vmatprep.subr.bf16.mxu0 %v4584_v39  ;;  %v4632_v39 = vld [vmem:[%s6507_s1 + $0x5c4] ss:$8 sps:$4 sm:$0xff]  }
  0x52   :  { %2374 = vmatmul.mubr.bf16.gmra.mrb[8].mxu1 %v3850_v44  ;;  %v3914_v44 = vcombine.low %v113_v26, %v121_v29  ;;  %v62_v29 = vld [vmem:[%s6508_s0 + $0x168] sm:$0xff] }
  0x53   :  { %2826 = vmatmul.mubr.bf16.gmra.mrb[8].mxu0 %v3858_v45  ;;  %2443 = vmatpush1.bf16.msra.mxu1 %v4579_v40  ;;  %v4627_v40 = vld [vmem:[%s6507_s1 + $0x1c0] ss:$8 sps:$4 sm:$0xff]   ;;  %v3922_v45 = vcombine.low %v117_v30, %v125_v31 }
  0x54   :  { %2895 = vmatpush1.bf16.msra.mxu0 %v4582_v41  ;;  %2444 = vmatprep.subr.bf16.mxu1 %v4587_v48  ;;  %v4630_v41 = vld [vmem:[%s6507_s1 + $0x5c0] ss:$8 sps:$4 sm:$0xff]   ;;  %v4635_v48 = vld [vmem:[%s6507_s1 + $0x1d4] ss:$8 sps:$4 sm:$0xff]  }
  0x55   :  { %2896 = vmatprep.subr.bf16.mxu0 %v4590_v49  ;;  %2383 = vmatprep.mubr.bf16.mxu1 %v3867_v50  ;;  %v4638_v49 = vld [vmem:[%s6507_s1 + $0x5d4] ss:$8 sps:$4 sm:$0xff]   ;;  %v3931_v50 = vcombine.high %v129_v42, %v137_v43  ;;  %v4663_v30 = vld [vmem:[%s6507_s1 + $0x220] ss:$8 sps:$4 sm:$0xff]  }
  0x56   :  { %2835 = vmatprep.mubr.bf16.mxu0 %v3875_v51  ;;  %v3939_v51 = vcombine.high %v133_v46, %v141_v47  ;;  %v4666_v31 = vld [vmem:[%s6507_s1 + $0x620] ss:$8 sps:$4 sm:$0xff]  }
  0x57   :  { %2445 = vmatpush1.bf16.msra.mxu1 %v4585_v52  ;;  %v4633_v52 = vld [vmem:[%s6507_s1 + $0x1d0] ss:$8 sps:$4 sm:$0xff]   ;;  %v70_v46 = vld [vmem:[%s6508_s0 + $0x1a8] sm:$0xff] }
  0x58   :  { %2897 = vmatpush1.bf16.msra.mxu0 %v4588_v53  ;;  %2446 = vmatprep.subr.bf16.mxu1 %v4593_v54  ;;  %v4636_v53 = vld [vmem:[%s6507_s1 + $0x5d0] ss:$8 sps:$4 sm:$0xff]   ;;  %v4641_v54 = vld [vmem:[%s6507_s1 + $0x1e4] ss:$8 sps:$4 sm:$0xff]  }
  0x59   :  { %2898 = vmatprep.subr.bf16.mxu0 %v4596_v55  ;;  %v4644_v55 = vld [vmem:[%s6507_s1 + $0x5e4] ss:$8 sps:$4 sm:$0xff]  }
  0x5a   :  { %2384 = vmatmul.mubr.bf16.gmra.mrb[12].mxu1 %v3866_v59  ;;  %v26_v59 = vld [vmem:[%s6508_s0 + $0x48] sm:$0xff] }
  0x5b   :  { %2836 = vmatmul.mubr.bf16.gmra.mrb[12].mxu0 %v3874_v60  ;;  %2447 = vmatpush1.bf16.msra.mxu1 %v4591_v56  ;;  %v4639_v56 = vld [vmem:[%s6507_s1 + $0x1e0] ss:$8 sps:$4 sm:$0xff]   ;;  %v3930_v60 = vcombine.low %v129_v42, %v137_v43 }
  0x5c   :  { %2899 = vmatpush1.bf16.msra.mxu0 %v4594_v63  ;;  %2448 = vmatprep.subr.bf16.mxu1 %v4599_v0  ;;  %v30_v63 = vld [vmem:[%s6508_s0 + $0x68] sm:$0xff]  ;;  %v4647_v0 = vld [vmem:[%s6507_s1 + $0x1f4] ss:$8 sps:$4 sm:$0xff]  }
  0x5d   :  { %2900 = vmatprep.subr.bf16.mxu0 %v4602_v1  ;;  %2393 = vmatprep.mubr.bf16.mxu1 %v3883_v2  ;;  %v4650_v1 = vld [vmem:[%s6507_s1 + $0x5f4] ss:$8 sps:$4 sm:$0xff]   ;;  %v3821_v2 = vcombine.high %v18_v58, %v26_v59  ;;  %v3828_v12 = vcombine.low %v22_v62, %v30_v63  ;;  %v66_v42 = vld [vmem:[%s6508_s0 + $0x188] sm:$0xff] }
  0x5e   :  { %2845 = vmatprep.mubr.bf16.mxu0 %v3891_v3  ;;  %v3829_v3 = vcombine.high %v22_v62, %v30_v63  ;;  %v78_v47 = vld [vmem:[%s6508_s0 + $0x1e8] sm:$0xff] }
  0x5f   :  { %2449 = vmatpush1.bf16.msra.mxu1 %v4597_v4  ;;  %v4645_v4 = vld [vmem:[%s6507_s1 + $0x1f0] ss:$8 sps:$4 sm:$0xff]   ;;  %v86_v62 = vld [vmem:[%s6508_s0 + $0x228] sm:$0xff] }
  0x60   :  { %2901 = vmatpush1.bf16.msra.mxu0 %v4600_v5  ;;  %2450 = vmatprep.subr.bf16.mxu1 %v4605_v6  ;;  %v4648_v5 = vld [vmem:[%s6507_s1 + $0x5f0] ss:$8 sps:$4 sm:$0xff]   ;;  %v4653_v6 = vld [vmem:[%s6507_s1 + $0x204] ss:$8 sps:$4 sm:$0xff]  }
  0x61   :  { %2902 = vmatprep.subr.bf16.mxu0 %v4608_v7  ;;  %v4656_v7 = vld [vmem:[%s6507_s1 + $0x604] ss:$8 sps:$4 sm:$0xff]  }
  0x62   :  { %2394 = vmatmul.mubr.bf16.gmra.mrb[16].mxu1 %v3882_v10  ;;  %v42_v10 = vld [vmem:[%s6508_s0 + $0xc8] sm:$0xff] }
  0x63   :  { %2846 = vmatmul.mubr.bf16.gmra.mrb[16].mxu0 %v3890_v11  ;;  %2451 = vmatpush1.bf16.msra.mxu1 %v4603_v14  ;;  %v3820_v11 = vcombine.low %v18_v58, %v26_v59  ;;  %v46_v14 = vld [vmem:[%s6508_s0 + $0xe8] sm:$0xff]  ;;  %v3836_v26 = vcombine.low %v34_v9, %v42_v10 }
  0x64   :  { %2903 = vmatpush1.bf16.msra.mxu0 %v4606_v15  ;;  %2452 = vmatprep.subr.bf16.mxu1 %v4611_v16  ;;  %v4654_v15 = vld [vmem:[%s6507_s1 + $0x600] ss:$8 sps:$4 sm:$0xff]   ;;  %v4659_v16 = vld [vmem:[%s6507_s1 + $0x214] ss:$8 sps:$4 sm:$0xff]  }
  0x65   :  { %2904 = vmatprep.subr.bf16.mxu0 %v4614_v17  ;;  %2403 = vmatprep.mubr.bf16.mxu1 %v3899_v18  ;;  %v4662_v17 = vld [vmem:[%s6507_s1 + $0x614] ss:$8 sps:$4 sm:$0xff]   ;;  %v3837_v18 = vcombine.high %v34_v9, %v42_v10  ;;  %v82_v58 = vld [vmem:[%s6508_s0 + $0x208] sm:$0xff] }
  0x66   :  { %2855 = vmatprep.mubr.bf16.mxu0 %v3907_v19  ;;  %v3845_v19 = vcombine.high %v38_v13, %v46_v14  ;;  %v90_v59 = vld [vmem:[%s6508_s0 + $0x248] sm:$0xff] }
  0x67   :  { %2453 = vmatpush1.bf16.msra.mxu1 %v4609_v20  ;;  %v4657_v20 = vld [vmem:[%s6507_s1 + $0x210] ss:$8 sps:$4 sm:$0xff]   ;;  %v94_v63 = vld [vmem:[%s6508_s0 + $0x268] sm:$0xff] }
  0x68   :  { %2905 = vmatpush1.bf16.msra.mxu0 %v4612_v21  ;;  %2454 = vmatprep.subr.bf16.mxu1 %v4617_v22  ;;  %v4660_v21 = vld [vmem:[%s6507_s1 + $0x610] ss:$8 sps:$4 sm:$0xff]   ;;  %v4665_v22 = vld [vmem:[%s6507_s1 + $0x224] ss:$8 sps:$4 sm:$0xff]   ;;  %v4702_v9 = vld [vmem:[%s6507_s1 + $0x680] ss:$8 sps:$4 sm:$0xff]  }
  0x69   :  { %2906 = vmatprep.subr.bf16.mxu0 %v4620_v23  ;;  %v4668_v23 = vld [vmem:[%s6507_s1 + $0x624] ss:$8 sps:$4 sm:$0xff]  }
  0x6a   :  { %2404 = vmatmul.mubr.bf16.gmra.mrb[20].mxu1 %v3898_v27  ;;  %v3844_v27 = vcombine.low %v38_v13, %v46_v14  ;;  %v98_v10 = vld [vmem:[%s6508_s0 + $0x288] sm:$0xff]  ;;  %v3892_v13 = vcombine.low %v86_v62, %v94_v63 }
  0x6b   :  { %2856 = vmatmul.mubr.bf16.gmra.mrb[20].mxu0 %v3906_v28  ;;  %2455 = vmatpush1.bf16.msra.mxu1 %v4615_v24  ;;  %v50_v24 = vld [vmem:[%s6508_s0 + $0x108] sm:$0xff] }
  0x6c   :  { %2907 = vmatpush1.bf16.msra.mxu0 %v4618_v25  ;;  %2456 = vmatprep.subr.bf16.mxu1 %v4623_v32  ;;  %v58_v25 = vld [vmem:[%s6508_s0 + $0x148] sm:$0xff]  ;;  %v4671_v32 = vld [vmem:[%s6507_s1 + $0x234] ss:$8 sps:$4 sm:$0xff]  }
  0x6d   :  { %2908 = vmatprep.subr.bf16.mxu0 %v4626_v33  ;;  %2413 = vmatprep.mubr.bf16.mxu1 %v3915_v34  ;;  %v54_v28 = vld [vmem:[%s6508_s0 + $0x128] sm:$0xff]  ;;  %v4674_v33 = vld [vmem:[%s6507_s1 + $0x634] ss:$8 sps:$4 sm:$0xff]   ;;  %v3853_v34 = vcombine.high %v50_v24, %v58_v25  ;;  %v3852_v43 = vcombine.low %v50_v24, %v58_v25 }
  0x6e   :  { %2865 = vmatprep.mubr.bf16.mxu0 %v3923_v35  ;;  %v3861_v35 = vcombine.high %v54_v28, %v62_v29  ;;  %v102_v14 = vld [vmem:[%s6508_s0 + $0x2a8] sm:$0xff] }
  0x6f   :  { %2457 = vmatpush1.bf16.msra.mxu1 %v4621_v36  ;;  %v4669_v36 = vld [vmem:[%s6507_s1 + $0x230] ss:$8 sps:$4 sm:$0xff]   ;;  %v4711_v24 = vld [vmem:[%s6507_s1 + $0x2a0] ss:$8 sps:$4 sm:$0xff]  }
  0x70   :  { %2909 = vmatpush1.bf16.msra.mxu0 %v4624_v37  ;;  %2458 = vmatprep.subr.bf16.mxu1 %v4629_v38  ;;  %v4672_v37 = vld [vmem:[%s6507_s1 + $0x630] ss:$8 sps:$4 sm:$0xff]   ;;  %v4677_v38 = vld [vmem:[%s6507_s1 + $0x244] ss:$8 sps:$4 sm:$0xff]  }
  0x71   :  { %2910 = vmatprep.subr.bf16.mxu0 %v4632_v39  ;;  %v4680_v39 = vld [vmem:[%s6507_s1 + $0x644] ss:$8 sps:$4 sm:$0xff]  }
  0x72   :  { %2414 = vmatmul.mubr.bf16.gmra.mrb[24].mxu1 %v3914_v44  ;;  %v3860_v44 = vcombine.low %v54_v28, %v62_v29  ;;  %v114_v25 = vld [vmem:[%s6508_s0 + $0x308] sm:$0xff] }
  0x73   :  { %2866 = vmatmul.mubr.bf16.gmra.mrb[24].mxu0 %v3922_v45  ;;  %2459 = vmatpush1.bf16.msra.mxu1 %v4627_v40  ;;  %v4675_v40 = vld [vmem:[%s6507_s1 + $0x240] ss:$8 sps:$4 sm:$0xff]  }
  0x74   :  { %2911 = vmatpush1.bf16.msra.mxu0 %v4630_v41  ;;  %2460 = vmatprep.subr.bf16.mxu1 %v4635_v48  ;;  %v4678_v41 = vld [vmem:[%s6507_s1 + $0x640] ss:$8 sps:$4 sm:$0xff]   ;;  %v4683_v48 = vld [vmem:[%s6507_s1 + $0x254] ss:$8 sps:$4 sm:$0xff]  }
  0x75   :  { %2912 = vmatprep.subr.bf16.mxu0 %v4638_v49  ;;  %2423 = vmatprep.mubr.bf16.mxu1 %v3931_v50  ;;  %v74_v45 = vld [vmem:[%s6508_s0 + $0x1c8] sm:$0xff]  ;;  %v4686_v49 = vld [vmem:[%s6507_s1 + $0x654] ss:$8 sps:$4 sm:$0xff]  }
  0x76   :  { %2875 = vmatprep.mubr.bf16.mxu0 %v3939_v51  ;;  %v3869_v50 = vcombine.high %v66_v42, %v74_v45  ;;  %v3877_v51 = vcombine.high %v70_v46, %v78_v47  ;;  %v118_v29 = vld [vmem:[%s6508_s0 + $0x328] sm:$0xff] }
  0x77   :  { %2461 = vmatpush1.bf16.msra.mxu1 %v4633_v52  ;;  %v4681_v52 = vld [vmem:[%s6507_s1 + $0x250] ss:$8 sps:$4 sm:$0xff]  }
  0x78   :  { %2913 = vmatpush1.bf16.msra.mxu0 %v4636_v53  ;;  %2462 = vmatprep.subr.bf16.mxu1 %v4641_v54  ;;  %v4684_v53 = vld [vmem:[%s6507_s1 + $0x650] ss:$8 sps:$4 sm:$0xff]   ;;  %v4689_v54 = vld [vmem:[%s6507_s1 + $0x264] ss:$8 sps:$4 sm:$0xff]  }
  0x79   :  { %2914 = vmatprep.subr.bf16.mxu0 %v4644_v55  ;;  %v4692_v55 = vld [vmem:[%s6507_s1 + $0x664] ss:$8 sps:$4 sm:$0xff]  }
  0x7a   :  { %2424 = vmatmul.mubr.bf16.gmra.mrb[28].mxu1 %v3930_v60  ;;  %v3868_v60 = vcombine.low %v66_v42, %v74_v45  ;;  %v142_v45 = vld [vmem:[%s6508_s0 + $0x3e8] sm:$0xff] }
  0x7b   :  { %2876 = vmatmul.mubr.bf16.gmra.mrb[28].mxu0 %v3938_v61  ;;  %2463 = vmatpush1.bf16.msra.mxu1 %v4639_v56  ;;  %v4687_v56 = vld [vmem:[%s6507_s1 + $0x260] ss:$8 sps:$4 sm:$0xff]   ;;  %v3876_v61 = vcombine.low %v70_v46, %v78_v47 }
  0x7c   :  { %2915 = vmatpush1.bf16.msra.mxu0 %v4642_v57  ;;  %2464 = vmatprep.subr.bf16.mxu1 %v4647_v0  ;;  %v4690_v57 = vld [vmem:[%s6507_s1 + $0x660] ss:$8 sps:$4 sm:$0xff]   ;;  %v4695_v0 = vld [vmem:[%s6507_s1 + $0x274] ss:$8 sps:$4 sm:$0xff]  }
  0x7d   :  { %2916 = vmatprep.subr.bf16.mxu0 %v4650_v1  ;;  %2466 = vmatprep.mubr.bf16.mxu1 %v3821_v2  ;;  %v4698_v1 = vld [vmem:[%s6507_s1 + $0x674] ss:$8 sps:$4 sm:$0xff]   ;;  %v3885_v2 = vcombine.high %v82_v58, %v90_v59  ;;  %v4723_v46 = vld [vmem:[%s6507_s1 + $0x2c0] ss:$8 sps:$4 sm:$0xff]  }
  0x7e   :  { %2918 = vmatprep.mubr.bf16.mxu0 %v3829_v3  ;;  %v3893_v3 = vcombine.high %v86_v62, %v94_v63  ;;  %v4726_v47 = vld [vmem:[%s6507_s1 + $0x6c0] ss:$8 sps:$4 sm:$0xff]   ;;  %v23_v62 = vld [vmem:[%s6508_s0 + $0x30] sm:$0xff] }
  0x7f   :  { %2465 = vmatpush1.bf16.msra.mxu1 %v4645_v4  ;;  %v4693_v4 = vld [vmem:[%s6507_s1 + $0x270] ss:$8 sps:$4 sm:$0xff]  }
  0x80   :  { %2917 = vmatpush1.bf16.msra.mxu0 %v4648_v5  ;;  %2547 = vmatprep.subr.bf16.mxu1 %v4653_v6  ;;  %v4696_v5 = vld [vmem:[%s6507_s1 + $0x670] ss:$8 sps:$4 sm:$0xff]   ;;  %v4701_v6 = vld [vmem:[%s6507_s1 + $0x284] ss:$8 sps:$4 sm:$0xff]  }
  0x81   :  { %2999 = vmatprep.subr.bf16.mxu0 %v4656_v7  ;;  %v4704_v7 = vld [vmem:[%s6507_s1 + $0x684] ss:$8 sps:$4 sm:$0xff]   ;;  %v31_v63 = vld [vmem:[%s6508_s0 + $0x70] sm:$0xff] }
  0x82   :  { %2467 = vmatmul.mubr.bf16.vlgmr.msra.gmra.mrb[0].mxu1 %v3820_v11  ;;  %v106_v11 = vld [vmem:[%s6508_s0 + $0x2c8] sm:$0xff] }
  0x83   :  { %2919 = vmatmul.mubr.bf16.vlgmr.msra.gmra.mrb[0].mxu0 %v3828_v12  ;;  %2548 = vmatpush1.bf16.msra.mxu1 %v4651_v8  ;;  %v4699_v8 = vld [vmem:[%s6507_s1 + $0x280] ss:$8 sps:$4 sm:$0xff]   ;;  %v3884_v12 = vcombine.low %v82_v58, %v90_v59  ;;  %v19_v58 = vld [vmem:[%s6508_s0 + $0x10] sm:$0xff] }
  0x84   :  { %3000 = vmatpush1.bf16.msra.mxu0 %v4654_v15  ;;  %2549 = vmatprep.subr.bf16.mxu1 %v4659_v16  ;;  %v110_v15 = vld [vmem:[%s6508_s0 + $0x2e8] sm:$0xff]  ;;  %v4707_v16 = vld [vmem:[%s6507_s1 + $0x294] ss:$8 sps:$4 sm:$0xff]  }
  0x85   :  { %3001 = vmatprep.subr.bf16.mxu0 %v4662_v17  ;;  %2476 = vmatprep.mubr.bf16.mxu1 %v3837_v18  ;;  %v4710_v17 = vld [vmem:[%s6507_s1 + $0x694] ss:$8 sps:$4 sm:$0xff]   ;;  %v3901_v18 = vcombine.high %v98_v10, %v106_v11  ;;  %v3908_v28 = vcombine.low %v102_v14, %v110_v15 }
  0x86   :  { %2928 = vmatprep.mubr.bf16.mxu0 %v3845_v19  ;;  %v3909_v19 = vcombine.high %v102_v14, %v110_v15  ;;  %v39_v14 = vld [vmem:[%s6508_s0 + $0xb0] sm:$0xff] }
  0x87   :  { %2550 = vmatpush1.bf16.msra.mxu1 %v4657_v20  ;;  %v4705_v20 = vld [vmem:[%s6507_s1 + $0x290] ss:$8 sps:$4 sm:$0xff]  }
  0x88   :  { %3002 = vmatpush1.bf16.msra.mxu0 %v4660_v21  ;;  %2551 = vmatprep.subr.bf16.mxu1 %v4665_v22  ;;  %v4708_v21 = vld [vmem:[%s6507_s1 + $0x690] ss:$8 sps:$4 sm:$0xff]   ;;  %v4713_v22 = vld [vmem:[%s6507_s1 + $0x2a4] ss:$8 sps:$4 sm:$0xff]  }
  0x89   :  { %3003 = vmatprep.subr.bf16.mxu0 %v4668_v23  ;;  %v4716_v23 = vld [vmem:[%s6507_s1 + $0x6a4] ss:$8 sps:$4 sm:$0xff]   ;;  %v47_v15 = vld [vmem:[%s6508_s0 + $0xf0] sm:$0xff] }
  0x8a   :  { %2477 = vmatmul.mubr.bf16.gmra.mrb[4].mxu1 %v3836_v26  ;;  %v122_v26 = vld [vmem:[%s6508_s0 + $0x348] sm:$0xff] }
  0x8b   :  { %2929 = vmatmul.mubr.bf16.gmra.mrb[4].mxu0 %v3844_v27  ;;  %2552 = vmatpush1.bf16.msra.mxu1 %v4663_v30  ;;  %v3900_v27 = vcombine.low %v98_v10, %v106_v11  ;;  %v126_v30 = vld [vmem:[%s6508_s0 + $0x368] sm:$0xff]  ;;  %v3916_v42 = vcombine.low %v114_v25, %v122_v26  ;;  %v35_v10 = vld [vmem:[%s6508_s0 + $0x90] sm:$0xff] }
  0x8c   :  { %3004 = vmatpush1.bf16.msra.mxu0 %v4666_v31  ;;  %2553 = vmatprep.subr.bf16.mxu1 %v4671_v32  ;;  %v4714_v31 = vld [vmem:[%s6507_s1 + $0x6a0] ss:$8 sps:$4 sm:$0xff]   ;;  %v4719_v32 = vld [vmem:[%s6507_s1 + $0x2b4] ss:$8 sps:$4 sm:$0xff]  }
  0x8d   :  { %3005 = vmatprep.subr.bf16.mxu0 %v4674_v33  ;;  %2486 = vmatprep.mubr.bf16.mxu1 %v3853_v34  ;;  %v4722_v33 = vld [vmem:[%s6507_s1 + $0x6b4] ss:$8 sps:$4 sm:$0xff]   ;;  %v3917_v34 = vcombine.high %v114_v25, %v122_v26  ;;  %v4762_v25 = vld [vmem:[%s6507_s1 + $0x720] ss:$8 sps:$4 sm:$0xff]  }
  0x8e   :  { %2938 = vmatprep.mubr.bf16.mxu0 %v3861_v35  ;;  %v3925_v35 = vcombine.high %v118_v29, %v126_v30  ;;  %v43_v11 = vld [vmem:[%s6508_s0 + $0xd0] sm:$0xff] }
  0x8f   :  { %2554 = vmatpush1.bf16.msra.mxu1 %v4669_v36  ;;  %v4717_v36 = vld [vmem:[%s6507_s1 + $0x2b0] ss:$8 sps:$4 sm:$0xff]  }
  0x90   :  { %3006 = vmatpush1.bf16.msra.mxu0 %v4672_v37  ;;  %2555 = vmatprep.subr.bf16.mxu1 %v4677_v38  ;;  %v4720_v37 = vld [vmem:[%s6507_s1 + $0x6b0] ss:$8 sps:$4 sm:$0xff]   ;;  %v4725_v38 = vld [vmem:[%s6507_s1 + $0x2c4] ss:$8 sps:$4 sm:$0xff]  }
  0x91   :  { %3007 = vmatprep.subr.bf16.mxu0 %v4680_v39  ;;  %v4728_v39 = vld [vmem:[%s6507_s1 + $0x6c4] ss:$8 sps:$4 sm:$0xff]   ;;  %v51_v26 = vld [vmem:[%s6508_s0 + $0x110] sm:$0xff] }
  0x92   :  { %2487 = vmatmul.mubr.bf16.gmra.mrb[8].mxu1 %v3852_v43  ;;  %v3924_v43 = vcombine.low %v118_v29, %v126_v30  ;;  %v3846_v29 = vcombine.low %v39_v14, %v47_v15  ;;  %v55_v30 = vld [vmem:[%s6508_s0 + $0x130] sm:$0xff] }
  0x93   :  { %2939 = vmatmul.mubr.bf16.gmra.mrb[8].mxu0 %v3860_v44  ;;  %2556 = vmatpush1.bf16.msra.mxu1 %v4675_v40  ;;  %v130_v40 = vld [vmem:[%s6508_s0 + $0x388] sm:$0xff] }
  0x94   :  { %3008 = vmatpush1.bf16.msra.mxu0 %v4678_v41  ;;  %2557 = vmatprep.subr.bf16.mxu1 %v4683_v48  ;;  %v138_v41 = vld [vmem:[%s6508_s0 + $0x3c8] sm:$0xff]  ;;  %v4731_v48 = vld [vmem:[%s6507_s1 + $0x2d4] ss:$8 sps:$4 sm:$0xff]  }
  0x95   :  { %3009 = vmatprep.subr.bf16.mxu0 %v4686_v49  ;;  %2496 = vmatprep.mubr.bf16.mxu1 %v3869_v50  ;;  %v134_v44 = vld [vmem:[%s6508_s0 + $0x3a8] sm:$0xff]  ;;  %v4734_v49 = vld [vmem:[%s6507_s1 + $0x6d4] ss:$8 sps:$4 sm:$0xff]   ;;  %v3933_v50 = vcombine.high %v130_v40, %v138_v41  ;;  %v3932_v59 = vcombine.low %v130_v40, %v138_v41 }
  0x96   :  { %2948 = vmatprep.mubr.bf16.mxu0 %v3877_v51  ;;  %v3941_v51 = vcombine.high %v134_v44, %v142_v45  ;;  %v67_v40 = vld [vmem:[%s6508_s0 + $0x190] sm:$0xff] }
  0x97   :  { %2558 = vmatpush1.bf16.msra.mxu1 %v4681_v52  ;;  %v4729_v52 = vld [vmem:[%s6507_s1 + $0x2d0] ss:$8 sps:$4 sm:$0xff]  }
  0x98   :  { %3010 = vmatpush1.bf16.msra.mxu0 %v4684_v53  ;;  %2559 = vmatprep.subr.bf16.mxu1 %v4689_v54  ;;  %v4732_v53 = vld [vmem:[%s6507_s1 + $0x6d0] ss:$8 sps:$4 sm:$0xff]   ;;  %v4737_v54 = vld [vmem:[%s6507_s1 + $0x2e4] ss:$8 sps:$4 sm:$0xff]  }
  0x99   :  { %3011 = vmatprep.subr.bf16.mxu0 %v4692_v55  ;;  %v4740_v55 = vld [vmem:[%s6507_s1 + $0x6e4] ss:$8 sps:$4 sm:$0xff]  }
  0x9a   :  { %2497 = vmatmul.mubr.bf16.gmra.mrb[12].mxu1 %v3868_v60  ;;  %v3940_v60 = vcombine.low %v134_v44, %v142_v45  ;;  %v71_v44 = vld [vmem:[%s6508_s0 + $0x1b0] sm:$0xff] }
  0x9b   :  { %2949 = vmatmul.mubr.bf16.gmra.mrb[12].mxu0 %v3876_v61  ;;  %2560 = vmatpush1.bf16.msra.mxu1 %v4687_v56  ;;  %v4735_v56 = vld [vmem:[%s6507_s1 + $0x2e0] ss:$8 sps:$4 sm:$0xff]   ;;  %v27_v61 = vld [vmem:[%s6508_s0 + $0x50] sm:$0xff] }
  0x9c   :  { %3012 = vmatpush1.bf16.msra.mxu0 %v4690_v57  ;;  %2561 = vmatprep.subr.bf16.mxu1 %v4695_v0  ;;  %v4738_v57 = vld [vmem:[%s6507_s1 + $0x6e0] ss:$8 sps:$4 sm:$0xff]   ;;  %v4743_v0 = vld [vmem:[%s6507_s1 + $0x2f4] ss:$8 sps:$4 sm:$0xff]  }
  0x9d   :  { %3013 = vmatprep.subr.bf16.mxu0 %v4698_v1  ;;  %2506 = vmatprep.mubr.bf16.mxu1 %v3885_v2  ;;  %v4746_v1 = vld [vmem:[%s6507_s1 + $0x6f4] ss:$8 sps:$4 sm:$0xff]   ;;  %v3823_v2 = vcombine.high %v19_v58, %v27_v61 }
  0x9e   :  { %2958 = vmatprep.mubr.bf16.mxu0 %v3893_v3  ;;  %v3831_v3 = vcombine.high %v23_v62, %v31_v63  ;;  %v79_v45 = vld [vmem:[%s6508_s0 + $0x1f0] sm:$0xff] }
  0x9f   :  { %2562 = vmatpush1.bf16.msra.mxu1 %v4693_v4  ;;  %v4741_v4 = vld [vmem:[%s6507_s1 + $0x2f0] ss:$8 sps:$4 sm:$0xff]  }
  0xa0   :  { %3014 = vmatpush1.bf16.msra.mxu0 %v4696_v5  ;;  %2563 = vmatprep.subr.bf16.mxu1 %v4701_v6  ;;  %v4744_v5 = vld [vmem:[%s6507_s1 + $0x6f0] ss:$8 sps:$4 sm:$0xff]   ;;  %v4749_v6 = vld [vmem:[%s6507_s1 + $0x304] ss:$8 sps:$4 sm:$0xff]  }
  0xa1   :  { %3015 = vmatprep.subr.bf16.mxu0 %v4704_v7  ;;  %v4752_v7 = vld [vmem:[%s6507_s1 + $0x704] ss:$8 sps:$4 sm:$0xff]  }
  0xa2   :  { %2507 = vmatmul.mubr.bf16.gmra.mrb[16].mxu1 %v3884_v12  ;;  %v3822_v12 = vcombine.low %v19_v58, %v27_v61  ;;  %v3878_v58 = vcombine.low %v71_v44, %v79_v45  ;;  %v95_v61 = vld [vmem:[%s6508_s0 + $0x270] sm:$0xff] }
  0xa3   :  { %2959 = vmatmul.mubr.bf16.gmra.mrb[16].mxu0 %v3892_v13  ;;  %2564 = vmatpush1.bf16.msra.mxu1 %v4699_v8  ;;  %v4747_v8 = vld [vmem:[%s6507_s1 + $0x300] ss:$8 sps:$4 sm:$0xff]   ;;  %v3830_v13 = vcombine.low %v23_v62, %v31_v63 }
  0xa4   :  { %3016 = vmatpush1.bf16.msra.mxu0 %v4702_v9  ;;  %2565 = vmatprep.subr.bf16.mxu1 %v4707_v16  ;;  %v4750_v9 = vld [vmem:[%s6507_s1 + $0x700] ss:$8 sps:$4 sm:$0xff]   ;;  %v4755_v16 = vld [vmem:[%s6507_s1 + $0x314] ss:$8 sps:$4 sm:$0xff]  }
  0xa5   :  { %3017 = vmatprep.subr.bf16.mxu0 %v4710_v17  ;;  %2516 = vmatprep.mubr.bf16.mxu1 %v3901_v18  ;;  %v4758_v17 = vld [vmem:[%s6507_s1 + $0x714] ss:$8 sps:$4 sm:$0xff]   ;;  %v3839_v18 = vcombine.high %v35_v10, %v43_v11  ;;  %v4783_v62 = vld [vmem:[%s6507_s1 + $0x360] ss:$8 sps:$4 sm:$0xff]  }
  0xa6   :  { %2968 = vmatprep.mubr.bf16.mxu0 %v3909_v19  ;;  %v3847_v19 = vcombine.high %v39_v14, %v47_v15  ;;  %v4786_v63 = vld [vmem:[%s6507_s1 + $0x760] ss:$8 sps:$4 sm:$0xff]  }
  0xa7   :  { %2566 = vmatpush1.bf16.msra.mxu1 %v4705_v20  ;;  %v4753_v20 = vld [vmem:[%s6507_s1 + $0x310] ss:$8 sps:$4 sm:$0xff]   ;;  %v4795_v14 = vld [vmem:[%s6507_s1 + $0x380] ss:$8 sps:$4 sm:$0xff]  }
  0xa8   :  { %3018 = vmatpush1.bf16.msra.mxu0 %v4708_v21  ;;  %2567 = vmatprep.subr.bf16.mxu1 %v4713_v22  ;;  %v4756_v21 = vld [vmem:[%s6507_s1 + $0x710] ss:$8 sps:$4 sm:$0xff]   ;;  %v4761_v22 = vld [vmem:[%s6507_s1 + $0x324] ss:$8 sps:$4 sm:$0xff]   ;;  %v4798_v15 = vld [vmem:[%s6507_s1 + $0x780] ss:$8 sps:$4 sm:$0xff]  }
  0xa9   :  { %3019 = vmatprep.subr.bf16.mxu0 %v4716_v23  ;;  %v4764_v23 = vld [vmem:[%s6507_s1 + $0x724] ss:$8 sps:$4 sm:$0xff]  }
  0xaa   :  { %2517 = vmatmul.mubr.bf16.gmra.mrb[20].mxu1 %v3900_v27  ;;  %v59_v27 = vld [vmem:[%s6508_s0 + $0x150] sm:$0xff] }
  0xab   :  { %2969 = vmatmul.mubr.bf16.gmra.mrb[20].mxu0 %v3908_v28  ;;  %2568 = vmatpush1.bf16.msra.mxu1 %v4711_v24  ;;  %v4759_v24 = vld [vmem:[%s6507_s1 + $0x320] ss:$8 sps:$4 sm:$0xff]   ;;  %v3838_v28 = vcombine.low %v35_v10, %v43_v11  ;;  %v3854_v41 = vcombine.low %v51_v26, %v59_v27  ;;  %v107_v11 = vld [vmem:[%s6508_s0 + $0x2d0] sm:$0xff] }
  0xac   :  { %3020 = vmatpush1.bf16.msra.mxu0 %v4714_v31  ;;  %2569 = vmatprep.subr.bf16.mxu1 %v4719_v32  ;;  %v63_v31 = vld [vmem:[%s6508_s0 + $0x170] sm:$0xff] }
  0xad   :  { %3021 = vmatprep.subr.bf16.mxu0 %v4722_v33  ;;  %2526 = vmatprep.mubr.bf16.mxu1 %v3917_v34  ;;  %v4767_v32 = vld [vmem:[%s6507_s1 + $0x334] ss:$8 sps:$4 sm:$0xff]   ;;  %v3855_v34 = vcombine.high %v51_v26, %v59_v27 }
  0xae   :  { %2978 = vmatprep.mubr.bf16.mxu0 %v3925_v35  ;;  %v4770_v33 = vld [vmem:[%s6507_s1 + $0x734] ss:$8 sps:$4 sm:$0xff]   ;;  %v3863_v35 = vcombine.high %v55_v30, %v63_v31 }
  0xaf   :  { %2570 = vmatpush1.bf16.msra.mxu1 %v4717_v36  ;;  %v4765_v36 = vld [vmem:[%s6507_s1 + $0x330] ss:$8 sps:$4 sm:$0xff]  }
  0xb0   :  { %3022 = vmatpush1.bf16.msra.mxu0 %v4720_v37  ;;  %2571 = vmatprep.subr.bf16.mxu1 %v4725_v38  ;;  %v4768_v37 = vld [vmem:[%s6507_s1 + $0x730] ss:$8 sps:$4 sm:$0xff]   ;;  %v4773_v38 = vld [vmem:[%s6507_s1 + $0x344] ss:$8 sps:$4 sm:$0xff]  }
  0xb1   :  { %3023 = vmatprep.subr.bf16.mxu0 %v4728_v39  ;;  %v4776_v39 = vld [vmem:[%s6507_s1 + $0x744] ss:$8 sps:$4 sm:$0xff]   ;;  %v123_v27 = vld [vmem:[%s6508_s0 + $0x350] sm:$0xff] }
  0xb2   :  { %2527 = vmatmul.mubr.bf16.gmra.mrb[24].mxu1 %v3916_v42  ;;  %v3862_v42 = vcombine.low %v55_v30, %v63_v31  ;;  %v4807_v30 = vld [vmem:[%s6507_s1 + $0x3a0] ss:$8 sps:$4 sm:$0xff]  }
  0xb3   :  { %2979 = vmatmul.mubr.bf16.gmra.mrb[24].mxu0 %v3924_v43  ;;  %2572 = vmatpush1.bf16.msra.mxu1 %v4723_v46  ;;  %v75_v43 = vld [vmem:[%s6508_s0 + $0x1d0] sm:$0xff]  ;;  %v4771_v46 = vld [vmem:[%s6507_s1 + $0x340] ss:$8 sps:$4 sm:$0xff]  }
  0xb4   :  { %3024 = vmatpush1.bf16.msra.mxu0 %v4726_v47  ;;  %2573 = vmatprep.subr.bf16.mxu1 %v4731_v48  ;;  %v4774_v47 = vld [vmem:[%s6507_s1 + $0x740] ss:$8 sps:$4 sm:$0xff]   ;;  %v4779_v48 = vld [vmem:[%s6507_s1 + $0x354] ss:$8 sps:$4 sm:$0xff]  }
  0xb5   :  { %3025 = vmatprep.subr.bf16.mxu0 %v4734_v49  ;;  %2536 = vmatprep.mubr.bf16.mxu1 %v3933_v50  ;;  %v4782_v49 = vld [vmem:[%s6507_s1 + $0x754] ss:$8 sps:$4 sm:$0xff]   ;;  %v3871_v50 = vcombine.high %v67_v40, %v75_v43  ;;  %v4810_v31 = vld [vmem:[%s6507_s1 + $0x7a0] ss:$8 sps:$4 sm:$0xff]  }
  0xb6   :  { %2988 = vmatprep.mubr.bf16.mxu0 %v3941_v51  ;;  %v3879_v51 = vcombine.high %v71_v44, %v79_v45  ;;  %v135_v44 = vld [vmem:[%s6508_s0 + $0x3b0] sm:$0xff] }
  0xb7   :  { %2574 = vmatpush1.bf16.msra.mxu1 %v4729_v52  ;;  %v4777_v52 = vld [vmem:[%s6507_s1 + $0x350] ss:$8 sps:$4 sm:$0xff]  }
  0xb8   :  { %3026 = vmatpush1.bf16.msra.mxu0 %v4732_v53  ;;  %2575 = vmatprep.subr.bf16.mxu1 %v4737_v54  ;;  %v4780_v53 = vld [vmem:[%s6507_s1 + $0x750] ss:$8 sps:$4 sm:$0xff]   ;;  %v4785_v54 = vld [vmem:[%s6507_s1 + $0x364] ss:$8 sps:$4 sm:$0xff]  }
  0xb9   :  { %3027 = vmatprep.subr.bf16.mxu0 %v4740_v55  ;;  %v4788_v55 = vld [vmem:[%s6507_s1 + $0x764] ss:$8 sps:$4 sm:$0xff]   ;;  %v143_v45 = vld [vmem:[%s6508_s0 + $0x3f0] sm:$0xff] }
  0xba   :  { %2537 = vmatmul.mubr.bf16.gmra.mrb[28].mxu1 %v3932_v59  ;;  %v91_v59 = vld [vmem:[%s6508_s0 + $0x250] sm:$0xff] }
  0xbb   :  { %2989 = vmatmul.mubr.bf16.gmra.mrb[28].mxu0 %v3940_v60  ;;  %2576 = vmatpush1.bf16.msra.mxu1 %v4735_v56  ;;  %v83_v56 = vld [vmem:[%s6508_s0 + $0x210] sm:$0xff] }
  0xbc   :  { %3028 = vmatpush1.bf16.msra.mxu0 %v4738_v57  ;;  %2577 = vmatprep.subr.bf16.mxu1 %v4743_v0  ;;  %v3870_v57 = vcombine.low %v67_v40, %v75_v43  ;;  %v87_v60 = vld [vmem:[%s6508_s0 + $0x230] sm:$0xff] }
  0xbd   :  { %3029 = vmatprep.subr.bf16.mxu0 %v4746_v1  ;;  %2579 = vmatprep.mubr.bf16.mxu1 %v3823_v2  ;;  %v4791_v0 = vld [vmem:[%s6507_s1 + $0x374] ss:$8 sps:$4 sm:$0xff]   ;;  %v3887_v2 = vcombine.high %v83_v56, %v91_v59  ;;  %v3894_v10 = vcombine.low %v87_v60, %v95_v61 }
  0xbe   :  { %3031 = vmatprep.mubr.bf16.mxu0 %v3831_v3  ;;  %v4794_v1 = vld [vmem:[%s6507_s1 + $0x774] ss:$8 sps:$4 sm:$0xff]   ;;  %v3895_v3 = vcombine.high %v87_v60, %v95_v61 }
  0xbf   :  { %2578 = vmatpush1.bf16.msra.mxu1 %v4741_v4  ;;  %v4789_v4 = vld [vmem:[%s6507_s1 + $0x370] ss:$8 sps:$4 sm:$0xff]  }
  0xc0   :  { %3030 = vmatpush1.bf16.msra.mxu0 %v4744_v5  ;;  %2660 = vmatprep.subr.bf16.mxu1 %v4749_v6  ;;  %v4792_v5 = vld [vmem:[%s6507_s1 + $0x770] ss:$8 sps:$4 sm:$0xff]   ;;  %v4797_v6 = vld [vmem:[%s6507_s1 + $0x384] ss:$8 sps:$4 sm:$0xff]  }
  0xc1   :  { %3112 = vmatprep.subr.bf16.mxu0 %v4752_v7  ;;  %v4800_v7 = vld [vmem:[%s6507_s1 + $0x784] ss:$8 sps:$4 sm:$0xff]   ;;  %v131_v40 = vld [vmem:[%s6508_s0 + $0x390] sm:$0xff]  ;;  %v24_v60 = vld [vmem:[%s6508_s0 + $0x38] sm:$0xff] }
  0xc2   :  { %2580 = vmatmul.mubr.bf16.vlgmr.msra.gmra.mrb[0].mxu1 %v3822_v12  ;;  %v103_v12 = vld [vmem:[%s6508_s0 + $0x2b0] sm:$0xff]  ;;  %v32_v61 = vld [vmem:[%s6508_s0 + $0x78] sm:$0xff] }
  0xc3   :  { %3032 = vmatmul.mubr.bf16.vlgmr.msra.gmra.mrb[0].mxu0 %v3830_v13  ;;  %2661 = vmatpush1.bf16.msra.mxu1 %v4747_v8  ;;  %v99_v8 = vld [vmem:[%s6508_s0 + $0x290] sm:$0xff] }
  0xc4   :  { %3113 = vmatpush1.bf16.msra.mxu0 %v4750_v9  ;;  %2662 = vmatprep.subr.bf16.mxu1 %v4755_v16  ;;  %v3886_v9 = vcombine.low %v83_v56, %v91_v59  ;;  %v111_v13 = vld [vmem:[%s6508_s0 + $0x2f0] sm:$0xff]  ;;  %v20_v56 = vld [vmem:[%s6508_s0 + $0x18] sm:$0xff] }
  0xc5   :  { %3114 = vmatprep.subr.bf16.mxu0 %v4758_v17  ;;  %2589 = vmatprep.mubr.bf16.mxu1 %v3839_v18  ;;  %v4803_v16 = vld [vmem:[%s6507_s1 + $0x394] ss:$8 sps:$4 sm:$0xff]   ;;  %v3903_v18 = vcombine.high %v99_v8, %v107_v11  ;;  %v3910_v26 = vcombine.low %v103_v12, %v111_v13 }
  0xc6   :  { %3041 = vmatprep.mubr.bf16.mxu0 %v3847_v19  ;;  %v4806_v17 = vld [vmem:[%s6507_s1 + $0x794] ss:$8 sps:$4 sm:$0xff]   ;;  %v3911_v19 = vcombine.high %v103_v12, %v111_v13 }
  0xc7   :  { %2663 = vmatpush1.bf16.msra.mxu1 %v4753_v20  ;;  %v4801_v20 = vld [vmem:[%s6507_s1 + $0x390] ss:$8 sps:$4 sm:$0xff]  }
  0xc8   :  { %3115 = vmatpush1.bf16.msra.mxu0 %v4756_v21  ;;  %2664 = vmatprep.subr.bf16.mxu1 %v4761_v22  ;;  %v4804_v21 = vld [vmem:[%s6507_s1 + $0x790] ss:$8 sps:$4 sm:$0xff]   ;;  %v4809_v22 = vld [vmem:[%s6507_s1 + $0x3a4] ss:$8 sps:$4 sm:$0xff]  }
  0xc9   :  { %3116 = vmatprep.subr.bf16.mxu0 %v4764_v23  ;;  %v4812_v23 = vld [vmem:[%s6507_s1 + $0x7a4] ss:$8 sps:$4 sm:$0xff]   ;;  %v139_v43 = vld [vmem:[%s6508_s0 + $0x3d0] sm:$0xff]  ;;  %v28_v59 = vld [vmem:[%s6508_s0 + $0x58] sm:$0xff] }
  0xca   :  { %2590 = vmatmul.mubr.bf16.gmra.mrb[4].mxu1 %v3838_v28  ;;  %v119_v28 = vld [vmem:[%s6508_s0 + $0x330] sm:$0xff] }
  0xcb   :  { %3042 = vmatmul.mubr.bf16.gmra.mrb[4].mxu0 %v3846_v29  ;;  %2665 = vmatpush1.bf16.msra.mxu1 %v4759_v24  ;;  %v115_v24 = vld [vmem:[%s6508_s0 + $0x310] sm:$0xff] }
  0xcc   :  { %3117 = vmatpush1.bf16.msra.mxu0 %v4762_v25  ;;  %2666 = vmatprep.subr.bf16.mxu1 %v4767_v32  ;;  %v3902_v25 = vcombine.low %v99_v8, %v107_v11  ;;  %v127_v29 = vld [vmem:[%s6508_s0 + $0x370] sm:$0xff]  ;;  %v40_v8 = vld [vmem:[%s6508_s0 + $0xb8] sm:$0xff]  ;;  %v3832_v11 = vcombine.low %v24_v60, %v32_v61 }
  0xcd   :  { %3118 = vmatprep.subr.bf16.mxu0 %v4770_v33  ;;  %2599 = vmatprep.mubr.bf16.mxu1 %v3855_v34  ;;  %v4815_v32 = vld [vmem:[%s6507_s1 + $0x3b4] ss:$8 sps:$4 sm:$0xff]   ;;  %v3919_v34 = vcombine.high %v115_v24, %v123_v27 }
  0xce   :  { %3051 = vmatprep.mubr.bf16.mxu0 %v3863_v35  ;;  %v4818_v33 = vld [vmem:[%s6507_s1 + $0x7b4] ss:$8 sps:$4 sm:$0xff]   ;;  %v3927_v35 = vcombine.high %v119_v28, %v127_v29 }
  0xcf   :  { %2667 = vmatpush1.bf16.msra.mxu1 %v4765_v36  ;;  %v4813_v36 = vld [vmem:[%s6507_s1 + $0x3b0] ss:$8 sps:$4 sm:$0xff]  }
  0xd0   :  { %3119 = vmatpush1.bf16.msra.mxu0 %v4768_v37  ;;  %2668 = vmatprep.subr.bf16.mxu1 %v4773_v38  ;;  %v4816_v37 = vld [vmem:[%s6507_s1 + $0x7b0] ss:$8 sps:$4 sm:$0xff]   ;;  %v4821_v38 = vld [vmem:[%s6507_s1 + $0x3c4] ss:$8 sps:$4 sm:$0xff]  }
  0xd1   :  { %3120 = vmatprep.subr.bf16.mxu0 %v4776_v39  ;;  %v4824_v39 = vld [vmem:[%s6507_s1 + $0x7c4] ss:$8 sps:$4 sm:$0xff]  }
  0xd2   :  { %2600 = vmatmul.mubr.bf16.gmra.mrb[8].mxu1 %v3854_v41  ;;  %v3918_v41 = vcombine.low %v115_v24, %v123_v27  ;;  %v72_v24 = vld [vmem:[%s6508_s0 + $0x1b8] sm:$0xff] }
  0xd3   :  { %3052 = vmatmul.mubr.bf16.gmra.mrb[8].mxu0 %v3862_v42  ;;  %2669 = vmatpush1.bf16.msra.mxu1 %v4771_v46  ;;  %v3926_v42 = vcombine.low %v119_v28, %v127_v29  ;;  %v4819_v46 = vld [vmem:[%s6507_s1 + $0x3c0] ss:$8 sps:$4 sm:$0xff]  }
  0xd4   :  { %3121 = vmatpush1.bf16.msra.mxu0 %v4774_v47  ;;  %2670 = vmatprep.subr.bf16.mxu1 %v4779_v48  ;;  %v4822_v47 = vld [vmem:[%s6507_s1 + $0x7c0] ss:$8 sps:$4 sm:$0xff]   ;;  %v4827_v48 = vld [vmem:[%s6507_s1 + $0x3d4] ss:$8 sps:$4 sm:$0xff]  }
  0xd5   :  { %3122 = vmatprep.subr.bf16.mxu0 %v4782_v49  ;;  %2609 = vmatprep.mubr.bf16.mxu1 %v3871_v50  ;;  %v4830_v49 = vld [vmem:[%s6507_s1 + $0x7d4] ss:$8 sps:$4 sm:$0xff]   ;;  %v3935_v50 = vcombine.high %v131_v40, %v139_v43 }
  0xd6   :  { %3061 = vmatprep.mubr.bf16.mxu0 %v3879_v51  ;;  %v3943_v51 = vcombine.high %v135_v44, %v143_v45 }
  0xd7   :  { %2671 = vmatpush1.bf16.msra.mxu1 %v4777_v52  ;;  %v4825_v52 = vld [vmem:[%s6507_s1 + $0x3d0] ss:$8 sps:$4 sm:$0xff]  }
  0xd8   :  { %3123 = vmatpush1.bf16.msra.mxu0 %v4780_v53  ;;  %2672 = vmatprep.subr.bf16.mxu1 %v4785_v54  ;;  %v4828_v53 = vld [vmem:[%s6507_s1 + $0x7d0] ss:$8 sps:$4 sm:$0xff]   ;;  %v4833_v54 = vld [vmem:[%s6507_s1 + $0x3e4] ss:$8 sps:$4 sm:$0xff]  }
  0xd9   :  { %3124 = vmatprep.subr.bf16.mxu0 %v4788_v55  ;;  %v4836_v55 = vld [vmem:[%s6507_s1 + $0x7e4] ss:$8 sps:$4 sm:$0xff]  }
  0xda   :  { %2610 = vmatmul.mubr.bf16.gmra.mrb[12].mxu1 %v3870_v57  ;;  %v3934_v57 = vcombine.low %v131_v40, %v139_v43  ;;  %v104_v40 = vld [vmem:[%s6508_s0 + $0x2b8] sm:$0xff] }
  0xdb   :  { %3062 = vmatmul.mubr.bf16.gmra.mrb[12].mxu0 %v3878_v58  ;;  %2673 = vmatpush1.bf16.msra.mxu1 %v4783_v62  ;;  %v3942_v58 = vcombine.low %v135_v44, %v143_v45  ;;  %v4831_v62 = vld [vmem:[%s6507_s1 + $0x3e0] ss:$8 sps:$4 sm:$0xff]  }
  0xdc   :  { %3125 = vmatpush1.bf16.msra.mxu0 %v4786_v63  ;;  %2674 = vmatprep.subr.bf16.mxu1 %v4791_v0  ;;  %v4834_v63 = vld [vmem:[%s6507_s1 + $0x7e0] ss:$8 sps:$4 sm:$0xff]   ;;  %v4839_v0 = vld [vmem:[%s6507_s1 + $0x3f4] ss:$8 sps:$4 sm:$0xff]  }
  0xdd   :  { %3126 = vmatprep.subr.bf16.mxu0 %v4794_v1  ;;  %2619 = vmatprep.mubr.bf16.mxu1 %v3887_v2  ;;  %v4842_v1 = vld [vmem:[%s6507_s1 + $0x7f4] ss:$8 sps:$4 sm:$0xff]   ;;  %v3825_v2 = vcombine.high %v20_v56, %v28_v59 }
  0xde   :  { %3071 = vmatprep.mubr.bf16.mxu0 %v3895_v3  ;;  %v3833_v3 = vcombine.high %v24_v60, %v32_v61 }
  0xdf   :  { %2675 = vmatpush1.bf16.msra.mxu1 %v4789_v4  ;;  %v4837_v4 = vld [vmem:[%s6507_s1 + $0x3f0] ss:$8 sps:$4 sm:$0xff]  }
  0xe0   :  { %3127 = vmatpush1.bf16.msra.mxu0 %v4792_v5  ;;  %2676 = vmatprep.subr.bf16.mxu1 %v4797_v6  ;;  %v4840_v5 = vld [vmem:[%s6507_s1 + $0x7f0] ss:$8 sps:$4 sm:$0xff]  }
  0xe1   :  { %3128 = vmatprep.subr.bf16.mxu0 %v4800_v7  ;;  %v36_v6 = vld [vmem:[%s6508_s0 + $0x98] sm:$0xff] }
  0xe2   :  { %2620 = vmatmul.mubr.bf16.gmra.mrb[16].mxu1 %v3886_v9  ;;  %v44_v7 = vld [vmem:[%s6508_s0 + $0xd8] sm:$0xff] }
  0xe3   :  { %3072 = vmatmul.mubr.bf16.gmra.mrb[16].mxu0 %v3894_v10  ;;  %2677 = vmatpush1.bf16.msra.mxu1 %v4795_v14  ;;  %v48_v9 = vld [vmem:[%s6508_s0 + $0xf8] sm:$0xff]  ;;  %v3824_v10 = vcombine.low %v20_v56, %v28_v59  ;;  %v3841_v12 = vcombine.high %v36_v6, %v44_v7 }
  0xe4   :  { %3129 = vmatpush1.bf16.msra.mxu0 %v4798_v15  ;;  %2678 = vmatprep.subr.bf16.mxu1 %v4803_v16  ;;  %v3849_v13 = vcombine.high %v40_v8, %v48_v9  ;;  %v52_v14 = vld [vmem:[%s6508_s0 + $0x118] sm:$0xff] }
  0xe5   :  { %3130 = vmatprep.subr.bf16.mxu0 %v4806_v17  ;;  %2629 = vmatprep.mubr.bf16.mxu1 %v3903_v18  ;;  %v60_v15 = vld [vmem:[%s6508_s0 + $0x158] sm:$0xff]  ;;  %v3840_v18 = vcombine.low %v36_v6, %v44_v7 }
  0xe6   :  { %3081 = vmatprep.mubr.bf16.mxu0 %v3911_v19  ;;  %v56_v16 = vld [vmem:[%s6508_s0 + $0x138] sm:$0xff]  ;;  %v3848_v19 = vcombine.low %v40_v8, %v48_v9 }
  0xe7   :  { %2679 = vmatpush1.bf16.msra.mxu1 %v4801_v20  ;;  %v64_v17 = vld [vmem:[%s6508_s0 + $0x178] sm:$0xff]  ;;  %v3857_v20 = vcombine.high %v52_v14, %v60_v15 }
  0xe8   :  { %3131 = vmatpush1.bf16.msra.mxu0 %v4804_v21  ;;  %2680 = vmatprep.subr.bf16.mxu1 %v4809_v22  ;;  %v3865_v21 = vcombine.high %v56_v16, %v64_v17  ;;  %v68_v22 = vld [vmem:[%s6508_s0 + $0x198] sm:$0xff]  ;;  %v3864_v27 = vcombine.low %v56_v16, %v64_v17 }
  0xe9   :  { %3132 = vmatprep.subr.bf16.mxu0 %v4812_v23  ;;  %v76_v23 = vld [vmem:[%s6508_s0 + $0x1d8] sm:$0xff] }
  0xea   :  { %2630 = vmatmul.mubr.bf16.gmra.mrb[20].mxu1 %v3902_v25  ;;  %v80_v25 = vld [vmem:[%s6508_s0 + $0x1f8] sm:$0xff]  ;;  %v3873_v28 = vcombine.high %v68_v22, %v76_v23 }
  0xeb   :  { %3082 = vmatmul.mubr.bf16.gmra.mrb[20].mxu0 %v3910_v26  ;;  %2681 = vmatpush1.bf16.msra.mxu1 %v4807_v30  ;;  %v3856_v26 = vcombine.low %v52_v14, %v60_v15  ;;  %v3881_v29 = vcombine.high %v72_v24, %v80_v25  ;;  %v84_v30 = vld [vmem:[%s6508_s0 + $0x218] sm:$0xff] }
  0xec   :  { %3133 = vmatpush1.bf16.msra.mxu0 %v4810_v31  ;;  %2682 = vmatprep.subr.bf16.mxu1 %v4815_v32  ;;  %v92_v31 = vld [vmem:[%s6508_s0 + $0x258] sm:$0xff] }
  0xed   :  { %3134 = vmatprep.subr.bf16.mxu0 %v4818_v33  ;;  %2639 = vmatprep.mubr.bf16.mxu1 %v3919_v34  ;;  %v88_v32 = vld [vmem:[%s6508_s0 + $0x238] sm:$0xff]  ;;  %v3872_v34 = vcombine.low %v68_v22, %v76_v23 }
  0xee   :  { %3091 = vmatprep.mubr.bf16.mxu0 %v3927_v35  ;;  %v96_v33 = vld [vmem:[%s6508_s0 + $0x278] sm:$0xff]  ;;  %v3880_v35 = vcombine.low %v72_v24, %v80_v25 }
  0xef   :  { %2683 = vmatpush1.bf16.msra.mxu1 %v4813_v36  ;;  %v3889_v36 = vcombine.high %v84_v30, %v92_v31  ;;  %v3896_v43 = vcombine.low %v88_v32, %v96_v33  ;;  %v136_v56 = vld [vmem:[%s6508_s0 + $0x3b8] sm:$0xff] }
  0xf0   :  { %3135 = vmatpush1.bf16.msra.mxu0 %v4816_v37  ;;  %2684 = vmatprep.subr.bf16.mxu1 %v4821_v38  ;;  %v3897_v37 = vcombine.high %v88_v32, %v96_v33  ;;  %v100_v38 = vld [vmem:[%s6508_s0 + $0x298] sm:$0xff] }
  0xf1   :  { %3136 = vmatprep.subr.bf16.mxu0 %v4824_v39  ;;  %v108_v39 = vld [vmem:[%s6508_s0 + $0x2d8] sm:$0xff] }
  0xf2   :  { %2640 = vmatmul.mubr.bf16.gmra.mrb[24].mxu1 %v3918_v41  ;;  %v112_v41 = vld [vmem:[%s6508_s0 + $0x2f8] sm:$0xff]  ;;  %v3905_v44 = vcombine.high %v100_v38, %v108_v39 }
  0xf3   :  { %3092 = vmatmul.mubr.bf16.gmra.mrb[24].mxu0 %v3926_v42  ;;  %2685 = vmatpush1.bf16.msra.mxu1 %v4819_v46  ;;  %v3888_v42 = vcombine.low %v84_v30, %v92_v31  ;;  %v3913_v45 = vcombine.high %v104_v40, %v112_v41  ;;  %v116_v46 = vld [vmem:[%s6508_s0 + $0x318] sm:$0xff] }
  0xf4   :  { %3137 = vmatpush1.bf16.msra.mxu0 %v4822_v47  ;;  %2686 = vmatprep.subr.bf16.mxu1 %v4827_v48  ;;  %v124_v47 = vld [vmem:[%s6508_s0 + $0x358] sm:$0xff] }
  0xf5   :  { %3138 = vmatprep.subr.bf16.mxu0 %v4830_v49  ;;  %2649 = vmatprep.mubr.bf16.mxu1 %v3935_v50  ;;  %v120_v48 = vld [vmem:[%s6508_s0 + $0x338] sm:$0xff]  ;;  %v3904_v50 = vcombine.low %v100_v38, %v108_v39 }
  0xf6   :  { %3101 = vmatprep.mubr.bf16.mxu0 %v3943_v51  ;;  %v128_v49 = vld [vmem:[%s6508_s0 + $0x378] sm:$0xff]  ;;  %v3912_v51 = vcombine.low %v104_v40, %v112_v41 }
  0xf7   :  { %2687 = vmatpush1.bf16.msra.mxu1 %v4825_v52  ;;  %v3921_v52 = vcombine.high %v116_v46, %v124_v47  ;;  %v3928_v59 = vcombine.low %v120_v48, %v128_v49 }
  0xf8   :  { %3139 = vmatpush1.bf16.msra.mxu0 %v4828_v53  ;;  %2688 = vmatprep.subr.bf16.mxu1 %v4833_v54  ;;  %v3929_v53 = vcombine.high %v120_v48, %v128_v49  ;;  %v132_v54 = vld [vmem:[%s6508_s0 + $0x398] sm:$0xff] }
  0xf9   :  { %3140 = vmatprep.subr.bf16.mxu0 %v4836_v55  ;;  %v140_v55 = vld [vmem:[%s6508_s0 + $0x3d8] sm:$0xff] }
  0xfa   :  { %2650 = vmatmul.mubr.bf16.gmra.mrb[28].mxu1 %v3934_v57  ;;  %v144_v57 = vld [vmem:[%s6508_s0 + $0x3f8] sm:$0xff]  ;;  %v3937_v60 = vcombine.high %v132_v54, %v140_v55 }
  0xfb   :  { %3102 = vmatmul.mubr.bf16.gmra.mrb[28].mxu0 %v3942_v58  ;;  %2689 = vmatpush1.bf16.msra.mxu1 %v4831_v62  ;;  %v3920_v58 = vcombine.low %v116_v46, %v124_v47  ;;  %v3945_v61 = vcombine.high %v136_v56, %v144_v57  ;;  %v3936_v62 = vcombine.low %v132_v54, %v140_v55 }
  0xfc   :  { %3141 = vmatpush1.bf16.msra.mxu0 %v4834_v63  ;;  %2690 = vmatprep.subr.bf16.mxu1 %v4839_v0  ;;  %v3944_v63 = vcombine.low %v136_v56, %v144_v57 }
  0xfd   :  { %3142 = vmatprep.subr.bf16.mxu0 %v4842_v1  ;;  %2692 = vmatprep.mubr.bf16.mxu1 %v3825_v2 }
  0xfe   :  { %3144 = vmatprep.mubr.bf16.mxu0 %v3833_v3 }
  0xff   :  { %2691 = vmatpush1.bf16.msra.mxu1 %v4837_v4 }
 0x100   :  { %3143 = vmatpush1.bf16.msra.mxu0 %v4840_v5 }
 0x102   :  { %2693 = vmatmul.mubr.bf16.vlgmr.msra.gmra.mrb[0].mxu1 %v3824_v10 }
 0x103   :  { %3145 = vmatmul.mubr.bf16.vlgmr.msra.gmra.mrb[0].mxu0 %v3832_v11  ;;  %2702 = vmatprep.mubr.bf16.mxu1 %v3841_v12 }
 0x104   :  { %3154 = vmatprep.mubr.bf16.mxu0 %v3849_v13 }
 0x10a   :  { %2703 = vmatmul.mubr.bf16.gmra.mrb[4].mxu1 %v3840_v18 }
 0x10b   :  { %3155 = vmatmul.mubr.bf16.gmra.mrb[4].mxu0 %v3848_v19  ;;  %2712 = vmatprep.mubr.bf16.mxu1 %v3857_v20 }
 0x10c   :  { %3164 = vmatprep.mubr.bf16.mxu0 %v3865_v21 }
 0x112   :  { %2713 = vmatmul.mubr.bf16.gmra.mrb[8].mxu1 %v3856_v26 }
 0x113   :  { %3165 = vmatmul.mubr.bf16.gmra.mrb[8].mxu0 %v3864_v27  ;;  %2722 = vmatprep.mubr.bf16.mxu1 %v3873_v28 }
 0x114   :  { %3174 = vmatprep.mubr.bf16.mxu0 %v3881_v29 }
 0x11a   :  { %2723 = vmatmul.mubr.bf16.gmra.mrb[12].mxu1 %v3872_v34 }
 0x11b   :  { %3175 = vmatmul.mubr.bf16.gmra.mrb[12].mxu0 %v3880_v35  ;;  %2732 = vmatprep.mubr.bf16.mxu1 %v3889_v36 }
 0x11c   :  { %3184 = vmatprep.mubr.bf16.mxu0 %v3897_v37 }
 0x122   :  { %2733 = vmatmul.mubr.bf16.gmra.mrb[16].mxu1 %v3888_v42 }
 0x123   :  { %3185 = vmatmul.mubr.bf16.gmra.mrb[16].mxu0 %v3896_v43  ;;  %2742 = vmatprep.mubr.bf16.mxu1 %v3905_v44 }
 0x124   :  { %3194 = vmatprep.mubr.bf16.mxu0 %v3913_v45 }
 0x12a   :  { %2743 = vmatmul.mubr.bf16.gmra.mrb[20].mxu1 %v3904_v50 }
 0x12b   :  { %3195 = vmatmul.mubr.bf16.gmra.mrb[20].mxu0 %v3912_v51  ;;  %2752 = vmatprep.mubr.bf16.mxu1 %v3921_v52 }
 0x12c   :  { %3204 = vmatprep.mubr.bf16.mxu0 %v3929_v53 }
 0x132   :  { %2753 = vmatmul.mubr.bf16.gmra.mrb[24].mxu1 %v3920_v58 }
 0x133   :  { %3205 = vmatmul.mubr.bf16.gmra.mrb[24].mxu0 %v3928_v59  ;;  %2762 = vmatprep.mubr.bf16.mxu1 %v3937_v60 }
 0x134   :  { %3214 = vmatprep.mubr.bf16.mxu0 %v3945_v61 }
 0x13a   :  { %2763 = vmatmul.mubr.bf16.gmra.mrb[28].mxu1 %v3936_v62 }
 0x13b   :  { %3215 = vmatmul.mubr.bf16.gmra.mrb[28].mxu0 %v3944_v63 }
 0x1d5   :  { %v2694_v0 = vpop.f32.mrb[0].mxu1 }
 0x1d6   :  { %v3146_v1 = vpop.f32.mrb[0].mxu0  ;;  %v2696_v3 = vpop.f32.mrb[1].mxu1 }
 0x1d7   :  { %v6025_v2 = vadd.f32 %v3146_v1, %v2694_v0  ;;  %v3148_v4 = vpop.f32.mrb[1].mxu0  ;;  %v2698_v6 = vpop.f32.mrb[2].mxu1 }
 0x1d8   :  { %v6027_v5 = vadd.f32 %v3148_v4, %v2696_v3  ;;  %v3150_v7 = vpop.f32.mrb[2].mxu0  ;;  %v2700_v9 = vpop.f32.mrb[3].mxu1 }
 0x1d9   :  { %v6029_v8 = vadd.f32 %v3150_v7, %v2698_v6  ;;  %v3152_v10 = vpop.f32.mrb[3].mxu0 }
 0x1da   :  { %v6031_v11 = vadd.f32 %v3152_v10, %v2700_v9 }
 0x1db   :  { %v3258_v36 = vadd.f32 %v6029_v8, %v6025_v2 }
 0x1dc   :  { %v3279_v37 = vadd.f32 %v6031_v11, %v6027_v5 }
 0x1dd   :  { %v2704_v12 = vpop.f32.mrb[4].mxu1 }
 0x1de   :  { %v3156_v13 = vpop.f32.mrb[4].mxu0  ;;  %v2706_v15 = vpop.f32.mrb[5].mxu1 }
 0x1df   :  { %v6033_v14 = vadd.f32 %v3156_v13, %v2704_v12  ;;  %v3158_v16 = vpop.f32.mrb[5].mxu0  ;;  %v2708_v18 = vpop.f32.mrb[6].mxu1 }
 0x1e0   :  { %v6035_v17 = vadd.f32 %v3158_v16, %v2706_v15  ;;  %v3160_v19 = vpop.f32.mrb[6].mxu0  ;;  %v2710_v21 = vpop.f32.mrb[7].mxu1 }
 0x1e1   :  { %v6037_v20 = vadd.f32 %v3160_v19, %v2708_v18  ;;  %v3162_v22 = vpop.f32.mrb[7].mxu0  ;;  %v3259_v38 = vadd.f32 %v6033_v14, %v3258_v36 }
 0x1e2   :  { %v6039_v23 = vadd.f32 %v3162_v22, %v2710_v21  ;;  %v3280_v39 = vadd.f32 %v6035_v17, %v3279_v37 }
 0x1e3   :  { %v3260_v48 = vadd.f32 %v6037_v20, %v3259_v38 }
 0x1e4   :  { %v3281_v52 = vadd.f32 %v6039_v23, %v3280_v39 }
 0x1e5   :  { %v2714_v24 = vpop.f32.mrb[8].mxu1 }
 0x1e6   :  { %v3166_v25 = vpop.f32.mrb[8].mxu0  ;;  %v2716_v27 = vpop.f32.mrb[9].mxu1 }
 0x1e7   :  { %v6041_v26 = vadd.f32 %v3166_v25, %v2714_v24  ;;  %v3168_v28 = vpop.f32.mrb[9].mxu0  ;;  %v2718_v30 = vpop.f32.mrb[10].mxu1 }
 0x1e8   :  { %v6043_v29 = vadd.f32 %v3168_v28, %v2716_v27  ;;  %v3170_v31 = vpop.f32.mrb[10].mxu0  ;;  %v2720_v33 = vpop.f32.mrb[11].mxu1 }
 0x1e9   :  { %v6045_v32 = vadd.f32 %v3170_v31, %v2718_v30  ;;  %v3172_v34 = vpop.f32.mrb[11].mxu0  ;;  %v3261_v54 = vadd.f32 %v6041_v26, %v3260_v48 }
 0x1ea   :  { %v6047_v35 = vadd.f32 %v3172_v34, %v2720_v33  ;;  %v3282_v55 = vadd.f32 %v6043_v29, %v3281_v52 }
 0x1eb   :  { %v3262_v58 = vadd.f32 %v6045_v32, %v3261_v54 }
 0x1ec   :  { %v3283_v62 = vadd.f32 %v6047_v35, %v3282_v55 }
 0x1ed   :  { %v2724_v40 = vpop.f32.mrb[12].mxu1 }
 0x1ee   :  { %v3176_v41 = vpop.f32.mrb[12].mxu0  ;;  %v2726_v43 = vpop.f32.mrb[13].mxu1 }
 0x1ef   :  { %v6055_v42 = vadd.f32 %v3176_v41, %v2724_v40  ;;  %v3178_v44 = vpop.f32.mrb[13].mxu0  ;;  %v2728_v46 = vpop.f32.mrb[14].mxu1 }
 0x1f0   :  { %v6057_v45 = vadd.f32 %v3178_v44, %v2726_v43  ;;  %v3180_v47 = vpop.f32.mrb[14].mxu0  ;;  %v2730_v50 = vpop.f32.mrb[15].mxu1 }
 0x1f1   :  { %v6060_v49 = vadd.f32 %v3180_v47, %v2728_v46  ;;  %v3182_v51 = vpop.f32.mrb[15].mxu0  ;;  %v3263_v3 = vadd.f32 %v6055_v42, %v3262_v58 }
 0x1f2   :  { %v6063_v53 = vadd.f32 %v3182_v51, %v2730_v50  ;;  %v3284_v9 = vadd.f32 %v6057_v45, %v3283_v62 }
 0x1f3   :  { %v3264_v12 = vadd.f32 %v6060_v49, %v3263_v3 }
 0x1f4   :  { %v3285_v13 = vadd.f32 %v6063_v53, %v3284_v9 }
 0x1f5   :  { %v2734_v56 = vpop.f32.mrb[16].mxu1 }
 0x1f6   :  { %v3186_v57 = vpop.f32.mrb[16].mxu0  ;;  %v2736_v60 = vpop.f32.mrb[17].mxu1 }
 0x1f7   :  { %v6068_v59 = vadd.f32 %v3186_v57, %v2734_v56  ;;  %v3188_v61 = vpop.f32.mrb[17].mxu0  ;;  %v2738_v0 = vpop.f32.mrb[18].mxu1 }
 0x1f8   :  { %v6071_v63 = vadd.f32 %v3188_v61, %v2736_v60  ;;  %v3190_v1 = vpop.f32.mrb[18].mxu0  ;;  %v2740_v6 = vpop.f32.mrb[19].mxu1 }
 0x1f9   :  { %v6074_v4 = vadd.f32 %v3190_v1, %v2738_v0  ;;  %v3192_v7 = vpop.f32.mrb[19].mxu0  ;;  %v3265_v18 = vadd.f32 %v6068_v59, %v3264_v12 }
 0x1fa   :  { %v6077_v10 = vadd.f32 %v3192_v7, %v2740_v6  ;;  %v3286_v24 = vadd.f32 %v6071_v63, %v3285_v13 }
 0x1fb   :  { %v3266_v36 = vadd.f32 %v6074_v4, %v3265_v18 }
 0x1fc   :  { %v3287_v37 = vadd.f32 %v6077_v10, %v3286_v24 }
 0x1fd   :  { %v2744_v15 = vpop.f32.mrb[20].mxu1 }
 0x1fe   :  { %v3196_v16 = vpop.f32.mrb[20].mxu0  ;;  %v2746_v21 = vpop.f32.mrb[21].mxu1 }
 0x1ff   :  { %v6082_v19 = vadd.f32 %v3196_v16, %v2744_v15  ;;  %v3198_v22 = vpop.f32.mrb[21].mxu0  ;;  %v2748_v27 = vpop.f32.mrb[22].mxu1 }
 0x200   :  { %v6085_v25 = vadd.f32 %v3198_v22, %v2746_v21  ;;  %v3200_v28 = vpop.f32.mrb[22].mxu0  ;;  %v2750_v31 = vpop.f32.mrb[23].mxu1 }
 0x201   :  { %v6087_v30 = vadd.f32 %v3200_v28, %v2748_v27  ;;  %v3202_v33 = vpop.f32.mrb[23].mxu0  ;;  %v3267_v38 = vadd.f32 %v6082_v19, %v3266_v36 }
 0x202   :  { %v6089_v34 = vadd.f32 %v3202_v33, %v2750_v31  ;;  %v3288_v39 = vadd.f32 %v6085_v25, %v3287_v37 }
 0x203   :  { %v3268_v51 = vadd.f32 %v6087_v30, %v3267_v38 }
 0x204   :  { %v3289_v56 = vadd.f32 %v6089_v34, %v3288_v39 }
 0x205   :  { %v2754_v40 = vpop.f32.mrb[24].mxu1 }
 0x206   :  { %v3206_v41 = vpop.f32.mrb[24].mxu0  ;;  %v2756_v44 = vpop.f32.mrb[25].mxu1 }
 0x207   :  { %v6095_v43 = vadd.f32 %v3206_v41, %v2754_v40  ;;  %v3208_v46 = vpop.f32.mrb[25].mxu0  ;;  %v2758_v48 = vpop.f32.mrb[26].mxu1 }
 0x208   :  { %v6097_v47 = vadd.f32 %v3208_v46, %v2756_v44  ;;  %v3210_v50 = vpop.f32.mrb[26].mxu0  ;;  %v2760_v54 = vpop.f32.mrb[27].mxu1 }
 0x209   :  { %v6100_v52 = vadd.f32 %v3210_v50, %v2758_v48  ;;  %v3212_v55 = vpop.f32.mrb[27].mxu0  ;;  %v3269_v58 = vadd.f32 %v6095_v43, %v3268_v51 }
 0x20a   :  { %v6103_v57 = vadd.f32 %v3212_v55, %v2760_v54  ;;  %v3290_v60 = vadd.f32 %v6097_v47, %v3289_v56 }
 0x20b   :  { %v3270_v0 = vadd.f32 %v6100_v52, %v3269_v58 }
 0x20c   :  { %v3291_v7 = vadd.f32 %v6103_v57, %v3290_v60 }
 0x20d   :  { %v2764_v61 = vpop.f32.mrb[28].mxu1 }
 0x20e   :  { %v3216_v62 = vpop.f32.mrb[28].mxu0  ;;  %v2766_v3 = vpop.f32.mrb[29].mxu1 }
 0x20f   :  { %v6108_v1 = vadd.f32 %v3216_v62, %v2764_v61  ;;  %v3218_v6 = vpop.f32.mrb[29].mxu0  ;;  %v2768_v12 = vpop.f32.mrb[30].mxu1 }
 0x210   :  { %v6111_v9 = vadd.f32 %v3218_v6, %v2766_v3  ;;  %v3220_v13 = vpop.f32.mrb[30].mxu0  ;;  %v2770_v18 = vpop.f32.mrb[31].mxu1 }
 0x211   :  { %v3271_v15 = vadd.f32 %v6108_v1, %v3270_v0  ;;  %v6114_v16 = vadd.f32 %v3220_v13, %v2768_v12  ;;  %v3222_v21 = vpop.f32.mrb[31].mxu0 }
 0x212   :  { %v3292_v22 = vadd.f32 %v6111_v9, %v3291_v7  ;;  %v6117_v24 = vadd.f32 %v3222_v21, %v2770_v18 }
 0x213   :  { %v3272_v27 = vadd.f32 %v6114_v16, %v3271_v15 }
 0x214   :  { %v3293_v28 = vadd.f32 %v6117_v24, %v3292_v22 }
 0x215   :  { %v3273_v31 = vrot.slane %v3272_v27, 4 }
 0x216   :  { %v3294_v33 = vrot.slane %v3293_v28, 4 }
 0x217   :  { %v3274_v36 = vadd.f32 %v3273_v31, %v3272_v27 }
 0x218   :  { %v3295_v37 = vadd.f32 %v3294_v33, %v3293_v28 }
 0x219   :  { %v3275_v38 = vrot.slane %v3274_v36, 2 }
 0x21a   :  { %v3296_v39 = vrot.slane %v3295_v37, 2 }
 0x21b   :  { %v3276_v40 = vadd.f32 %v3275_v38, %v3274_v36 }
 0x21c   :  { %v3297_v41 = vadd.f32 %v3296_v39, %v3295_v37 }
 0x21d   :  { %v3277_v44 = vrot.slane %v3276_v40, 1 }
 0x21e   :  { %v3298_v48 = vrot.slane %v3297_v41, 1 }
 0x21f   :  { %v3278_v46 = vadd.f32 %v3277_v44, %v3276_v40 }
 0x220   :  { %v3299_v55 = vadd.f32 %v3298_v48, %v3297_v41 }
 0x221   :  { %v6121_v50 = vmul.f32 0.0078125, %v3278_v46 }
 0x222   :  { %v6129_v61 = vmul.f32 0.0078125, %v3299_v55 }
 0x223   :  { %v3302_v51 = vsub.f32 %v6025_v2, %v6121_v50  ;;  %v3304_v54 = vsub.f32 %v6029_v8, %v6121_v50  ;;  %v3306_v56 = vsub.f32 %v6033_v14, %v6121_v50  ;;  %v3308_v62 = vsub.f32 %v6037_v20, %v6121_v50 }
 0x224   :  { %v3310_v0 = vsub.f32 %v6041_v26, %v6121_v50  ;;  %v3303_v7 = vsub.f32 %v6027_v5, %v6129_v61  ;;  %v3305_v12 = vsub.f32 %v6031_v11, %v6129_v61  ;;  %v3312_v13 = vsub.f32 %v6045_v32, %v6121_v50 }
 0x225   :  { %v3398_v58 = vmul.f32 %v3302_v51, %v3302_v51  ;;  %v3400_v60 = vmul.f32 %v3304_v54, %v3304_v54  ;;  %v3402_v3 = vmul.f32 %v3306_v56, %v3306_v56  ;;  %v3404_v15 = vmul.f32 %v3308_v62, %v3308_v62 }
 0x226   :  { %v3314_v21 = vsub.f32 %v6055_v42, %v6121_v50  ;;  %v3406_v22 = vmul.f32 %v3310_v0, %v3310_v0  ;;  %v3307_v28 = vsub.f32 %v6035_v17, %v6129_v61  ;;  %v3399_v31 = vmul.f32 %v3303_v7, %v3303_v7 }
 0x227   :  { %v3430_v6 = vadd.f32 %v3400_v60, %v3398_v58  ;;  %v3401_v33 = vmul.f32 %v3305_v12, %v3305_v12  ;;  %v3316_v36 = vsub.f32 %v6060_v49, %v6121_v50  ;;  %v3408_v37 = vmul.f32 %v3312_v13, %v3312_v13 }
 0x228   :  { %v3309_v39 = vsub.f32 %v6039_v23, %v6129_v61  ;;  %v3318_v40 = vsub.f32 %v6068_v59, %v6121_v50  ;;  %v3410_v41 = vmul.f32 %v3314_v21, %v3314_v21  ;;  %v3311_v46 = vsub.f32 %v6043_v29, %v6129_v61 }
 0x229   :  { %v3431_v18 = vadd.f32 %v3430_v6, %v3402_v3  ;;  %v3403_v48 = vmul.f32 %v3307_v28, %v3307_v28  ;;  %v3451_v51 = vadd.f32 %v3401_v33, %v3399_v31  ;;  %v3320_v54 = vsub.f32 %v6074_v4, %v6121_v50 }
 0x22a   :  { %v3412_v55 = vmul.f32 %v3316_v36, %v3316_v36  ;;  %v3313_v58 = vsub.f32 %v6047_v35, %v6129_v61  ;;  %v3405_v60 = vmul.f32 %v3309_v39, %v3309_v39  ;;  %v3322_v0 = vsub.f32 %v6082_v19, %v6121_v50 }
 0x22b   :  { %v3432_v27 = vadd.f32 %v3431_v18, %v3404_v15  ;;  %v3452_v62 = vadd.f32 %v3451_v51, %v3403_v48  ;;  %v3414_v3 = vmul.f32 %v3318_v40, %v3318_v40  ;;  %v3315_v7 = vsub.f32 %v6057_v45, %v6129_v61 }
 0x22c   :  { %v3407_v12 = vmul.f32 %v3311_v46, %v3311_v46  ;;  %v3324_v15 = vsub.f32 %v6087_v30, %v6121_v50  ;;  %v3416_v18 = vmul.f32 %v3320_v54, %v3320_v54  ;;  %v3326_v31 = vsub.f32 %v6095_v43, %v6121_v50 }
 0x22d   :  { %v3433_v38 = vadd.f32 %v3432_v27, %v3406_v22  ;;  %v3453_v13 = vadd.f32 %v3452_v62, %v3405_v60  ;;  %v3317_v22 = vsub.f32 %v6063_v53, %v6129_v61  ;;  %v3409_v27 = vmul.f32 %v3313_v58, %v3313_v58 }
 0x22e   :  { %v3418_v33 = vmul.f32 %v3322_v0, %v3322_v0  ;;  %v3328_v40 = vsub.f32 %v6100_v52, %v6121_v50  ;;  %v3321_v46 = vsub.f32 %v6077_v10, %v6129_v61  ;;  %v3330_v54 = vsub.f32 %v6108_v1, %v6121_v50 }
 0x22f   :  { %v3434_v44 = vadd.f32 %v3433_v38, %v3408_v37  ;;  %v3454_v28 = vadd.f32 %v3453_v13, %v3407_v12  ;;  %v3319_v37 = vsub.f32 %v6071_v63, %v6129_v61  ;;  %v3411_v38 = vmul.f32 %v3315_v7, %v3315_v7 }
 0x230   :  { %v3413_v48 = vmul.f32 %v3317_v22, %v3317_v22  ;;  %v3323_v58 = vsub.f32 %v6085_v25, %v6129_v61  ;;  %v3332_v0 = vsub.f32 %v6114_v16, %v6121_v50  ;;  %v3325_v7 = vsub.f32 %v6089_v34, %v6129_v61 }
 0x231   :  { %v3435_v56 = vadd.f32 %v3434_v44, %v3410_v41  ;;  %v3455_v39 = vadd.f32 %v3454_v28, %v3409_v27  ;;  %v3420_v41 = vmul.f32 %v3324_v15, %v3324_v15  ;;  %v3415_v60 = vmul.f32 %v3319_v37, %v3319_v37 }
 0x232   :  { %v3417_v12 = vmul.f32 %v3321_v46, %v3321_v46  ;;  %v3426_v15 = vmul.f32 %v3330_v54, %v3330_v54  ;;  %v3419_v22 = vmul.f32 %v3323_v58, %v3323_v58  ;;  %v3428_v28 = vmul.f32 %v3332_v0, %v3332_v0 }
 0x233   :  { %v3436_v6 = vadd.f32 %v3435_v56, %v3412_v55  ;;  %v3456_v51 = vadd.f32 %v3455_v39, %v3411_v38  ;;  %v3422_v55 = vmul.f32 %v3326_v31, %v3326_v31  ;;  %v3331_v39 = vsub.f32 %v6111_v9, %v6129_v61 }
 0x234   :  { %v3333_v46 = vsub.f32 %v6117_v24, %v6129_v61 }
 0x235   :  { %v3437_v21 = vadd.f32 %v3436_v6, %v3414_v3  ;;  %v3457_v62 = vadd.f32 %v3456_v51, %v3413_v48  ;;  %v3424_v3 = vmul.f32 %v3328_v40, %v3328_v40 }
 0x237   :  { %v3438_v36 = vadd.f32 %v3437_v21, %v3416_v18  ;;  %v3458_v13 = vadd.f32 %v3457_v62, %v3415_v60  ;;  %v3327_v21 = vsub.f32 %v6097_v47, %v6129_v61  ;;  %v3429_v60 = vmul.f32 %v3333_v46, %v3333_v46 }
 0x239   :  { %v3439_v44 = vadd.f32 %v3438_v36, %v3418_v33  ;;  %v3459_v27 = vadd.f32 %v3458_v13, %v3417_v12  ;;  %v3329_v33 = vsub.f32 %v6103_v57, %v6129_v61  ;;  %v3421_v36 = vmul.f32 %v3325_v7, %v3325_v7 }
 0x23a   :  { %v3423_v40 = vmul.f32 %v3327_v21, %v3327_v21 }
 0x23b   :  { %v3440_v56 = vadd.f32 %v3439_v44, %v3420_v41  ;;  %v3460_v37 = vadd.f32 %v3459_v27, %v3419_v22  ;;  %v3425_v48 = vmul.f32 %v3329_v33, %v3329_v33 }
 0x23d   :  { %v3441_v6 = vadd.f32 %v3440_v56, %v3422_v55  ;;  %v3461_v41 = vadd.f32 %v3460_v37, %v3421_v36  ;;  %v3427_v55 = vmul.f32 %v3331_v39, %v3331_v39  ;;  %v4847_v36 = vmov 1966171168  }
 0x23e   :  { %v3483_v37 = vunpack.c.l.s4 %v4847_v36 }
 0x23f   :  { %v3442_v18 = vadd.f32 %v3441_v6, %v3424_v3  ;;  %v3462_v51 = vadd.f32 %v3461_v41, %v3423_v40 }
 0x240   :  { %v3484_v39 = vunpack.c.0.s8 %v3483_v37 }
 0x241   :  { %v3443_v31 = vadd.f32 %v3442_v18, %v3426_v15  ;;  %v3463_v56 = vadd.f32 %v3462_v51, %v3425_v48 }
 0x243   :  { %v3444_v38 = vadd.f32 %v3443_v31, %v3428_v28  ;;  %v3464_v62 = vadd.f32 %v3463_v56, %v3427_v55 }
 0x245   :  { %v3445_v44 = vrot.slane %v3444_v38, 4  ;;  %v3465_v3 = vadd.f32 %v3464_v62, %v3429_v60 }
 0x247   :  { %v3446_v54 = vadd.f32 %v3445_v44, %v3444_v38  ;;  %v3466_v7 = vrot.slane %v3465_v3, 4  ;;  %v3485_v38 = vlaneseq }
 0x249   :  { %v3447_v58 = vrot.slane %v3446_v54, 2  ;;  %v3467_v13 = vadd.f32 %v3466_v7, %v3465_v3  ;;  %v3486_v40 = vshrl.u32 %v3485_v38, 7 }
 0x24b   :  { %v3448_v0 = vadd.f32 %v3447_v58, %v3446_v54  ;;  %v3468_v15 = vrot.slane %v3467_v13, 2  ;;  %v3487_v44 = vsub.s32 %v3484_v39, %v3486_v40  ;;  %v3478_v54 = vld [vmem:[%s6509_s2] sm:$0x3]  ;;  %v3502_v56 = vsub.s32 0, %v3486_v40 }
 0x24c   :  { %v3506_v58 = vsub.s32 1, %v3486_v40 }
 0x24d   :  { %v3449_v6 = vrot.slane %v3448_v0, 1  ;;  %v3469_v21 = vadd.f32 %v3468_v15, %v3467_v13  ;;  %v3498_v15 = vld [vmem:[%s6510_s3] sm:$0x3] }
 0x24f   :  { %v3450_v12 = vadd.f32 %v3449_v6, %v3448_v0  ;;  %v3470_v22 = vrot.slane %v3469_v21, 1 }
 0x251   :  { %v3472_v18 = vmul.f32 0.0078125, %v3450_v12  ;;  %v3471_v28 = vadd.f32 %v3470_v22, %v3469_v21 }
 0x253   :  { %v3474_v27 = vadd.f32 1e-05, %v3472_v18  ;;  %v3473_v31 = vmul.f32 0.0078125, %v3471_v28 }
 0x255   :  { %4843 = vrsqrt.f32 %v3474_v27  ;;  %v3475_v33 = vadd.f32 1e-05, %v3473_v31 }
 0x257   :  { %4845 = vrsqrt.f32 %v3475_v33 }
 0x25f   :  { %v4844_v41 = vpop.eup %4843 }
 0x261   :  { %v4846_v46 = vpop.eup %4845 }
 0x262   :  { %v3481_v48 = vcombine.low %v4844_v41, %v4846_v46 }
 0x264   :  { %v3488_v51 = vrot.slane %v3481_v48, %v3487_v44 }
 0x266   :  { %v3495_v55 = vrot.slane %v3488_v51, %v3487_v44 }
 0x268   :  { %v3497_v60 = vmul.f32 %v3495_v55, %v3478_v54 }
 0x26a   :  { %v3503_v62 = vrot.slane %v3497_v60, %v3502_v56  ;;  %v3507_v0 = vrot.slane %v3497_v60, %v3506_v58 }
 0x26c   :  { %v3510_v3 = vmul.f32 %v3503_v62, %v6121_v50  ;;  %v3511_v6 = vmul.f32 %v3507_v0, %v6129_v61  ;;  %v3531_v18 = vmul.f32 %v6025_v2, %v3503_v62  ;;  %v3532_v21 = vmul.f32 %v6027_v5, %v3507_v0 }
 0x26d   :  { %v3533_v22 = vmul.f32 %v6029_v8, %v3503_v62  ;;  %v3534_v28 = vmul.f32 %v6031_v11, %v3507_v0  ;;  %v3535_v50 = vmul.f32 %v6033_v14, %v3503_v62  ;;  %v3536_v61 = vmul.f32 %v6035_v17, %v3507_v0 }
 0x26e   :  { %v3514_v7 = vcombine.low %v3510_v3, %v3511_v6  ;;  %v3537_v31 = vmul.f32 %v6037_v20, %v3503_v62  ;;  %v3538_v33 = vmul.f32 %v6039_v23, %v3507_v0  ;;  %v3539_v36 = vmul.f32 %v6041_v26, %v3503_v62 }
 0x26f   :  { %v3540_v37 = vmul.f32 %v6043_v29, %v3507_v0  ;;  %v3541_v2 = vmul.f32 %v6045_v32, %v3503_v62  ;;  %v3542_v5 = vmul.f32 %v6047_v35, %v3507_v0  ;;  %v3543_v8 = vmul.f32 %v6055_v42, %v3503_v62 }
 0x270   :  { %v3521_v12 = vrot.slane %v3514_v7, %v3487_v44  ;;  %v3544_v11 = vmul.f32 %v6057_v45, %v3507_v0  ;;  %v3545_v14 = vmul.f32 %v6060_v49, %v3503_v62  ;;  %v3546_v17 = vmul.f32 %v6063_v53, %v3507_v0 }
 0x271   :  { %v3547_v20 = vmul.f32 %v6068_v59, %v3503_v62  ;;  %v3548_v23 = vmul.f32 %v6071_v63, %v3507_v0  ;;  %v3549_v26 = vmul.f32 %v6074_v4, %v3503_v62  ;;  %v3550_v29 = vmul.f32 %v6077_v10, %v3507_v0 }
 0x272   :  { %v3528_v13 = vrot.slane %v3521_v12, %v3487_v44  ;;  %v3551_v35 = vmul.f32 %v6082_v19, %v3503_v62  ;;  %v3552_v42 = vmul.f32 %v6085_v25, %v3507_v0  ;;  %v3553_v45 = vmul.f32 %v6087_v30, %v3503_v62 }
 0x273   :  { %v3554_v49 = vmul.f32 %v6089_v34, %v3507_v0  ;;  %v3555_v53 = vmul.f32 %v6095_v43, %v3503_v62  ;;  %v3556_v59 = vmul.f32 %v6097_v47, %v3507_v0  ;;  %v3557_v63 = vmul.f32 %v6100_v52, %v3503_v62 }
 0x274   :  { %v3530_v27 = vsub.f32 %v3498_v15, %v3528_v13  ;;  %v3558_v4 = vmul.f32 %v6103_v57, %v3507_v0  ;;  %v3559_v10 = vmul.f32 %v6108_v1, %v3503_v62  ;;  %v3560_v39 = vmul.f32 %v6111_v9, %v3507_v0 }
 0x275   :  { %v3561_v19 = vmul.f32 %v6114_v16, %v3503_v62  ;;  %v3562_v25 = vmul.f32 %v6117_v24, %v3507_v0 }
 0x276   :  { %v3567_v38 = vrot.slane %v3530_v27, %v3502_v56  ;;  %v3571_v32 = vrot.slane %v3530_v27, %v3506_v58 }
 0x278   :  { %v6229_v40 = vadd.f32 %v3567_v38, %v3531_v18  ;;  %v6231_v30 = vadd.f32 %v3571_v32, %v3532_v21  ;;  %v6233_v34 = vadd.f32 %v3567_v38, %v3533_v22  ;;  %v6235_v43 = vadd.f32 %v3571_v32, %v3534_v28 }
 0x279   :  { %v6237_v47 = vadd.f32 %v3567_v38, %v3535_v50  ;;  %v6239_v52 = vadd.f32 %v3571_v32, %v3536_v61  ;;  %v6241_v57 = vadd.f32 %v3567_v38, %v3537_v31  ;;  %v6243_v1 = vadd.f32 %v3571_v32, %v3538_v33 }
 0x27a   :  { %v6245_v9 = vadd.f32 %v3567_v38, %v3539_v36  ;;  %v6247_v16 = vadd.f32 %v3571_v32, %v3540_v37  ;;  %v6249_v24 = vadd.f32 %v3567_v38, %v3541_v2  ;;  %v6251_v41 = vadd.f32 %v3571_v32, %v3542_v5 }
 0x27b   :  { %v6253_v44 = vadd.f32 %v3567_v38, %v3543_v8  ;;  %v6255_v46 = vadd.f32 %v3571_v32, %v3544_v11  ;;  %v6257_v48 = vadd.f32 %v3567_v38, %v3545_v14  ;;  %v6259_v51 = vadd.f32 %v3571_v32, %v3546_v17 }
 0x27c   :  { %v6261_v54 = vadd.f32 %v3567_v38, %v3547_v20  ;;  %v6263_v55 = vadd.f32 %v3571_v32, %v3548_v23  ;;  %v6265_v56 = vadd.f32 %v3567_v38, %v3549_v26  ;;  %v6267_v58 = vadd.f32 %v3571_v32, %v3550_v29 }
 0x27d   :  { %v6269_v60 = vadd.f32 %v3567_v38, %v3551_v35  ;;  %v6271_v62 = vadd.f32 %v3571_v32, %v3552_v42  ;;  %v6273_v0 = vadd.f32 %v3567_v38, %v3553_v45  ;;  %v6275_v3 = vadd.f32 %v3571_v32, %v3554_v49 }
 0x27e   :  { %v6277_v6 = vadd.f32 %v3567_v38, %v3555_v53  ;;  %v6279_v7 = vadd.f32 %v3571_v32, %v3556_v59  ;;  %v6281_v12 = vadd.f32 %v3567_v38, %v3557_v63  ;;  %v6283_v13 = vadd.f32 %v3571_v32, %v3558_v4 }
 0x27f   :  { %v6285_v15 = vadd.f32 %v3567_v38, %v3559_v10  ;;  %v6287_v18 = vadd.f32 %v3571_v32, %v3560_v39  ;;  %vm3606_vm0 = vcmp.gt.f32.partialorder %v6229_v40, 0.0  ;;  %vm3607_vm1 = vcmp.gt.f32.partialorder %v6231_v30, 0.0 }
 0x280   :  { %vm3608_vm2 = vcmp.gt.f32.partialorder %v6233_v34, 0.0  ;;  %vm3609_vm3 = vcmp.gt.f32.partialorder %v6235_v43, 0.0  ;;  %vm3610_vm4 = vcmp.gt.f32.partialorder %v6237_v47, 0.0  ;;  %vm3611_vm5 = vcmp.gt.f32.partialorder %v6239_v52, 0.0 }
 0x281   :  { %vm3612_vm6 = vcmp.gt.f32.partialorder %v6241_v57, 0.0  ;;  %vm3613_vm7 = vcmp.gt.f32.partialorder %v6243_v1, 0.0  ;;  %vm3614_vm8 = vcmp.gt.f32.partialorder %v6245_v9, 0.0  ;;  %v6299_v21 = vadd.f32 %v3567_v38, %v3561_v19 }
 0x282   :  { %v3638_v22 = vmul.f32 0.2, %v6229_v40  ;;  %v3639_v27 = vmul.f32 0.2, %v6231_v30  ;;  %v3640_v28 = vmul.f32 0.2, %v6233_v34  ;;  %v6308_v50 = vadd.f32 %v3571_v32, %v3562_v25 }
 0x283   :  { %vm3621_vm15 = vcmp.gt.f32.partialorder %v6259_v51, 0.0  ;;  %vm3622_vm10 = vcmp.gt.f32.partialorder %v6261_v54, 0.0  ;;  %v3641_v61 = vmul.f32 0.2, %v6235_v43  ;;  %v3642_v31 = vmul.f32 0.2, %v6237_v47 }
 0x284   :  { %v3643_v33 = vmul.f32 0.2, %v6239_v52  ;;  %vm3627_vm14 = vcmp.gt.f32.partialorder %v6271_v62, 0.0  ;;  %v3644_v36 = vmul.f32 0.2, %v6241_v57  ;;  %v6327_v5 = vsel %vm3606_vm0, %v6229_v40, %v3638_v22 }
 0x285   :  { %v3645_v37 = vmul.f32 0.2, %v6243_v1  ;;  %v3646_v2 = vmul.f32 0.2, %v6245_v9  ;;  %vm3631_vm9 = vcmp.gt.f32.partialorder %v6279_v7, 0.0  ;;  %v6339_v17 = vsel %vm3607_vm1, %v6231_v30, %v3639_v27 }
 0x286   :  { %v3647_v8 = vmul.f32 0.2, %v6247_v16  ;;  %v3648_v11 = vmul.f32 0.2, %v6249_v24  ;;  %v3649_v14 = vmul.f32 0.2, %v6251_v41  ;;  %v3672_v29 = vsel %vm3608_vm2, %v6233_v34, %v3640_v28 }
 0x287   :  { %vm3633_vm11 = vcmp.gt.f32.partialorder %v6283_v13, 0.0  ;;  %vm3634_vm13 = vcmp.gt.f32.partialorder %v6285_v15, 0.0  ;;  %vm3635_vm12 = vcmp.gt.f32.partialorder %v6287_v18, 0.0  ;;  %v3650_v20 = vmul.f32 0.2, %v6253_v44 }
 0x288   :  { %v3651_v23 = vmul.f32 0.2, %v6255_v46  ;;  %v3652_v26 = vmul.f32 0.2, %v6257_v48  ;;  %vm3636_vm1 = vcmp.gt.f32.partialorder %v6299_v21, 0.0  ;;  %vm3637_vm0 = vcmp.gt.f32.partialorder %v6308_v50, 0.0 }
 0x289   :  { %v3653_v38 = vmul.f32 0.2, %v6259_v51  ;;  %v3654_v32 = vmul.f32 0.2, %v6261_v54  ;;  %v3655_v35 = vmul.f32 0.2, %v6263_v55  ;;  %v3673_v42 = vsel %vm3609_vm3, %v6235_v43, %v3641_v61 }
 0x28a   :  { %v3656_v45 = vmul.f32 0.2, %v6265_v56  ;;  %v3657_v49 = vmul.f32 0.2, %v6267_v58  ;;  %v3658_v53 = vmul.f32 0.2, %v6269_v60  ;;  %v3674_v59 = vsel %vm3610_vm4, %v6237_v47, %v3642_v31 }
 0x28b   :  { %v3659_v63 = vmul.f32 0.2, %v6271_v62  ;;  %v3660_v4 = vmul.f32 0.2, %v6273_v0  ;;  %v3661_v10 = vmul.f32 0.2, %v6275_v3  ;;  %v3675_v39 = vsel %vm3611_vm5, %v6239_v52, %v3643_v33 }
 0x28c   :  { %v3662_v19 = vmul.f32 0.2, %v6277_v6  ;;  %v3663_v25 = vmul.f32 0.2, %v6279_v7  ;;  %v3664_v40 = vmul.f32 0.2, %v6281_v12  ;;  %v3676_v30 = vsel %vm3612_vm6, %v6241_v57, %v3644_v36 }
 0x28d   :  { %v3665_v34 = vmul.f32 0.2, %v6283_v13  ;;  %v3666_v43 = vmul.f32 0.2, %v6285_v15  ;;  %v3667_v47 = vmul.f32 0.2, %v6287_v18  ;;  %v3677_v52 = vsel %vm3613_vm7, %v6243_v1, %v3645_v37 }
 0x28e   :  { %v3668_v22 = vmul.f32 0.2, %v6299_v21  ;;  %v3669_v27 = vmul.f32 0.2, %v6308_v50  ;;  %v3678_v28 = vsel %vm3614_vm8, %v6245_v9, %v3646_v2  ;;  %vm6512_vm2 = vcmp.gt.f32.partialorder %v6247_v16, 0.0 }
 0x28f   :  { %v3679_v57 = vsel %vm6512_vm2, %v6247_v16, %v3647_v8  ;;  %vm6513_vm3 = vcmp.gt.f32.partialorder %v6249_v24, 0.0  ;;  %vm6514_vm4 = vcmp.gt.f32.partialorder %v6251_v41, 0.0  ;;  %vm6515_vm5 = vcmp.gt.f32.partialorder %v6253_v44, 0.0 }
 0x290   :  { %v3680_v61 = vsel %vm6513_vm3, %v6249_v24, %v3648_v11  ;;  %v3681_v1 = vsel %vm6514_vm4, %v6251_v41, %v3649_v14  ;;  %v3682_v31 = vsel %vm6515_vm5, %v6253_v44, %v3650_v20  ;;  %vm6516_vm6 = vcmp.gt.f32.partialorder %v6255_v46, 0.0 }
 0x291   :  { %v3683_v9 = vsel %vm6516_vm6, %v6255_v46, %v3651_v23  ;;  %vm6517_vm7 = vcmp.gt.f32.partialorder %v6257_v48, 0.0  ;;  %v3685_v24 = vsel %vm3621_vm15, %v6259_v51, %v3653_v38  ;;  %v3686_v41 = vsel %vm3622_vm10, %v6261_v54, %v3654_v32 }
 0x292   :  { %v3684_v16 = vsel %vm6517_vm7, %v6257_v48, %v3652_v26  ;;  %vm6518_vm8 = vcmp.gt.f32.partialorder %v6263_v55, 0.0  ;;  %vm6519_vm2 = vcmp.gt.f32.partialorder %v6265_v56, 0.0  ;;  %vm6520_vm3 = vcmp.gt.f32.partialorder %v6267_v58, 0.0 }
 0x293   :  { %v3687_v44 = vsel %vm6518_vm8, %v6263_v55, %v3655_v35  ;;  %v3688_v46 = vsel %vm6519_vm2, %v6265_v56, %v3656_v45  ;;  %v3689_v48 = vsel %vm6520_vm3, %v6267_v58, %v3657_v49  ;;  %vm6521_vm4 = vcmp.gt.f32.partialorder %v6269_v60, 0.0 }
 0x294   :  { %v3690_v51 = vsel %vm6521_vm4, %v6269_v60, %v3658_v53  ;;  %v3691_v54 = vsel %vm3627_vm14, %v6271_v62, %v3659_v63  ;;  %vm6522_vm10 = vcmp.gt.f32.partialorder %v6273_v0, 0.0  ;;  %vm6523_vm15 = vcmp.gt.f32.partialorder %v6275_v3, 0.0 }
 0x295   :  { %v3692_v55 = vsel %vm6522_vm10, %v6273_v0, %v3660_v4  ;;  %v3693_v56 = vsel %vm6523_vm15, %v6275_v3, %v3661_v10  ;;  %vm6524_vm5 = vcmp.gt.f32.partialorder %v6277_v6, 0.0  ;;  %v3695_v60 = vsel %vm3631_vm9, %v6279_v7, %v3663_v25 }
 0x296   :  { %v3694_v58 = vsel %vm6524_vm5, %v6277_v6, %v3662_v19  ;;  %vm6525_vm6 = vcmp.gt.f32.partialorder %v6281_v12, 0.0  ;;  %v3697_v0 = vsel %vm3633_vm11, %v6283_v13, %v3665_v34  ;;  %v3698_v3 = vsel %vm3634_vm13, %v6285_v15, %v3666_v43 }
 0x297   :  { %v3696_v62 = vsel %vm6525_vm6, %v6281_v12, %v3664_v40  ;;  %v3699_v6 = vsel %vm3635_vm12, %v6287_v18, %v3667_v47  ;;  %v3700_v7 = vsel %vm3636_vm1, %v6299_v21, %v3668_v22  ;;  %v3701_v12 = vsel %vm3637_vm0, %v6308_v50, %v3669_v27 }
 0x298   :  { %v4218_v33 = vpack.c.bf16 %v6339_v17, %v6327_v5  ;;  %v4219_v13 = vpack.c.bf16 %v3673_v42, %v3672_v29  ;;  %v4220_v36 = vpack.c.bf16 %v3675_v39, %v3674_v59  ;;  %v4221_v37 = vpack.c.bf16 %v3677_v52, %v3676_v30 }
 0x299   :  { %v4222_v2 = vpack.c.bf16 %v3679_v57, %v3678_v28  ;;  %v4223_v15 = vpack.c.bf16 %v3681_v1, %v3680_v61  ;;  %v4224_v8 = vpack.c.bf16 %v3683_v9, %v3682_v31  ;;  %v4225_v11 = vpack.c.bf16 %v3685_v24, %v3684_v16 }
 0x29a   :  { %v4226_v14 = vpack.c.bf16 %v3687_v44, %v3686_v41  ;;  %v4227_v18 = vpack.c.bf16 %v3689_v48, %v3688_v46  ;;  %3798 = vst [vmem:[%s6511_s4] sm:$0xff] %v4218_v33  ;;  %3799 = vst [vmem:[%s6511_s4 + $0x8] sm:$0xff] %v4219_v13  ;;  %v4228_v21 = vpack.c.bf16 %v3691_v54, %v3690_v51 }
 0x29b   :  { %v4229_v50 = vpack.c.bf16 %v3693_v56, %v3692_v55  ;;  %v4230_v5 = vpack.c.bf16 %v3695_v60, %v3694_v58  ;;  %v4231_v17 = vpack.c.bf16 %v3697_v0, %v3696_v62  ;;  %3800 = vst [vmem:[%s6511_s4 + $0x10] sm:$0xff] %v4220_v36  ;;  %3801 = vst [vmem:[%s6511_s4 + $0x18] sm:$0xff] %v4221_v37 }
 0x29c   :  { %3802 = vst [vmem:[%s6511_s4 + $0x20] sm:$0xff] %v4222_v2  ;;  %3803 = vst [vmem:[%s6511_s4 + $0x28] sm:$0xff] %v4223_v15  ;;  %v4232_v20 = vpack.c.bf16 %v3699_v6, %v3698_v3  ;;  %v4233_v23 = vpack.c.bf16 %v3701_v12, %v3700_v7 }
 0x29d   :  { %3804 = vst [vmem:[%s6511_s4 + $0x30] sm:$0xff] %v4224_v8  ;;  %3805 = vst [vmem:[%s6511_s4 + $0x38] sm:$0xff] %v4225_v11 }
 0x29e   :  { %3806 = vst [vmem:[%s6511_s4 + $0x40] sm:$0xff] %v4226_v14  ;;  %3807 = vst [vmem:[%s6511_s4 + $0x48] sm:$0xff] %v4227_v18 }
 0x29f   :  { %3808 = vst [vmem:[%s6511_s4 + $0x50] sm:$0xff] %v4228_v21  ;;  %3809 = vst [vmem:[%s6511_s4 + $0x58] sm:$0xff] %v4229_v50 }
 0x2a0   :  { %3810 = vst [vmem:[%s6511_s4 + $0x60] sm:$0xff] %v4230_v5  ;;  %3811 = vst [vmem:[%s6511_s4 + $0x68] sm:$0xff] %v4231_v17 }
 0x2a1   :  { %3812 = vst [vmem:[%s6511_s4 + $0x70] sm:$0xff] %v4232_v20  ;;  %3813 = vst [vmem:[%s6511_s4 + $0x78] sm:$0xff] %v4233_v23 }

// kernel: photo_discriminator_forward.7
= control target key start
LH: loop header
LB: loop body
LE: loop exit
PB: predicated region body
PF: predicated region fallthrough
CT: control target
= control target key end

     0   :  { %v28_v0 = vlaneseq  ;;  %vm881_vm0 = vcmask 7168   ;;  %s1240_s0 = inlined_call_operand.vmem [shape: bf16[8,8192], index: 0, kind: input, shape index: {}]   ;;  %s1241_s1 = inlined_call_operand.vmem [shape: bf16[1,8192], index: 1, kind: input, shape index: {}]   ;;  %s1242_s2 = inlined_call_operand.vmem [shape: f32[8,1], index: 2, kind: output, shape index: {}]  }
   0x1   :  { %v11_v1 = vld [vmem:[%s1240_s0] sm:$0xff]  ;;  %v12_v2 = vld [vmem:[%s1240_s0 + $0x8] sm:$0xff]  ;;  %v13_v3 = vld [vmem:[%s1240_s0 + $0x10] sm:$0xff] }
   0x2   :  { %v14_v4 = vld [vmem:[%s1240_s0 + $0x18] sm:$0xff]  ;;  %v15_v5 = vunpack.c.l.bf16 %v11_v1  ;;  %v16_v6 = vunpack.c.h.bf16 %v11_v1  ;;  %v23_v7 = vld [vmem:[%s1241_s1] sm:$0xff]  ;;  %v17_v9 = vunpack.c.l.bf16 %v12_v2  ;;  %v18_v10 = vunpack.c.h.bf16 %v12_v2  ;;  %v960_v13 = vld [vmem:[%s1240_s0 + $0x48] sm:$0xff] }
   0x3   :  { %v955_v8 = vld [vmem:[%s1240_s0 + $0x40] sm:$0xff]  ;;  %v19_v11 = vunpack.c.l.bf16 %v13_v3  ;;  %v20_v12 = vunpack.c.h.bf16 %v13_v3  ;;  %v21_v14 = vunpack.c.l.bf16 %v14_v4  ;;  %v22_v15 = vunpack.c.h.bf16 %v14_v4  ;;  %v965_v18 = vld [vmem:[%s1240_s0 + $0x50] sm:$0xff]  ;;  %v895_v40 = vld [vmem:[%s1240_s0 + $0x58] sm:$0xff] }
   0x4   :  { %v24_v16 = vunpack.c.l.bf16 %v23_v7  ;;  %v29_v17 = vshrl.u32 %v28_v0, 7  ;;  %v896_v19 = vld [vmem:[%s1241_s1 + $0x10] sm:$0xff]  ;;  %v25_v20 = vunpack.c.h.bf16 %v23_v7  ;;  %v232_v21 = vunpack.c.l.bf16 %v955_v8 }
   0x5   :  { %v233_v22 = vunpack.c.h.bf16 %v955_v8  ;;  %v234_v23 = vunpack.c.l.bf16 %v960_v13  ;;  %v235_v28 = vunpack.c.h.bf16 %v960_v13  ;;  %v236_v29 = vunpack.c.l.bf16 %v965_v18 }
   0x6   :  { %v973_v24 = vsub.s32 0, %v29_v17  ;;  %v975_v25 = vsub.s32 2, %v29_v17  ;;  %v977_v26 = vsub.s32 4, %v29_v17  ;;  %v979_v27 = vsub.s32 6, %v29_v17 }
   0x7   :  { %v237_v30 = vunpack.c.h.bf16 %v965_v18  ;;  %v242_v31 = vunpack.c.l.bf16 %v896_v19  ;;  %v238_v52 = vunpack.c.l.bf16 %v895_v40  ;;  %v239_v56 = vunpack.c.h.bf16 %v895_v40  ;;  %v888_v18 = vld [vmem:[%s1240_s0 + $0x28] sm:$0xff] }
   0x8   :  { %v31_v32 = vrot.slane %v24_v16, %v973_v24  ;;  %v35_v33 = vrot.slane %v24_v16, %v975_v25  ;;  %v39_v34 = vrot.slane %v24_v16, %v977_v26  ;;  %v43_v35 = vrot.slane %v24_v16, %v979_v27 }
   0x9   :  { %v47_v36 = vrot.slane %v25_v20, %v973_v24  ;;  %v51_v37 = vrot.slane %v25_v20, %v975_v25  ;;  %v55_v38 = vrot.slane %v25_v20, %v977_v26  ;;  %v59_v39 = vrot.slane %v25_v20, %v979_v27 }
   0xa   :  { %v71_v41 = vrot.slane %v31_v32, %v973_v24  ;;  %v75_v42 = vrot.slane %v35_v33, %v973_v24  ;;  %v79_v43 = vrot.slane %v39_v34, %v973_v24  ;;  %v83_v44 = vrot.slane %v43_v35, %v973_v24 }
   0xb   :  { %v87_v45 = vrot.slane %v47_v36, %v973_v24  ;;  %v91_v46 = vrot.slane %v51_v37, %v973_v24  ;;  %v95_v47 = vrot.slane %v55_v38, %v973_v24  ;;  %v99_v48 = vrot.slane %v59_v39, %v973_v24 }
   0xc   :  { %v100_v49 = vmul.f32 %v71_v41, %v15_v5  ;;  %v101_v50 = vmul.f32 %v75_v42, %v16_v6  ;;  %v102_v51 = vmul.f32 %v79_v43, %v17_v9  ;;  %v103_v53 = vmul.f32 %v83_v44, %v18_v10  ;;  %v887_v9 = vld [vmem:[%s1240_s0 + $0x20] sm:$0xff] }
   0xd   :  { %v104_v54 = vmul.f32 %v87_v45, %v19_v11  ;;  %v105_v55 = vmul.f32 %v91_v46, %v20_v12  ;;  %v243_v58 = vunpack.c.h.bf16 %v896_v19  ;;  %v249_v59 = vrot.slane %v242_v31, %v973_v24  ;;  %v1037_v41 = vld [vmem:[%s1240_s0 + $0x60] sm:$0xff] }
   0xe   :  { %v108_v57 = vadd.f32 %v101_v50, %v100_v49  ;;  %v253_v60 = vrot.slane %v242_v31, %v975_v25  ;;  %v106_v61 = vmul.f32 %v95_v47, %v21_v14  ;;  %v107_v62 = vmul.f32 %v99_v48, %v22_v15 }
   0xf   :  { %v257_v63 = vrot.slane %v242_v31, %v977_v26  ;;  %v261_v0 = vrot.slane %v242_v31, %v979_v27  ;;  %v265_v2 = vrot.slane %v243_v58, %v973_v24  ;;  %v269_v3 = vrot.slane %v243_v58, %v975_v25  ;;  %v889_v31 = vld [vmem:[%s1240_s0 + $0x30] sm:$0xff] }
  0x10   :  { %v109_v1 = vadd.f32 %v108_v57, %v102_v51  ;;  %v273_v4 = vrot.slane %v243_v58, %v977_v26  ;;  %v277_v5 = vrot.slane %v243_v58, %v979_v27  ;;  %v289_v6 = vrot.slane %v249_v59, %v973_v24 }
  0x11   :  { %v293_v7 = vrot.slane %v253_v60, %v973_v24  ;;  %v297_v8 = vrot.slane %v257_v63, %v973_v24  ;;  %v301_v11 = vrot.slane %v261_v0, %v973_v24  ;;  %v305_v12 = vrot.slane %v265_v2, %v973_v24  ;;  %v898_v63 = vld [vmem:[%s1240_s0 + $0x68] sm:$0xff] }
  0x12   :  { %v110_v10 = vadd.f32 %v109_v1, %v103_v53  ;;  %v309_v13 = vrot.slane %v269_v3, %v973_v24  ;;  %v313_v14 = vrot.slane %v273_v4, %v973_v24  ;;  %v317_v15 = vrot.slane %v277_v5, %v973_v24 }
  0x13   :  { %v318_v16 = vmul.f32 %v289_v6, %v232_v21  ;;  %v319_v17 = vmul.f32 %v293_v7, %v233_v22  ;;  %v320_v20 = vmul.f32 %v297_v8, %v234_v23  ;;  %v123_v32 = vunpack.c.l.bf16 %v887_v9  ;;  %v890_v21 = vld [vmem:[%s1240_s0 + $0x38] sm:$0xff]  ;;  %v891_v22 = vld [vmem:[%s1241_s1 + $0x8] sm:$0xff] }
  0x14   :  { %v111_v19 = vadd.f32 %v110_v10, %v104_v54  ;;  %v124_v33 = vunpack.c.h.bf16 %v887_v9  ;;  %v321_v34 = vmul.f32 %v301_v11, %v235_v28  ;;  %v322_v35 = vmul.f32 %v305_v12, %v236_v29  ;;  %v899_v11 = vld [vmem:[%s1240_s0 + $0x70] sm:$0xff] }
  0x15   :  { %v323_v36 = vmul.f32 %v309_v13, %v237_v30  ;;  %v326_v37 = vadd.f32 %v319_v17, %v318_v16  ;;  %v324_v23 = vmul.f32 %v313_v14, %v238_v52  ;;  %v325_v39 = vmul.f32 %v317_v15, %v239_v56  ;;  %v901_v13 = vld [vmem:[%s1241_s1 + $0x18] sm:$0xff] }
  0x16   :  { %v112_v38 = vadd.f32 %v111_v19, %v105_v55  ;;  %v125_v40 = vunpack.c.l.bf16 %v888_v18  ;;  %v126_v29 = vunpack.c.h.bf16 %v888_v18  ;;  %v127_v30 = vunpack.c.l.bf16 %v889_v31  ;;  %v900_v17 = vld [vmem:[%s1240_s0 + $0x78] sm:$0xff]  ;;  %v1072_v19 = vld [vmem:[%s1240_s0 + $0x80] sm:$0xff] }
  0x17   :  { %v327_v28 = vadd.f32 %v326_v37, %v320_v20  ;;  %v128_v42 = vunpack.c.h.bf16 %v889_v31  ;;  %v129_v44 = vunpack.c.l.bf16 %v890_v21  ;;  %v133_v45 = vunpack.c.l.bf16 %v891_v22 }
  0x18   :  { %v113_v43 = vadd.f32 %v112_v38, %v106_v61  ;;  %v134_v46 = vunpack.c.h.bf16 %v891_v22  ;;  %v130_v48 = vunpack.c.h.bf16 %v890_v21  ;;  %v341_v49 = vunpack.c.l.bf16 %v1037_v41 }
  0x19   :  { %v328_v47 = vadd.f32 %v327_v28, %v321_v34  ;;  %v342_v50 = vunpack.c.h.bf16 %v1037_v41  ;;  %v140_v52 = vrot.slane %v133_v45, %v973_v24  ;;  %v144_v53 = vrot.slane %v133_v45, %v975_v25  ;;  %v905_v41 = vld [vmem:[%s1240_s0 + $0x98] sm:$0xff] }
  0x1a   :  { %v114_v51 = vadd.f32 %v113_v43, %v107_v62  ;;  %v148_v54 = vrot.slane %v133_v45, %v977_v26  ;;  %v152_v56 = vrot.slane %v133_v45, %v979_v27  ;;  %v156_v57 = vrot.slane %v134_v46, %v973_v24 }
  0x1b   :  { %v329_v55 = vadd.f32 %v328_v47, %v322_v35  ;;  %v160_v58 = vrot.slane %v134_v46, %v975_v25  ;;  %v164_v59 = vrot.slane %v134_v46, %v977_v26  ;;  %v168_v60 = vrot.slane %v134_v46, %v979_v27 }
  0x1c   :  { %115 = vadd.xlane.f32.xlu0 %v114_v51  ;;  %v180_v61 = vrot.slane %v140_v52, %v973_v24  ;;  %v184_v62 = vrot.slane %v144_v53, %v973_v24  ;;  %v188_v1 = vrot.slane %v148_v54, %v973_v24  ;;  %v192_v2 = vrot.slane %v152_v56, %v973_v24  ;;  %v903_v51 = vld [vmem:[%s1240_s0 + $0x88] sm:$0xff] }
  0x1d   :  { %v330_v0 = vadd.f32 %v329_v55, %v323_v36  ;;  %v196_v3 = vrot.slane %v156_v57, %v973_v24  ;;  %v200_v4 = vrot.slane %v160_v58, %v973_v24  ;;  %v204_v5 = vrot.slane %v164_v59, %v973_v24 }
  0x1e   :  { %v208_v6 = vrot.slane %v168_v60, %v973_v24  ;;  %v209_v7 = vmul.f32 %v180_v61, %v123_v32  ;;  %v210_v9 = vmul.f32 %v184_v62, %v124_v33  ;;  %v211_v10 = vmul.f32 %v188_v1, %v125_v40  ;;  %v904_v62 = vld [vmem:[%s1240_s0 + $0x90] sm:$0xff]  ;;  %v906_v1 = vld [vmem:[%s1241_s1 + $0x20] sm:$0xff] }
  0x1f   :  { %v331_v8 = vadd.f32 %v330_v0, %v324_v23  ;;  %v343_v12 = vunpack.c.l.bf16 %v898_v63  ;;  %v212_v14 = vmul.f32 %v192_v2, %v126_v29  ;;  %v213_v15 = vmul.f32 %v196_v3, %v127_v30 }
  0x20   :  { %v214_v16 = vmul.f32 %v200_v4, %v128_v42  ;;  %v344_v18 = vunpack.c.h.bf16 %v898_v63  ;;  %v215_v31 = vmul.f32 %v204_v5, %v129_v44  ;;  %v216_v32 = vmul.f32 %v208_v6, %v130_v48 }
  0x21   :  { %v332_v20 = vadd.f32 %v331_v8, %v325_v39  ;;  %v217_v33 = vadd.f32 %v210_v9, %v209_v7  ;;  %v345_v34 = vunpack.c.l.bf16 %v899_v11  ;;  %v346_v35 = vunpack.c.h.bf16 %v899_v11 }
  0x22   :  { %v351_v36 = vunpack.c.l.bf16 %v901_v13  ;;  %v352_v37 = vunpack.c.h.bf16 %v901_v13  ;;  %v347_v22 = vunpack.c.l.bf16 %v900_v17  ;;  %v348_v38 = vunpack.c.h.bf16 %v900_v17 }
  0x23   :  { %333 = vadd.xlane.f32.xlu1 %v332_v20  ;;  %v218_v21 = vadd.f32 %v217_v33, %v211_v10  ;;  %v450_v23 = vunpack.c.l.bf16 %v1072_v19  ;;  %v451_v63 = vunpack.c.h.bf16 %v1072_v19  ;;  %v452_v0 = vunpack.c.l.bf16 %v903_v51  ;;  %v911_v19 = vld [vmem:[%s1241_s1 + $0x28] sm:$0xff] }
  0x24   :  { %v358_v40 = vrot.slane %v351_v36, %v973_v24  ;;  %v362_v28 = vrot.slane %v351_v36, %v975_v25  ;;  %v366_v29 = vrot.slane %v351_v36, %v977_v26  ;;  %v370_v39 = vrot.slane %v351_v36, %v979_v27 }
  0x25   :  { %v219_v30 = vadd.f32 %v218_v21, %v212_v14  ;;  %v374_v42 = vrot.slane %v352_v37, %v973_v24  ;;  %v378_v43 = vrot.slane %v352_v37, %v975_v25  ;;  %v382_v44 = vrot.slane %v352_v37, %v977_v26 }
  0x26   :  { %v386_v45 = vrot.slane %v352_v37, %v979_v27  ;;  %v398_v46 = vrot.slane %v358_v40, %v973_v24  ;;  %v402_v47 = vrot.slane %v362_v28, %v973_v24  ;;  %v406_v48 = vrot.slane %v366_v29, %v973_v24 }
  0x27   :  { %v220_v52 = vadd.f32 %v219_v30, %v213_v15  ;;  %v410_v53 = vrot.slane %v370_v39, %v973_v24  ;;  %v414_v54 = vrot.slane %v374_v42, %v973_v24  ;;  %v418_v55 = vrot.slane %v378_v43, %v973_v24 }
  0x28   :  { %v422_v56 = vrot.slane %v382_v44, %v973_v24  ;;  %v426_v57 = vrot.slane %v386_v45, %v973_v24  ;;  %v427_v58 = vmul.f32 %v398_v46, %v341_v49  ;;  %v428_v59 = vmul.f32 %v402_v47, %v342_v50  ;;  %v908_v46 = vld [vmem:[%s1240_s0 + $0xa8] sm:$0xff]  ;;  %v909_v47 = vld [vmem:[%s1240_s0 + $0xb0] sm:$0xff] }
  0x29   :  { %v221_v60 = vadd.f32 %v220_v52, %v214_v16  ;;  %v429_v61 = vmul.f32 %v406_v48, %v343_v12  ;;  %v430_v2 = vmul.f32 %v410_v53, %v344_v18  ;;  %v431_v3 = vmul.f32 %v414_v54, %v345_v34 }
  0x2a   :  { %v432_v4 = vmul.f32 %v418_v55, %v346_v35  ;;  %v435_v49 = vadd.f32 %v428_v59, %v427_v58  ;;  %v433_v5 = vmul.f32 %v422_v56, %v347_v22  ;;  %v434_v6 = vmul.f32 %v426_v57, %v348_v38  ;;  %v907_v22 = vld [vmem:[%s1240_s0 + $0xa0] sm:$0xff]  ;;  %v910_v58 = vld [vmem:[%s1240_s0 + $0xb8] sm:$0xff] }
  0x2b   :  { %v222_v50 = vadd.f32 %v221_v60, %v215_v31  ;;  %v453_v7 = vunpack.c.h.bf16 %v903_v51  ;;  %v454_v9 = vunpack.c.l.bf16 %v904_v62  ;;  %v455_v10 = vunpack.c.h.bf16 %v904_v62  ;;  %v1144_v59 = vld [vmem:[%s1240_s0 + $0xc0] sm:$0xff] }
  0x2c   :  { %v436_v8 = vadd.f32 %v435_v49, %v429_v61  ;;  %v460_v11 = vunpack.c.l.bf16 %v906_v1  ;;  %v456_v13 = vunpack.c.l.bf16 %v905_v41  ;;  %v457_v14 = vunpack.c.h.bf16 %v905_v41 }
  0x2d   :  { %v223_v12 = vadd.f32 %v222_v50, %v216_v32  ;;  %v461_v15 = vunpack.c.h.bf16 %v906_v1  ;;  %v559_v48 = vunpack.c.l.bf16 %v907_v22  ;;  %v560_v54 = vunpack.c.h.bf16 %v907_v22 }
  0x2e   :  { %v437_v16 = vadd.f32 %v436_v8, %v430_v2  ;;  %v467_v17 = vrot.slane %v460_v11, %v973_v24  ;;  %v471_v18 = vrot.slane %v460_v11, %v975_v25  ;;  %v475_v20 = vrot.slane %v460_v11, %v977_v26 }
  0x2f   :  { %224 = vadd.xlane.f32.xlu0 %v223_v12  ;;  %v479_v31 = vrot.slane %v460_v11, %v979_v27  ;;  %v483_v33 = vrot.slane %v461_v15, %v973_v24  ;;  %v487_v34 = vrot.slane %v461_v15, %v975_v25  ;;  %v491_v35 = vrot.slane %v461_v15, %v977_v26 }
  0x30   :  { %v438_v32 = vadd.f32 %v437_v16, %v431_v3  ;;  %v495_v36 = vrot.slane %v461_v15, %v979_v27  ;;  %v507_v37 = vrot.slane %v467_v17, %v973_v24  ;;  %v511_v21 = vrot.slane %v471_v18, %v973_v24  ;;  %v913_v17 = vld [vmem:[%s1240_s0 + $0xc8] sm:$0xff] }
  0x31   :  { %v515_v38 = vrot.slane %v475_v20, %v973_v24  ;;  %v519_v40 = vrot.slane %v479_v31, %v973_v24  ;;  %v523_v28 = vrot.slane %v483_v33, %v973_v24  ;;  %v527_v29 = vrot.slane %v487_v34, %v973_v24  ;;  %v1168_v34 = vld [vmem:[%s1240_s0 + $0xd0] sm:$0xff] }
  0x32   :  { %v439_v39 = vadd.f32 %v438_v32, %v432_v4  ;;  %v531_v30 = vrot.slane %v491_v35, %v973_v24  ;;  %v535_v42 = vrot.slane %v495_v36, %v973_v24  ;;  %v536_v43 = vmul.f32 %v507_v37, %v450_v23 }
  0x33   :  { %v537_v44 = vmul.f32 %v511_v21, %v451_v63  ;;  %v538_v45 = vmul.f32 %v515_v38, %v452_v0  ;;  %v539_v52 = vmul.f32 %v519_v40, %v453_v7  ;;  %v540_v53 = vmul.f32 %v523_v28, %v454_v9  ;;  %v916_v28 = vld [vmem:[%s1241_s1 + $0x30] sm:$0xff] }
  0x34   :  { %v440_v51 = vadd.f32 %v439_v39, %v433_v5  ;;  %v541_v23 = vmul.f32 %v527_v29, %v455_v10  ;;  %v542_v55 = vmul.f32 %v531_v30, %v456_v13  ;;  %v543_v56 = vmul.f32 %v535_v42, %v457_v14  ;;  %v915_v42 = vld [vmem:[%s1240_s0 + $0xd8] sm:$0xff] }
  0x35   :  { %v544_v57 = vadd.f32 %v537_v44, %v536_v43  ;;  %v561_v61 = vunpack.c.l.bf16 %v908_v46  ;;  %v562_v62 = vunpack.c.h.bf16 %v908_v46  ;;  %v563_v63 = vunpack.c.l.bf16 %v909_v47  ;;  %v1182_v44 = vld [vmem:[%s1240_s0 + $0xe0] sm:$0xff] }
  0x36   :  { %v441_v60 = vadd.f32 %v440_v51, %v434_v6  ;;  %v564_v1 = vunpack.c.h.bf16 %v909_v47  ;;  %v569_v2 = vunpack.c.l.bf16 %v911_v19  ;;  %v570_v3 = vunpack.c.h.bf16 %v911_v19 }
  0x37   :  { %v545_v0 = vadd.f32 %v544_v57, %v538_v45  ;;  %v565_v4 = vunpack.c.l.bf16 %v910_v58  ;;  %v566_v49 = vunpack.c.h.bf16 %v910_v58  ;;  %v668_v41 = vunpack.c.l.bf16 %v1144_v59 }
  0x38   :  { %442 = vadd.xlane.f32.xlu1 %v441_v60  ;;  %v669_v50 = vunpack.c.h.bf16 %v1144_v59  ;;  %v576_v7 = vrot.slane %v569_v2, %v973_v24  ;;  %v580_v8 = vrot.slane %v569_v2, %v975_v25  ;;  %v584_v6 = vrot.slane %v569_v2, %v977_v26  ;;  %v920_v59 = vld [vmem:[%s1240_s0 + $0xf8] sm:$0xff] }
  0x39   :  { %v546_v5 = vadd.f32 %v545_v0, %v539_v52  ;;  %v588_v9 = vrot.slane %v569_v2, %v979_v27  ;;  %v592_v10 = vrot.slane %v570_v3, %v973_v24  ;;  %v596_v11 = vrot.slane %v570_v3, %v975_v25 }
  0x3a   :  { %v600_v12 = vrot.slane %v570_v3, %v977_v26  ;;  %v604_v14 = vrot.slane %v570_v3, %v979_v27  ;;  %v616_v15 = vrot.slane %v576_v7, %v973_v24  ;;  %v620_v16 = vrot.slane %v580_v8, %v973_v24 }
  0x3b   :  { %v547_v13 = vadd.f32 %v546_v5, %v540_v53  ;;  %v624_v18 = vrot.slane %v584_v6, %v973_v24  ;;  %v628_v20 = vrot.slane %v588_v9, %v973_v24  ;;  %v632_v31 = vrot.slane %v592_v10, %v973_v24  ;;  %v918_v5 = vld [vmem:[%s1240_s0 + $0xe8] sm:$0xff] }
  0x3c   :  { %v636_v33 = vrot.slane %v596_v11, %v973_v24  ;;  %v640_v32 = vrot.slane %v600_v12, %v973_v24  ;;  %v644_v36 = vrot.slane %v604_v14, %v973_v24  ;;  %v645_v37 = vmul.f32 %v616_v15, %v559_v48 }
  0x3d   :  { %v548_v35 = vadd.f32 %v547_v13, %v541_v23  ;;  %v646_v21 = vmul.f32 %v620_v16, %v560_v54  ;;  %v647_v22 = vmul.f32 %v624_v18, %v561_v61  ;;  %v670_v38 = vunpack.c.l.bf16 %v913_v17  ;;  %v919_v16 = vld [vmem:[%s1240_s0 + $0xf0] sm:$0xff] }
  0x3e   :  { %v671_v40 = vunpack.c.h.bf16 %v913_v17  ;;  %v648_v39 = vmul.f32 %v628_v20, %v562_v62  ;;  %v649_v30 = vmul.f32 %v632_v31, %v563_v63  ;;  %v672_v43 = vunpack.c.l.bf16 %v1168_v34  ;;  %v921_v20 = vld [vmem:[%s1241_s1 + $0x38] sm:$0xff] }
  0x3f   :  { %v549_v29 = vadd.f32 %v548_v35, %v542_v55  ;;  %v650_v45 = vmul.f32 %v636_v33, %v564_v1  ;;  %v651_v46 = vmul.f32 %v640_v32, %v565_v4  ;;  %v652_v47 = vmul.f32 %v644_v36, %v566_v49 }
  0x40   :  { %v653_v48 = vadd.f32 %v646_v21, %v645_v37  ;;  %v673_v52 = vunpack.c.h.bf16 %v1168_v34  ;;  %v678_v53 = vunpack.c.l.bf16 %v916_v28  ;;  %v679_v54 = vunpack.c.h.bf16 %v916_v28 }
  0x41   :  { %v550_v51 = vadd.f32 %v549_v29, %v543_v56  ;;  %v674_v23 = vunpack.c.l.bf16 %v915_v42  ;;  %v675_v55 = vunpack.c.h.bf16 %v915_v42  ;;  %v777_v57 = vunpack.c.l.bf16 %v1182_v44 }
  0x42   :  { %v654_v19 = vadd.f32 %v653_v48, %v647_v22  ;;  %v685_v58 = vrot.slane %v678_v53, %v973_v24  ;;  %v689_v60 = vrot.slane %v678_v53, %v975_v25  ;;  %v693_v61 = vrot.slane %v678_v53, %v977_v26 }
  0x43   :  { %551 = vadd.xlane.f32.xlu0 %v550_v51  ;;  %v697_v62 = vrot.slane %v678_v53, %v979_v27  ;;  %v701_v56 = vrot.slane %v679_v54, %v973_v24  ;;  %v705_v0 = vrot.slane %v679_v54, %v975_v25  ;;  %v709_v1 = vrot.slane %v679_v54, %v977_v26 }
  0x44   :  { %v655_v63 = vadd.f32 %v654_v19, %v648_v39  ;;  %v713_v2 = vrot.slane %v679_v54, %v979_v27  ;;  %v725_v3 = vrot.slane %v685_v58, %v973_v24  ;;  %v729_v4 = vrot.slane %v689_v60, %v973_v24 }
  0x45   :  { %v733_v49 = vrot.slane %v693_v61, %v973_v24  ;;  %v737_v8 = vrot.slane %v697_v62, %v973_v24  ;;  %v741_v6 = vrot.slane %v701_v56, %v973_v24  ;;  %v745_v9 = vrot.slane %v705_v0, %v973_v24 }
  0x46   :  { %v656_v7 = vadd.f32 %v655_v63, %v649_v30  ;;  %v749_v10 = vrot.slane %v709_v1, %v973_v24  ;;  %v753_v11 = vrot.slane %v713_v2, %v973_v24  ;;  %v754_v12 = vmul.f32 %v725_v3, %v668_v41 }
  0x47   :  { %v755_v13 = vmul.f32 %v729_v4, %v669_v50  ;;  %v756_v15 = vmul.f32 %v733_v49, %v670_v38  ;;  %v778_v17 = vunpack.c.h.bf16 %v1182_v44  ;;  %v779_v18 = vunpack.c.l.bf16 %v918_v5 }
  0x48   :  { %v657_v14 = vadd.f32 %v656_v7, %v650_v45  ;;  %v757_v31 = vmul.f32 %v737_v8, %v671_v40  ;;  %v758_v33 = vmul.f32 %v741_v6, %v672_v43  ;;  %v780_v41 = vunpack.c.h.bf16 %v918_v5 }
  0x49   :  { %v762_v34 = vadd.f32 %v755_v13, %v754_v12  ;;  %v759_v35 = vmul.f32 %v745_v9, %v673_v52  ;;  %v760_v32 = vmul.f32 %v749_v10, %v674_v23  ;;  %v761_v36 = vmul.f32 %v753_v11, %v675_v55 }
  0x4a   :  { %v658_v50 = vadd.f32 %v657_v14, %v651_v46  ;;  %v781_v21 = vunpack.c.l.bf16 %v919_v16  ;;  %v787_v22 = vunpack.c.l.bf16 %v921_v20  ;;  %v788_v38 = vunpack.c.h.bf16 %v921_v20 }
  0x4b   :  { %v763_v37 = vadd.f32 %v762_v34, %v756_v15  ;;  %v782_v29 = vunpack.c.h.bf16 %v919_v16  ;;  %v783_v39 = vunpack.c.l.bf16 %v920_v59  ;;  %v784_v30 = vunpack.c.h.bf16 %v920_v59 }
  0x4c   :  { %v659_v28 = vadd.f32 %v658_v50, %v652_v47  ;;  %v794_v42 = vrot.slane %v787_v22, %v973_v24  ;;  %v798_v43 = vrot.slane %v787_v22, %v975_v25  ;;  %v802_v45 = vrot.slane %v787_v22, %v977_v26 }
  0x4d   :  { %v764_v40 = vadd.f32 %v763_v37, %v757_v31  ;;  %v806_v46 = vrot.slane %v787_v22, %v979_v27  ;;  %v810_v48 = vrot.slane %v788_v38, %v973_v24  ;;  %v814_v51 = vrot.slane %v788_v38, %v975_v25 }
  0x4e   :  { %660 = vadd.xlane.f32.xlu1 %v659_v28  ;;  %v818_v52 = vrot.slane %v788_v38, %v977_v26  ;;  %v822_v53 = vrot.slane %v788_v38, %v979_v27  ;;  %v834_v54 = vrot.slane %v794_v42, %v973_v24  ;;  %v838_v19 = vrot.slane %v798_v43, %v973_v24 }
  0x4f   :  { %v765_v47 = vadd.f32 %v764_v40, %v758_v33  ;;  %v842_v23 = vrot.slane %v802_v45, %v973_v24  ;;  %v846_v55 = vrot.slane %v806_v46, %v973_v24  ;;  %v850_v58 = vrot.slane %v810_v48, %v973_v24 }
  0x50   :  { %v854_v60 = vrot.slane %v814_v51, %v973_v24  ;;  %v858_v25 = vrot.slane %v818_v52, %v973_v24  ;;  %v862_v26 = vrot.slane %v822_v53, %v973_v24  ;;  %v863_v27 = vmul.f32 %v834_v54, %v777_v57 }
  0x51   :  { %v766_v61 = vadd.f32 %v765_v47, %v759_v35  ;;  %v864_v62 = vmul.f32 %v838_v19, %v778_v17  ;;  %v865_v63 = vmul.f32 %v842_v23, %v779_v18  ;;  %v866_v56 = vmul.f32 %v846_v55, %v780_v41 }
  0x52   :  { %v867_v0 = vmul.f32 %v850_v58, %v781_v21  ;;  %v868_v2 = vmul.f32 %v854_v60, %v782_v29  ;;  %v869_v3 = vmul.f32 %v858_v25, %v783_v39  ;;  %v870_v4 = vmul.f32 %v862_v26, %v784_v30 }
  0x53   :  { %v767_v1 = vadd.f32 %v766_v61, %v760_v32  ;;  %v871_v49 = vadd.f32 %v864_v62, %v863_v27 }
  0x55   :  { %v768_v5 = vadd.f32 %v767_v1, %v761_v36  ;;  %v872_v7 = vadd.f32 %v871_v49, %v865_v63 }
  0x57   :  { %769 = vadd.xlane.f32.xlu0 %v768_v5  ;;  %v873_v8 = vadd.f32 %v872_v7, %v866_v56 }
  0x59   :  { %v874_v6 = vadd.f32 %v873_v8, %v867_v0 }
  0x5b   :  { %v875_v9 = vadd.f32 %v874_v6, %v868_v2 }
  0x5d   :  { %v876_v10 = vadd.f32 %v875_v9, %v869_v3 }
  0x5f   :  { %v877_v24 = vadd.f32 %v876_v10, %v870_v4 }
  0x61   :  { %878 = vadd.xlane.f32.xlu1 %v877_v24 }
  0xa9   :  { %v116_v44 = vpop.xlane.xlu0 %115 }
  0xb0   :  { %v334_v11 = vpop.xlane.xlu1 %333 }
  0xbc   :  { %v225_v57 = vpop.xlane.xlu0 %224 }
  0xbd   :  { %v226_v12 = vadd.f32 %v225_v57, %v116_v44 }
  0xbf   :  { %v335_v13 = vadd.f32 %v334_v11, %v226_v12 }
  0xc5   :  { %v443_v14 = vpop.xlane.xlu1 %442 }
  0xc6   :  { %v444_v15 = vadd.f32 %v443_v14, %v335_v13 }
  0xd0   :  { %v552_v16 = vpop.xlane.xlu0 %551 }
  0xd1   :  { %v553_v17 = vadd.f32 %v552_v16, %v444_v15 }
  0xdb   :  { %v661_v18 = vpop.xlane.xlu1 %660 }
  0xdc   :  { %v662_v20 = vadd.f32 %v661_v18, %v553_v17 }
  0xe4   :  { %v770_v31 = vpop.xlane.xlu0 %769 }
  0xe5   :  { %v771_v33 = vadd.f32 %v770_v31, %v662_v20 }
  0xee   :  { %v879_v34 = vpop.xlane.xlu1 %878 }
  0xef   :  { %v880_v59 = vadd.f32 %v879_v34, %v771_v33 }
  0xf1   :  { %882 = vst.msk [vmem:[%s1242_s2] sm:$0xff] %vm881_vm0, %v880_v59 }

// kernel: photo_discriminator_forward.6
= control target key start
LH: loop header
LB: loop body
LE: loop exit
PB: predicated region body
PF: predicated region fallthrough
CT: control target
= control target key end

     0   :  { %s15095_s1 = inlined_call_operand.vmem [shape: bf16[4096,512], index: 1, kind: input, shape index: {}]   ;;  %s15096_s0 = inlined_call_operand.vmem [shape: bf16[32,4096], index: 0, kind: input, shape index: {}]   ;;  %s15097_s2 = inlined_call_operand.vmem [shape: f32[1,512], index: 2, kind: input, shape index: {}]   ;;  %s15098_s3 = inlined_call_operand.vmem [shape: f32[1,512], index: 3, kind: input, shape index: {}]   ;;  %s15099_s4 = inlined_call_operand.vmem [shape: bf16[32,512], index: 4, kind: output, shape index: {}]  }
   0x1   :  { %v9987_v0 = vld [vmem:[%s15095_s1 + $0x4] ss:$16 sps:$4 sm:$0xff]   ;;  %v9989_v1 = vld [vmem:[%s15095_s1 + $0xc] ss:$16 sps:$4 sm:$0xff]   ;;  %v9991_v2 = vld [vmem:[%s15095_s1] ss:$16 sps:$4 sm:$0xff]  }
   0x2   :  { %6545 = vmatprep.subr.bf16.mxu0 %v9987_v0  ;;  %v9992_v3 = vld [vmem:[%s15095_s1 + $0x8] ss:$16 sps:$4 sm:$0xff]   ;;  %7393 = vmatprep.subr.bf16.mxu1 %v9989_v1  ;;  %v9993_v4 = vld [vmem:[%s15095_s1 + $0x24] ss:$16 sps:$4 sm:$0xff]   ;;  %v9995_v5 = vld [vmem:[%s15095_s1 + $0x2c] ss:$16 sps:$4 sm:$0xff]  }
   0x3   :  { %6546 = vmatpush1.bf16.msra.mxu0 %v9991_v2  ;;  %7394 = vmatpush1.bf16.msra.mxu1 %v9992_v3  ;;  %v9997_v6 = vld [vmem:[%s15095_s1 + $0x20] ss:$16 sps:$4 sm:$0xff]   ;;  %v9998_v7 = vld [vmem:[%s15095_s1 + $0x28] ss:$16 sps:$4 sm:$0xff]   ;;  %v9999_v8 = vld [vmem:[%s15095_s1 + $0x44] ss:$16 sps:$4 sm:$0xff]  }
   0x4   :  { %6547 = vmatprep.subr.bf16.mxu0 %v9993_v4  ;;  %7395 = vmatprep.subr.bf16.mxu1 %v9995_v5  ;;  %v10001_v9 = vld [vmem:[%s15095_s1 + $0x4c] ss:$16 sps:$4 sm:$0xff]   ;;  %v10003_v10 = vld [vmem:[%s15095_s1 + $0x40] ss:$16 sps:$4 sm:$0xff]   ;;  %v10004_v11 = vld [vmem:[%s15095_s1 + $0x48] ss:$16 sps:$4 sm:$0xff]  }
   0x5   :  { %v10005_v12 = vld [vmem:[%s15095_s1 + $0x64] ss:$16 sps:$4 sm:$0xff]   ;;  %v10007_v13 = vld [vmem:[%s15095_s1 + $0x6c] ss:$16 sps:$4 sm:$0xff]   ;;  %v10009_v14 = vld [vmem:[%s15095_s1 + $0x60] ss:$16 sps:$4 sm:$0xff]  }
   0x6   :  { %v10010_v15 = vld [vmem:[%s15095_s1 + $0x68] ss:$16 sps:$4 sm:$0xff]   ;;  %v10011_v16 = vld [vmem:[%s15095_s1 + $0x84] ss:$16 sps:$4 sm:$0xff]   ;;  %v10013_v17 = vld [vmem:[%s15095_s1 + $0x8c] ss:$16 sps:$4 sm:$0xff]  }
   0x7   :  { %6548 = vmatpush1.bf16.msra.mxu0 %v9997_v6  ;;  %7396 = vmatpush1.bf16.msra.mxu1 %v9998_v7  ;;  %v10015_v18 = vld [vmem:[%s15095_s1 + $0x80] ss:$16 sps:$4 sm:$0xff]   ;;  %v10016_v19 = vld [vmem:[%s15095_s1 + $0x88] ss:$16 sps:$4 sm:$0xff]   ;;  %v10017_v20 = vld [vmem:[%s15095_s1 + $0xa4] ss:$16 sps:$4 sm:$0xff]  }
   0x8   :  { %6549 = vmatprep.subr.bf16.mxu0 %v9999_v8  ;;  %7397 = vmatprep.subr.bf16.mxu1 %v10001_v9  ;;  %v10019_v21 = vld [vmem:[%s15095_s1 + $0xac] ss:$16 sps:$4 sm:$0xff]   ;;  %v10021_v22 = vld [vmem:[%s15095_s1 + $0xa0] ss:$16 sps:$4 sm:$0xff]   ;;  %v10022_v23 = vld [vmem:[%s15095_s1 + $0xa8] ss:$16 sps:$4 sm:$0xff]  }
   0x9   :  { %v10023_v24 = vld [vmem:[%s15095_s1 + $0xc4] ss:$16 sps:$4 sm:$0xff]   ;;  %v10025_v25 = vld [vmem:[%s15095_s1 + $0xcc] ss:$16 sps:$4 sm:$0xff]   ;;  %v10027_v26 = vld [vmem:[%s15095_s1 + $0xc0] ss:$16 sps:$4 sm:$0xff]  }
   0xa   :  { %v10028_v27 = vld [vmem:[%s15095_s1 + $0xc8] ss:$16 sps:$4 sm:$0xff]   ;;  %v10029_v28 = vld [vmem:[%s15095_s1 + $0xe4] ss:$16 sps:$4 sm:$0xff]   ;;  %v10031_v29 = vld [vmem:[%s15095_s1 + $0xec] ss:$16 sps:$4 sm:$0xff]  }
   0xb   :  { %6550 = vmatpush1.bf16.msra.mxu0 %v10003_v10  ;;  %7398 = vmatpush1.bf16.msra.mxu1 %v10004_v11  ;;  %v10033_v30 = vld [vmem:[%s15095_s1 + $0xe0] ss:$16 sps:$4 sm:$0xff]   ;;  %v10034_v31 = vld [vmem:[%s15095_s1 + $0xe8] ss:$16 sps:$4 sm:$0xff]   ;;  %v10035_v32 = vld [vmem:[%s15095_s1 + $0x104] ss:$16 sps:$4 sm:$0xff]  }
   0xc   :  { %6551 = vmatprep.subr.bf16.mxu0 %v10005_v12  ;;  %7399 = vmatprep.subr.bf16.mxu1 %v10007_v13  ;;  %v10037_v33 = vld [vmem:[%s15095_s1 + $0x10c] ss:$16 sps:$4 sm:$0xff]   ;;  %v10039_v34 = vld [vmem:[%s15095_s1 + $0x100] ss:$16 sps:$4 sm:$0xff]   ;;  %v10040_v35 = vld [vmem:[%s15095_s1 + $0x108] ss:$16 sps:$4 sm:$0xff]  }
   0xd   :  { %v10041_v36 = vld [vmem:[%s15095_s1 + $0x124] ss:$16 sps:$4 sm:$0xff]   ;;  %v10043_v37 = vld [vmem:[%s15095_s1 + $0x12c] ss:$16 sps:$4 sm:$0xff]   ;;  %v10045_v38 = vld [vmem:[%s15095_s1 + $0x120] ss:$16 sps:$4 sm:$0xff]  }
   0xe   :  { %v10046_v39 = vld [vmem:[%s15095_s1 + $0x128] ss:$16 sps:$4 sm:$0xff]   ;;  %v10047_v40 = vld [vmem:[%s15095_s1 + $0x144] ss:$16 sps:$4 sm:$0xff]   ;;  %v10049_v41 = vld [vmem:[%s15095_s1 + $0x14c] ss:$16 sps:$4 sm:$0xff]  }
   0xf   :  { %6552 = vmatpush1.bf16.msra.mxu0 %v10009_v14  ;;  %7400 = vmatpush1.bf16.msra.mxu1 %v10010_v15  ;;  %v10051_v42 = vld [vmem:[%s15095_s1 + $0x140] ss:$16 sps:$4 sm:$0xff]   ;;  %v10052_v43 = vld [vmem:[%s15095_s1 + $0x148] ss:$16 sps:$4 sm:$0xff]   ;;  %v10053_v44 = vld [vmem:[%s15095_s1 + $0x164] ss:$16 sps:$4 sm:$0xff]  }
  0x10   :  { %6553 = vmatprep.subr.bf16.mxu0 %v10011_v16  ;;  %7401 = vmatprep.subr.bf16.mxu1 %v10013_v17  ;;  %v10055_v45 = vld [vmem:[%s15095_s1 + $0x16c] ss:$16 sps:$4 sm:$0xff]   ;;  %v17_v46 = vld [vmem:[%s15096_s0] sm:$0xff]  ;;  %v10058_v49 = vld [vmem:[%s15095_s1 + $0x168] ss:$16 sps:$4 sm:$0xff]  }
  0x11   :  { %v33_v47 = vld [vmem:[%s15096_s0 + $0x80] sm:$0xff]  ;;  %v10061_v52 = vld [vmem:[%s15095_s1 + $0x18c] ss:$16 sps:$4 sm:$0xff]   ;;  %v10064_v54 = vld [vmem:[%s15095_s1 + $0x188] ss:$16 sps:$4 sm:$0xff]  }
  0x12   :  { %v10057_v48 = vld [vmem:[%s15095_s1 + $0x160] ss:$16 sps:$4 sm:$0xff]   ;;  %v8643_v50 = vcombine.high %v17_v46, %v33_v47  ;;  %v10059_v51 = vld [vmem:[%s15095_s1 + $0x184] ss:$16 sps:$4 sm:$0xff]   ;;  %v10067_v56 = vld [vmem:[%s15095_s1 + $0x1ac] ss:$16 sps:$4 sm:$0xff]   ;;  %v8642_v5 = vcombine.low %v17_v46, %v33_v47 }
  0x13   :  { %6554 = vmatpush1.bf16.msra.mxu0 %v10015_v18  ;;  %7402 = vmatpush1.bf16.msra.mxu1 %v10016_v19  ;;  %v10063_v53 = vld [vmem:[%s15095_s1 + $0x180] ss:$16 sps:$4 sm:$0xff]   ;;  %v10065_v55 = vld [vmem:[%s15095_s1 + $0x1a4] ss:$16 sps:$4 sm:$0xff]   ;;  %v10070_v58 = vld [vmem:[%s15095_s1 + $0x1a8] ss:$16 sps:$4 sm:$0xff]  }
  0x14   :  { %6555 = vmatprep.subr.bf16.mxu0 %v10017_v20  ;;  %7403 = vmatprep.subr.bf16.mxu1 %v10019_v21  ;;  %v10069_v57 = vld [vmem:[%s15095_s1 + $0x1a0] ss:$16 sps:$4 sm:$0xff]   ;;  %v10071_v59 = vld [vmem:[%s15095_s1 + $0x1c4] ss:$16 sps:$4 sm:$0xff]   ;;  %v10073_v60 = vld [vmem:[%s15095_s1 + $0x1cc] ss:$16 sps:$4 sm:$0xff]  }
  0x15   :  { %6577 = vmatprep.mubr.bf16.mxu0 %v8643_v50  ;;  %7425 = vmatprep.mubr.bf16.mxu1 %v8643_v50  ;;  %v10075_v61 = vld [vmem:[%s15095_s1 + $0x1c0] ss:$16 sps:$4 sm:$0xff]   ;;  %v10076_v62 = vld [vmem:[%s15095_s1 + $0x1c8] ss:$16 sps:$4 sm:$0xff]   ;;  %v10077_v63 = vld [vmem:[%s15095_s1 + $0x1e4] ss:$16 sps:$4 sm:$0xff]  }
  0x16   :  { %v10079_v0 = vld [vmem:[%s15095_s1 + $0x1ec] ss:$16 sps:$4 sm:$0xff]   ;;  %v10081_v1 = vld [vmem:[%s15095_s1 + $0x1e0] ss:$16 sps:$4 sm:$0xff]   ;;  %v10082_v2 = vld [vmem:[%s15095_s1 + $0x1e8] ss:$16 sps:$4 sm:$0xff]  }
  0x17   :  { %6556 = vmatpush1.bf16.msra.mxu0 %v10021_v22  ;;  %7404 = vmatpush1.bf16.msra.mxu1 %v10022_v23  ;;  %v10085_v3 = vld [vmem:[%s15095_s1 + $0x204] ss:$16 sps:$4 sm:$0xff]   ;;  %v10088_v4 = vld [vmem:[%s15095_s1 + $0x20c] ss:$16 sps:$4 sm:$0xff]   ;;  %v10083_v6 = vld [vmem:[%s15095_s1 + $0x200] ss:$16 sps:$4 sm:$0xff]  }
  0x18   :  { %6557 = vmatprep.subr.bf16.mxu0 %v10023_v24  ;;  %7405 = vmatprep.subr.bf16.mxu1 %v10025_v25  ;;  %v10086_v7 = vld [vmem:[%s15095_s1 + $0x208] ss:$16 sps:$4 sm:$0xff]   ;;  %v10091_v8 = vld [vmem:[%s15095_s1 + $0x224] ss:$16 sps:$4 sm:$0xff]   ;;  %v10094_v9 = vld [vmem:[%s15095_s1 + $0x22c] ss:$16 sps:$4 sm:$0xff]  }
  0x19   :  { %v10089_v10 = vld [vmem:[%s15095_s1 + $0x220] ss:$16 sps:$4 sm:$0xff]   ;;  %v10092_v11 = vld [vmem:[%s15095_s1 + $0x228] ss:$16 sps:$4 sm:$0xff]   ;;  %v10097_v12 = vld [vmem:[%s15095_s1 + $0x244] ss:$16 sps:$4 sm:$0xff]  }
  0x1a   :  { %v10100_v13 = vld [vmem:[%s15095_s1 + $0x24c] ss:$16 sps:$4 sm:$0xff]   ;;  %v10095_v14 = vld [vmem:[%s15095_s1 + $0x240] ss:$16 sps:$4 sm:$0xff]   ;;  %v10098_v15 = vld [vmem:[%s15095_s1 + $0x248] ss:$16 sps:$4 sm:$0xff]  }
  0x1b   :  { %6558 = vmatpush1.bf16.msra.mxu0 %v10027_v26  ;;  %7406 = vmatpush1.bf16.msra.mxu1 %v10028_v27  ;;  %v10103_v16 = vld [vmem:[%s15095_s1 + $0x264] ss:$16 sps:$4 sm:$0xff]   ;;  %v10106_v17 = vld [vmem:[%s15095_s1 + $0x26c] ss:$16 sps:$4 sm:$0xff]   ;;  %v10101_v18 = vld [vmem:[%s15095_s1 + $0x260] ss:$16 sps:$4 sm:$0xff]  }
  0x1c   :  { %6559 = vmatprep.subr.bf16.mxu0 %v10029_v28  ;;  %7407 = vmatprep.subr.bf16.mxu1 %v10031_v29  ;;  %v10104_v19 = vld [vmem:[%s15095_s1 + $0x268] ss:$16 sps:$4 sm:$0xff]   ;;  %v10109_v20 = vld [vmem:[%s15095_s1 + $0x284] ss:$16 sps:$4 sm:$0xff]   ;;  %v10112_v21 = vld [vmem:[%s15095_s1 + $0x28c] ss:$16 sps:$4 sm:$0xff]  }
  0x1d   :  { %v10107_v22 = vld [vmem:[%s15095_s1 + $0x280] ss:$16 sps:$4 sm:$0xff]   ;;  %v10110_v23 = vld [vmem:[%s15095_s1 + $0x288] ss:$16 sps:$4 sm:$0xff]   ;;  %v10115_v24 = vld [vmem:[%s15095_s1 + $0x2a4] ss:$16 sps:$4 sm:$0xff]  }
  0x1e   :  { %v10118_v25 = vld [vmem:[%s15095_s1 + $0x2ac] ss:$16 sps:$4 sm:$0xff]   ;;  %v49_v26 = vld [vmem:[%s15096_s0 + $0x100] sm:$0xff]  ;;  %v10134_v46 = vld [vmem:[%s15095_s1 + $0x308] ss:$16 sps:$4 sm:$0xff]  }
  0x1f   :  { %6560 = vmatpush1.bf16.msra.mxu0 %v10033_v30  ;;  %7408 = vmatpush1.bf16.msra.mxu1 %v10034_v31  ;;  %v65_v27 = vld [vmem:[%s15096_s0 + $0x180] sm:$0xff]  ;;  %v10116_v30 = vld [vmem:[%s15095_s1 + $0x2a8] ss:$16 sps:$4 sm:$0xff]  }
  0x20   :  { %6561 = vmatprep.subr.bf16.mxu0 %v10035_v32  ;;  %7409 = vmatprep.subr.bf16.mxu1 %v10037_v33  ;;  %v8675_v28 = vcombine.high %v49_v26, %v65_v27  ;;  %v10113_v29 = vld [vmem:[%s15095_s1 + $0x2a0] ss:$16 sps:$4 sm:$0xff]   ;;  %v8674_v31 = vcombine.low %v49_v26, %v65_v27  ;;  %v10121_v32 = vld [vmem:[%s15095_s1 + $0x2c4] ss:$16 sps:$4 sm:$0xff]   ;;  %v10124_v33 = vld [vmem:[%s15095_s1 + $0x2cc] ss:$16 sps:$4 sm:$0xff]  }
  0x21   :  { %v10139_v47 = vld [vmem:[%s15095_s1 + $0x324] ss:$16 sps:$4 sm:$0xff]   ;;  %v10140_v50 = vld [vmem:[%s15095_s1 + $0x328] ss:$16 sps:$4 sm:$0xff]  }
  0x22   :  { %v12011_v27 = vld [vmem:[%s15096_s0 + $0x90] sm:$0xff] }
  0x23   :  { %6562 = vmatpush1.bf16.msra.mxu0 %v10039_v34  ;;  %7410 = vmatpush1.bf16.msra.mxu1 %v10040_v35  ;;  %v11842_v34 = vld [vmem:[%s15096_s0 + $0x8] sm:$0xff] }
  0x24   :  { %6563 = vmatprep.subr.bf16.mxu0 %v10041_v36  ;;  %7411 = vmatprep.subr.bf16.mxu1 %v10043_v37  ;;  %v11847_v35 = vld [vmem:[%s15096_s0 + $0x88] sm:$0xff]  ;;  %v10119_v36 = vld [vmem:[%s15095_s1 + $0x2c0] ss:$16 sps:$4 sm:$0xff]  }
  0x25   :  { %v10122_v37 = vld [vmem:[%s15095_s1 + $0x2c8] ss:$16 sps:$4 sm:$0xff]  }
  0x27   :  { %6564 = vmatpush1.bf16.msra.mxu0 %v10045_v38  ;;  %7412 = vmatpush1.bf16.msra.mxu1 %v10046_v39  ;;  %v8645_v38 = vcombine.high %v11842_v34, %v11847_v35  ;;  %v10127_v39 = vld [vmem:[%s15095_s1 + $0x2e4] ss:$16 sps:$4 sm:$0xff]  }
  0x28   :  { %6565 = vmatprep.subr.bf16.mxu0 %v10047_v40  ;;  %7413 = vmatprep.subr.bf16.mxu1 %v10049_v41  ;;  %v10130_v40 = vld [vmem:[%s15095_s1 + $0x2ec] ss:$16 sps:$4 sm:$0xff]   ;;  %v10125_v41 = vld [vmem:[%s15095_s1 + $0x2e0] ss:$16 sps:$4 sm:$0xff]  }
  0x2b   :  { %6566 = vmatpush1.bf16.msra.mxu0 %v10051_v42  ;;  %7414 = vmatpush1.bf16.msra.mxu1 %v10052_v43  ;;  %v10128_v42 = vld [vmem:[%s15095_s1 + $0x2e8] ss:$16 sps:$4 sm:$0xff]   ;;  %v10133_v43 = vld [vmem:[%s15095_s1 + $0x304] ss:$16 sps:$4 sm:$0xff]  }
  0x2c   :  { %6567 = vmatprep.subr.bf16.mxu0 %v10053_v44  ;;  %7415 = vmatprep.subr.bf16.mxu1 %v10055_v45  ;;  %v10136_v44 = vld [vmem:[%s15095_s1 + $0x30c] ss:$16 sps:$4 sm:$0xff]   ;;  %v10131_v45 = vld [vmem:[%s15095_s1 + $0x300] ss:$16 sps:$4 sm:$0xff]  }
  0x2f   :  { %6568 = vmatpush1.bf16.msra.mxu0 %v10057_v48  ;;  %7416 = vmatpush1.bf16.msra.mxu1 %v10058_v49  ;;  %v10142_v48 = vld [vmem:[%s15095_s1 + $0x32c] ss:$16 sps:$4 sm:$0xff]   ;;  %v10137_v49 = vld [vmem:[%s15095_s1 + $0x320] ss:$16 sps:$4 sm:$0xff]  }
  0x30   :  { %6569 = vmatprep.subr.bf16.mxu0 %v10059_v51  ;;  %7417 = vmatprep.subr.bf16.mxu1 %v10061_v52  ;;  %v10145_v51 = vld [vmem:[%s15095_s1 + $0x344] ss:$16 sps:$4 sm:$0xff]   ;;  %v10148_v52 = vld [vmem:[%s15095_s1 + $0x34c] ss:$16 sps:$4 sm:$0xff]  }
  0x33   :  { %6570 = vmatpush1.bf16.msra.mxu0 %v10063_v53  ;;  %7418 = vmatpush1.bf16.msra.mxu1 %v10064_v54  ;;  %v10143_v53 = vld [vmem:[%s15095_s1 + $0x340] ss:$16 sps:$4 sm:$0xff]   ;;  %v10146_v54 = vld [vmem:[%s15095_s1 + $0x348] ss:$16 sps:$4 sm:$0xff]  }
  0x34   :  { %6571 = vmatprep.subr.bf16.mxu0 %v10065_v55  ;;  %7419 = vmatprep.subr.bf16.mxu1 %v10067_v56  ;;  %v10151_v55 = vld [vmem:[%s15095_s1 + $0x364] ss:$16 sps:$4 sm:$0xff]   ;;  %v10154_v56 = vld [vmem:[%s15095_s1 + $0x36c] ss:$16 sps:$4 sm:$0xff]  }
  0x37   :  { %6572 = vmatpush1.bf16.msra.mxu0 %v10069_v57  ;;  %7420 = vmatpush1.bf16.msra.mxu1 %v10070_v58  ;;  %v10149_v57 = vld [vmem:[%s15095_s1 + $0x360] ss:$16 sps:$4 sm:$0xff]   ;;  %v10152_v58 = vld [vmem:[%s15095_s1 + $0x368] ss:$16 sps:$4 sm:$0xff]  }
  0x38   :  { %6573 = vmatprep.subr.bf16.mxu0 %v10071_v59  ;;  %7421 = vmatprep.subr.bf16.mxu1 %v10073_v60  ;;  %v10157_v59 = vld [vmem:[%s15095_s1 + $0x384] ss:$16 sps:$4 sm:$0xff]   ;;  %v10160_v60 = vld [vmem:[%s15095_s1 + $0x38c] ss:$16 sps:$4 sm:$0xff]  }
  0x3b   :  { %6574 = vmatpush1.bf16.msra.mxu0 %v10075_v61  ;;  %7422 = vmatpush1.bf16.msra.mxu1 %v10076_v62  ;;  %v10155_v61 = vld [vmem:[%s15095_s1 + $0x380] ss:$16 sps:$4 sm:$0xff]   ;;  %v10158_v62 = vld [vmem:[%s15095_s1 + $0x388] ss:$16 sps:$4 sm:$0xff]  }
  0x3c   :  { %6575 = vmatprep.subr.bf16.mxu0 %v10077_v63  ;;  %7423 = vmatprep.subr.bf16.mxu1 %v10079_v0  ;;  %v10163_v63 = vld [vmem:[%s15095_s1 + $0x3a4] ss:$16 sps:$4 sm:$0xff]   ;;  %v10166_v0 = vld [vmem:[%s15095_s1 + $0x3ac] ss:$16 sps:$4 sm:$0xff]  }
  0x3f   :  { %6576 = vmatpush1.bf16.msra.mxu0 %v10081_v1  ;;  %7424 = vmatpush1.bf16.msra.mxu1 %v10082_v2  ;;  %v10161_v1 = vld [vmem:[%s15095_s1 + $0x3a0] ss:$16 sps:$4 sm:$0xff]   ;;  %v10164_v2 = vld [vmem:[%s15095_s1 + $0x3a8] ss:$16 sps:$4 sm:$0xff]  }
  0x40   :  { %6598 = vmatprep.subr.bf16.mxu0 %v10085_v3  ;;  %7446 = vmatprep.subr.bf16.mxu1 %v10088_v4  ;;  %v10169_v3 = vld [vmem:[%s15095_s1 + $0x3c4] ss:$16 sps:$4 sm:$0xff]   ;;  %v10172_v4 = vld [vmem:[%s15095_s1 + $0x3cc] ss:$16 sps:$4 sm:$0xff]  }
  0x42   :  { %6578 = vmatmul.mubr.bf16.vlgmr.msra.gmra.mrb[0].mxu0 %v8642_v5  ;;  %7426 = vmatmul.mubr.bf16.vlgmr.msra.gmra.mrb[0].mxu1 %v8642_v5  ;;  %v10167_v5 = vld [vmem:[%s15095_s1 + $0x3c0] ss:$16 sps:$4 sm:$0xff]  }
  0x43   :  { %6599 = vmatpush1.bf16.msra.mxu0 %v10083_v6  ;;  %7447 = vmatpush1.bf16.msra.mxu1 %v10086_v7  ;;  %v10170_v6 = vld [vmem:[%s15095_s1 + $0x3c8] ss:$16 sps:$4 sm:$0xff]   ;;  %v10175_v7 = vld [vmem:[%s15095_s1 + $0x3e4] ss:$16 sps:$4 sm:$0xff]  }
  0x44   :  { %6600 = vmatprep.subr.bf16.mxu0 %v10091_v8  ;;  %7448 = vmatprep.subr.bf16.mxu1 %v10094_v9  ;;  %v10178_v8 = vld [vmem:[%s15095_s1 + $0x3ec] ss:$16 sps:$4 sm:$0xff]   ;;  %v10173_v9 = vld [vmem:[%s15095_s1 + $0x3e0] ss:$16 sps:$4 sm:$0xff]  }
  0x45   :  { %6587 = vmatprep.mubr.bf16.mxu0 %v8675_v28  ;;  %7435 = vmatprep.mubr.bf16.mxu1 %v8675_v28  ;;  %v10191_v28 = vld [vmem:[%s15095_s1 + $0x440] ss:$16 sps:$4 sm:$0xff]  }
  0x47   :  { %6601 = vmatpush1.bf16.msra.mxu0 %v10089_v10  ;;  %7449 = vmatpush1.bf16.msra.mxu1 %v10092_v11  ;;  %v10176_v10 = vld [vmem:[%s15095_s1 + $0x3e8] ss:$16 sps:$4 sm:$0xff]   ;;  %v10181_v11 = vld [vmem:[%s15095_s1 + $0x404] ss:$16 sps:$4 sm:$0xff]  }
  0x48   :  { %6602 = vmatprep.subr.bf16.mxu0 %v10097_v12  ;;  %7450 = vmatprep.subr.bf16.mxu1 %v10100_v13  ;;  %v10184_v12 = vld [vmem:[%s15095_s1 + $0x40c] ss:$16 sps:$4 sm:$0xff]   ;;  %v10179_v13 = vld [vmem:[%s15095_s1 + $0x400] ss:$16 sps:$4 sm:$0xff]  }
  0x4a   :  { %6588 = vmatmul.mubr.bf16.gmra.mrb[4].mxu0 %v8674_v31  ;;  %7436 = vmatmul.mubr.bf16.gmra.mrb[4].mxu1 %v8674_v31  ;;  %v10202_v31 = vld [vmem:[%s15095_s1 + $0x46c] ss:$16 sps:$4 sm:$0xff]  }
  0x4b   :  { %6603 = vmatpush1.bf16.msra.mxu0 %v10095_v14  ;;  %7451 = vmatpush1.bf16.msra.mxu1 %v10098_v15  ;;  %v10182_v14 = vld [vmem:[%s15095_s1 + $0x408] ss:$16 sps:$4 sm:$0xff]   ;;  %v8644_v15 = vcombine.low %v11842_v34, %v11847_v35  ;;  %v10205_v35 = vld [vmem:[%s15095_s1 + $0x484] ss:$16 sps:$4 sm:$0xff]  }
  0x4c   :  { %6604 = vmatprep.subr.bf16.mxu0 %v10103_v16  ;;  %7452 = vmatprep.subr.bf16.mxu1 %v10106_v17  ;;  %v50_v16 = vld [vmem:[%s15096_s0 + $0x108] sm:$0xff] }
  0x4d   :  { %6630 = vmatprep.mubr.bf16.mxu0 %v8645_v38  ;;  %7478 = vmatprep.mubr.bf16.mxu1 %v8645_v38  ;;  %v66_v17 = vld [vmem:[%s15096_s0 + $0x188] sm:$0xff] }
  0x4e   :  { %v8676_v26 = vcombine.low %v50_v16, %v66_v17  ;;  %v10200_v34 = vld [vmem:[%s15095_s1 + $0x468] ss:$16 sps:$4 sm:$0xff]  }
  0x4f   :  { %6605 = vmatpush1.bf16.msra.mxu0 %v10101_v18  ;;  %7453 = vmatpush1.bf16.msra.mxu1 %v10104_v19  ;;  %v10187_v18 = vld [vmem:[%s15095_s1 + $0x424] ss:$16 sps:$4 sm:$0xff]   ;;  %v10190_v19 = vld [vmem:[%s15095_s1 + $0x42c] ss:$16 sps:$4 sm:$0xff]   ;;  %v10206_v38 = vld [vmem:[%s15095_s1 + $0x488] ss:$16 sps:$4 sm:$0xff]  }
  0x50   :  { %6606 = vmatprep.subr.bf16.mxu0 %v10109_v20  ;;  %7454 = vmatprep.subr.bf16.mxu1 %v10112_v21  ;;  %v8677_v20 = vcombine.high %v50_v16, %v66_v17  ;;  %v10185_v21 = vld [vmem:[%s15095_s1 + $0x420] ss:$16 sps:$4 sm:$0xff]   ;;  %v10274_v16 = vld [vmem:[%s15095_s1 + $0x5ec] ss:$16 sps:$4 sm:$0xff]  }
  0x51   :  { %v10269_v17 = vld [vmem:[%s15095_s1 + $0x5e0] ss:$16 sps:$4 sm:$0xff]  }
  0x53   :  { %6607 = vmatpush1.bf16.msra.mxu0 %v10107_v22  ;;  %7455 = vmatpush1.bf16.msra.mxu1 %v10110_v23  ;;  %v10188_v22 = vld [vmem:[%s15095_s1 + $0x428] ss:$16 sps:$4 sm:$0xff]   ;;  %v10193_v23 = vld [vmem:[%s15095_s1 + $0x444] ss:$16 sps:$4 sm:$0xff]  }
  0x54   :  { %6608 = vmatprep.subr.bf16.mxu0 %v10115_v24  ;;  %7456 = vmatprep.subr.bf16.mxu1 %v10118_v25  ;;  %v10196_v24 = vld [vmem:[%s15095_s1 + $0x44c] ss:$16 sps:$4 sm:$0xff]   ;;  %v12006_v25 = vld [vmem:[%s15096_s0 + $0x10] sm:$0xff] }
  0x57   :  { %6609 = vmatpush1.bf16.msra.mxu0 %v10113_v29  ;;  %7457 = vmatpush1.bf16.msra.mxu1 %v10116_v30  ;;  %v10194_v29 = vld [vmem:[%s15095_s1 + $0x448] ss:$16 sps:$4 sm:$0xff]   ;;  %v10199_v30 = vld [vmem:[%s15095_s1 + $0x464] ss:$16 sps:$4 sm:$0xff]  }
  0x58   :  { %6610 = vmatprep.subr.bf16.mxu0 %v10121_v32  ;;  %7458 = vmatprep.subr.bf16.mxu1 %v10124_v33  ;;  %v8647_v32 = vcombine.high %v12006_v25, %v12011_v27  ;;  %v10197_v33 = vld [vmem:[%s15095_s1 + $0x460] ss:$16 sps:$4 sm:$0xff]  }
  0x5b   :  { %6611 = vmatpush1.bf16.msra.mxu0 %v10119_v36  ;;  %7459 = vmatpush1.bf16.msra.mxu1 %v10122_v37  ;;  %v10208_v36 = vld [vmem:[%s15095_s1 + $0x48c] ss:$16 sps:$4 sm:$0xff]   ;;  %v10203_v37 = vld [vmem:[%s15095_s1 + $0x480] ss:$16 sps:$4 sm:$0xff]  }
  0x5c   :  { %6612 = vmatprep.subr.bf16.mxu0 %v10127_v39  ;;  %7460 = vmatprep.subr.bf16.mxu1 %v10130_v40  ;;  %v10211_v39 = vld [vmem:[%s15095_s1 + $0x4a4] ss:$16 sps:$4 sm:$0xff]   ;;  %v10214_v40 = vld [vmem:[%s15095_s1 + $0x4ac] ss:$16 sps:$4 sm:$0xff]  }
  0x5f   :  { %6613 = vmatpush1.bf16.msra.mxu0 %v10125_v41  ;;  %7461 = vmatpush1.bf16.msra.mxu1 %v10128_v42  ;;  %v10209_v41 = vld [vmem:[%s15095_s1 + $0x4a0] ss:$16 sps:$4 sm:$0xff]   ;;  %v10212_v42 = vld [vmem:[%s15095_s1 + $0x4a8] ss:$16 sps:$4 sm:$0xff]  }
  0x60   :  { %6614 = vmatprep.subr.bf16.mxu0 %v10133_v43  ;;  %7462 = vmatprep.subr.bf16.mxu1 %v10136_v44  ;;  %v10217_v43 = vld [vmem:[%s15095_s1 + $0x4c4] ss:$16 sps:$4 sm:$0xff]   ;;  %v10220_v44 = vld [vmem:[%s15095_s1 + $0x4cc] ss:$16 sps:$4 sm:$0xff]  }
  0x63   :  { %6615 = vmatpush1.bf16.msra.mxu0 %v10131_v45  ;;  %7463 = vmatpush1.bf16.msra.mxu1 %v10134_v46  ;;  %v10215_v45 = vld [vmem:[%s15095_s1 + $0x4c0] ss:$16 sps:$4 sm:$0xff]   ;;  %v10218_v46 = vld [vmem:[%s15095_s1 + $0x4c8] ss:$16 sps:$4 sm:$0xff]  }
  0x64   :  { %6616 = vmatprep.subr.bf16.mxu0 %v10139_v47  ;;  %7464 = vmatprep.subr.bf16.mxu1 %v10142_v48  ;;  %v10223_v47 = vld [vmem:[%s15095_s1 + $0x4e4] ss:$16 sps:$4 sm:$0xff]   ;;  %v10226_v48 = vld [vmem:[%s15095_s1 + $0x4ec] ss:$16 sps:$4 sm:$0xff]  }
  0x67   :  { %6617 = vmatpush1.bf16.msra.mxu0 %v10137_v49  ;;  %7465 = vmatpush1.bf16.msra.mxu1 %v10140_v50  ;;  %v10221_v49 = vld [vmem:[%s15095_s1 + $0x4e0] ss:$16 sps:$4 sm:$0xff]   ;;  %v10224_v50 = vld [vmem:[%s15095_s1 + $0x4e8] ss:$16 sps:$4 sm:$0xff]  }
  0x68   :  { %6618 = vmatprep.subr.bf16.mxu0 %v10145_v51  ;;  %7466 = vmatprep.subr.bf16.mxu1 %v10148_v52  ;;  %v10229_v51 = vld [vmem:[%s15095_s1 + $0x504] ss:$16 sps:$4 sm:$0xff]   ;;  %v10232_v52 = vld [vmem:[%s15095_s1 + $0x50c] ss:$16 sps:$4 sm:$0xff]  }
  0x6b   :  { %6619 = vmatpush1.bf16.msra.mxu0 %v10143_v53  ;;  %7467 = vmatpush1.bf16.msra.mxu1 %v10146_v54  ;;  %v10227_v53 = vld [vmem:[%s15095_s1 + $0x500] ss:$16 sps:$4 sm:$0xff]   ;;  %v10230_v54 = vld [vmem:[%s15095_s1 + $0x508] ss:$16 sps:$4 sm:$0xff]  }
  0x6c   :  { %6620 = vmatprep.subr.bf16.mxu0 %v10151_v55  ;;  %7468 = vmatprep.subr.bf16.mxu1 %v10154_v56  ;;  %v10235_v55 = vld [vmem:[%s15095_s1 + $0x524] ss:$16 sps:$4 sm:$0xff]   ;;  %v10238_v56 = vld [vmem:[%s15095_s1 + $0x52c] ss:$16 sps:$4 sm:$0xff]  }
  0x6f   :  { %6621 = vmatpush1.bf16.msra.mxu0 %v10149_v57  ;;  %7469 = vmatpush1.bf16.msra.mxu1 %v10152_v58  ;;  %v10233_v57 = vld [vmem:[%s15095_s1 + $0x520] ss:$16 sps:$4 sm:$0xff]   ;;  %v10236_v58 = vld [vmem:[%s15095_s1 + $0x528] ss:$16 sps:$4 sm:$0xff]  }
  0x70   :  { %6622 = vmatprep.subr.bf16.mxu0 %v10157_v59  ;;  %7470 = vmatprep.subr.bf16.mxu1 %v10160_v60  ;;  %v10241_v59 = vld [vmem:[%s15095_s1 + $0x544] ss:$16 sps:$4 sm:$0xff]   ;;  %v10244_v60 = vld [vmem:[%s15095_s1 + $0x54c] ss:$16 sps:$4 sm:$0xff]  }
  0x73   :  { %6623 = vmatpush1.bf16.msra.mxu0 %v10155_v61  ;;  %7471 = vmatpush1.bf16.msra.mxu1 %v10158_v62  ;;  %v10239_v61 = vld [vmem:[%s15095_s1 + $0x540] ss:$16 sps:$4 sm:$0xff]   ;;  %v10242_v62 = vld [vmem:[%s15095_s1 + $0x548] ss:$16 sps:$4 sm:$0xff]  }
  0x74   :  { %6624 = vmatprep.subr.bf16.mxu0 %v10163_v63  ;;  %7472 = vmatprep.subr.bf16.mxu1 %v10166_v0  ;;  %v10247_v63 = vld [vmem:[%s15095_s1 + $0x564] ss:$16 sps:$4 sm:$0xff]   ;;  %v10250_v0 = vld [vmem:[%s15095_s1 + $0x56c] ss:$16 sps:$4 sm:$0xff]  }
  0x77   :  { %6625 = vmatpush1.bf16.msra.mxu0 %v10161_v1  ;;  %7473 = vmatpush1.bf16.msra.mxu1 %v10164_v2  ;;  %v10245_v1 = vld [vmem:[%s15095_s1 + $0x560] ss:$16 sps:$4 sm:$0xff]   ;;  %v10248_v2 = vld [vmem:[%s15095_s1 + $0x568] ss:$16 sps:$4 sm:$0xff]  }
  0x78   :  { %6626 = vmatprep.subr.bf16.mxu0 %v10169_v3  ;;  %7474 = vmatprep.subr.bf16.mxu1 %v10172_v4  ;;  %v10253_v3 = vld [vmem:[%s15095_s1 + $0x584] ss:$16 sps:$4 sm:$0xff]   ;;  %v10256_v4 = vld [vmem:[%s15095_s1 + $0x58c] ss:$16 sps:$4 sm:$0xff]  }
  0x7b   :  { %6627 = vmatpush1.bf16.msra.mxu0 %v10167_v5  ;;  %7475 = vmatpush1.bf16.msra.mxu1 %v10170_v6  ;;  %v10251_v5 = vld [vmem:[%s15095_s1 + $0x580] ss:$16 sps:$4 sm:$0xff]   ;;  %v10254_v6 = vld [vmem:[%s15095_s1 + $0x588] ss:$16 sps:$4 sm:$0xff]  }
  0x7c   :  { %6628 = vmatprep.subr.bf16.mxu0 %v10175_v7  ;;  %7476 = vmatprep.subr.bf16.mxu1 %v10178_v8  ;;  %v10259_v7 = vld [vmem:[%s15095_s1 + $0x5a4] ss:$16 sps:$4 sm:$0xff]   ;;  %v10262_v8 = vld [vmem:[%s15095_s1 + $0x5ac] ss:$16 sps:$4 sm:$0xff]  }
  0x7f   :  { %6629 = vmatpush1.bf16.msra.mxu0 %v10173_v9  ;;  %7477 = vmatpush1.bf16.msra.mxu1 %v10176_v10  ;;  %v10257_v9 = vld [vmem:[%s15095_s1 + $0x5a0] ss:$16 sps:$4 sm:$0xff]   ;;  %v10260_v10 = vld [vmem:[%s15095_s1 + $0x5a8] ss:$16 sps:$4 sm:$0xff]  }
  0x80   :  { %6651 = vmatprep.subr.bf16.mxu0 %v10181_v11  ;;  %7499 = vmatprep.subr.bf16.mxu1 %v10184_v12  ;;  %v10265_v11 = vld [vmem:[%s15095_s1 + $0x5c4] ss:$16 sps:$4 sm:$0xff]   ;;  %v10268_v12 = vld [vmem:[%s15095_s1 + $0x5cc] ss:$16 sps:$4 sm:$0xff]  }
  0x82   :  { %6631 = vmatmul.mubr.bf16.vlgmr.msra.gmra.mrb[0].mxu0 %v8644_v15  ;;  %7479 = vmatmul.mubr.bf16.vlgmr.msra.gmra.mrb[0].mxu1 %v8644_v15  ;;  %v10271_v15 = vld [vmem:[%s15095_s1 + $0x5e4] ss:$16 sps:$4 sm:$0xff]  }
  0x83   :  { %6652 = vmatpush1.bf16.msra.mxu0 %v10179_v13  ;;  %7500 = vmatpush1.bf16.msra.mxu1 %v10182_v14  ;;  %v10263_v13 = vld [vmem:[%s15095_s1 + $0x5c0] ss:$16 sps:$4 sm:$0xff]   ;;  %v10266_v14 = vld [vmem:[%s15095_s1 + $0x5c8] ss:$16 sps:$4 sm:$0xff]  }
  0x84   :  { %6653 = vmatprep.subr.bf16.mxu0 %v10187_v18  ;;  %7501 = vmatprep.subr.bf16.mxu1 %v10190_v19  ;;  %v10272_v18 = vld [vmem:[%s15095_s1 + $0x5e8] ss:$16 sps:$4 sm:$0xff]   ;;  %v10277_v19 = vld [vmem:[%s15095_s1 + $0x604] ss:$16 sps:$4 sm:$0xff]  }
  0x85   :  { %6640 = vmatprep.mubr.bf16.mxu0 %v8677_v20  ;;  %7488 = vmatprep.mubr.bf16.mxu1 %v8677_v20  ;;  %v10280_v20 = vld [vmem:[%s15095_s1 + $0x60c] ss:$16 sps:$4 sm:$0xff]  }
  0x87   :  { %6654 = vmatpush1.bf16.msra.mxu0 %v10185_v21  ;;  %7502 = vmatpush1.bf16.msra.mxu1 %v10188_v22  ;;  %v51_v21 = vld [vmem:[%s15096_s0 + $0x110] sm:$0xff]  ;;  %v8646_v22 = vcombine.low %v12006_v25, %v12011_v27  ;;  %v10286_v27 = vld [vmem:[%s15095_s1 + $0x62c] ss:$16 sps:$4 sm:$0xff]  }
  0x88   :  { %6655 = vmatprep.subr.bf16.mxu0 %v10193_v23  ;;  %7503 = vmatprep.subr.bf16.mxu1 %v10196_v24  ;;  %v67_v23 = vld [vmem:[%s15096_s0 + $0x190] sm:$0xff] }
  0x89   :  { %v10275_v24 = vld [vmem:[%s15095_s1 + $0x600] ss:$16 sps:$4 sm:$0xff]   ;;  %v10283_v25 = vld [vmem:[%s15095_s1 + $0x624] ss:$16 sps:$4 sm:$0xff]  }
  0x8a   :  { %6641 = vmatmul.mubr.bf16.gmra.mrb[4].mxu0 %v8676_v26  ;;  %7489 = vmatmul.mubr.bf16.gmra.mrb[4].mxu1 %v8676_v26  ;;  %v10278_v26 = vld [vmem:[%s15095_s1 + $0x608] ss:$16 sps:$4 sm:$0xff]  }
  0x8b   :  { %6656 = vmatpush1.bf16.msra.mxu0 %v10191_v28  ;;  %7504 = vmatpush1.bf16.msra.mxu1 %v10194_v29  ;;  %v8679_v28 = vcombine.high %v51_v21, %v67_v23  ;;  %v10281_v29 = vld [vmem:[%s15095_s1 + $0x620] ss:$16 sps:$4 sm:$0xff]  }
  0x8c   :  { %6657 = vmatprep.subr.bf16.mxu0 %v10199_v30  ;;  %7505 = vmatprep.subr.bf16.mxu1 %v10202_v31  ;;  %v10284_v30 = vld [vmem:[%s15095_s1 + $0x628] ss:$16 sps:$4 sm:$0xff]   ;;  %v10289_v31 = vld [vmem:[%s15095_s1 + $0x644] ss:$16 sps:$4 sm:$0xff]  }
  0x8d   :  { %6683 = vmatprep.mubr.bf16.mxu0 %v8647_v32  ;;  %7531 = vmatprep.mubr.bf16.mxu1 %v8647_v32  ;;  %v10292_v32 = vld [vmem:[%s15095_s1 + $0x64c] ss:$16 sps:$4 sm:$0xff]  }
  0x8f   :  { %6658 = vmatpush1.bf16.msra.mxu0 %v10197_v33  ;;  %7506 = vmatpush1.bf16.msra.mxu1 %v10200_v34  ;;  %v12218_v33 = vld [vmem:[%s15096_s0 + $0x18] sm:$0xff]  ;;  %v8678_v34 = vcombine.low %v51_v21, %v67_v23  ;;  %v10359_v21 = vld [vmem:[%s15095_s1 + $0x7c0] ss:$16 sps:$4 sm:$0xff]   ;;  %v10367_v23 = vld [vmem:[%s15095_s1 + $0x7e4] ss:$16 sps:$4 sm:$0xff]  }
  0x90   :  { %6659 = vmatprep.subr.bf16.mxu0 %v10205_v35  ;;  %7507 = vmatprep.subr.bf16.mxu1 %v10208_v36  ;;  %v12223_v35 = vld [vmem:[%s15096_s0 + $0x98] sm:$0xff]  ;;  %v10287_v36 = vld [vmem:[%s15095_s1 + $0x640] ss:$16 sps:$4 sm:$0xff]  }
  0x93   :  { %6660 = vmatpush1.bf16.msra.mxu0 %v10203_v37  ;;  %7508 = vmatpush1.bf16.msra.mxu1 %v10206_v38  ;;  %v10290_v37 = vld [vmem:[%s15095_s1 + $0x648] ss:$16 sps:$4 sm:$0xff]   ;;  %v10295_v38 = vld [vmem:[%s15095_s1 + $0x664] ss:$16 sps:$4 sm:$0xff]  }
  0x94   :  { %6661 = vmatprep.subr.bf16.mxu0 %v10211_v39  ;;  %7509 = vmatprep.subr.bf16.mxu1 %v10214_v40  ;;  %v10298_v39 = vld [vmem:[%s15095_s1 + $0x66c] ss:$16 sps:$4 sm:$0xff]   ;;  %v8649_v40 = vcombine.high %v12218_v33, %v12223_v35 }
  0x97   :  { %6662 = vmatpush1.bf16.msra.mxu0 %v10209_v41  ;;  %7510 = vmatpush1.bf16.msra.mxu1 %v10212_v42  ;;  %v10293_v41 = vld [vmem:[%s15095_s1 + $0x660] ss:$16 sps:$4 sm:$0xff]   ;;  %v10296_v42 = vld [vmem:[%s15095_s1 + $0x668] ss:$16 sps:$4 sm:$0xff]  }
  0x98   :  { %6663 = vmatprep.subr.bf16.mxu0 %v10217_v43  ;;  %7511 = vmatprep.subr.bf16.mxu1 %v10220_v44  ;;  %v10301_v43 = vld [vmem:[%s15095_s1 + $0x684] ss:$16 sps:$4 sm:$0xff]   ;;  %v10304_v44 = vld [vmem:[%s15095_s1 + $0x68c] ss:$16 sps:$4 sm:$0xff]  }
  0x9b   :  { %6664 = vmatpush1.bf16.msra.mxu0 %v10215_v45  ;;  %7512 = vmatpush1.bf16.msra.mxu1 %v10218_v46  ;;  %v10299_v45 = vld [vmem:[%s15095_s1 + $0x680] ss:$16 sps:$4 sm:$0xff]   ;;  %v10302_v46 = vld [vmem:[%s15095_s1 + $0x688] ss:$16 sps:$4 sm:$0xff]  }
  0x9c   :  { %6665 = vmatprep.subr.bf16.mxu0 %v10223_v47  ;;  %7513 = vmatprep.subr.bf16.mxu1 %v10226_v48  ;;  %v10307_v47 = vld [vmem:[%s15095_s1 + $0x6a4] ss:$16 sps:$4 sm:$0xff]   ;;  %v10310_v48 = vld [vmem:[%s15095_s1 + $0x6ac] ss:$16 sps:$4 sm:$0xff]  }
  0x9f   :  { %6666 = vmatpush1.bf16.msra.mxu0 %v10221_v49  ;;  %7514 = vmatpush1.bf16.msra.mxu1 %v10224_v50  ;;  %v10305_v49 = vld [vmem:[%s15095_s1 + $0x6a0] ss:$16 sps:$4 sm:$0xff]   ;;  %v10308_v50 = vld [vmem:[%s15095_s1 + $0x6a8] ss:$16 sps:$4 sm:$0xff]  }
  0xa0   :  { %6667 = vmatprep.subr.bf16.mxu0 %v10229_v51  ;;  %7515 = vmatprep.subr.bf16.mxu1 %v10232_v52  ;;  %v10313_v51 = vld [vmem:[%s15095_s1 + $0x6c4] ss:$16 sps:$4 sm:$0xff]   ;;  %v10316_v52 = vld [vmem:[%s15095_s1 + $0x6cc] ss:$16 sps:$4 sm:$0xff]  }
  0xa3   :  { %6668 = vmatpush1.bf16.msra.mxu0 %v10227_v53  ;;  %7516 = vmatpush1.bf16.msra.mxu1 %v10230_v54  ;;  %v10311_v53 = vld [vmem:[%s15095_s1 + $0x6c0] ss:$16 sps:$4 sm:$0xff]   ;;  %v10314_v54 = vld [vmem:[%s15095_s1 + $0x6c8] ss:$16 sps:$4 sm:$0xff]  }
  0xa4   :  { %6669 = vmatprep.subr.bf16.mxu0 %v10235_v55  ;;  %7517 = vmatprep.subr.bf16.mxu1 %v10238_v56  ;;  %v10319_v55 = vld [vmem:[%s15095_s1 + $0x6e4] ss:$16 sps:$4 sm:$0xff]   ;;  %v10322_v56 = vld [vmem:[%s15095_s1 + $0x6ec] ss:$16 sps:$4 sm:$0xff]  }
  0xa7   :  { %6670 = vmatpush1.bf16.msra.mxu0 %v10233_v57  ;;  %7518 = vmatpush1.bf16.msra.mxu1 %v10236_v58  ;;  %v10317_v57 = vld [vmem:[%s15095_s1 + $0x6e0] ss:$16 sps:$4 sm:$0xff]   ;;  %v10320_v58 = vld [vmem:[%s15095_s1 + $0x6e8] ss:$16 sps:$4 sm:$0xff]  }
  0xa8   :  { %6671 = vmatprep.subr.bf16.mxu0 %v10241_v59  ;;  %7519 = vmatprep.subr.bf16.mxu1 %v10244_v60  ;;  %v10325_v59 = vld [vmem:[%s15095_s1 + $0x704] ss:$16 sps:$4 sm:$0xff]   ;;  %v10328_v60 = vld [vmem:[%s15095_s1 + $0x70c] ss:$16 sps:$4 sm:$0xff]  }
  0xab   :  { %6672 = vmatpush1.bf16.msra.mxu0 %v10239_v61  ;;  %7520 = vmatpush1.bf16.msra.mxu1 %v10242_v62  ;;  %v10323_v61 = vld [vmem:[%s15095_s1 + $0x700] ss:$16 sps:$4 sm:$0xff]   ;;  %v10326_v62 = vld [vmem:[%s15095_s1 + $0x708] ss:$16 sps:$4 sm:$0xff]  }
  0xac   :  { %6673 = vmatprep.subr.bf16.mxu0 %v10247_v63  ;;  %7521 = vmatprep.subr.bf16.mxu1 %v10250_v0  ;;  %v10331_v63 = vld [vmem:[%s15095_s1 + $0x724] ss:$16 sps:$4 sm:$0xff]   ;;  %v10334_v0 = vld [vmem:[%s15095_s1 + $0x72c] ss:$16 sps:$4 sm:$0xff]  }
  0xaf   :  { %6674 = vmatpush1.bf16.msra.mxu0 %v10245_v1  ;;  %7522 = vmatpush1.bf16.msra.mxu1 %v10248_v2  ;;  %v10329_v1 = vld [vmem:[%s15095_s1 + $0x720] ss:$16 sps:$4 sm:$0xff]   ;;  %v10332_v2 = vld [vmem:[%s15095_s1 + $0x728] ss:$16 sps:$4 sm:$0xff]  }
  0xb0   :  { %6675 = vmatprep.subr.bf16.mxu0 %v10253_v3  ;;  %7523 = vmatprep.subr.bf16.mxu1 %v10256_v4  ;;  %v10337_v3 = vld [vmem:[%s15095_s1 + $0x744] ss:$16 sps:$4 sm:$0xff]   ;;  %v10340_v4 = vld [vmem:[%s15095_s1 + $0x74c] ss:$16 sps:$4 sm:$0xff]  }
  0xb3   :  { %6676 = vmatpush1.bf16.msra.mxu0 %v10251_v5  ;;  %7524 = vmatpush1.bf16.msra.mxu1 %v10254_v6  ;;  %v10335_v5 = vld [vmem:[%s15095_s1 + $0x740] ss:$16 sps:$4 sm:$0xff]   ;;  %v10338_v6 = vld [vmem:[%s15095_s1 + $0x748] ss:$16 sps:$4 sm:$0xff]  }
  0xb4   :  { %6677 = vmatprep.subr.bf16.mxu0 %v10259_v7  ;;  %7525 = vmatprep.subr.bf16.mxu1 %v10262_v8  ;;  %v10343_v7 = vld [vmem:[%s15095_s1 + $0x764] ss:$16 sps:$4 sm:$0xff]   ;;  %v10346_v8 = vld [vmem:[%s15095_s1 + $0x76c] ss:$16 sps:$4 sm:$0xff]  }
  0xb7   :  { %6678 = vmatpush1.bf16.msra.mxu0 %v10257_v9  ;;  %7526 = vmatpush1.bf16.msra.mxu1 %v10260_v10  ;;  %v10341_v9 = vld [vmem:[%s15095_s1 + $0x760] ss:$16 sps:$4 sm:$0xff]   ;;  %v10344_v10 = vld [vmem:[%s15095_s1 + $0x768] ss:$16 sps:$4 sm:$0xff]  }
  0xb8   :  { %6679 = vmatprep.subr.bf16.mxu0 %v10265_v11  ;;  %7527 = vmatprep.subr.bf16.mxu1 %v10268_v12  ;;  %v10349_v11 = vld [vmem:[%s15095_s1 + $0x784] ss:$16 sps:$4 sm:$0xff]   ;;  %v10352_v12 = vld [vmem:[%s15095_s1 + $0x78c] ss:$16 sps:$4 sm:$0xff]  }
  0xbb   :  { %6680 = vmatpush1.bf16.msra.mxu0 %v10263_v13  ;;  %7528 = vmatpush1.bf16.msra.mxu1 %v10266_v14  ;;  %v10347_v13 = vld [vmem:[%s15095_s1 + $0x780] ss:$16 sps:$4 sm:$0xff]   ;;  %v10350_v14 = vld [vmem:[%s15095_s1 + $0x788] ss:$16 sps:$4 sm:$0xff]  }
  0xbc   :  { %6681 = vmatprep.subr.bf16.mxu0 %v10271_v15  ;;  %7529 = vmatprep.subr.bf16.mxu1 %v10274_v16  ;;  %v10355_v15 = vld [vmem:[%s15095_s1 + $0x7a4] ss:$16 sps:$4 sm:$0xff]   ;;  %v10358_v16 = vld [vmem:[%s15095_s1 + $0x7ac] ss:$16 sps:$4 sm:$0xff]  }
  0xbf   :  { %6682 = vmatpush1.bf16.msra.mxu0 %v10269_v17  ;;  %7530 = vmatpush1.bf16.msra.mxu1 %v10272_v18  ;;  %v10353_v17 = vld [vmem:[%s15095_s1 + $0x7a0] ss:$16 sps:$4 sm:$0xff]   ;;  %v10356_v18 = vld [vmem:[%s15095_s1 + $0x7a8] ss:$16 sps:$4 sm:$0xff]  }
  0xc0   :  { %6704 = vmatprep.subr.bf16.mxu0 %v10277_v19  ;;  %7552 = vmatprep.subr.bf16.mxu1 %v10280_v20  ;;  %v10361_v19 = vld [vmem:[%s15095_s1 + $0x7c4] ss:$16 sps:$4 sm:$0xff]   ;;  %v10364_v20 = vld [vmem:[%s15095_s1 + $0x7cc] ss:$16 sps:$4 sm:$0xff]  }
  0xc2   :  { %6684 = vmatmul.mubr.bf16.vlgmr.msra.gmra.mrb[0].mxu0 %v8646_v22  ;;  %7532 = vmatmul.mubr.bf16.vlgmr.msra.gmra.mrb[0].mxu1 %v8646_v22  ;;  %v10362_v22 = vld [vmem:[%s15095_s1 + $0x7c8] ss:$16 sps:$4 sm:$0xff]  }
  0xc3   :  { %6705 = vmatpush1.bf16.msra.mxu0 %v10275_v24  ;;  %7553 = vmatpush1.bf16.msra.mxu1 %v10278_v26  ;;  %v10370_v24 = vld [vmem:[%s15095_s1 + $0x7ec] ss:$16 sps:$4 sm:$0xff]   ;;  %v10365_v26 = vld [vmem:[%s15095_s1 + $0x7e0] ss:$16 sps:$4 sm:$0xff]  }
  0xc4   :  { %6706 = vmatprep.subr.bf16.mxu0 %v10283_v25  ;;  %7554 = vmatprep.subr.bf16.mxu1 %v10286_v27  ;;  %v10368_v25 = vld [vmem:[%s15095_s1 + $0x7e8] ss:$16 sps:$4 sm:$0xff]   ;;  %v10373_v27 = vld [vmem:[%s15095_s1 + $0x804] ss:$16 sps:$4 sm:$0xff]  }
  0xc5   :  { %6693 = vmatprep.mubr.bf16.mxu0 %v8679_v28  ;;  %7541 = vmatprep.mubr.bf16.mxu1 %v8679_v28  ;;  %v10376_v28 = vld [vmem:[%s15095_s1 + $0x80c] ss:$16 sps:$4 sm:$0xff]  }
  0xc7   :  { %6707 = vmatpush1.bf16.msra.mxu0 %v10281_v29  ;;  %7555 = vmatpush1.bf16.msra.mxu1 %v10284_v30  ;;  %v52_v29 = vld [vmem:[%s15096_s0 + $0x118] sm:$0xff]  ;;  %v8648_v30 = vcombine.low %v12218_v33, %v12223_v35 }
  0xc8   :  { %6708 = vmatprep.subr.bf16.mxu0 %v10289_v31  ;;  %7556 = vmatprep.subr.bf16.mxu1 %v10292_v32  ;;  %v68_v31 = vld [vmem:[%s15096_s0 + $0x198] sm:$0xff]  ;;  %v10371_v32 = vld [vmem:[%s15095_s1 + $0x800] ss:$16 sps:$4 sm:$0xff]  }
  0xc9   :  { %v10382_v33 = vld [vmem:[%s15095_s1 + $0x82c] ss:$16 sps:$4 sm:$0xff]   ;;  %v8681_v35 = vcombine.high %v52_v29, %v68_v31 }
  0xca   :  { %6694 = vmatmul.mubr.bf16.gmra.mrb[4].mxu0 %v8678_v34  ;;  %7542 = vmatmul.mubr.bf16.gmra.mrb[4].mxu1 %v8678_v34  ;;  %v10374_v34 = vld [vmem:[%s15095_s1 + $0x808] ss:$16 sps:$4 sm:$0xff]  }
  0xcb   :  { %6709 = vmatpush1.bf16.msra.mxu0 %v10287_v36  ;;  %7557 = vmatpush1.bf16.msra.mxu1 %v10290_v37  ;;  %v10379_v36 = vld [vmem:[%s15095_s1 + $0x824] ss:$16 sps:$4 sm:$0xff]   ;;  %v10377_v37 = vld [vmem:[%s15095_s1 + $0x820] ss:$16 sps:$4 sm:$0xff]  }
  0xcc   :  { %6710 = vmatprep.subr.bf16.mxu0 %v10295_v38  ;;  %7558 = vmatprep.subr.bf16.mxu1 %v10298_v39  ;;  %v10380_v38 = vld [vmem:[%s15095_s1 + $0x828] ss:$16 sps:$4 sm:$0xff]   ;;  %v10385_v39 = vld [vmem:[%s15095_s1 + $0x844] ss:$16 sps:$4 sm:$0xff]  }
  0xcd   :  { %6736 = vmatprep.mubr.bf16.mxu0 %v8649_v40  ;;  %7584 = vmatprep.mubr.bf16.mxu1 %v8649_v40  ;;  %v10388_v40 = vld [vmem:[%s15095_s1 + $0x84c] ss:$16 sps:$4 sm:$0xff]  }
  0xcf   :  { %6711 = vmatpush1.bf16.msra.mxu0 %v10293_v41  ;;  %7559 = vmatpush1.bf16.msra.mxu1 %v10296_v42  ;;  %v12430_v41 = vld [vmem:[%s15096_s0 + $0x20] sm:$0xff]  ;;  %v8680_v42 = vcombine.low %v52_v29, %v68_v31 }
  0xd0   :  { %6712 = vmatprep.subr.bf16.mxu0 %v10301_v43  ;;  %7560 = vmatprep.subr.bf16.mxu1 %v10304_v44  ;;  %v12435_v43 = vld [vmem:[%s15096_s0 + $0xa0] sm:$0xff] }
  0xd1   :  { %v10383_v44 = vld [vmem:[%s15095_s1 + $0x840] ss:$16 sps:$4 sm:$0xff]   ;;  %v10463_v31 = vld [vmem:[%s15095_s1 + $0x9e4] ss:$16 sps:$4 sm:$0xff]  }
  0xd2   :  { %v10455_v29 = vld [vmem:[%s15095_s1 + $0x9c0] ss:$16 sps:$4 sm:$0xff]  }
  0xd3   :  { %6713 = vmatpush1.bf16.msra.mxu0 %v10299_v45  ;;  %7561 = vmatpush1.bf16.msra.mxu1 %v10302_v46  ;;  %v10386_v45 = vld [vmem:[%s15095_s1 + $0x848] ss:$16 sps:$4 sm:$0xff]   ;;  %v10391_v46 = vld [vmem:[%s15095_s1 + $0x864] ss:$16 sps:$4 sm:$0xff]  }
  0xd4   :  { %6714 = vmatprep.subr.bf16.mxu0 %v10307_v47  ;;  %7562 = vmatprep.subr.bf16.mxu1 %v10310_v48  ;;  %v10394_v47 = vld [vmem:[%s15095_s1 + $0x86c] ss:$16 sps:$4 sm:$0xff]   ;;  %v8651_v48 = vcombine.high %v12430_v41, %v12435_v43 }
  0xd7   :  { %6715 = vmatpush1.bf16.msra.mxu0 %v10305_v49  ;;  %7563 = vmatpush1.bf16.msra.mxu1 %v10308_v50  ;;  %v10389_v49 = vld [vmem:[%s15095_s1 + $0x860] ss:$16 sps:$4 sm:$0xff]   ;;  %v10392_v50 = vld [vmem:[%s15095_s1 + $0x868] ss:$16 sps:$4 sm:$0xff]  }
  0xd8   :  { %6716 = vmatprep.subr.bf16.mxu0 %v10313_v51  ;;  %7564 = vmatprep.subr.bf16.mxu1 %v10316_v52  ;;  %v10397_v51 = vld [vmem:[%s15095_s1 + $0x884] ss:$16 sps:$4 sm:$0xff]   ;;  %v10400_v52 = vld [vmem:[%s15095_s1 + $0x88c] ss:$16 sps:$4 sm:$0xff]  }
  0xdb   :  { %6717 = vmatpush1.bf16.msra.mxu0 %v10311_v53  ;;  %7565 = vmatpush1.bf16.msra.mxu1 %v10314_v54  ;;  %v10395_v53 = vld [vmem:[%s15095_s1 + $0x880] ss:$16 sps:$4 sm:$0xff]   ;;  %v10398_v54 = vld [vmem:[%s15095_s1 + $0x888] ss:$16 sps:$4 sm:$0xff]  }
  0xdc   :  { %6718 = vmatprep.subr.bf16.mxu0 %v10319_v55  ;;  %7566 = vmatprep.subr.bf16.mxu1 %v10322_v56  ;;  %v10403_v55 = vld [vmem:[%s15095_s1 + $0x8a4] ss:$16 sps:$4 sm:$0xff]   ;;  %v10406_v56 = vld [vmem:[%s15095_s1 + $0x8ac] ss:$16 sps:$4 sm:$0xff]  }
  0xdf   :  { %6719 = vmatpush1.bf16.msra.mxu0 %v10317_v57  ;;  %7567 = vmatpush1.bf16.msra.mxu1 %v10320_v58  ;;  %v10401_v57 = vld [vmem:[%s15095_s1 + $0x8a0] ss:$16 sps:$4 sm:$0xff]   ;;  %v10404_v58 = vld [vmem:[%s15095_s1 + $0x8a8] ss:$16 sps:$4 sm:$0xff]  }
  0xe0   :  { %6720 = vmatprep.subr.bf16.mxu0 %v10325_v59  ;;  %7568 = vmatprep.subr.bf16.mxu1 %v10328_v60  ;;  %v10409_v59 = vld [vmem:[%s15095_s1 + $0x8c4] ss:$16 sps:$4 sm:$0xff]   ;;  %v10412_v60 = vld [vmem:[%s15095_s1 + $0x8cc] ss:$16 sps:$4 sm:$0xff]  }
  0xe3   :  { %6721 = vmatpush1.bf16.msra.mxu0 %v10323_v61  ;;  %7569 = vmatpush1.bf16.msra.mxu1 %v10326_v62  ;;  %v10407_v61 = vld [vmem:[%s15095_s1 + $0x8c0] ss:$16 sps:$4 sm:$0xff]   ;;  %v10410_v62 = vld [vmem:[%s15095_s1 + $0x8c8] ss:$16 sps:$4 sm:$0xff]  }
  0xe4   :  { %6722 = vmatprep.subr.bf16.mxu0 %v10331_v63  ;;  %7570 = vmatprep.subr.bf16.mxu1 %v10334_v0  ;;  %v10415_v63 = vld [vmem:[%s15095_s1 + $0x8e4] ss:$16 sps:$4 sm:$0xff]   ;;  %v10418_v0 = vld [vmem:[%s15095_s1 + $0x8ec] ss:$16 sps:$4 sm:$0xff]  }
  0xe7   :  { %6723 = vmatpush1.bf16.msra.mxu0 %v10329_v1  ;;  %7571 = vmatpush1.bf16.msra.mxu1 %v10332_v2  ;;  %v10413_v1 = vld [vmem:[%s15095_s1 + $0x8e0] ss:$16 sps:$4 sm:$0xff]   ;;  %v10416_v2 = vld [vmem:[%s15095_s1 + $0x8e8] ss:$16 sps:$4 sm:$0xff]  }
  0xe8   :  { %6724 = vmatprep.subr.bf16.mxu0 %v10337_v3  ;;  %7572 = vmatprep.subr.bf16.mxu1 %v10340_v4  ;;  %v10421_v3 = vld [vmem:[%s15095_s1 + $0x904] ss:$16 sps:$4 sm:$0xff]   ;;  %v10424_v4 = vld [vmem:[%s15095_s1 + $0x90c] ss:$16 sps:$4 sm:$0xff]  }
  0xeb   :  { %6725 = vmatpush1.bf16.msra.mxu0 %v10335_v5  ;;  %7573 = vmatpush1.bf16.msra.mxu1 %v10338_v6  ;;  %v10419_v5 = vld [vmem:[%s15095_s1 + $0x900] ss:$16 sps:$4 sm:$0xff]   ;;  %v10422_v6 = vld [vmem:[%s15095_s1 + $0x908] ss:$16 sps:$4 sm:$0xff]  }
  0xec   :  { %6726 = vmatprep.subr.bf16.mxu0 %v10343_v7  ;;  %7574 = vmatprep.subr.bf16.mxu1 %v10346_v8  ;;  %v10427_v7 = vld [vmem:[%s15095_s1 + $0x924] ss:$16 sps:$4 sm:$0xff]   ;;  %v10430_v8 = vld [vmem:[%s15095_s1 + $0x92c] ss:$16 sps:$4 sm:$0xff]  }
  0xef   :  { %6727 = vmatpush1.bf16.msra.mxu0 %v10341_v9  ;;  %7575 = vmatpush1.bf16.msra.mxu1 %v10344_v10  ;;  %v10425_v9 = vld [vmem:[%s15095_s1 + $0x920] ss:$16 sps:$4 sm:$0xff]   ;;  %v10428_v10 = vld [vmem:[%s15095_s1 + $0x928] ss:$16 sps:$4 sm:$0xff]  }
  0xf0   :  { %6728 = vmatprep.subr.bf16.mxu0 %v10349_v11  ;;  %7576 = vmatprep.subr.bf16.mxu1 %v10352_v12  ;;  %v10433_v11 = vld [vmem:[%s15095_s1 + $0x944] ss:$16 sps:$4 sm:$0xff]   ;;  %v10436_v12 = vld [vmem:[%s15095_s1 + $0x94c] ss:$16 sps:$4 sm:$0xff]  }
  0xf3   :  { %6729 = vmatpush1.bf16.msra.mxu0 %v10347_v13  ;;  %7577 = vmatpush1.bf16.msra.mxu1 %v10350_v14  ;;  %v10431_v13 = vld [vmem:[%s15095_s1 + $0x940] ss:$16 sps:$4 sm:$0xff]   ;;  %v10434_v14 = vld [vmem:[%s15095_s1 + $0x948] ss:$16 sps:$4 sm:$0xff]  }
  0xf4   :  { %6730 = vmatprep.subr.bf16.mxu0 %v10355_v15  ;;  %7578 = vmatprep.subr.bf16.mxu1 %v10358_v16  ;;  %v10439_v15 = vld [vmem:[%s15095_s1 + $0x964] ss:$16 sps:$4 sm:$0xff]   ;;  %v10442_v16 = vld [vmem:[%s15095_s1 + $0x96c] ss:$16 sps:$4 sm:$0xff]  }
  0xf7   :  { %6731 = vmatpush1.bf16.msra.mxu0 %v10353_v17  ;;  %7579 = vmatpush1.bf16.msra.mxu1 %v10356_v18  ;;  %v10437_v17 = vld [vmem:[%s15095_s1 + $0x960] ss:$16 sps:$4 sm:$0xff]   ;;  %v10440_v18 = vld [vmem:[%s15095_s1 + $0x968] ss:$16 sps:$4 sm:$0xff]  }
  0xf8   :  { %6732 = vmatprep.subr.bf16.mxu0 %v10361_v19  ;;  %7580 = vmatprep.subr.bf16.mxu1 %v10364_v20  ;;  %v10445_v19 = vld [vmem:[%s15095_s1 + $0x984] ss:$16 sps:$4 sm:$0xff]   ;;  %v10448_v20 = vld [vmem:[%s15095_s1 + $0x98c] ss:$16 sps:$4 sm:$0xff]  }
  0xfb   :  { %6733 = vmatpush1.bf16.msra.mxu0 %v10359_v21  ;;  %7581 = vmatpush1.bf16.msra.mxu1 %v10362_v22  ;;  %v10443_v21 = vld [vmem:[%s15095_s1 + $0x980] ss:$16 sps:$4 sm:$0xff]   ;;  %v10446_v22 = vld [vmem:[%s15095_s1 + $0x988] ss:$16 sps:$4 sm:$0xff]  }
  0xfc   :  { %6734 = vmatprep.subr.bf16.mxu0 %v10367_v23  ;;  %7582 = vmatprep.subr.bf16.mxu1 %v10370_v24  ;;  %v10451_v23 = vld [vmem:[%s15095_s1 + $0x9a4] ss:$16 sps:$4 sm:$0xff]   ;;  %v10454_v24 = vld [vmem:[%s15095_s1 + $0x9ac] ss:$16 sps:$4 sm:$0xff]  }
  0xff   :  { %6735 = vmatpush1.bf16.msra.mxu0 %v10365_v26  ;;  %7583 = vmatpush1.bf16.msra.mxu1 %v10368_v25  ;;  %v10449_v26 = vld [vmem:[%s15095_s1 + $0x9a0] ss:$16 sps:$4 sm:$0xff]   ;;  %v10452_v25 = vld [vmem:[%s15095_s1 + $0x9a8] ss:$16 sps:$4 sm:$0xff]  }
 0x100   :  { %6757 = vmatprep.subr.bf16.mxu0 %v10373_v27  ;;  %7605 = vmatprep.subr.bf16.mxu1 %v10376_v28  ;;  %v10457_v27 = vld [vmem:[%s15095_s1 + $0x9c4] ss:$16 sps:$4 sm:$0xff]   ;;  %v10460_v28 = vld [vmem:[%s15095_s1 + $0x9cc] ss:$16 sps:$4 sm:$0xff]  }
 0x102   :  { %6737 = vmatmul.mubr.bf16.vlgmr.msra.gmra.mrb[0].mxu0 %v8648_v30  ;;  %7585 = vmatmul.mubr.bf16.vlgmr.msra.gmra.mrb[0].mxu1 %v8648_v30  ;;  %v10458_v30 = vld [vmem:[%s15095_s1 + $0x9c8] ss:$16 sps:$4 sm:$0xff]  }
 0x103   :  { %6758 = vmatpush1.bf16.msra.mxu0 %v10371_v32  ;;  %7606 = vmatpush1.bf16.msra.mxu1 %v10374_v34  ;;  %v10466_v32 = vld [vmem:[%s15095_s1 + $0x9ec] ss:$16 sps:$4 sm:$0xff]   ;;  %v10461_v34 = vld [vmem:[%s15095_s1 + $0x9e0] ss:$16 sps:$4 sm:$0xff]  }
 0x104   :  { %6759 = vmatprep.subr.bf16.mxu0 %v10379_v36  ;;  %7607 = vmatprep.subr.bf16.mxu1 %v10382_v33  ;;  %v10464_v36 = vld [vmem:[%s15095_s1 + $0x9e8] ss:$16 sps:$4 sm:$0xff]   ;;  %v10469_v33 = vld [vmem:[%s15095_s1 + $0xa04] ss:$16 sps:$4 sm:$0xff]  }
 0x105   :  { %6746 = vmatprep.mubr.bf16.mxu0 %v8681_v35  ;;  %7594 = vmatprep.mubr.bf16.mxu1 %v8681_v35  ;;  %v10472_v35 = vld [vmem:[%s15095_s1 + $0xa0c] ss:$16 sps:$4 sm:$0xff]  }
 0x107   :  { %6760 = vmatpush1.bf16.msra.mxu0 %v10377_v37  ;;  %7608 = vmatpush1.bf16.msra.mxu1 %v10380_v38  ;;  %v53_v37 = vld [vmem:[%s15096_s0 + $0x120] sm:$0xff] }
 0x108   :  { %6761 = vmatprep.subr.bf16.mxu0 %v10385_v39  ;;  %7609 = vmatprep.subr.bf16.mxu1 %v10388_v40  ;;  %v69_v38 = vld [vmem:[%s15096_s0 + $0x1a0] sm:$0xff]  ;;  %v8650_v39 = vcombine.low %v12430_v41, %v12435_v43  ;;  %v10478_v41 = vld [vmem:[%s15095_s1 + $0xa2c] ss:$16 sps:$4 sm:$0xff]  }
 0x109   :  { %v10467_v40 = vld [vmem:[%s15095_s1 + $0xa00] ss:$16 sps:$4 sm:$0xff]  }
 0x10a   :  { %6747 = vmatmul.mubr.bf16.gmra.mrb[4].mxu0 %v8680_v42  ;;  %7595 = vmatmul.mubr.bf16.gmra.mrb[4].mxu1 %v8680_v42  ;;  %v10470_v42 = vld [vmem:[%s15095_s1 + $0xa08] ss:$16 sps:$4 sm:$0xff]   ;;  %v10473_v43 = vld [vmem:[%s15095_s1 + $0xa20] ss:$16 sps:$4 sm:$0xff]  }
 0x10b   :  { %6762 = vmatpush1.bf16.msra.mxu0 %v10383_v44  ;;  %7610 = vmatpush1.bf16.msra.mxu1 %v10386_v45  ;;  %v10475_v44 = vld [vmem:[%s15095_s1 + $0xa24] ss:$16 sps:$4 sm:$0xff]   ;;  %v10476_v45 = vld [vmem:[%s15095_s1 + $0xa28] ss:$16 sps:$4 sm:$0xff]  }
 0x10c   :  { %6763 = vmatprep.subr.bf16.mxu0 %v10391_v46  ;;  %7611 = vmatprep.subr.bf16.mxu1 %v10394_v47  ;;  %v8683_v46 = vcombine.high %v53_v37, %v69_v38  ;;  %v10481_v47 = vld [vmem:[%s15095_s1 + $0xa44] ss:$16 sps:$4 sm:$0xff]  }
 0x10d   :  { %6789 = vmatprep.mubr.bf16.mxu0 %v8651_v48  ;;  %7637 = vmatprep.mubr.bf16.mxu1 %v8651_v48  ;;  %v10484_v48 = vld [vmem:[%s15095_s1 + $0xa4c] ss:$16 sps:$4 sm:$0xff]  }
 0x10f   :  { %6764 = vmatpush1.bf16.msra.mxu0 %v10389_v49  ;;  %7612 = vmatpush1.bf16.msra.mxu1 %v10392_v50  ;;  %v12642_v49 = vld [vmem:[%s15096_s0 + $0x28] sm:$0xff] }
 0x110   :  { %6765 = vmatprep.subr.bf16.mxu0 %v10397_v51  ;;  %7613 = vmatprep.subr.bf16.mxu1 %v10400_v52  ;;  %v12647_v50 = vld [vmem:[%s15096_s0 + $0xa8] sm:$0xff]  ;;  %v8682_v51 = vcombine.low %v53_v37, %v69_v38  ;;  %v10479_v52 = vld [vmem:[%s15095_s1 + $0xa40] ss:$16 sps:$4 sm:$0xff]  }
 0x111   :  { %v10551_v37 = vld [vmem:[%s15095_s1 + $0xbc0] ss:$16 sps:$4 sm:$0xff]   ;;  %v10554_v38 = vld [vmem:[%s15095_s1 + $0xbc8] ss:$16 sps:$4 sm:$0xff]  }
 0x113   :  { %6766 = vmatpush1.bf16.msra.mxu0 %v10395_v53  ;;  %7614 = vmatpush1.bf16.msra.mxu1 %v10398_v54  ;;  %v10482_v53 = vld [vmem:[%s15095_s1 + $0xa48] ss:$16 sps:$4 sm:$0xff]   ;;  %v10487_v54 = vld [vmem:[%s15095_s1 + $0xa64] ss:$16 sps:$4 sm:$0xff]  }
 0x114   :  { %6767 = vmatprep.subr.bf16.mxu0 %v10403_v55  ;;  %7615 = vmatprep.subr.bf16.mxu1 %v10406_v56  ;;  %v10490_v55 = vld [vmem:[%s15095_s1 + $0xa6c] ss:$16 sps:$4 sm:$0xff]   ;;  %v8653_v56 = vcombine.high %v12642_v49, %v12647_v50 }
 0x117   :  { %6768 = vmatpush1.bf16.msra.mxu0 %v10401_v57  ;;  %7616 = vmatpush1.bf16.msra.mxu1 %v10404_v58  ;;  %v10485_v57 = vld [vmem:[%s15095_s1 + $0xa60] ss:$16 sps:$4 sm:$0xff]   ;;  %v10488_v58 = vld [vmem:[%s15095_s1 + $0xa68] ss:$16 sps:$4 sm:$0xff]  }
 0x118   :  { %6769 = vmatprep.subr.bf16.mxu0 %v10409_v59  ;;  %7617 = vmatprep.subr.bf16.mxu1 %v10412_v60  ;;  %v10493_v59 = vld [vmem:[%s15095_s1 + $0xa84] ss:$16 sps:$4 sm:$0xff]   ;;  %v10496_v60 = vld [vmem:[%s15095_s1 + $0xa8c] ss:$16 sps:$4 sm:$0xff]  }
 0x11b   :  { %6770 = vmatpush1.bf16.msra.mxu0 %v10407_v61  ;;  %7618 = vmatpush1.bf16.msra.mxu1 %v10410_v62  ;;  %v10491_v61 = vld [vmem:[%s15095_s1 + $0xa80] ss:$16 sps:$4 sm:$0xff]   ;;  %v10494_v62 = vld [vmem:[%s15095_s1 + $0xa88] ss:$16 sps:$4 sm:$0xff]  }
 0x11c   :  { %6771 = vmatprep.subr.bf16.mxu0 %v10415_v63  ;;  %7619 = vmatprep.subr.bf16.mxu1 %v10418_v0  ;;  %v10499_v63 = vld [vmem:[%s15095_s1 + $0xaa4] ss:$16 sps:$4 sm:$0xff]   ;;  %v10502_v0 = vld [vmem:[%s15095_s1 + $0xaac] ss:$16 sps:$4 sm:$0xff]  }
 0x11f   :  { %6772 = vmatpush1.bf16.msra.mxu0 %v10413_v1  ;;  %7620 = vmatpush1.bf16.msra.mxu1 %v10416_v2  ;;  %v10497_v1 = vld [vmem:[%s15095_s1 + $0xaa0] ss:$16 sps:$4 sm:$0xff]   ;;  %v10500_v2 = vld [vmem:[%s15095_s1 + $0xaa8] ss:$16 sps:$4 sm:$0xff]  }
 0x120   :  { %6773 = vmatprep.subr.bf16.mxu0 %v10421_v3  ;;  %7621 = vmatprep.subr.bf16.mxu1 %v10424_v4  ;;  %v10505_v3 = vld [vmem:[%s15095_s1 + $0xac4] ss:$16 sps:$4 sm:$0xff]   ;;  %v10508_v4 = vld [vmem:[%s15095_s1 + $0xacc] ss:$16 sps:$4 sm:$0xff]  }
 0x123   :  { %6774 = vmatpush1.bf16.msra.mxu0 %v10419_v5  ;;  %7622 = vmatpush1.bf16.msra.mxu1 %v10422_v6  ;;  %v10503_v5 = vld [vmem:[%s15095_s1 + $0xac0] ss:$16 sps:$4 sm:$0xff]   ;;  %v10506_v6 = vld [vmem:[%s15095_s1 + $0xac8] ss:$16 sps:$4 sm:$0xff]  }
 0x124   :  { %6775 = vmatprep.subr.bf16.mxu0 %v10427_v7  ;;  %7623 = vmatprep.subr.bf16.mxu1 %v10430_v8  ;;  %v10511_v7 = vld [vmem:[%s15095_s1 + $0xae4] ss:$16 sps:$4 sm:$0xff]   ;;  %v10514_v8 = vld [vmem:[%s15095_s1 + $0xaec] ss:$16 sps:$4 sm:$0xff]  }
 0x127   :  { %6776 = vmatpush1.bf16.msra.mxu0 %v10425_v9  ;;  %7624 = vmatpush1.bf16.msra.mxu1 %v10428_v10  ;;  %v10509_v9 = vld [vmem:[%s15095_s1 + $0xae0] ss:$16 sps:$4 sm:$0xff]   ;;  %v10512_v10 = vld [vmem:[%s15095_s1 + $0xae8] ss:$16 sps:$4 sm:$0xff]  }
 0x128   :  { %6777 = vmatprep.subr.bf16.mxu0 %v10433_v11  ;;  %7625 = vmatprep.subr.bf16.mxu1 %v10436_v12  ;;  %v10517_v11 = vld [vmem:[%s15095_s1 + $0xb04] ss:$16 sps:$4 sm:$0xff]   ;;  %v10520_v12 = vld [vmem:[%s15095_s1 + $0xb0c] ss:$16 sps:$4 sm:$0xff]  }
 0x12b   :  { %6778 = vmatpush1.bf16.msra.mxu0 %v10431_v13  ;;  %7626 = vmatpush1.bf16.msra.mxu1 %v10434_v14  ;;  %v10515_v13 = vld [vmem:[%s15095_s1 + $0xb00] ss:$16 sps:$4 sm:$0xff]   ;;  %v10518_v14 = vld [vmem:[%s15095_s1 + $0xb08] ss:$16 sps:$4 sm:$0xff]  }
 0x12c   :  { %6779 = vmatprep.subr.bf16.mxu0 %v10439_v15  ;;  %7627 = vmatprep.subr.bf16.mxu1 %v10442_v16  ;;  %v10523_v15 = vld [vmem:[%s15095_s1 + $0xb24] ss:$16 sps:$4 sm:$0xff]   ;;  %v10526_v16 = vld [vmem:[%s15095_s1 + $0xb2c] ss:$16 sps:$4 sm:$0xff]  }
 0x12f   :  { %6780 = vmatpush1.bf16.msra.mxu0 %v10437_v17  ;;  %7628 = vmatpush1.bf16.msra.mxu1 %v10440_v18  ;;  %v10521_v17 = vld [vmem:[%s15095_s1 + $0xb20] ss:$16 sps:$4 sm:$0xff]   ;;  %v10524_v18 = vld [vmem:[%s15095_s1 + $0xb28] ss:$16 sps:$4 sm:$0xff]  }
 0x130   :  { %6781 = vmatprep.subr.bf16.mxu0 %v10445_v19  ;;  %7629 = vmatprep.subr.bf16.mxu1 %v10448_v20  ;;  %v10529_v19 = vld [vmem:[%s15095_s1 + $0xb44] ss:$16 sps:$4 sm:$0xff]   ;;  %v10532_v20 = vld [vmem:[%s15095_s1 + $0xb4c] ss:$16 sps:$4 sm:$0xff]  }
 0x133   :  { %6782 = vmatpush1.bf16.msra.mxu0 %v10443_v21  ;;  %7630 = vmatpush1.bf16.msra.mxu1 %v10446_v22  ;;  %v10527_v21 = vld [vmem:[%s15095_s1 + $0xb40] ss:$16 sps:$4 sm:$0xff]   ;;  %v10530_v22 = vld [vmem:[%s15095_s1 + $0xb48] ss:$16 sps:$4 sm:$0xff]  }
 0x134   :  { %6783 = vmatprep.subr.bf16.mxu0 %v10451_v23  ;;  %7631 = vmatprep.subr.bf16.mxu1 %v10454_v24  ;;  %v10535_v23 = vld [vmem:[%s15095_s1 + $0xb64] ss:$16 sps:$4 sm:$0xff]   ;;  %v10538_v24 = vld [vmem:[%s15095_s1 + $0xb6c] ss:$16 sps:$4 sm:$0xff]  }
 0x137   :  { %6784 = vmatpush1.bf16.msra.mxu0 %v10449_v26  ;;  %7632 = vmatpush1.bf16.msra.mxu1 %v10452_v25  ;;  %v10533_v26 = vld [vmem:[%s15095_s1 + $0xb60] ss:$16 sps:$4 sm:$0xff]   ;;  %v10536_v25 = vld [vmem:[%s15095_s1 + $0xb68] ss:$16 sps:$4 sm:$0xff]  }
 0x138   :  { %6785 = vmatprep.subr.bf16.mxu0 %v10457_v27  ;;  %7633 = vmatprep.subr.bf16.mxu1 %v10460_v28  ;;  %v10541_v27 = vld [vmem:[%s15095_s1 + $0xb84] ss:$16 sps:$4 sm:$0xff]   ;;  %v10544_v28 = vld [vmem:[%s15095_s1 + $0xb8c] ss:$16 sps:$4 sm:$0xff]  }
 0x13b   :  { %6786 = vmatpush1.bf16.msra.mxu0 %v10455_v29  ;;  %7634 = vmatpush1.bf16.msra.mxu1 %v10458_v30  ;;  %v10539_v29 = vld [vmem:[%s15095_s1 + $0xb80] ss:$16 sps:$4 sm:$0xff]   ;;  %v10542_v30 = vld [vmem:[%s15095_s1 + $0xb88] ss:$16 sps:$4 sm:$0xff]  }
 0x13c   :  { %6787 = vmatprep.subr.bf16.mxu0 %v10463_v31  ;;  %7635 = vmatprep.subr.bf16.mxu1 %v10466_v32  ;;  %v10547_v31 = vld [vmem:[%s15095_s1 + $0xba4] ss:$16 sps:$4 sm:$0xff]   ;;  %v10550_v32 = vld [vmem:[%s15095_s1 + $0xbac] ss:$16 sps:$4 sm:$0xff]  }
 0x13f   :  { %6788 = vmatpush1.bf16.msra.mxu0 %v10461_v34  ;;  %7636 = vmatpush1.bf16.msra.mxu1 %v10464_v36  ;;  %v10545_v34 = vld [vmem:[%s15095_s1 + $0xba0] ss:$16 sps:$4 sm:$0xff]   ;;  %v10548_v36 = vld [vmem:[%s15095_s1 + $0xba8] ss:$16 sps:$4 sm:$0xff]  }
 0x140   :  { %6810 = vmatprep.subr.bf16.mxu0 %v10469_v33  ;;  %7658 = vmatprep.subr.bf16.mxu1 %v10472_v35  ;;  %v10553_v33 = vld [vmem:[%s15095_s1 + $0xbc4] ss:$16 sps:$4 sm:$0xff]   ;;  %v10556_v35 = vld [vmem:[%s15095_s1 + $0xbcc] ss:$16 sps:$4 sm:$0xff]  }
 0x142   :  { %6790 = vmatmul.mubr.bf16.vlgmr.msra.gmra.mrb[0].mxu0 %v8650_v39  ;;  %7638 = vmatmul.mubr.bf16.vlgmr.msra.gmra.mrb[0].mxu1 %v8650_v39  ;;  %v10559_v39 = vld [vmem:[%s15095_s1 + $0xbe4] ss:$16 sps:$4 sm:$0xff]  }
 0x143   :  { %6811 = vmatpush1.bf16.msra.mxu0 %v10467_v40  ;;  %7659 = vmatpush1.bf16.msra.mxu1 %v10470_v42  ;;  %v10562_v40 = vld [vmem:[%s15095_s1 + $0xbec] ss:$16 sps:$4 sm:$0xff]   ;;  %v10557_v42 = vld [vmem:[%s15095_s1 + $0xbe0] ss:$16 sps:$4 sm:$0xff]  }
 0x144   :  { %6812 = vmatprep.subr.bf16.mxu0 %v10475_v44  ;;  %7660 = vmatprep.subr.bf16.mxu1 %v10478_v41  ;;  %v10560_v44 = vld [vmem:[%s15095_s1 + $0xbe8] ss:$16 sps:$4 sm:$0xff]   ;;  %v10565_v41 = vld [vmem:[%s15095_s1 + $0xc04] ss:$16 sps:$4 sm:$0xff]  }
 0x145   :  { %6799 = vmatprep.mubr.bf16.mxu0 %v8683_v46  ;;  %7647 = vmatprep.mubr.bf16.mxu1 %v8683_v46  ;;  %v70_v46 = vld [vmem:[%s15096_s0 + $0x1a8] sm:$0xff] }
 0x147   :  { %6813 = vmatpush1.bf16.msra.mxu0 %v10473_v43  ;;  %7661 = vmatpush1.bf16.msra.mxu1 %v10476_v45  ;;  %v10568_v43 = vld [vmem:[%s15095_s1 + $0xc0c] ss:$16 sps:$4 sm:$0xff]  }
 0x148   :  { %6814 = vmatprep.subr.bf16.mxu0 %v10481_v47  ;;  %7662 = vmatprep.subr.bf16.mxu1 %v10484_v48  ;;  %v54_v45 = vld [vmem:[%s15096_s0 + $0x128] sm:$0xff]  ;;  %v8652_v47 = vcombine.low %v12642_v49, %v12647_v50  ;;  %v10563_v48 = vld [vmem:[%s15095_s1 + $0xc00] ss:$16 sps:$4 sm:$0xff]  }
 0x149   :  { %v10574_v49 = vld [vmem:[%s15095_s1 + $0xc2c] ss:$16 sps:$4 sm:$0xff]   ;;  %v10569_v50 = vld [vmem:[%s15095_s1 + $0xc20] ss:$16 sps:$4 sm:$0xff]  }
 0x14a   :  { %6800 = vmatmul.mubr.bf16.gmra.mrb[4].mxu0 %v8682_v51  ;;  %7648 = vmatmul.mubr.bf16.gmra.mrb[4].mxu1 %v8682_v51  ;;  %v10566_v51 = vld [vmem:[%s15095_s1 + $0xc08] ss:$16 sps:$4 sm:$0xff]  }
 0x14b   :  { %6815 = vmatpush1.bf16.msra.mxu0 %v10479_v52  ;;  %7663 = vmatpush1.bf16.msra.mxu1 %v10482_v53  ;;  %v10571_v52 = vld [vmem:[%s15095_s1 + $0xc24] ss:$16 sps:$4 sm:$0xff]   ;;  %v10572_v53 = vld [vmem:[%s15095_s1 + $0xc28] ss:$16 sps:$4 sm:$0xff]  }
 0x14c   :  { %6816 = vmatprep.subr.bf16.mxu0 %v10487_v54  ;;  %7664 = vmatprep.subr.bf16.mxu1 %v10490_v55  ;;  %v8685_v54 = vcombine.high %v54_v45, %v70_v46  ;;  %v10577_v55 = vld [vmem:[%s15095_s1 + $0xc44] ss:$16 sps:$4 sm:$0xff]  }
 0x14d   :  { %6842 = vmatprep.mubr.bf16.mxu0 %v8653_v56  ;;  %7690 = vmatprep.mubr.bf16.mxu1 %v8653_v56  ;;  %v10580_v56 = vld [vmem:[%s15095_s1 + $0xc4c] ss:$16 sps:$4 sm:$0xff]  }
 0x14f   :  { %6817 = vmatpush1.bf16.msra.mxu0 %v10485_v57  ;;  %7665 = vmatpush1.bf16.msra.mxu1 %v10488_v58  ;;  %v12854_v57 = vld [vmem:[%s15096_s0 + $0x30] sm:$0xff] }
 0x150   :  { %6818 = vmatprep.subr.bf16.mxu0 %v10493_v59  ;;  %7666 = vmatprep.subr.bf16.mxu1 %v10496_v60  ;;  %v12859_v58 = vld [vmem:[%s15096_s0 + $0xb0] sm:$0xff]  ;;  %v8684_v59 = vcombine.low %v54_v45, %v70_v46  ;;  %v10650_v46 = vld [vmem:[%s15095_s1 + $0xdc8] ss:$16 sps:$4 sm:$0xff]  }
 0x151   :  { %v10575_v60 = vld [vmem:[%s15095_s1 + $0xc40] ss:$16 sps:$4 sm:$0xff]  }
 0x152   :  { %v10647_v45 = vld [vmem:[%s15095_s1 + $0xdc0] ss:$16 sps:$4 sm:$0xff]  }
 0x153   :  { %6819 = vmatpush1.bf16.msra.mxu0 %v10491_v61  ;;  %7667 = vmatpush1.bf16.msra.mxu1 %v10494_v62  ;;  %v10578_v61 = vld [vmem:[%s15095_s1 + $0xc48] ss:$16 sps:$4 sm:$0xff]   ;;  %v10583_v62 = vld [vmem:[%s15095_s1 + $0xc64] ss:$16 sps:$4 sm:$0xff]  }
 0x154   :  { %6820 = vmatprep.subr.bf16.mxu0 %v10499_v63  ;;  %7668 = vmatprep.subr.bf16.mxu1 %v10502_v0  ;;  %v10586_v63 = vld [vmem:[%s15095_s1 + $0xc6c] ss:$16 sps:$4 sm:$0xff]   ;;  %v8655_v0 = vcombine.high %v12854_v57, %v12859_v58 }
 0x157   :  { %6821 = vmatpush1.bf16.msra.mxu0 %v10497_v1  ;;  %7669 = vmatpush1.bf16.msra.mxu1 %v10500_v2  ;;  %v10581_v1 = vld [vmem:[%s15095_s1 + $0xc60] ss:$16 sps:$4 sm:$0xff]   ;;  %v10584_v2 = vld [vmem:[%s15095_s1 + $0xc68] ss:$16 sps:$4 sm:$0xff]  }
 0x158   :  { %6822 = vmatprep.subr.bf16.mxu0 %v10505_v3  ;;  %7670 = vmatprep.subr.bf16.mxu1 %v10508_v4  ;;  %v10589_v3 = vld [vmem:[%s15095_s1 + $0xc84] ss:$16 sps:$4 sm:$0xff]   ;;  %v10592_v4 = vld [vmem:[%s15095_s1 + $0xc8c] ss:$16 sps:$4 sm:$0xff]  }
 0x15b   :  { %6823 = vmatpush1.bf16.msra.mxu0 %v10503_v5  ;;  %7671 = vmatpush1.bf16.msra.mxu1 %v10506_v6  ;;  %v10587_v5 = vld [vmem:[%s15095_s1 + $0xc80] ss:$16 sps:$4 sm:$0xff]   ;;  %v10590_v6 = vld [vmem:[%s15095_s1 + $0xc88] ss:$16 sps:$4 sm:$0xff]  }
 0x15c   :  { %6824 = vmatprep.subr.bf16.mxu0 %v10511_v7  ;;  %7672 = vmatprep.subr.bf16.mxu1 %v10514_v8  ;;  %v10595_v7 = vld [vmem:[%s15095_s1 + $0xca4] ss:$16 sps:$4 sm:$0xff]   ;;  %v10598_v8 = vld [vmem:[%s15095_s1 + $0xcac] ss:$16 sps:$4 sm:$0xff]  }
 0x15f   :  { %6825 = vmatpush1.bf16.msra.mxu0 %v10509_v9  ;;  %7673 = vmatpush1.bf16.msra.mxu1 %v10512_v10  ;;  %v10593_v9 = vld [vmem:[%s15095_s1 + $0xca0] ss:$16 sps:$4 sm:$0xff]   ;;  %v10596_v10 = vld [vmem:[%s15095_s1 + $0xca8] ss:$16 sps:$4 sm:$0xff]  }
 0x160   :  { %6826 = vmatprep.subr.bf16.mxu0 %v10517_v11  ;;  %7674 = vmatprep.subr.bf16.mxu1 %v10520_v12  ;;  %v10601_v11 = vld [vmem:[%s15095_s1 + $0xcc4] ss:$16 sps:$4 sm:$0xff]   ;;  %v10604_v12 = vld [vmem:[%s15095_s1 + $0xccc] ss:$16 sps:$4 sm:$0xff]  }
 0x163   :  { %6827 = vmatpush1.bf16.msra.mxu0 %v10515_v13  ;;  %7675 = vmatpush1.bf16.msra.mxu1 %v10518_v14  ;;  %v10599_v13 = vld [vmem:[%s15095_s1 + $0xcc0] ss:$16 sps:$4 sm:$0xff]   ;;  %v10602_v14 = vld [vmem:[%s15095_s1 + $0xcc8] ss:$16 sps:$4 sm:$0xff]  }
 0x164   :  { %6828 = vmatprep.subr.bf16.mxu0 %v10523_v15  ;;  %7676 = vmatprep.subr.bf16.mxu1 %v10526_v16  ;;  %v10607_v15 = vld [vmem:[%s15095_s1 + $0xce4] ss:$16 sps:$4 sm:$0xff]   ;;  %v10610_v16 = vld [vmem:[%s15095_s1 + $0xcec] ss:$16 sps:$4 sm:$0xff]  }
 0x167   :  { %6829 = vmatpush1.bf16.msra.mxu0 %v10521_v17  ;;  %7677 = vmatpush1.bf16.msra.mxu1 %v10524_v18  ;;  %v10605_v17 = vld [vmem:[%s15095_s1 + $0xce0] ss:$16 sps:$4 sm:$0xff]   ;;  %v10608_v18 = vld [vmem:[%s15095_s1 + $0xce8] ss:$16 sps:$4 sm:$0xff]  }
 0x168   :  { %6830 = vmatprep.subr.bf16.mxu0 %v10529_v19  ;;  %7678 = vmatprep.subr.bf16.mxu1 %v10532_v20  ;;  %v10613_v19 = vld [vmem:[%s15095_s1 + $0xd04] ss:$16 sps:$4 sm:$0xff]   ;;  %v10616_v20 = vld [vmem:[%s15095_s1 + $0xd0c] ss:$16 sps:$4 sm:$0xff]  }
 0x16b   :  { %6831 = vmatpush1.bf16.msra.mxu0 %v10527_v21  ;;  %7679 = vmatpush1.bf16.msra.mxu1 %v10530_v22  ;;  %v10611_v21 = vld [vmem:[%s15095_s1 + $0xd00] ss:$16 sps:$4 sm:$0xff]   ;;  %v10614_v22 = vld [vmem:[%s15095_s1 + $0xd08] ss:$16 sps:$4 sm:$0xff]  }
 0x16c   :  { %6832 = vmatprep.subr.bf16.mxu0 %v10535_v23  ;;  %7680 = vmatprep.subr.bf16.mxu1 %v10538_v24  ;;  %v10619_v23 = vld [vmem:[%s15095_s1 + $0xd24] ss:$16 sps:$4 sm:$0xff]   ;;  %v10622_v24 = vld [vmem:[%s15095_s1 + $0xd2c] ss:$16 sps:$4 sm:$0xff]  }
 0x16f   :  { %6833 = vmatpush1.bf16.msra.mxu0 %v10533_v26  ;;  %7681 = vmatpush1.bf16.msra.mxu1 %v10536_v25  ;;  %v10617_v26 = vld [vmem:[%s15095_s1 + $0xd20] ss:$16 sps:$4 sm:$0xff]   ;;  %v10620_v25 = vld [vmem:[%s15095_s1 + $0xd28] ss:$16 sps:$4 sm:$0xff]  }
 0x170   :  { %6834 = vmatprep.subr.bf16.mxu0 %v10541_v27  ;;  %7682 = vmatprep.subr.bf16.mxu1 %v10544_v28  ;;  %v10625_v27 = vld [vmem:[%s15095_s1 + $0xd44] ss:$16 sps:$4 sm:$0xff]   ;;  %v10628_v28 = vld [vmem:[%s15095_s1 + $0xd4c] ss:$16 sps:$4 sm:$0xff]  }
 0x173   :  { %6835 = vmatpush1.bf16.msra.mxu0 %v10539_v29  ;;  %7683 = vmatpush1.bf16.msra.mxu1 %v10542_v30  ;;  %v10623_v29 = vld [vmem:[%s15095_s1 + $0xd40] ss:$16 sps:$4 sm:$0xff]   ;;  %v10626_v30 = vld [vmem:[%s15095_s1 + $0xd48] ss:$16 sps:$4 sm:$0xff]  }
 0x174   :  { %6836 = vmatprep.subr.bf16.mxu0 %v10547_v31  ;;  %7684 = vmatprep.subr.bf16.mxu1 %v10550_v32  ;;  %v10631_v31 = vld [vmem:[%s15095_s1 + $0xd64] ss:$16 sps:$4 sm:$0xff]   ;;  %v10634_v32 = vld [vmem:[%s15095_s1 + $0xd6c] ss:$16 sps:$4 sm:$0xff]  }
 0x177   :  { %6837 = vmatpush1.bf16.msra.mxu0 %v10545_v34  ;;  %7685 = vmatpush1.bf16.msra.mxu1 %v10548_v36  ;;  %v10629_v34 = vld [vmem:[%s15095_s1 + $0xd60] ss:$16 sps:$4 sm:$0xff]   ;;  %v10632_v36 = vld [vmem:[%s15095_s1 + $0xd68] ss:$16 sps:$4 sm:$0xff]  }
 0x178   :  { %6838 = vmatprep.subr.bf16.mxu0 %v10553_v33  ;;  %7686 = vmatprep.subr.bf16.mxu1 %v10556_v35  ;;  %v10637_v33 = vld [vmem:[%s15095_s1 + $0xd84] ss:$16 sps:$4 sm:$0xff]   ;;  %v10640_v35 = vld [vmem:[%s15095_s1 + $0xd8c] ss:$16 sps:$4 sm:$0xff]  }
 0x17b   :  { %6839 = vmatpush1.bf16.msra.mxu0 %v10551_v37  ;;  %7687 = vmatpush1.bf16.msra.mxu1 %v10554_v38  ;;  %v10635_v37 = vld [vmem:[%s15095_s1 + $0xd80] ss:$16 sps:$4 sm:$0xff]   ;;  %v10638_v38 = vld [vmem:[%s15095_s1 + $0xd88] ss:$16 sps:$4 sm:$0xff]  }
 0x17c   :  { %6840 = vmatprep.subr.bf16.mxu0 %v10559_v39  ;;  %7688 = vmatprep.subr.bf16.mxu1 %v10562_v40  ;;  %v10643_v39 = vld [vmem:[%s15095_s1 + $0xda4] ss:$16 sps:$4 sm:$0xff]   ;;  %v10646_v40 = vld [vmem:[%s15095_s1 + $0xdac] ss:$16 sps:$4 sm:$0xff]  }
 0x17f   :  { %6841 = vmatpush1.bf16.msra.mxu0 %v10557_v42  ;;  %7689 = vmatpush1.bf16.msra.mxu1 %v10560_v44  ;;  %v10641_v42 = vld [vmem:[%s15095_s1 + $0xda0] ss:$16 sps:$4 sm:$0xff]   ;;  %v10644_v44 = vld [vmem:[%s15095_s1 + $0xda8] ss:$16 sps:$4 sm:$0xff]  }
 0x180   :  { %6863 = vmatprep.subr.bf16.mxu0 %v10565_v41  ;;  %7711 = vmatprep.subr.bf16.mxu1 %v10568_v43  ;;  %v10649_v41 = vld [vmem:[%s15095_s1 + $0xdc4] ss:$16 sps:$4 sm:$0xff]   ;;  %v10652_v43 = vld [vmem:[%s15095_s1 + $0xdcc] ss:$16 sps:$4 sm:$0xff]  }
 0x182   :  { %6843 = vmatmul.mubr.bf16.vlgmr.msra.gmra.mrb[0].mxu0 %v8652_v47  ;;  %7691 = vmatmul.mubr.bf16.vlgmr.msra.gmra.mrb[0].mxu1 %v8652_v47  ;;  %v10655_v47 = vld [vmem:[%s15095_s1 + $0xde4] ss:$16 sps:$4 sm:$0xff]  }
 0x183   :  { %6864 = vmatpush1.bf16.msra.mxu0 %v10563_v48  ;;  %7712 = vmatpush1.bf16.msra.mxu1 %v10566_v51  ;;  %v10658_v48 = vld [vmem:[%s15095_s1 + $0xdec] ss:$16 sps:$4 sm:$0xff]   ;;  %v10653_v51 = vld [vmem:[%s15095_s1 + $0xde0] ss:$16 sps:$4 sm:$0xff]  }
 0x184   :  { %6865 = vmatprep.subr.bf16.mxu0 %v10571_v52  ;;  %7713 = vmatprep.subr.bf16.mxu1 %v10574_v49  ;;  %v10656_v52 = vld [vmem:[%s15095_s1 + $0xde8] ss:$16 sps:$4 sm:$0xff]   ;;  %v10661_v49 = vld [vmem:[%s15095_s1 + $0xe04] ss:$16 sps:$4 sm:$0xff]  }
 0x185   :  { %6852 = vmatprep.mubr.bf16.mxu0 %v8685_v54  ;;  %7700 = vmatprep.mubr.bf16.mxu1 %v8685_v54  ;;  %v71_v54 = vld [vmem:[%s15096_s0 + $0x1b0] sm:$0xff] }
 0x187   :  { %6866 = vmatpush1.bf16.msra.mxu0 %v10569_v50  ;;  %7714 = vmatpush1.bf16.msra.mxu1 %v10572_v53  ;;  %v10664_v50 = vld [vmem:[%s15095_s1 + $0xe0c] ss:$16 sps:$4 sm:$0xff]   ;;  %v55_v53 = vld [vmem:[%s15096_s0 + $0x130] sm:$0xff] }
 0x188   :  { %6867 = vmatprep.subr.bf16.mxu0 %v10577_v55  ;;  %7715 = vmatprep.subr.bf16.mxu1 %v10580_v56  ;;  %v8654_v55 = vcombine.low %v12854_v57, %v12859_v58  ;;  %v10659_v56 = vld [vmem:[%s15095_s1 + $0xe00] ss:$16 sps:$4 sm:$0xff]   ;;  %v10670_v57 = vld [vmem:[%s15095_s1 + $0xe2c] ss:$16 sps:$4 sm:$0xff]  }
 0x189   :  { %v10665_v58 = vld [vmem:[%s15095_s1 + $0xe20] ss:$16 sps:$4 sm:$0xff]  }
 0x18a   :  { %6853 = vmatmul.mubr.bf16.gmra.mrb[4].mxu0 %v8684_v59  ;;  %7701 = vmatmul.mubr.bf16.gmra.mrb[4].mxu1 %v8684_v59  ;;  %v10662_v59 = vld [vmem:[%s15095_s1 + $0xe08] ss:$16 sps:$4 sm:$0xff]  }
 0x18b   :  { %6868 = vmatpush1.bf16.msra.mxu0 %v10575_v60  ;;  %7716 = vmatpush1.bf16.msra.mxu1 %v10578_v61  ;;  %v10667_v60 = vld [vmem:[%s15095_s1 + $0xe24] ss:$16 sps:$4 sm:$0xff]   ;;  %v10668_v61 = vld [vmem:[%s15095_s1 + $0xe28] ss:$16 sps:$4 sm:$0xff]  }
 0x18c   :  { %6869 = vmatprep.subr.bf16.mxu0 %v10583_v62  ;;  %7717 = vmatprep.subr.bf16.mxu1 %v10586_v63  ;;  %v8687_v62 = vcombine.high %v55_v53, %v71_v54  ;;  %v10673_v63 = vld [vmem:[%s15095_s1 + $0xe44] ss:$16 sps:$4 sm:$0xff]  }
 0x18d   :  { %6895 = vmatprep.mubr.bf16.mxu0 %v8655_v0  ;;  %7743 = vmatprep.mubr.bf16.mxu1 %v8655_v0  ;;  %v10676_v0 = vld [vmem:[%s15095_s1 + $0xe4c] ss:$16 sps:$4 sm:$0xff]  }
 0x18f   :  { %6870 = vmatpush1.bf16.msra.mxu0 %v10581_v1  ;;  %7718 = vmatpush1.bf16.msra.mxu1 %v10584_v2  ;;  %v13066_v1 = vld [vmem:[%s15096_s0 + $0x38] sm:$0xff] }
 0x190   :  { %6871 = vmatprep.subr.bf16.mxu0 %v10589_v3  ;;  %7719 = vmatprep.subr.bf16.mxu1 %v10592_v4  ;;  %v13071_v2 = vld [vmem:[%s15096_s0 + $0xb8] sm:$0xff]  ;;  %v8686_v3 = vcombine.low %v55_v53, %v71_v54  ;;  %v10671_v4 = vld [vmem:[%s15095_s1 + $0xe40] ss:$16 sps:$4 sm:$0xff]  }
 0x191   :  { %v10743_v53 = vld [vmem:[%s15095_s1 + $0xfc0] ss:$16 sps:$4 sm:$0xff]   ;;  %v10746_v54 = vld [vmem:[%s15095_s1 + $0xfc8] ss:$16 sps:$4 sm:$0xff]  }
 0x193   :  { %6872 = vmatpush1.bf16.msra.mxu0 %v10587_v5  ;;  %7720 = vmatpush1.bf16.msra.mxu1 %v10590_v6  ;;  %v10674_v5 = vld [vmem:[%s15095_s1 + $0xe48] ss:$16 sps:$4 sm:$0xff]   ;;  %v10679_v6 = vld [vmem:[%s15095_s1 + $0xe64] ss:$16 sps:$4 sm:$0xff]  }
 0x194   :  { %6873 = vmatprep.subr.bf16.mxu0 %v10595_v7  ;;  %7721 = vmatprep.subr.bf16.mxu1 %v10598_v8  ;;  %v10682_v7 = vld [vmem:[%s15095_s1 + $0xe6c] ss:$16 sps:$4 sm:$0xff]   ;;  %v8657_v8 = vcombine.high %v13066_v1, %v13071_v2 }
 0x197   :  { %6874 = vmatpush1.bf16.msra.mxu0 %v10593_v9  ;;  %7722 = vmatpush1.bf16.msra.mxu1 %v10596_v10  ;;  %v10677_v9 = vld [vmem:[%s15095_s1 + $0xe60] ss:$16 sps:$4 sm:$0xff]   ;;  %v10680_v10 = vld [vmem:[%s15095_s1 + $0xe68] ss:$16 sps:$4 sm:$0xff]  }
 0x198   :  { %6875 = vmatprep.subr.bf16.mxu0 %v10601_v11  ;;  %7723 = vmatprep.subr.bf16.mxu1 %v10604_v12  ;;  %v10685_v11 = vld [vmem:[%s15095_s1 + $0xe84] ss:$16 sps:$4 sm:$0xff]   ;;  %v10688_v12 = vld [vmem:[%s15095_s1 + $0xe8c] ss:$16 sps:$4 sm:$0xff]  }
 0x19b   :  { %6876 = vmatpush1.bf16.msra.mxu0 %v10599_v13  ;;  %7724 = vmatpush1.bf16.msra.mxu1 %v10602_v14  ;;  %v10683_v13 = vld [vmem:[%s15095_s1 + $0xe80] ss:$16 sps:$4 sm:$0xff]   ;;  %v10686_v14 = vld [vmem:[%s15095_s1 + $0xe88] ss:$16 sps:$4 sm:$0xff]  }
 0x19c   :  { %6877 = vmatprep.subr.bf16.mxu0 %v10607_v15  ;;  %7725 = vmatprep.subr.bf16.mxu1 %v10610_v16  ;;  %v10691_v15 = vld [vmem:[%s15095_s1 + $0xea4] ss:$16 sps:$4 sm:$0xff]   ;;  %v10694_v16 = vld [vmem:[%s15095_s1 + $0xeac] ss:$16 sps:$4 sm:$0xff]  }
 0x19f   :  { %6878 = vmatpush1.bf16.msra.mxu0 %v10605_v17  ;;  %7726 = vmatpush1.bf16.msra.mxu1 %v10608_v18  ;;  %v10689_v17 = vld [vmem:[%s15095_s1 + $0xea0] ss:$16 sps:$4 sm:$0xff]   ;;  %v10692_v18 = vld [vmem:[%s15095_s1 + $0xea8] ss:$16 sps:$4 sm:$0xff]  }
 0x1a0   :  { %6879 = vmatprep.subr.bf16.mxu0 %v10613_v19  ;;  %7727 = vmatprep.subr.bf16.mxu1 %v10616_v20  ;;  %v10697_v19 = vld [vmem:[%s15095_s1 + $0xec4] ss:$16 sps:$4 sm:$0xff]   ;;  %v10700_v20 = vld [vmem:[%s15095_s1 + $0xecc] ss:$16 sps:$4 sm:$0xff]  }
 0x1a3   :  { %6880 = vmatpush1.bf16.msra.mxu0 %v10611_v21  ;;  %7728 = vmatpush1.bf16.msra.mxu1 %v10614_v22  ;;  %v10695_v21 = vld [vmem:[%s15095_s1 + $0xec0] ss:$16 sps:$4 sm:$0xff]   ;;  %v10698_v22 = vld [vmem:[%s15095_s1 + $0xec8] ss:$16 sps:$4 sm:$0xff]  }
 0x1a4   :  { %6881 = vmatprep.subr.bf16.mxu0 %v10619_v23  ;;  %7729 = vmatprep.subr.bf16.mxu1 %v10622_v24  ;;  %v10703_v23 = vld [vmem:[%s15095_s1 + $0xee4] ss:$16 sps:$4 sm:$0xff]   ;;  %v10706_v24 = vld [vmem:[%s15095_s1 + $0xeec] ss:$16 sps:$4 sm:$0xff]  }
 0x1a7   :  { %6882 = vmatpush1.bf16.msra.mxu0 %v10617_v26  ;;  %7730 = vmatpush1.bf16.msra.mxu1 %v10620_v25  ;;  %v10701_v26 = vld [vmem:[%s15095_s1 + $0xee0] ss:$16 sps:$4 sm:$0xff]   ;;  %v10704_v25 = vld [vmem:[%s15095_s1 + $0xee8] ss:$16 sps:$4 sm:$0xff]  }
 0x1a8   :  { %6883 = vmatprep.subr.bf16.mxu0 %v10625_v27  ;;  %7731 = vmatprep.subr.bf16.mxu1 %v10628_v28  ;;  %v10709_v27 = vld [vmem:[%s15095_s1 + $0xf04] ss:$16 sps:$4 sm:$0xff]   ;;  %v10712_v28 = vld [vmem:[%s15095_s1 + $0xf0c] ss:$16 sps:$4 sm:$0xff]  }
 0x1ab   :  { %6884 = vmatpush1.bf16.msra.mxu0 %v10623_v29  ;;  %7732 = vmatpush1.bf16.msra.mxu1 %v10626_v30  ;;  %v10707_v29 = vld [vmem:[%s15095_s1 + $0xf00] ss:$16 sps:$4 sm:$0xff]   ;;  %v10710_v30 = vld [vmem:[%s15095_s1 + $0xf08] ss:$16 sps:$4 sm:$0xff]  }
 0x1ac   :  { %6885 = vmatprep.subr.bf16.mxu0 %v10631_v31  ;;  %7733 = vmatprep.subr.bf16.mxu1 %v10634_v32  ;;  %v10715_v31 = vld [vmem:[%s15095_s1 + $0xf24] ss:$16 sps:$4 sm:$0xff]   ;;  %v10718_v32 = vld [vmem:[%s15095_s1 + $0xf2c] ss:$16 sps:$4 sm:$0xff]  }
 0x1af   :  { %6886 = vmatpush1.bf16.msra.mxu0 %v10629_v34  ;;  %7734 = vmatpush1.bf16.msra.mxu1 %v10632_v36  ;;  %v10713_v34 = vld [vmem:[%s15095_s1 + $0xf20] ss:$16 sps:$4 sm:$0xff]   ;;  %v10716_v36 = vld [vmem:[%s15095_s1 + $0xf28] ss:$16 sps:$4 sm:$0xff]  }
 0x1b0   :  { %6887 = vmatprep.subr.bf16.mxu0 %v10637_v33  ;;  %7735 = vmatprep.subr.bf16.mxu1 %v10640_v35  ;;  %v10721_v33 = vld [vmem:[%s15095_s1 + $0xf44] ss:$16 sps:$4 sm:$0xff]   ;;  %v10724_v35 = vld [vmem:[%s15095_s1 + $0xf4c] ss:$16 sps:$4 sm:$0xff]  }
 0x1b3   :  { %6888 = vmatpush1.bf16.msra.mxu0 %v10635_v37  ;;  %7736 = vmatpush1.bf16.msra.mxu1 %v10638_v38  ;;  %v10719_v37 = vld [vmem:[%s15095_s1 + $0xf40] ss:$16 sps:$4 sm:$0xff]   ;;  %v10722_v38 = vld [vmem:[%s15095_s1 + $0xf48] ss:$16 sps:$4 sm:$0xff]  }
 0x1b4   :  { %6889 = vmatprep.subr.bf16.mxu0 %v10643_v39  ;;  %7737 = vmatprep.subr.bf16.mxu1 %v10646_v40  ;;  %v10727_v39 = vld [vmem:[%s15095_s1 + $0xf64] ss:$16 sps:$4 sm:$0xff]   ;;  %v10730_v40 = vld [vmem:[%s15095_s1 + $0xf6c] ss:$16 sps:$4 sm:$0xff]  }
 0x1b7   :  { %6890 = vmatpush1.bf16.msra.mxu0 %v10641_v42  ;;  %7738 = vmatpush1.bf16.msra.mxu1 %v10644_v44  ;;  %v10725_v42 = vld [vmem:[%s15095_s1 + $0xf60] ss:$16 sps:$4 sm:$0xff]   ;;  %v10728_v44 = vld [vmem:[%s15095_s1 + $0xf68] ss:$16 sps:$4 sm:$0xff]  }
 0x1b8   :  { %6891 = vmatprep.subr.bf16.mxu0 %v10649_v41  ;;  %7739 = vmatprep.subr.bf16.mxu1 %v10652_v43  ;;  %v10733_v41 = vld [vmem:[%s15095_s1 + $0xf84] ss:$16 sps:$4 sm:$0xff]   ;;  %v10736_v43 = vld [vmem:[%s15095_s1 + $0xf8c] ss:$16 sps:$4 sm:$0xff]  }
 0x1bb   :  { %6892 = vmatpush1.bf16.msra.mxu0 %v10647_v45  ;;  %7740 = vmatpush1.bf16.msra.mxu1 %v10650_v46  ;;  %v10731_v45 = vld [vmem:[%s15095_s1 + $0xf80] ss:$16 sps:$4 sm:$0xff]   ;;  %v10734_v46 = vld [vmem:[%s15095_s1 + $0xf88] ss:$16 sps:$4 sm:$0xff]  }
 0x1bc   :  { %6893 = vmatprep.subr.bf16.mxu0 %v10655_v47  ;;  %7741 = vmatprep.subr.bf16.mxu1 %v10658_v48  ;;  %v10739_v47 = vld [vmem:[%s15095_s1 + $0xfa4] ss:$16 sps:$4 sm:$0xff]   ;;  %v10742_v48 = vld [vmem:[%s15095_s1 + $0xfac] ss:$16 sps:$4 sm:$0xff]  }
 0x1bf   :  { %6894 = vmatpush1.bf16.msra.mxu0 %v10653_v51  ;;  %7742 = vmatpush1.bf16.msra.mxu1 %v10656_v52  ;;  %v10737_v51 = vld [vmem:[%s15095_s1 + $0xfa0] ss:$16 sps:$4 sm:$0xff]   ;;  %v10740_v52 = vld [vmem:[%s15095_s1 + $0xfa8] ss:$16 sps:$4 sm:$0xff]  }
 0x1c0   :  { %6916 = vmatprep.subr.bf16.mxu0 %v10661_v49  ;;  %7764 = vmatprep.subr.bf16.mxu1 %v10664_v50  ;;  %v10745_v49 = vld [vmem:[%s15095_s1 + $0xfc4] ss:$16 sps:$4 sm:$0xff]   ;;  %v10748_v50 = vld [vmem:[%s15095_s1 + $0xfcc] ss:$16 sps:$4 sm:$0xff]  }
 0x1c2   :  { %6896 = vmatmul.mubr.bf16.vlgmr.msra.gmra.mrb[0].mxu0 %v8654_v55  ;;  %7744 = vmatmul.mubr.bf16.vlgmr.msra.gmra.mrb[0].mxu1 %v8654_v55  ;;  %v10751_v55 = vld [vmem:[%s15095_s1 + $0xfe4] ss:$16 sps:$4 sm:$0xff]  }
 0x1c3   :  { %6917 = vmatpush1.bf16.msra.mxu0 %v10659_v56  ;;  %7765 = vmatpush1.bf16.msra.mxu1 %v10662_v59  ;;  %v10754_v56 = vld [vmem:[%s15095_s1 + $0xfec] ss:$16 sps:$4 sm:$0xff]   ;;  %v10749_v59 = vld [vmem:[%s15095_s1 + $0xfe0] ss:$16 sps:$4 sm:$0xff]  }
 0x1c4   :  { %6918 = vmatprep.subr.bf16.mxu0 %v10667_v60  ;;  %7766 = vmatprep.subr.bf16.mxu1 %v10670_v57  ;;  %v10752_v60 = vld [vmem:[%s15095_s1 + $0xfe8] ss:$16 sps:$4 sm:$0xff]   ;;  %v10757_v57 = vld [vmem:[%s15095_s1 + $0x1004] ss:$16 sps:$4 sm:$0xff]  }
 0x1c5   :  { %6905 = vmatprep.mubr.bf16.mxu0 %v8687_v62  ;;  %7753 = vmatprep.mubr.bf16.mxu1 %v8687_v62  ;;  %v72_v62 = vld [vmem:[%s15096_s0 + $0x1b8] sm:$0xff] }
 0x1c7   :  { %6919 = vmatpush1.bf16.msra.mxu0 %v10665_v58  ;;  %7767 = vmatpush1.bf16.msra.mxu1 %v10668_v61  ;;  %v10760_v58 = vld [vmem:[%s15095_s1 + $0x100c] ss:$16 sps:$4 sm:$0xff]  }
 0x1c8   :  { %6920 = vmatprep.subr.bf16.mxu0 %v10673_v63  ;;  %7768 = vmatprep.subr.bf16.mxu1 %v10676_v0  ;;  %v56_v61 = vld [vmem:[%s15096_s0 + $0x138] sm:$0xff]  ;;  %v8656_v63 = vcombine.low %v13066_v1, %v13071_v2  ;;  %v10755_v0 = vld [vmem:[%s15095_s1 + $0x1000] ss:$16 sps:$4 sm:$0xff]  }
 0x1c9   :  { %v10766_v1 = vld [vmem:[%s15095_s1 + $0x102c] ss:$16 sps:$4 sm:$0xff]   ;;  %v10761_v2 = vld [vmem:[%s15095_s1 + $0x1020] ss:$16 sps:$4 sm:$0xff]  }
 0x1ca   :  { %6906 = vmatmul.mubr.bf16.gmra.mrb[4].mxu0 %v8686_v3  ;;  %7754 = vmatmul.mubr.bf16.gmra.mrb[4].mxu1 %v8686_v3  ;;  %v10758_v3 = vld [vmem:[%s15095_s1 + $0x1008] ss:$16 sps:$4 sm:$0xff]  }
 0x1cb   :  { %6921 = vmatpush1.bf16.msra.mxu0 %v10671_v4  ;;  %7769 = vmatpush1.bf16.msra.mxu1 %v10674_v5  ;;  %v10763_v4 = vld [vmem:[%s15095_s1 + $0x1024] ss:$16 sps:$4 sm:$0xff]   ;;  %v10764_v5 = vld [vmem:[%s15095_s1 + $0x1028] ss:$16 sps:$4 sm:$0xff]  }
 0x1cc   :  { %6922 = vmatprep.subr.bf16.mxu0 %v10679_v6  ;;  %7770 = vmatprep.subr.bf16.mxu1 %v10682_v7  ;;  %v8689_v6 = vcombine.high %v56_v61, %v72_v62  ;;  %v10769_v7 = vld [vmem:[%s15095_s1 + $0x1044] ss:$16 sps:$4 sm:$0xff]  }
 0x1cd   :  { %6948 = vmatprep.mubr.bf16.mxu0 %v8657_v8  ;;  %7796 = vmatprep.mubr.bf16.mxu1 %v8657_v8  ;;  %v10772_v8 = vld [vmem:[%s15095_s1 + $0x104c] ss:$16 sps:$4 sm:$0xff]  }
 0x1cf   :  { %6923 = vmatpush1.bf16.msra.mxu0 %v10677_v9  ;;  %7771 = vmatpush1.bf16.msra.mxu1 %v10680_v10  ;;  %v13278_v9 = vld [vmem:[%s15096_s0 + $0x40] sm:$0xff] }
 0x1d0   :  { %6924 = vmatprep.subr.bf16.mxu0 %v10685_v11  ;;  %7772 = vmatprep.subr.bf16.mxu1 %v10688_v12  ;;  %v13283_v10 = vld [vmem:[%s15096_s0 + $0xc0] sm:$0xff]  ;;  %v8688_v11 = vcombine.low %v56_v61, %v72_v62  ;;  %v10842_v62 = vld [vmem:[%s15095_s1 + $0x11c8] ss:$16 sps:$4 sm:$0xff]  }
 0x1d1   :  { %v10767_v12 = vld [vmem:[%s15095_s1 + $0x1040] ss:$16 sps:$4 sm:$0xff]  }
 0x1d2   :  { %v10839_v61 = vld [vmem:[%s15095_s1 + $0x11c0] ss:$16 sps:$4 sm:$0xff]  }
 0x1d3   :  { %6925 = vmatpush1.bf16.msra.mxu0 %v10683_v13  ;;  %7773 = vmatpush1.bf16.msra.mxu1 %v10686_v14  ;;  %v10770_v13 = vld [vmem:[%s15095_s1 + $0x1048] ss:$16 sps:$4 sm:$0xff]   ;;  %v10775_v14 = vld [vmem:[%s15095_s1 + $0x1064] ss:$16 sps:$4 sm:$0xff]  }
 0x1d4   :  { %6926 = vmatprep.subr.bf16.mxu0 %v10691_v15  ;;  %7774 = vmatprep.subr.bf16.mxu1 %v10694_v16  ;;  %v10778_v15 = vld [vmem:[%s15095_s1 + $0x106c] ss:$16 sps:$4 sm:$0xff]   ;;  %v8659_v16 = vcombine.high %v13278_v9, %v13283_v10 }
 0x1d7   :  { %6927 = vmatpush1.bf16.msra.mxu0 %v10689_v17  ;;  %7775 = vmatpush1.bf16.msra.mxu1 %v10692_v18  ;;  %v10773_v17 = vld [vmem:[%s15095_s1 + $0x1060] ss:$16 sps:$4 sm:$0xff]   ;;  %v10776_v18 = vld [vmem:[%s15095_s1 + $0x1068] ss:$16 sps:$4 sm:$0xff]  }
 0x1d8   :  { %6928 = vmatprep.subr.bf16.mxu0 %v10697_v19  ;;  %7776 = vmatprep.subr.bf16.mxu1 %v10700_v20  ;;  %v10781_v19 = vld [vmem:[%s15095_s1 + $0x1084] ss:$16 sps:$4 sm:$0xff]   ;;  %v10784_v20 = vld [vmem:[%s15095_s1 + $0x108c] ss:$16 sps:$4 sm:$0xff]  }
 0x1db   :  { %6929 = vmatpush1.bf16.msra.mxu0 %v10695_v21  ;;  %7777 = vmatpush1.bf16.msra.mxu1 %v10698_v22  ;;  %v10779_v21 = vld [vmem:[%s15095_s1 + $0x1080] ss:$16 sps:$4 sm:$0xff]   ;;  %v10782_v22 = vld [vmem:[%s15095_s1 + $0x1088] ss:$16 sps:$4 sm:$0xff]  }
 0x1dc   :  { %6930 = vmatprep.subr.bf16.mxu0 %v10703_v23  ;;  %7778 = vmatprep.subr.bf16.mxu1 %v10706_v24  ;;  %v10787_v23 = vld [vmem:[%s15095_s1 + $0x10a4] ss:$16 sps:$4 sm:$0xff]   ;;  %v10790_v24 = vld [vmem:[%s15095_s1 + $0x10ac] ss:$16 sps:$4 sm:$0xff]  }
 0x1df   :  { %6931 = vmatpush1.bf16.msra.mxu0 %v10701_v26  ;;  %7779 = vmatpush1.bf16.msra.mxu1 %v10704_v25  ;;  %v10785_v26 = vld [vmem:[%s15095_s1 + $0x10a0] ss:$16 sps:$4 sm:$0xff]   ;;  %v10788_v25 = vld [vmem:[%s15095_s1 + $0x10a8] ss:$16 sps:$4 sm:$0xff]  }
 0x1e0   :  { %6932 = vmatprep.subr.bf16.mxu0 %v10709_v27  ;;  %7780 = vmatprep.subr.bf16.mxu1 %v10712_v28  ;;  %v10793_v27 = vld [vmem:[%s15095_s1 + $0x10c4] ss:$16 sps:$4 sm:$0xff]   ;;  %v10796_v28 = vld [vmem:[%s15095_s1 + $0x10cc] ss:$16 sps:$4 sm:$0xff]  }
 0x1e3   :  { %6933 = vmatpush1.bf16.msra.mxu0 %v10707_v29  ;;  %7781 = vmatpush1.bf16.msra.mxu1 %v10710_v30  ;;  %v10791_v29 = vld [vmem:[%s15095_s1 + $0x10c0] ss:$16 sps:$4 sm:$0xff]   ;;  %v10794_v30 = vld [vmem:[%s15095_s1 + $0x10c8] ss:$16 sps:$4 sm:$0xff]  }
 0x1e4   :  { %6934 = vmatprep.subr.bf16.mxu0 %v10715_v31  ;;  %7782 = vmatprep.subr.bf16.mxu1 %v10718_v32  ;;  %v10799_v31 = vld [vmem:[%s15095_s1 + $0x10e4] ss:$16 sps:$4 sm:$0xff]   ;;  %v10802_v32 = vld [vmem:[%s15095_s1 + $0x10ec] ss:$16 sps:$4 sm:$0xff]  }
 0x1e7   :  { %6935 = vmatpush1.bf16.msra.mxu0 %v10713_v34  ;;  %7783 = vmatpush1.bf16.msra.mxu1 %v10716_v36  ;;  %v10797_v34 = vld [vmem:[%s15095_s1 + $0x10e0] ss:$16 sps:$4 sm:$0xff]   ;;  %v10800_v36 = vld [vmem:[%s15095_s1 + $0x10e8] ss:$16 sps:$4 sm:$0xff]  }
 0x1e8   :  { %6936 = vmatprep.subr.bf16.mxu0 %v10721_v33  ;;  %7784 = vmatprep.subr.bf16.mxu1 %v10724_v35  ;;  %v10805_v33 = vld [vmem:[%s15095_s1 + $0x1104] ss:$16 sps:$4 sm:$0xff]   ;;  %v10808_v35 = vld [vmem:[%s15095_s1 + $0x110c] ss:$16 sps:$4 sm:$0xff]  }
 0x1eb   :  { %6937 = vmatpush1.bf16.msra.mxu0 %v10719_v37  ;;  %7785 = vmatpush1.bf16.msra.mxu1 %v10722_v38  ;;  %v10803_v37 = vld [vmem:[%s15095_s1 + $0x1100] ss:$16 sps:$4 sm:$0xff]   ;;  %v10806_v38 = vld [vmem:[%s15095_s1 + $0x1108] ss:$16 sps:$4 sm:$0xff]  }
 0x1ec   :  { %6938 = vmatprep.subr.bf16.mxu0 %v10727_v39  ;;  %7786 = vmatprep.subr.bf16.mxu1 %v10730_v40  ;;  %v10811_v39 = vld [vmem:[%s15095_s1 + $0x1124] ss:$16 sps:$4 sm:$0xff]   ;;  %v10814_v40 = vld [vmem:[%s15095_s1 + $0x112c] ss:$16 sps:$4 sm:$0xff]  }
 0x1ef   :  { %6939 = vmatpush1.bf16.msra.mxu0 %v10725_v42  ;;  %7787 = vmatpush1.bf16.msra.mxu1 %v10728_v44  ;;  %v10809_v42 = vld [vmem:[%s15095_s1 + $0x1120] ss:$16 sps:$4 sm:$0xff]   ;;  %v10812_v44 = vld [vmem:[%s15095_s1 + $0x1128] ss:$16 sps:$4 sm:$0xff]  }
 0x1f0   :  { %6940 = vmatprep.subr.bf16.mxu0 %v10733_v41  ;;  %7788 = vmatprep.subr.bf16.mxu1 %v10736_v43  ;;  %v10817_v41 = vld [vmem:[%s15095_s1 + $0x1144] ss:$16 sps:$4 sm:$0xff]   ;;  %v10820_v43 = vld [vmem:[%s15095_s1 + $0x114c] ss:$16 sps:$4 sm:$0xff]  }
 0x1f3   :  { %6941 = vmatpush1.bf16.msra.mxu0 %v10731_v45  ;;  %7789 = vmatpush1.bf16.msra.mxu1 %v10734_v46  ;;  %v10815_v45 = vld [vmem:[%s15095_s1 + $0x1140] ss:$16 sps:$4 sm:$0xff]   ;;  %v10818_v46 = vld [vmem:[%s15095_s1 + $0x1148] ss:$16 sps:$4 sm:$0xff]  }
 0x1f4   :  { %6942 = vmatprep.subr.bf16.mxu0 %v10739_v47  ;;  %7790 = vmatprep.subr.bf16.mxu1 %v10742_v48  ;;  %v10823_v47 = vld [vmem:[%s15095_s1 + $0x1164] ss:$16 sps:$4 sm:$0xff]   ;;  %v10826_v48 = vld [vmem:[%s15095_s1 + $0x116c] ss:$16 sps:$4 sm:$0xff]  }
 0x1f7   :  { %6943 = vmatpush1.bf16.msra.mxu0 %v10737_v51  ;;  %7791 = vmatpush1.bf16.msra.mxu1 %v10740_v52  ;;  %v10821_v51 = vld [vmem:[%s15095_s1 + $0x1160] ss:$16 sps:$4 sm:$0xff]   ;;  %v10824_v52 = vld [vmem:[%s15095_s1 + $0x1168] ss:$16 sps:$4 sm:$0xff]  }
 0x1f8   :  { %6944 = vmatprep.subr.bf16.mxu0 %v10745_v49  ;;  %7792 = vmatprep.subr.bf16.mxu1 %v10748_v50  ;;  %v10829_v49 = vld [vmem:[%s15095_s1 + $0x1184] ss:$16 sps:$4 sm:$0xff]   ;;  %v10832_v50 = vld [vmem:[%s15095_s1 + $0x118c] ss:$16 sps:$4 sm:$0xff]  }
 0x1fb   :  { %6945 = vmatpush1.bf16.msra.mxu0 %v10743_v53  ;;  %7793 = vmatpush1.bf16.msra.mxu1 %v10746_v54  ;;  %v10827_v53 = vld [vmem:[%s15095_s1 + $0x1180] ss:$16 sps:$4 sm:$0xff]   ;;  %v10830_v54 = vld [vmem:[%s15095_s1 + $0x1188] ss:$16 sps:$4 sm:$0xff]  }
 0x1fc   :  { %6946 = vmatprep.subr.bf16.mxu0 %v10751_v55  ;;  %7794 = vmatprep.subr.bf16.mxu1 %v10754_v56  ;;  %v10835_v55 = vld [vmem:[%s15095_s1 + $0x11a4] ss:$16 sps:$4 sm:$0xff]   ;;  %v10838_v56 = vld [vmem:[%s15095_s1 + $0x11ac] ss:$16 sps:$4 sm:$0xff]  }
 0x1ff   :  { %6947 = vmatpush1.bf16.msra.mxu0 %v10749_v59  ;;  %7795 = vmatpush1.bf16.msra.mxu1 %v10752_v60  ;;  %v10833_v59 = vld [vmem:[%s15095_s1 + $0x11a0] ss:$16 sps:$4 sm:$0xff]   ;;  %v10836_v60 = vld [vmem:[%s15095_s1 + $0x11a8] ss:$16 sps:$4 sm:$0xff]  }
 0x200   :  { %6969 = vmatprep.subr.bf16.mxu0 %v10757_v57  ;;  %7817 = vmatprep.subr.bf16.mxu1 %v10760_v58  ;;  %v10841_v57 = vld [vmem:[%s15095_s1 + $0x11c4] ss:$16 sps:$4 sm:$0xff]   ;;  %v10844_v58 = vld [vmem:[%s15095_s1 + $0x11cc] ss:$16 sps:$4 sm:$0xff]  }
 0x202   :  { %6949 = vmatmul.mubr.bf16.vlgmr.msra.gmra.mrb[0].mxu0 %v8656_v63  ;;  %7797 = vmatmul.mubr.bf16.vlgmr.msra.gmra.mrb[0].mxu1 %v8656_v63  ;;  %v10847_v63 = vld [vmem:[%s15095_s1 + $0x11e4] ss:$16 sps:$4 sm:$0xff]  }
 0x203   :  { %6970 = vmatpush1.bf16.msra.mxu0 %v10755_v0  ;;  %7818 = vmatpush1.bf16.msra.mxu1 %v10758_v3  ;;  %v10850_v0 = vld [vmem:[%s15095_s1 + $0x11ec] ss:$16 sps:$4 sm:$0xff]   ;;  %v10845_v3 = vld [vmem:[%s15095_s1 + $0x11e0] ss:$16 sps:$4 sm:$0xff]  }
 0x204   :  { %6971 = vmatprep.subr.bf16.mxu0 %v10763_v4  ;;  %7819 = vmatprep.subr.bf16.mxu1 %v10766_v1  ;;  %v10848_v4 = vld [vmem:[%s15095_s1 + $0x11e8] ss:$16 sps:$4 sm:$0xff]   ;;  %v10853_v1 = vld [vmem:[%s15095_s1 + $0x1204] ss:$16 sps:$4 sm:$0xff]  }
 0x205   :  { %6958 = vmatprep.mubr.bf16.mxu0 %v8689_v6  ;;  %7806 = vmatprep.mubr.bf16.mxu1 %v8689_v6  ;;  %v73_v6 = vld [vmem:[%s15096_s0 + $0x1c0] sm:$0xff] }
 0x207   :  { %6972 = vmatpush1.bf16.msra.mxu0 %v10761_v2  ;;  %7820 = vmatpush1.bf16.msra.mxu1 %v10764_v5  ;;  %v10856_v2 = vld [vmem:[%s15095_s1 + $0x120c] ss:$16 sps:$4 sm:$0xff]   ;;  %v57_v5 = vld [vmem:[%s15096_s0 + $0x140] sm:$0xff] }
 0x208   :  { %6973 = vmatprep.subr.bf16.mxu0 %v10769_v7  ;;  %7821 = vmatprep.subr.bf16.mxu1 %v10772_v8  ;;  %v8658_v7 = vcombine.low %v13278_v9, %v13283_v10  ;;  %v10851_v8 = vld [vmem:[%s15095_s1 + $0x1200] ss:$16 sps:$4 sm:$0xff]   ;;  %v10862_v9 = vld [vmem:[%s15095_s1 + $0x122c] ss:$16 sps:$4 sm:$0xff]  }
 0x209   :  { %v10857_v10 = vld [vmem:[%s15095_s1 + $0x1220] ss:$16 sps:$4 sm:$0xff]  }
 0x20a   :  { %6959 = vmatmul.mubr.bf16.gmra.mrb[4].mxu0 %v8688_v11  ;;  %7807 = vmatmul.mubr.bf16.gmra.mrb[4].mxu1 %v8688_v11  ;;  %v10854_v11 = vld [vmem:[%s15095_s1 + $0x1208] ss:$16 sps:$4 sm:$0xff]  }
 0x20b   :  { %6974 = vmatpush1.bf16.msra.mxu0 %v10767_v12  ;;  %7822 = vmatpush1.bf16.msra.mxu1 %v10770_v13  ;;  %v10859_v12 = vld [vmem:[%s15095_s1 + $0x1224] ss:$16 sps:$4 sm:$0xff]   ;;  %v10860_v13 = vld [vmem:[%s15095_s1 + $0x1228] ss:$16 sps:$4 sm:$0xff]  }
 0x20c   :  { %6975 = vmatprep.subr.bf16.mxu0 %v10775_v14  ;;  %7823 = vmatprep.subr.bf16.mxu1 %v10778_v15  ;;  %v8691_v14 = vcombine.high %v57_v5, %v73_v6  ;;  %v10865_v15 = vld [vmem:[%s15095_s1 + $0x1244] ss:$16 sps:$4 sm:$0xff]  }
 0x20d   :  { %7001 = vmatprep.mubr.bf16.mxu0 %v8659_v16  ;;  %7849 = vmatprep.mubr.bf16.mxu1 %v8659_v16  ;;  %v10868_v16 = vld [vmem:[%s15095_s1 + $0x124c] ss:$16 sps:$4 sm:$0xff]  }
 0x20f   :  { %6976 = vmatpush1.bf16.msra.mxu0 %v10773_v17  ;;  %7824 = vmatpush1.bf16.msra.mxu1 %v10776_v18  ;;  %v13490_v17 = vld [vmem:[%s15096_s0 + $0x48] sm:$0xff] }
 0x210   :  { %6977 = vmatprep.subr.bf16.mxu0 %v10781_v19  ;;  %7825 = vmatprep.subr.bf16.mxu1 %v10784_v20  ;;  %v13495_v18 = vld [vmem:[%s15096_s0 + $0xc8] sm:$0xff]  ;;  %v8690_v19 = vcombine.low %v57_v5, %v73_v6  ;;  %v10863_v20 = vld [vmem:[%s15095_s1 + $0x1240] ss:$16 sps:$4 sm:$0xff]  }
 0x211   :  { %v10935_v5 = vld [vmem:[%s15095_s1 + $0x13c0] ss:$16 sps:$4 sm:$0xff]   ;;  %v10938_v6 = vld [vmem:[%s15095_s1 + $0x13c8] ss:$16 sps:$4 sm:$0xff]  }
 0x213   :  { %6978 = vmatpush1.bf16.msra.mxu0 %v10779_v21  ;;  %7826 = vmatpush1.bf16.msra.mxu1 %v10782_v22  ;;  %v10866_v21 = vld [vmem:[%s15095_s1 + $0x1248] ss:$16 sps:$4 sm:$0xff]   ;;  %v10871_v22 = vld [vmem:[%s15095_s1 + $0x1264] ss:$16 sps:$4 sm:$0xff]  }
 0x214   :  { %6979 = vmatprep.subr.bf16.mxu0 %v10787_v23  ;;  %7827 = vmatprep.subr.bf16.mxu1 %v10790_v24  ;;  %v10874_v23 = vld [vmem:[%s15095_s1 + $0x126c] ss:$16 sps:$4 sm:$0xff]   ;;  %v8661_v24 = vcombine.high %v13490_v17, %v13495_v18 }
 0x217   :  { %6980 = vmatpush1.bf16.msra.mxu0 %v10785_v26  ;;  %7828 = vmatpush1.bf16.msra.mxu1 %v10788_v25  ;;  %v10869_v26 = vld [vmem:[%s15095_s1 + $0x1260] ss:$16 sps:$4 sm:$0xff]   ;;  %v10872_v25 = vld [vmem:[%s15095_s1 + $0x1268] ss:$16 sps:$4 sm:$0xff]  }
 0x218   :  { %6981 = vmatprep.subr.bf16.mxu0 %v10793_v27  ;;  %7829 = vmatprep.subr.bf16.mxu1 %v10796_v28  ;;  %v10877_v27 = vld [vmem:[%s15095_s1 + $0x1284] ss:$16 sps:$4 sm:$0xff]   ;;  %v10880_v28 = vld [vmem:[%s15095_s1 + $0x128c] ss:$16 sps:$4 sm:$0xff]  }
 0x21b   :  { %6982 = vmatpush1.bf16.msra.mxu0 %v10791_v29  ;;  %7830 = vmatpush1.bf16.msra.mxu1 %v10794_v30  ;;  %v10875_v29 = vld [vmem:[%s15095_s1 + $0x1280] ss:$16 sps:$4 sm:$0xff]   ;;  %v10878_v30 = vld [vmem:[%s15095_s1 + $0x1288] ss:$16 sps:$4 sm:$0xff]  }
 0x21c   :  { %6983 = vmatprep.subr.bf16.mxu0 %v10799_v31  ;;  %7831 = vmatprep.subr.bf16.mxu1 %v10802_v32  ;;  %v10883_v31 = vld [vmem:[%s15095_s1 + $0x12a4] ss:$16 sps:$4 sm:$0xff]   ;;  %v10886_v32 = vld [vmem:[%s15095_s1 + $0x12ac] ss:$16 sps:$4 sm:$0xff]  }
 0x21f   :  { %6984 = vmatpush1.bf16.msra.mxu0 %v10797_v34  ;;  %7832 = vmatpush1.bf16.msra.mxu1 %v10800_v36  ;;  %v10881_v34 = vld [vmem:[%s15095_s1 + $0x12a0] ss:$16 sps:$4 sm:$0xff]   ;;  %v10884_v36 = vld [vmem:[%s15095_s1 + $0x12a8] ss:$16 sps:$4 sm:$0xff]  }
 0x220   :  { %6985 = vmatprep.subr.bf16.mxu0 %v10805_v33  ;;  %7833 = vmatprep.subr.bf16.mxu1 %v10808_v35  ;;  %v10889_v33 = vld [vmem:[%s15095_s1 + $0x12c4] ss:$16 sps:$4 sm:$0xff]   ;;  %v10892_v35 = vld [vmem:[%s15095_s1 + $0x12cc] ss:$16 sps:$4 sm:$0xff]  }
 0x223   :  { %6986 = vmatpush1.bf16.msra.mxu0 %v10803_v37  ;;  %7834 = vmatpush1.bf16.msra.mxu1 %v10806_v38  ;;  %v10887_v37 = vld [vmem:[%s15095_s1 + $0x12c0] ss:$16 sps:$4 sm:$0xff]   ;;  %v10890_v38 = vld [vmem:[%s15095_s1 + $0x12c8] ss:$16 sps:$4 sm:$0xff]  }
 0x224   :  { %6987 = vmatprep.subr.bf16.mxu0 %v10811_v39  ;;  %7835 = vmatprep.subr.bf16.mxu1 %v10814_v40  ;;  %v10895_v39 = vld [vmem:[%s15095_s1 + $0x12e4] ss:$16 sps:$4 sm:$0xff]   ;;  %v10898_v40 = vld [vmem:[%s15095_s1 + $0x12ec] ss:$16 sps:$4 sm:$0xff]  }
 0x227   :  { %6988 = vmatpush1.bf16.msra.mxu0 %v10809_v42  ;;  %7836 = vmatpush1.bf16.msra.mxu1 %v10812_v44  ;;  %v10893_v42 = vld [vmem:[%s15095_s1 + $0x12e0] ss:$16 sps:$4 sm:$0xff]   ;;  %v10896_v44 = vld [vmem:[%s15095_s1 + $0x12e8] ss:$16 sps:$4 sm:$0xff]  }
 0x228   :  { %6989 = vmatprep.subr.bf16.mxu0 %v10817_v41  ;;  %7837 = vmatprep.subr.bf16.mxu1 %v10820_v43  ;;  %v10901_v41 = vld [vmem:[%s15095_s1 + $0x1304] ss:$16 sps:$4 sm:$0xff]   ;;  %v10904_v43 = vld [vmem:[%s15095_s1 + $0x130c] ss:$16 sps:$4 sm:$0xff]  }
 0x22b   :  { %6990 = vmatpush1.bf16.msra.mxu0 %v10815_v45  ;;  %7838 = vmatpush1.bf16.msra.mxu1 %v10818_v46  ;;  %v10899_v45 = vld [vmem:[%s15095_s1 + $0x1300] ss:$16 sps:$4 sm:$0xff]   ;;  %v10902_v46 = vld [vmem:[%s15095_s1 + $0x1308] ss:$16 sps:$4 sm:$0xff]  }
 0x22c   :  { %6991 = vmatprep.subr.bf16.mxu0 %v10823_v47  ;;  %7839 = vmatprep.subr.bf16.mxu1 %v10826_v48  ;;  %v10907_v47 = vld [vmem:[%s15095_s1 + $0x1324] ss:$16 sps:$4 sm:$0xff]   ;;  %v10910_v48 = vld [vmem:[%s15095_s1 + $0x132c] ss:$16 sps:$4 sm:$0xff]  }
 0x22f   :  { %6992 = vmatpush1.bf16.msra.mxu0 %v10821_v51  ;;  %7840 = vmatpush1.bf16.msra.mxu1 %v10824_v52  ;;  %v10905_v51 = vld [vmem:[%s15095_s1 + $0x1320] ss:$16 sps:$4 sm:$0xff]   ;;  %v10908_v52 = vld [vmem:[%s15095_s1 + $0x1328] ss:$16 sps:$4 sm:$0xff]  }
 0x230   :  { %6993 = vmatprep.subr.bf16.mxu0 %v10829_v49  ;;  %7841 = vmatprep.subr.bf16.mxu1 %v10832_v50  ;;  %v10913_v49 = vld [vmem:[%s15095_s1 + $0x1344] ss:$16 sps:$4 sm:$0xff]   ;;  %v10916_v50 = vld [vmem:[%s15095_s1 + $0x134c] ss:$16 sps:$4 sm:$0xff]  }
 0x233   :  { %6994 = vmatpush1.bf16.msra.mxu0 %v10827_v53  ;;  %7842 = vmatpush1.bf16.msra.mxu1 %v10830_v54  ;;  %v10911_v53 = vld [vmem:[%s15095_s1 + $0x1340] ss:$16 sps:$4 sm:$0xff]   ;;  %v10914_v54 = vld [vmem:[%s15095_s1 + $0x1348] ss:$16 sps:$4 sm:$0xff]  }
 0x234   :  { %6995 = vmatprep.subr.bf16.mxu0 %v10835_v55  ;;  %7843 = vmatprep.subr.bf16.mxu1 %v10838_v56  ;;  %v10919_v55 = vld [vmem:[%s15095_s1 + $0x1364] ss:$16 sps:$4 sm:$0xff]   ;;  %v10922_v56 = vld [vmem:[%s15095_s1 + $0x136c] ss:$16 sps:$4 sm:$0xff]  }
 0x237   :  { %6996 = vmatpush1.bf16.msra.mxu0 %v10833_v59  ;;  %7844 = vmatpush1.bf16.msra.mxu1 %v10836_v60  ;;  %v10917_v59 = vld [vmem:[%s15095_s1 + $0x1360] ss:$16 sps:$4 sm:$0xff]   ;;  %v10920_v60 = vld [vmem:[%s15095_s1 + $0x1368] ss:$16 sps:$4 sm:$0xff]  }
 0x238   :  { %6997 = vmatprep.subr.bf16.mxu0 %v10841_v57  ;;  %7845 = vmatprep.subr.bf16.mxu1 %v10844_v58  ;;  %v10925_v57 = vld [vmem:[%s15095_s1 + $0x1384] ss:$16 sps:$4 sm:$0xff]   ;;  %v10928_v58 = vld [vmem:[%s15095_s1 + $0x138c] ss:$16 sps:$4 sm:$0xff]  }
 0x23b   :  { %6998 = vmatpush1.bf16.msra.mxu0 %v10839_v61  ;;  %7846 = vmatpush1.bf16.msra.mxu1 %v10842_v62  ;;  %v10923_v61 = vld [vmem:[%s15095_s1 + $0x1380] ss:$16 sps:$4 sm:$0xff]   ;;  %v10926_v62 = vld [vmem:[%s15095_s1 + $0x1388] ss:$16 sps:$4 sm:$0xff]  }
 0x23c   :  { %6999 = vmatprep.subr.bf16.mxu0 %v10847_v63  ;;  %7847 = vmatprep.subr.bf16.mxu1 %v10850_v0  ;;  %v10931_v63 = vld [vmem:[%s15095_s1 + $0x13a4] ss:$16 sps:$4 sm:$0xff]   ;;  %v10934_v0 = vld [vmem:[%s15095_s1 + $0x13ac] ss:$16 sps:$4 sm:$0xff]  }
 0x23f   :  { %7000 = vmatpush1.bf16.msra.mxu0 %v10845_v3  ;;  %7848 = vmatpush1.bf16.msra.mxu1 %v10848_v4  ;;  %v10929_v3 = vld [vmem:[%s15095_s1 + $0x13a0] ss:$16 sps:$4 sm:$0xff]   ;;  %v10932_v4 = vld [vmem:[%s15095_s1 + $0x13a8] ss:$16 sps:$4 sm:$0xff]  }
 0x240   :  { %7022 = vmatprep.subr.bf16.mxu0 %v10853_v1  ;;  %7870 = vmatprep.subr.bf16.mxu1 %v10856_v2  ;;  %v10937_v1 = vld [vmem:[%s15095_s1 + $0x13c4] ss:$16 sps:$4 sm:$0xff]   ;;  %v10940_v2 = vld [vmem:[%s15095_s1 + $0x13cc] ss:$16 sps:$4 sm:$0xff]  }
 0x242   :  { %7002 = vmatmul.mubr.bf16.vlgmr.msra.gmra.mrb[0].mxu0 %v8658_v7  ;;  %7850 = vmatmul.mubr.bf16.vlgmr.msra.gmra.mrb[0].mxu1 %v8658_v7  ;;  %v10943_v7 = vld [vmem:[%s15095_s1 + $0x13e4] ss:$16 sps:$4 sm:$0xff]  }
 0x243   :  { %7023 = vmatpush1.bf16.msra.mxu0 %v10851_v8  ;;  %7871 = vmatpush1.bf16.msra.mxu1 %v10854_v11  ;;  %v10946_v8 = vld [vmem:[%s15095_s1 + $0x13ec] ss:$16 sps:$4 sm:$0xff]   ;;  %v10941_v11 = vld [vmem:[%s15095_s1 + $0x13e0] ss:$16 sps:$4 sm:$0xff]  }
 0x244   :  { %7024 = vmatprep.subr.bf16.mxu0 %v10859_v12  ;;  %7872 = vmatprep.subr.bf16.mxu1 %v10862_v9  ;;  %v10944_v12 = vld [vmem:[%s15095_s1 + $0x13e8] ss:$16 sps:$4 sm:$0xff]   ;;  %v10949_v9 = vld [vmem:[%s15095_s1 + $0x1404] ss:$16 sps:$4 sm:$0xff]  }
 0x245   :  { %7011 = vmatprep.mubr.bf16.mxu0 %v8691_v14  ;;  %7859 = vmatprep.mubr.bf16.mxu1 %v8691_v14  ;;  %v58_v14 = vld [vmem:[%s15096_s0 + $0x148] sm:$0xff] }
 0x247   :  { %7025 = vmatpush1.bf16.msra.mxu0 %v10857_v10  ;;  %7873 = vmatpush1.bf16.msra.mxu1 %v10860_v13  ;;  %v10952_v10 = vld [vmem:[%s15095_s1 + $0x140c] ss:$16 sps:$4 sm:$0xff]   ;;  %v8660_v13 = vcombine.low %v13490_v17, %v13495_v18  ;;  %v10955_v17 = vld [vmem:[%s15095_s1 + $0x1424] ss:$16 sps:$4 sm:$0xff]  }
 0x248   :  { %7026 = vmatprep.subr.bf16.mxu0 %v10865_v15  ;;  %7874 = vmatprep.subr.bf16.mxu1 %v10868_v16  ;;  %v74_v15 = vld [vmem:[%s15096_s0 + $0x1c8] sm:$0xff]  ;;  %v10947_v16 = vld [vmem:[%s15095_s1 + $0x1400] ss:$16 sps:$4 sm:$0xff]  }
 0x249   :  { %v10958_v18 = vld [vmem:[%s15095_s1 + $0x142c] ss:$16 sps:$4 sm:$0xff]  }
 0x24a   :  { %7012 = vmatmul.mubr.bf16.gmra.mrb[4].mxu0 %v8690_v19  ;;  %7860 = vmatmul.mubr.bf16.gmra.mrb[4].mxu1 %v8690_v19  ;;  %v10950_v19 = vld [vmem:[%s15095_s1 + $0x1408] ss:$16 sps:$4 sm:$0xff]  }
 0x24b   :  { %7027 = vmatpush1.bf16.msra.mxu0 %v10863_v20  ;;  %7875 = vmatpush1.bf16.msra.mxu1 %v10866_v21  ;;  %v8693_v20 = vcombine.high %v58_v14, %v74_v15  ;;  %v10953_v21 = vld [vmem:[%s15095_s1 + $0x1420] ss:$16 sps:$4 sm:$0xff]  }
 0x24c   :  { %7028 = vmatprep.subr.bf16.mxu0 %v10871_v22  ;;  %7876 = vmatprep.subr.bf16.mxu1 %v10874_v23  ;;  %v10956_v22 = vld [vmem:[%s15095_s1 + $0x1428] ss:$16 sps:$4 sm:$0xff]   ;;  %v10961_v23 = vld [vmem:[%s15095_s1 + $0x1444] ss:$16 sps:$4 sm:$0xff]  }
 0x24d   :  { %7054 = vmatprep.mubr.bf16.mxu0 %v8661_v24  ;;  %7902 = vmatprep.mubr.bf16.mxu1 %v8661_v24  ;;  %v10964_v24 = vld [vmem:[%s15095_s1 + $0x144c] ss:$16 sps:$4 sm:$0xff]  }
 0x24f   :  { %7029 = vmatpush1.bf16.msra.mxu0 %v10869_v26  ;;  %7877 = vmatpush1.bf16.msra.mxu1 %v10872_v25  ;;  %v8692_v26 = vcombine.low %v58_v14, %v74_v15  ;;  %v13702_v25 = vld [vmem:[%s15096_s0 + $0x50] sm:$0xff]  ;;  %v11034_v14 = vld [vmem:[%s15095_s1 + $0x15c8] ss:$16 sps:$4 sm:$0xff]  }
 0x250   :  { %7030 = vmatprep.subr.bf16.mxu0 %v10877_v27  ;;  %7878 = vmatprep.subr.bf16.mxu1 %v10880_v28  ;;  %v13707_v27 = vld [vmem:[%s15096_s0 + $0xd0] sm:$0xff] }
 0x251   :  { %v10959_v28 = vld [vmem:[%s15095_s1 + $0x1440] ss:$16 sps:$4 sm:$0xff]   ;;  %v11039_v15 = vld [vmem:[%s15095_s1 + $0x15e4] ss:$16 sps:$4 sm:$0xff]  }
 0x253   :  { %7031 = vmatpush1.bf16.msra.mxu0 %v10875_v29  ;;  %7879 = vmatpush1.bf16.msra.mxu1 %v10878_v30  ;;  %v10962_v29 = vld [vmem:[%s15095_s1 + $0x1448] ss:$16 sps:$4 sm:$0xff]   ;;  %v10967_v30 = vld [vmem:[%s15095_s1 + $0x1464] ss:$16 sps:$4 sm:$0xff]  }
 0x254   :  { %7032 = vmatprep.subr.bf16.mxu0 %v10883_v31  ;;  %7880 = vmatprep.subr.bf16.mxu1 %v10886_v32  ;;  %v10970_v31 = vld [vmem:[%s15095_s1 + $0x146c] ss:$16 sps:$4 sm:$0xff]   ;;  %v8663_v32 = vcombine.high %v13702_v25, %v13707_v27 }
 0x257   :  { %7033 = vmatpush1.bf16.msra.mxu0 %v10881_v34  ;;  %7881 = vmatpush1.bf16.msra.mxu1 %v10884_v36  ;;  %v10965_v34 = vld [vmem:[%s15095_s1 + $0x1460] ss:$16 sps:$4 sm:$0xff]   ;;  %v10968_v36 = vld [vmem:[%s15095_s1 + $0x1468] ss:$16 sps:$4 sm:$0xff]  }
 0x258   :  { %7034 = vmatprep.subr.bf16.mxu0 %v10889_v33  ;;  %7882 = vmatprep.subr.bf16.mxu1 %v10892_v35  ;;  %v10973_v33 = vld [vmem:[%s15095_s1 + $0x1484] ss:$16 sps:$4 sm:$0xff]   ;;  %v10976_v35 = vld [vmem:[%s15095_s1 + $0x148c] ss:$16 sps:$4 sm:$0xff]  }
 0x25b   :  { %7035 = vmatpush1.bf16.msra.mxu0 %v10887_v37  ;;  %7883 = vmatpush1.bf16.msra.mxu1 %v10890_v38  ;;  %v10971_v37 = vld [vmem:[%s15095_s1 + $0x1480] ss:$16 sps:$4 sm:$0xff]   ;;  %v10974_v38 = vld [vmem:[%s15095_s1 + $0x1488] ss:$16 sps:$4 sm:$0xff]  }
 0x25c   :  { %7036 = vmatprep.subr.bf16.mxu0 %v10895_v39  ;;  %7884 = vmatprep.subr.bf16.mxu1 %v10898_v40  ;;  %v10979_v39 = vld [vmem:[%s15095_s1 + $0x14a4] ss:$16 sps:$4 sm:$0xff]   ;;  %v10982_v40 = vld [vmem:[%s15095_s1 + $0x14ac] ss:$16 sps:$4 sm:$0xff]  }
 0x25f   :  { %7037 = vmatpush1.bf16.msra.mxu0 %v10893_v42  ;;  %7885 = vmatpush1.bf16.msra.mxu1 %v10896_v44  ;;  %v10977_v42 = vld [vmem:[%s15095_s1 + $0x14a0] ss:$16 sps:$4 sm:$0xff]   ;;  %v10980_v44 = vld [vmem:[%s15095_s1 + $0x14a8] ss:$16 sps:$4 sm:$0xff]  }
 0x260   :  { %7038 = vmatprep.subr.bf16.mxu0 %v10901_v41  ;;  %7886 = vmatprep.subr.bf16.mxu1 %v10904_v43  ;;  %v10985_v41 = vld [vmem:[%s15095_s1 + $0x14c4] ss:$16 sps:$4 sm:$0xff]   ;;  %v10988_v43 = vld [vmem:[%s15095_s1 + $0x14cc] ss:$16 sps:$4 sm:$0xff]  }
 0x263   :  { %7039 = vmatpush1.bf16.msra.mxu0 %v10899_v45  ;;  %7887 = vmatpush1.bf16.msra.mxu1 %v10902_v46  ;;  %v10983_v45 = vld [vmem:[%s15095_s1 + $0x14c0] ss:$16 sps:$4 sm:$0xff]   ;;  %v10986_v46 = vld [vmem:[%s15095_s1 + $0x14c8] ss:$16 sps:$4 sm:$0xff]  }
 0x264   :  { %7040 = vmatprep.subr.bf16.mxu0 %v10907_v47  ;;  %7888 = vmatprep.subr.bf16.mxu1 %v10910_v48  ;;  %v10991_v47 = vld [vmem:[%s15095_s1 + $0x14e4] ss:$16 sps:$4 sm:$0xff]   ;;  %v10994_v48 = vld [vmem:[%s15095_s1 + $0x14ec] ss:$16 sps:$4 sm:$0xff]  }
 0x267   :  { %7041 = vmatpush1.bf16.msra.mxu0 %v10905_v51  ;;  %7889 = vmatpush1.bf16.msra.mxu1 %v10908_v52  ;;  %v10989_v51 = vld [vmem:[%s15095_s1 + $0x14e0] ss:$16 sps:$4 sm:$0xff]   ;;  %v10992_v52 = vld [vmem:[%s15095_s1 + $0x14e8] ss:$16 sps:$4 sm:$0xff]  }
 0x268   :  { %7042 = vmatprep.subr.bf16.mxu0 %v10913_v49  ;;  %7890 = vmatprep.subr.bf16.mxu1 %v10916_v50  ;;  %v10997_v49 = vld [vmem:[%s15095_s1 + $0x1504] ss:$16 sps:$4 sm:$0xff]   ;;  %v11000_v50 = vld [vmem:[%s15095_s1 + $0x150c] ss:$16 sps:$4 sm:$0xff]  }
 0x26b   :  { %7043 = vmatpush1.bf16.msra.mxu0 %v10911_v53  ;;  %7891 = vmatpush1.bf16.msra.mxu1 %v10914_v54  ;;  %v10995_v53 = vld [vmem:[%s15095_s1 + $0x1500] ss:$16 sps:$4 sm:$0xff]   ;;  %v10998_v54 = vld [vmem:[%s15095_s1 + $0x1508] ss:$16 sps:$4 sm:$0xff]  }
 0x26c   :  { %7044 = vmatprep.subr.bf16.mxu0 %v10919_v55  ;;  %7892 = vmatprep.subr.bf16.mxu1 %v10922_v56  ;;  %v11003_v55 = vld [vmem:[%s15095_s1 + $0x1524] ss:$16 sps:$4 sm:$0xff]   ;;  %v11006_v56 = vld [vmem:[%s15095_s1 + $0x152c] ss:$16 sps:$4 sm:$0xff]  }
 0x26f   :  { %7045 = vmatpush1.bf16.msra.mxu0 %v10917_v59  ;;  %7893 = vmatpush1.bf16.msra.mxu1 %v10920_v60  ;;  %v11001_v59 = vld [vmem:[%s15095_s1 + $0x1520] ss:$16 sps:$4 sm:$0xff]   ;;  %v11004_v60 = vld [vmem:[%s15095_s1 + $0x1528] ss:$16 sps:$4 sm:$0xff]  }
 0x270   :  { %7046 = vmatprep.subr.bf16.mxu0 %v10925_v57  ;;  %7894 = vmatprep.subr.bf16.mxu1 %v10928_v58  ;;  %v11009_v57 = vld [vmem:[%s15095_s1 + $0x1544] ss:$16 sps:$4 sm:$0xff]   ;;  %v11012_v58 = vld [vmem:[%s15095_s1 + $0x154c] ss:$16 sps:$4 sm:$0xff]  }
 0x273   :  { %7047 = vmatpush1.bf16.msra.mxu0 %v10923_v61  ;;  %7895 = vmatpush1.bf16.msra.mxu1 %v10926_v62  ;;  %v11007_v61 = vld [vmem:[%s15095_s1 + $0x1540] ss:$16 sps:$4 sm:$0xff]   ;;  %v11010_v62 = vld [vmem:[%s15095_s1 + $0x1548] ss:$16 sps:$4 sm:$0xff]  }
 0x274   :  { %7048 = vmatprep.subr.bf16.mxu0 %v10931_v63  ;;  %7896 = vmatprep.subr.bf16.mxu1 %v10934_v0  ;;  %v11015_v63 = vld [vmem:[%s15095_s1 + $0x1564] ss:$16 sps:$4 sm:$0xff]   ;;  %v11018_v0 = vld [vmem:[%s15095_s1 + $0x156c] ss:$16 sps:$4 sm:$0xff]  }
 0x277   :  { %7049 = vmatpush1.bf16.msra.mxu0 %v10929_v3  ;;  %7897 = vmatpush1.bf16.msra.mxu1 %v10932_v4  ;;  %v11013_v3 = vld [vmem:[%s15095_s1 + $0x1560] ss:$16 sps:$4 sm:$0xff]   ;;  %v11016_v4 = vld [vmem:[%s15095_s1 + $0x1568] ss:$16 sps:$4 sm:$0xff]  }
 0x278   :  { %7050 = vmatprep.subr.bf16.mxu0 %v10937_v1  ;;  %7898 = vmatprep.subr.bf16.mxu1 %v10940_v2  ;;  %v11021_v1 = vld [vmem:[%s15095_s1 + $0x1584] ss:$16 sps:$4 sm:$0xff]   ;;  %v11024_v2 = vld [vmem:[%s15095_s1 + $0x158c] ss:$16 sps:$4 sm:$0xff]  }
 0x27b   :  { %7051 = vmatpush1.bf16.msra.mxu0 %v10935_v5  ;;  %7899 = vmatpush1.bf16.msra.mxu1 %v10938_v6  ;;  %v11019_v5 = vld [vmem:[%s15095_s1 + $0x1580] ss:$16 sps:$4 sm:$0xff]   ;;  %v11022_v6 = vld [vmem:[%s15095_s1 + $0x1588] ss:$16 sps:$4 sm:$0xff]  }
 0x27c   :  { %7052 = vmatprep.subr.bf16.mxu0 %v10943_v7  ;;  %7900 = vmatprep.subr.bf16.mxu1 %v10946_v8  ;;  %v11027_v7 = vld [vmem:[%s15095_s1 + $0x15a4] ss:$16 sps:$4 sm:$0xff]   ;;  %v11030_v8 = vld [vmem:[%s15095_s1 + $0x15ac] ss:$16 sps:$4 sm:$0xff]  }
 0x27f   :  { %7053 = vmatpush1.bf16.msra.mxu0 %v10941_v11  ;;  %7901 = vmatpush1.bf16.msra.mxu1 %v10944_v12  ;;  %v11025_v11 = vld [vmem:[%s15095_s1 + $0x15a0] ss:$16 sps:$4 sm:$0xff]   ;;  %v11028_v12 = vld [vmem:[%s15095_s1 + $0x15a8] ss:$16 sps:$4 sm:$0xff]  }
 0x280   :  { %7075 = vmatprep.subr.bf16.mxu0 %v10949_v9  ;;  %7923 = vmatprep.subr.bf16.mxu1 %v10952_v10  ;;  %v11033_v9 = vld [vmem:[%s15095_s1 + $0x15c4] ss:$16 sps:$4 sm:$0xff]   ;;  %v11036_v10 = vld [vmem:[%s15095_s1 + $0x15cc] ss:$16 sps:$4 sm:$0xff]  }
 0x282   :  { %7055 = vmatmul.mubr.bf16.vlgmr.msra.gmra.mrb[0].mxu0 %v8660_v13  ;;  %7903 = vmatmul.mubr.bf16.vlgmr.msra.gmra.mrb[0].mxu1 %v8660_v13  ;;  %v11031_v13 = vld [vmem:[%s15095_s1 + $0x15c0] ss:$16 sps:$4 sm:$0xff]  }
 0x283   :  { %7076 = vmatpush1.bf16.msra.mxu0 %v10947_v16  ;;  %7924 = vmatpush1.bf16.msra.mxu1 %v10950_v19  ;;  %v11042_v16 = vld [vmem:[%s15095_s1 + $0x15ec] ss:$16 sps:$4 sm:$0xff]   ;;  %v11037_v19 = vld [vmem:[%s15095_s1 + $0x15e0] ss:$16 sps:$4 sm:$0xff]  }
 0x284   :  { %7077 = vmatprep.subr.bf16.mxu0 %v10955_v17  ;;  %7925 = vmatprep.subr.bf16.mxu1 %v10958_v18  ;;  %v11040_v17 = vld [vmem:[%s15095_s1 + $0x15e8] ss:$16 sps:$4 sm:$0xff]   ;;  %v11045_v18 = vld [vmem:[%s15095_s1 + $0x1604] ss:$16 sps:$4 sm:$0xff]  }
 0x285   :  { %7064 = vmatprep.mubr.bf16.mxu0 %v8693_v20  ;;  %7912 = vmatprep.mubr.bf16.mxu1 %v8693_v20  ;;  %v11048_v20 = vld [vmem:[%s15095_s1 + $0x160c] ss:$16 sps:$4 sm:$0xff]  }
 0x287   :  { %7078 = vmatpush1.bf16.msra.mxu0 %v10953_v21  ;;  %7926 = vmatpush1.bf16.msra.mxu1 %v10956_v22  ;;  %v8662_v21 = vcombine.low %v13702_v25, %v13707_v27  ;;  %v59_v22 = vld [vmem:[%s15096_s0 + $0x150] sm:$0xff]  ;;  %v11054_v27 = vld [vmem:[%s15095_s1 + $0x162c] ss:$16 sps:$4 sm:$0xff]  }
 0x288   :  { %7079 = vmatprep.subr.bf16.mxu0 %v10961_v23  ;;  %7927 = vmatprep.subr.bf16.mxu1 %v10964_v24  ;;  %v75_v23 = vld [vmem:[%s15096_s0 + $0x1d0] sm:$0xff] }
 0x289   :  { %v11043_v24 = vld [vmem:[%s15095_s1 + $0x1600] ss:$16 sps:$4 sm:$0xff]   ;;  %v11051_v25 = vld [vmem:[%s15095_s1 + $0x1624] ss:$16 sps:$4 sm:$0xff]  }
 0x28a   :  { %7065 = vmatmul.mubr.bf16.gmra.mrb[4].mxu0 %v8692_v26  ;;  %7913 = vmatmul.mubr.bf16.gmra.mrb[4].mxu1 %v8692_v26  ;;  %v11046_v26 = vld [vmem:[%s15095_s1 + $0x1608] ss:$16 sps:$4 sm:$0xff]  }
 0x28b   :  { %7080 = vmatpush1.bf16.msra.mxu0 %v10959_v28  ;;  %7928 = vmatpush1.bf16.msra.mxu1 %v10962_v29  ;;  %v8695_v28 = vcombine.high %v59_v22, %v75_v23  ;;  %v11049_v29 = vld [vmem:[%s15095_s1 + $0x1620] ss:$16 sps:$4 sm:$0xff]  }
 0x28c   :  { %7081 = vmatprep.subr.bf16.mxu0 %v10967_v30  ;;  %7929 = vmatprep.subr.bf16.mxu1 %v10970_v31  ;;  %v11052_v30 = vld [vmem:[%s15095_s1 + $0x1628] ss:$16 sps:$4 sm:$0xff]   ;;  %v11057_v31 = vld [vmem:[%s15095_s1 + $0x1644] ss:$16 sps:$4 sm:$0xff]  }
 0x28d   :  { %7107 = vmatprep.mubr.bf16.mxu0 %v8663_v32  ;;  %7955 = vmatprep.mubr.bf16.mxu1 %v8663_v32  ;;  %v11060_v32 = vld [vmem:[%s15095_s1 + $0x164c] ss:$16 sps:$4 sm:$0xff]  }
 0x28f   :  { %7082 = vmatpush1.bf16.msra.mxu0 %v10965_v34  ;;  %7930 = vmatpush1.bf16.msra.mxu1 %v10968_v36  ;;  %v8694_v34 = vcombine.low %v59_v22, %v75_v23  ;;  %v13914_v36 = vld [vmem:[%s15096_s0 + $0x58] sm:$0xff]  ;;  %v11135_v23 = vld [vmem:[%s15095_s1 + $0x17e4] ss:$16 sps:$4 sm:$0xff]  }
 0x290   :  { %7083 = vmatprep.subr.bf16.mxu0 %v10973_v33  ;;  %7931 = vmatprep.subr.bf16.mxu1 %v10976_v35  ;;  %v13919_v33 = vld [vmem:[%s15096_s0 + $0xd8] sm:$0xff]  ;;  %v11055_v35 = vld [vmem:[%s15095_s1 + $0x1640] ss:$16 sps:$4 sm:$0xff]  }
 0x291   :  { %v11130_v22 = vld [vmem:[%s15095_s1 + $0x17c8] ss:$16 sps:$4 sm:$0xff]  }
 0x293   :  { %7084 = vmatpush1.bf16.msra.mxu0 %v10971_v37  ;;  %7932 = vmatpush1.bf16.msra.mxu1 %v10974_v38  ;;  %v11058_v37 = vld [vmem:[%s15095_s1 + $0x1648] ss:$16 sps:$4 sm:$0xff]   ;;  %v11063_v38 = vld [vmem:[%s15095_s1 + $0x1664] ss:$16 sps:$4 sm:$0xff]  }
 0x294   :  { %7085 = vmatprep.subr.bf16.mxu0 %v10979_v39  ;;  %7933 = vmatprep.subr.bf16.mxu1 %v10982_v40  ;;  %v11066_v39 = vld [vmem:[%s15095_s1 + $0x166c] ss:$16 sps:$4 sm:$0xff]   ;;  %v8665_v40 = vcombine.high %v13914_v36, %v13919_v33 }
 0x297   :  { %7086 = vmatpush1.bf16.msra.mxu0 %v10977_v42  ;;  %7934 = vmatpush1.bf16.msra.mxu1 %v10980_v44  ;;  %v11061_v42 = vld [vmem:[%s15095_s1 + $0x1660] ss:$16 sps:$4 sm:$0xff]   ;;  %v11064_v44 = vld [vmem:[%s15095_s1 + $0x1668] ss:$16 sps:$4 sm:$0xff]  }
 0x298   :  { %7087 = vmatprep.subr.bf16.mxu0 %v10985_v41  ;;  %7935 = vmatprep.subr.bf16.mxu1 %v10988_v43  ;;  %v11069_v41 = vld [vmem:[%s15095_s1 + $0x1684] ss:$16 sps:$4 sm:$0xff]   ;;  %v11072_v43 = vld [vmem:[%s15095_s1 + $0x168c] ss:$16 sps:$4 sm:$0xff]  }
 0x29b   :  { %7088 = vmatpush1.bf16.msra.mxu0 %v10983_v45  ;;  %7936 = vmatpush1.bf16.msra.mxu1 %v10986_v46  ;;  %v11067_v45 = vld [vmem:[%s15095_s1 + $0x1680] ss:$16 sps:$4 sm:$0xff]   ;;  %v11070_v46 = vld [vmem:[%s15095_s1 + $0x1688] ss:$16 sps:$4 sm:$0xff]  }
 0x29c   :  { %7089 = vmatprep.subr.bf16.mxu0 %v10991_v47  ;;  %7937 = vmatprep.subr.bf16.mxu1 %v10994_v48  ;;  %v11075_v47 = vld [vmem:[%s15095_s1 + $0x16a4] ss:$16 sps:$4 sm:$0xff]   ;;  %v11078_v48 = vld [vmem:[%s15095_s1 + $0x16ac] ss:$16 sps:$4 sm:$0xff]  }
 0x29f   :  { %7090 = vmatpush1.bf16.msra.mxu0 %v10989_v51  ;;  %7938 = vmatpush1.bf16.msra.mxu1 %v10992_v52  ;;  %v11073_v51 = vld [vmem:[%s15095_s1 + $0x16a0] ss:$16 sps:$4 sm:$0xff]   ;;  %v11076_v52 = vld [vmem:[%s15095_s1 + $0x16a8] ss:$16 sps:$4 sm:$0xff]  }
 0x2a0   :  { %7091 = vmatprep.subr.bf16.mxu0 %v10997_v49  ;;  %7939 = vmatprep.subr.bf16.mxu1 %v11000_v50  ;;  %v11081_v49 = vld [vmem:[%s15095_s1 + $0x16c4] ss:$16 sps:$4 sm:$0xff]   ;;  %v11084_v50 = vld [vmem:[%s15095_s1 + $0x16cc] ss:$16 sps:$4 sm:$0xff]  }
 0x2a3   :  { %7092 = vmatpush1.bf16.msra.mxu0 %v10995_v53  ;;  %7940 = vmatpush1.bf16.msra.mxu1 %v10998_v54  ;;  %v11079_v53 = vld [vmem:[%s15095_s1 + $0x16c0] ss:$16 sps:$4 sm:$0xff]   ;;  %v11082_v54 = vld [vmem:[%s15095_s1 + $0x16c8] ss:$16 sps:$4 sm:$0xff]  }
 0x2a4   :  { %7093 = vmatprep.subr.bf16.mxu0 %v11003_v55  ;;  %7941 = vmatprep.subr.bf16.mxu1 %v11006_v56  ;;  %v11087_v55 = vld [vmem:[%s15095_s1 + $0x16e4] ss:$16 sps:$4 sm:$0xff]   ;;  %v11090_v56 = vld [vmem:[%s15095_s1 + $0x16ec] ss:$16 sps:$4 sm:$0xff]  }
 0x2a7   :  { %7094 = vmatpush1.bf16.msra.mxu0 %v11001_v59  ;;  %7942 = vmatpush1.bf16.msra.mxu1 %v11004_v60  ;;  %v11085_v59 = vld [vmem:[%s15095_s1 + $0x16e0] ss:$16 sps:$4 sm:$0xff]   ;;  %v11088_v60 = vld [vmem:[%s15095_s1 + $0x16e8] ss:$16 sps:$4 sm:$0xff]  }
 0x2a8   :  { %7095 = vmatprep.subr.bf16.mxu0 %v11009_v57  ;;  %7943 = vmatprep.subr.bf16.mxu1 %v11012_v58  ;;  %v11093_v57 = vld [vmem:[%s15095_s1 + $0x1704] ss:$16 sps:$4 sm:$0xff]   ;;  %v11096_v58 = vld [vmem:[%s15095_s1 + $0x170c] ss:$16 sps:$4 sm:$0xff]  }
 0x2ab   :  { %7096 = vmatpush1.bf16.msra.mxu0 %v11007_v61  ;;  %7944 = vmatpush1.bf16.msra.mxu1 %v11010_v62  ;;  %v11091_v61 = vld [vmem:[%s15095_s1 + $0x1700] ss:$16 sps:$4 sm:$0xff]   ;;  %v11094_v62 = vld [vmem:[%s15095_s1 + $0x1708] ss:$16 sps:$4 sm:$0xff]  }
 0x2ac   :  { %7097 = vmatprep.subr.bf16.mxu0 %v11015_v63  ;;  %7945 = vmatprep.subr.bf16.mxu1 %v11018_v0  ;;  %v11099_v63 = vld [vmem:[%s15095_s1 + $0x1724] ss:$16 sps:$4 sm:$0xff]   ;;  %v11102_v0 = vld [vmem:[%s15095_s1 + $0x172c] ss:$16 sps:$4 sm:$0xff]  }
 0x2af   :  { %7098 = vmatpush1.bf16.msra.mxu0 %v11013_v3  ;;  %7946 = vmatpush1.bf16.msra.mxu1 %v11016_v4  ;;  %v11097_v3 = vld [vmem:[%s15095_s1 + $0x1720] ss:$16 sps:$4 sm:$0xff]   ;;  %v11100_v4 = vld [vmem:[%s15095_s1 + $0x1728] ss:$16 sps:$4 sm:$0xff]  }
 0x2b0   :  { %7099 = vmatprep.subr.bf16.mxu0 %v11021_v1  ;;  %7947 = vmatprep.subr.bf16.mxu1 %v11024_v2  ;;  %v11105_v1 = vld [vmem:[%s15095_s1 + $0x1744] ss:$16 sps:$4 sm:$0xff]   ;;  %v11108_v2 = vld [vmem:[%s15095_s1 + $0x174c] ss:$16 sps:$4 sm:$0xff]  }
 0x2b3   :  { %7100 = vmatpush1.bf16.msra.mxu0 %v11019_v5  ;;  %7948 = vmatpush1.bf16.msra.mxu1 %v11022_v6  ;;  %v11103_v5 = vld [vmem:[%s15095_s1 + $0x1740] ss:$16 sps:$4 sm:$0xff]   ;;  %v11106_v6 = vld [vmem:[%s15095_s1 + $0x1748] ss:$16 sps:$4 sm:$0xff]  }
 0x2b4   :  { %7101 = vmatprep.subr.bf16.mxu0 %v11027_v7  ;;  %7949 = vmatprep.subr.bf16.mxu1 %v11030_v8  ;;  %v11111_v7 = vld [vmem:[%s15095_s1 + $0x1764] ss:$16 sps:$4 sm:$0xff]   ;;  %v11114_v8 = vld [vmem:[%s15095_s1 + $0x176c] ss:$16 sps:$4 sm:$0xff]  }
 0x2b7   :  { %7102 = vmatpush1.bf16.msra.mxu0 %v11025_v11  ;;  %7950 = vmatpush1.bf16.msra.mxu1 %v11028_v12  ;;  %v11109_v11 = vld [vmem:[%s15095_s1 + $0x1760] ss:$16 sps:$4 sm:$0xff]   ;;  %v11112_v12 = vld [vmem:[%s15095_s1 + $0x1768] ss:$16 sps:$4 sm:$0xff]  }
 0x2b8   :  { %7103 = vmatprep.subr.bf16.mxu0 %v11033_v9  ;;  %7951 = vmatprep.subr.bf16.mxu1 %v11036_v10  ;;  %v11117_v9 = vld [vmem:[%s15095_s1 + $0x1784] ss:$16 sps:$4 sm:$0xff]   ;;  %v11120_v10 = vld [vmem:[%s15095_s1 + $0x178c] ss:$16 sps:$4 sm:$0xff]  }
 0x2bb   :  { %7104 = vmatpush1.bf16.msra.mxu0 %v11031_v13  ;;  %7952 = vmatpush1.bf16.msra.mxu1 %v11034_v14  ;;  %v11115_v13 = vld [vmem:[%s15095_s1 + $0x1780] ss:$16 sps:$4 sm:$0xff]   ;;  %v11118_v14 = vld [vmem:[%s15095_s1 + $0x1788] ss:$16 sps:$4 sm:$0xff]  }
 0x2bc   :  { %7105 = vmatprep.subr.bf16.mxu0 %v11039_v15  ;;  %7953 = vmatprep.subr.bf16.mxu1 %v11042_v16  ;;  %v11123_v15 = vld [vmem:[%s15095_s1 + $0x17a4] ss:$16 sps:$4 sm:$0xff]   ;;  %v11126_v16 = vld [vmem:[%s15095_s1 + $0x17ac] ss:$16 sps:$4 sm:$0xff]  }
 0x2bf   :  { %7106 = vmatpush1.bf16.msra.mxu0 %v11037_v19  ;;  %7954 = vmatpush1.bf16.msra.mxu1 %v11040_v17  ;;  %v11121_v19 = vld [vmem:[%s15095_s1 + $0x17a0] ss:$16 sps:$4 sm:$0xff]   ;;  %v11124_v17 = vld [vmem:[%s15095_s1 + $0x17a8] ss:$16 sps:$4 sm:$0xff]  }
 0x2c0   :  { %7128 = vmatprep.subr.bf16.mxu0 %v11045_v18  ;;  %7976 = vmatprep.subr.bf16.mxu1 %v11048_v20  ;;  %v11129_v18 = vld [vmem:[%s15095_s1 + $0x17c4] ss:$16 sps:$4 sm:$0xff]   ;;  %v11132_v20 = vld [vmem:[%s15095_s1 + $0x17cc] ss:$16 sps:$4 sm:$0xff]  }
 0x2c2   :  { %7108 = vmatmul.mubr.bf16.vlgmr.msra.gmra.mrb[0].mxu0 %v8662_v21  ;;  %7956 = vmatmul.mubr.bf16.vlgmr.msra.gmra.mrb[0].mxu1 %v8662_v21  ;;  %v11127_v21 = vld [vmem:[%s15095_s1 + $0x17c0] ss:$16 sps:$4 sm:$0xff]  }
 0x2c3   :  { %7129 = vmatpush1.bf16.msra.mxu0 %v11043_v24  ;;  %7977 = vmatpush1.bf16.msra.mxu1 %v11046_v26  ;;  %v11138_v24 = vld [vmem:[%s15095_s1 + $0x17ec] ss:$16 sps:$4 sm:$0xff]   ;;  %v11133_v26 = vld [vmem:[%s15095_s1 + $0x17e0] ss:$16 sps:$4 sm:$0xff]  }
 0x2c4   :  { %7130 = vmatprep.subr.bf16.mxu0 %v11051_v25  ;;  %7978 = vmatprep.subr.bf16.mxu1 %v11054_v27  ;;  %v11136_v25 = vld [vmem:[%s15095_s1 + $0x17e8] ss:$16 sps:$4 sm:$0xff]   ;;  %v11141_v27 = vld [vmem:[%s15095_s1 + $0x1804] ss:$16 sps:$4 sm:$0xff]  }
 0x2c5   :  { %7117 = vmatprep.mubr.bf16.mxu0 %v8695_v28  ;;  %7965 = vmatprep.mubr.bf16.mxu1 %v8695_v28  ;;  %v11144_v28 = vld [vmem:[%s15095_s1 + $0x180c] ss:$16 sps:$4 sm:$0xff]  }
 0x2c7   :  { %7131 = vmatpush1.bf16.msra.mxu0 %v11049_v29  ;;  %7979 = vmatpush1.bf16.msra.mxu1 %v11052_v30  ;;  %v8664_v29 = vcombine.low %v13914_v36, %v13919_v33  ;;  %v60_v30 = vld [vmem:[%s15096_s0 + $0x158] sm:$0xff]  ;;  %v11147_v36 = vld [vmem:[%s15095_s1 + $0x1824] ss:$16 sps:$4 sm:$0xff]  }
 0x2c8   :  { %7132 = vmatprep.subr.bf16.mxu0 %v11057_v31  ;;  %7980 = vmatprep.subr.bf16.mxu1 %v11060_v32  ;;  %v76_v31 = vld [vmem:[%s15096_s0 + $0x1d8] sm:$0xff]  ;;  %v11139_v32 = vld [vmem:[%s15095_s1 + $0x1800] ss:$16 sps:$4 sm:$0xff]  }
 0x2c9   :  { %v11150_v33 = vld [vmem:[%s15095_s1 + $0x182c] ss:$16 sps:$4 sm:$0xff]  }
 0x2ca   :  { %7118 = vmatmul.mubr.bf16.gmra.mrb[4].mxu0 %v8694_v34  ;;  %7966 = vmatmul.mubr.bf16.gmra.mrb[4].mxu1 %v8694_v34  ;;  %v11142_v34 = vld [vmem:[%s15095_s1 + $0x1808] ss:$16 sps:$4 sm:$0xff]  }
 0x2cb   :  { %7133 = vmatpush1.bf16.msra.mxu0 %v11055_v35  ;;  %7981 = vmatpush1.bf16.msra.mxu1 %v11058_v37  ;;  %v8697_v35 = vcombine.high %v60_v30, %v76_v31  ;;  %v11145_v37 = vld [vmem:[%s15095_s1 + $0x1820] ss:$16 sps:$4 sm:$0xff]  }
 0x2cc   :  { %7134 = vmatprep.subr.bf16.mxu0 %v11063_v38  ;;  %7982 = vmatprep.subr.bf16.mxu1 %v11066_v39  ;;  %v11148_v38 = vld [vmem:[%s15095_s1 + $0x1828] ss:$16 sps:$4 sm:$0xff]   ;;  %v11153_v39 = vld [vmem:[%s15095_s1 + $0x1844] ss:$16 sps:$4 sm:$0xff]  }
 0x2cd   :  { %7160 = vmatprep.mubr.bf16.mxu0 %v8665_v40  ;;  %8008 = vmatprep.mubr.bf16.mxu1 %v8665_v40  ;;  %v11156_v40 = vld [vmem:[%s15095_s1 + $0x184c] ss:$16 sps:$4 sm:$0xff]  }
 0x2cf   :  { %7135 = vmatpush1.bf16.msra.mxu0 %v11061_v42  ;;  %7983 = vmatpush1.bf16.msra.mxu1 %v11064_v44  ;;  %v8696_v42 = vcombine.low %v60_v30, %v76_v31  ;;  %v14126_v44 = vld [vmem:[%s15096_s0 + $0x60] sm:$0xff]  ;;  %v11226_v30 = vld [vmem:[%s15095_s1 + $0x19c8] ss:$16 sps:$4 sm:$0xff]  }
 0x2d0   :  { %7136 = vmatprep.subr.bf16.mxu0 %v11069_v41  ;;  %7984 = vmatprep.subr.bf16.mxu1 %v11072_v43  ;;  %v14131_v41 = vld [vmem:[%s15096_s0 + $0xe0] sm:$0xff] }
 0x2d1   :  { %v11151_v43 = vld [vmem:[%s15095_s1 + $0x1840] ss:$16 sps:$4 sm:$0xff]   ;;  %v11231_v31 = vld [vmem:[%s15095_s1 + $0x19e4] ss:$16 sps:$4 sm:$0xff]  }
 0x2d3   :  { %7137 = vmatpush1.bf16.msra.mxu0 %v11067_v45  ;;  %7985 = vmatpush1.bf16.msra.mxu1 %v11070_v46  ;;  %v11154_v45 = vld [vmem:[%s15095_s1 + $0x1848] ss:$16 sps:$4 sm:$0xff]   ;;  %v11159_v46 = vld [vmem:[%s15095_s1 + $0x1864] ss:$16 sps:$4 sm:$0xff]  }
 0x2d4   :  { %7138 = vmatprep.subr.bf16.mxu0 %v11075_v47  ;;  %7986 = vmatprep.subr.bf16.mxu1 %v11078_v48  ;;  %v11162_v47 = vld [vmem:[%s15095_s1 + $0x186c] ss:$16 sps:$4 sm:$0xff]   ;;  %v8667_v48 = vcombine.high %v14126_v44, %v14131_v41 }
 0x2d7   :  { %7139 = vmatpush1.bf16.msra.mxu0 %v11073_v51  ;;  %7987 = vmatpush1.bf16.msra.mxu1 %v11076_v52  ;;  %v11157_v51 = vld [vmem:[%s15095_s1 + $0x1860] ss:$16 sps:$4 sm:$0xff]   ;;  %v11160_v52 = vld [vmem:[%s15095_s1 + $0x1868] ss:$16 sps:$4 sm:$0xff]  }
 0x2d8   :  { %7140 = vmatprep.subr.bf16.mxu0 %v11081_v49  ;;  %7988 = vmatprep.subr.bf16.mxu1 %v11084_v50  ;;  %v11165_v49 = vld [vmem:[%s15095_s1 + $0x1884] ss:$16 sps:$4 sm:$0xff]   ;;  %v11168_v50 = vld [vmem:[%s15095_s1 + $0x188c] ss:$16 sps:$4 sm:$0xff]  }
 0x2db   :  { %7141 = vmatpush1.bf16.msra.mxu0 %v11079_v53  ;;  %7989 = vmatpush1.bf16.msra.mxu1 %v11082_v54  ;;  %v11163_v53 = vld [vmem:[%s15095_s1 + $0x1880] ss:$16 sps:$4 sm:$0xff]   ;;  %v11166_v54 = vld [vmem:[%s15095_s1 + $0x1888] ss:$16 sps:$4 sm:$0xff]  }
 0x2dc   :  { %7142 = vmatprep.subr.bf16.mxu0 %v11087_v55  ;;  %7990 = vmatprep.subr.bf16.mxu1 %v11090_v56  ;;  %v11171_v55 = vld [vmem:[%s15095_s1 + $0x18a4] ss:$16 sps:$4 sm:$0xff]   ;;  %v11174_v56 = vld [vmem:[%s15095_s1 + $0x18ac] ss:$16 sps:$4 sm:$0xff]  }
 0x2df   :  { %7143 = vmatpush1.bf16.msra.mxu0 %v11085_v59  ;;  %7991 = vmatpush1.bf16.msra.mxu1 %v11088_v60  ;;  %v11169_v59 = vld [vmem:[%s15095_s1 + $0x18a0] ss:$16 sps:$4 sm:$0xff]   ;;  %v11172_v60 = vld [vmem:[%s15095_s1 + $0x18a8] ss:$16 sps:$4 sm:$0xff]  }
 0x2e0   :  { %7144 = vmatprep.subr.bf16.mxu0 %v11093_v57  ;;  %7992 = vmatprep.subr.bf16.mxu1 %v11096_v58  ;;  %v11177_v57 = vld [vmem:[%s15095_s1 + $0x18c4] ss:$16 sps:$4 sm:$0xff]   ;;  %v11180_v58 = vld [vmem:[%s15095_s1 + $0x18cc] ss:$16 sps:$4 sm:$0xff]  }
 0x2e3   :  { %7145 = vmatpush1.bf16.msra.mxu0 %v11091_v61  ;;  %7993 = vmatpush1.bf16.msra.mxu1 %v11094_v62  ;;  %v11175_v61 = vld [vmem:[%s15095_s1 + $0x18c0] ss:$16 sps:$4 sm:$0xff]   ;;  %v11178_v62 = vld [vmem:[%s15095_s1 + $0x18c8] ss:$16 sps:$4 sm:$0xff]  }
 0x2e4   :  { %7146 = vmatprep.subr.bf16.mxu0 %v11099_v63  ;;  %7994 = vmatprep.subr.bf16.mxu1 %v11102_v0  ;;  %v11183_v63 = vld [vmem:[%s15095_s1 + $0x18e4] ss:$16 sps:$4 sm:$0xff]   ;;  %v11186_v0 = vld [vmem:[%s15095_s1 + $0x18ec] ss:$16 sps:$4 sm:$0xff]  }
 0x2e7   :  { %7147 = vmatpush1.bf16.msra.mxu0 %v11097_v3  ;;  %7995 = vmatpush1.bf16.msra.mxu1 %v11100_v4  ;;  %v11181_v3 = vld [vmem:[%s15095_s1 + $0x18e0] ss:$16 sps:$4 sm:$0xff]   ;;  %v11184_v4 = vld [vmem:[%s15095_s1 + $0x18e8] ss:$16 sps:$4 sm:$0xff]  }
 0x2e8   :  { %7148 = vmatprep.subr.bf16.mxu0 %v11105_v1  ;;  %7996 = vmatprep.subr.bf16.mxu1 %v11108_v2  ;;  %v11189_v1 = vld [vmem:[%s15095_s1 + $0x1904] ss:$16 sps:$4 sm:$0xff]   ;;  %v11192_v2 = vld [vmem:[%s15095_s1 + $0x190c] ss:$16 sps:$4 sm:$0xff]  }
 0x2eb   :  { %7149 = vmatpush1.bf16.msra.mxu0 %v11103_v5  ;;  %7997 = vmatpush1.bf16.msra.mxu1 %v11106_v6  ;;  %v11187_v5 = vld [vmem:[%s15095_s1 + $0x1900] ss:$16 sps:$4 sm:$0xff]   ;;  %v11190_v6 = vld [vmem:[%s15095_s1 + $0x1908] ss:$16 sps:$4 sm:$0xff]  }
 0x2ec   :  { %7150 = vmatprep.subr.bf16.mxu0 %v11111_v7  ;;  %7998 = vmatprep.subr.bf16.mxu1 %v11114_v8  ;;  %v11195_v7 = vld [vmem:[%s15095_s1 + $0x1924] ss:$16 sps:$4 sm:$0xff]   ;;  %v11198_v8 = vld [vmem:[%s15095_s1 + $0x192c] ss:$16 sps:$4 sm:$0xff]  }
 0x2ef   :  { %7151 = vmatpush1.bf16.msra.mxu0 %v11109_v11  ;;  %7999 = vmatpush1.bf16.msra.mxu1 %v11112_v12  ;;  %v11193_v11 = vld [vmem:[%s15095_s1 + $0x1920] ss:$16 sps:$4 sm:$0xff]   ;;  %v11196_v12 = vld [vmem:[%s15095_s1 + $0x1928] ss:$16 sps:$4 sm:$0xff]  }
 0x2f0   :  { %7152 = vmatprep.subr.bf16.mxu0 %v11117_v9  ;;  %8000 = vmatprep.subr.bf16.mxu1 %v11120_v10  ;;  %v11201_v9 = vld [vmem:[%s15095_s1 + $0x1944] ss:$16 sps:$4 sm:$0xff]   ;;  %v11204_v10 = vld [vmem:[%s15095_s1 + $0x194c] ss:$16 sps:$4 sm:$0xff]  }
 0x2f3   :  { %7153 = vmatpush1.bf16.msra.mxu0 %v11115_v13  ;;  %8001 = vmatpush1.bf16.msra.mxu1 %v11118_v14  ;;  %v11199_v13 = vld [vmem:[%s15095_s1 + $0x1940] ss:$16 sps:$4 sm:$0xff]   ;;  %v11202_v14 = vld [vmem:[%s15095_s1 + $0x1948] ss:$16 sps:$4 sm:$0xff]  }
 0x2f4   :  { %7154 = vmatprep.subr.bf16.mxu0 %v11123_v15  ;;  %8002 = vmatprep.subr.bf16.mxu1 %v11126_v16  ;;  %v11207_v15 = vld [vmem:[%s15095_s1 + $0x1964] ss:$16 sps:$4 sm:$0xff]   ;;  %v11210_v16 = vld [vmem:[%s15095_s1 + $0x196c] ss:$16 sps:$4 sm:$0xff]  }
 0x2f7   :  { %7155 = vmatpush1.bf16.msra.mxu0 %v11121_v19  ;;  %8003 = vmatpush1.bf16.msra.mxu1 %v11124_v17  ;;  %v11205_v19 = vld [vmem:[%s15095_s1 + $0x1960] ss:$16 sps:$4 sm:$0xff]   ;;  %v11208_v17 = vld [vmem:[%s15095_s1 + $0x1968] ss:$16 sps:$4 sm:$0xff]  }
 0x2f8   :  { %7156 = vmatprep.subr.bf16.mxu0 %v11129_v18  ;;  %8004 = vmatprep.subr.bf16.mxu1 %v11132_v20  ;;  %v11213_v18 = vld [vmem:[%s15095_s1 + $0x1984] ss:$16 sps:$4 sm:$0xff]   ;;  %v11216_v20 = vld [vmem:[%s15095_s1 + $0x198c] ss:$16 sps:$4 sm:$0xff]  }
 0x2fb   :  { %7157 = vmatpush1.bf16.msra.mxu0 %v11127_v21  ;;  %8005 = vmatpush1.bf16.msra.mxu1 %v11130_v22  ;;  %v11211_v21 = vld [vmem:[%s15095_s1 + $0x1980] ss:$16 sps:$4 sm:$0xff]   ;;  %v11214_v22 = vld [vmem:[%s15095_s1 + $0x1988] ss:$16 sps:$4 sm:$0xff]  }
 0x2fc   :  { %7158 = vmatprep.subr.bf16.mxu0 %v11135_v23  ;;  %8006 = vmatprep.subr.bf16.mxu1 %v11138_v24  ;;  %v11219_v23 = vld [vmem:[%s15095_s1 + $0x19a4] ss:$16 sps:$4 sm:$0xff]   ;;  %v11222_v24 = vld [vmem:[%s15095_s1 + $0x19ac] ss:$16 sps:$4 sm:$0xff]  }
 0x2ff   :  { %7159 = vmatpush1.bf16.msra.mxu0 %v11133_v26  ;;  %8007 = vmatpush1.bf16.msra.mxu1 %v11136_v25  ;;  %v11217_v26 = vld [vmem:[%s15095_s1 + $0x19a0] ss:$16 sps:$4 sm:$0xff]   ;;  %v11220_v25 = vld [vmem:[%s15095_s1 + $0x19a8] ss:$16 sps:$4 sm:$0xff]  }
 0x300   :  { %7181 = vmatprep.subr.bf16.mxu0 %v11141_v27  ;;  %8029 = vmatprep.subr.bf16.mxu1 %v11144_v28  ;;  %v11225_v27 = vld [vmem:[%s15095_s1 + $0x19c4] ss:$16 sps:$4 sm:$0xff]   ;;  %v11228_v28 = vld [vmem:[%s15095_s1 + $0x19cc] ss:$16 sps:$4 sm:$0xff]  }
 0x302   :  { %7161 = vmatmul.mubr.bf16.vlgmr.msra.gmra.mrb[0].mxu0 %v8664_v29  ;;  %8009 = vmatmul.mubr.bf16.vlgmr.msra.gmra.mrb[0].mxu1 %v8664_v29  ;;  %v11223_v29 = vld [vmem:[%s15095_s1 + $0x19c0] ss:$16 sps:$4 sm:$0xff]  }
 0x303   :  { %7182 = vmatpush1.bf16.msra.mxu0 %v11139_v32  ;;  %8030 = vmatpush1.bf16.msra.mxu1 %v11142_v34  ;;  %v11234_v32 = vld [vmem:[%s15095_s1 + $0x19ec] ss:$16 sps:$4 sm:$0xff]   ;;  %v11229_v34 = vld [vmem:[%s15095_s1 + $0x19e0] ss:$16 sps:$4 sm:$0xff]  }
 0x304   :  { %7183 = vmatprep.subr.bf16.mxu0 %v11147_v36  ;;  %8031 = vmatprep.subr.bf16.mxu1 %v11150_v33  ;;  %v11232_v36 = vld [vmem:[%s15095_s1 + $0x19e8] ss:$16 sps:$4 sm:$0xff]   ;;  %v11237_v33 = vld [vmem:[%s15095_s1 + $0x1a04] ss:$16 sps:$4 sm:$0xff]  }
 0x305   :  { %7170 = vmatprep.mubr.bf16.mxu0 %v8697_v35  ;;  %8018 = vmatprep.mubr.bf16.mxu1 %v8697_v35  ;;  %v11240_v35 = vld [vmem:[%s15095_s1 + $0x1a0c] ss:$16 sps:$4 sm:$0xff]  }
 0x307   :  { %7184 = vmatpush1.bf16.msra.mxu0 %v11145_v37  ;;  %8032 = vmatpush1.bf16.msra.mxu1 %v11148_v38  ;;  %v8666_v37 = vcombine.low %v14126_v44, %v14131_v41  ;;  %v61_v38 = vld [vmem:[%s15096_s0 + $0x160] sm:$0xff]  ;;  %v11246_v41 = vld [vmem:[%s15095_s1 + $0x1a2c] ss:$16 sps:$4 sm:$0xff]  }
 0x308   :  { %7185 = vmatprep.subr.bf16.mxu0 %v11153_v39  ;;  %8033 = vmatprep.subr.bf16.mxu1 %v11156_v40  ;;  %v77_v39 = vld [vmem:[%s15096_s0 + $0x1e0] sm:$0xff] }
 0x309   :  { %v11235_v40 = vld [vmem:[%s15095_s1 + $0x1a00] ss:$16 sps:$4 sm:$0xff]   ;;  %v11243_v44 = vld [vmem:[%s15095_s1 + $0x1a24] ss:$16 sps:$4 sm:$0xff]  }
 0x30a   :  { %7171 = vmatmul.mubr.bf16.gmra.mrb[4].mxu0 %v8696_v42  ;;  %8019 = vmatmul.mubr.bf16.gmra.mrb[4].mxu1 %v8696_v42  ;;  %v11238_v42 = vld [vmem:[%s15095_s1 + $0x1a08] ss:$16 sps:$4 sm:$0xff]  }
 0x30b   :  { %7186 = vmatpush1.bf16.msra.mxu0 %v11151_v43  ;;  %8034 = vmatpush1.bf16.msra.mxu1 %v11154_v45  ;;  %v8699_v43 = vcombine.high %v61_v38, %v77_v39  ;;  %v11241_v45 = vld [vmem:[%s15095_s1 + $0x1a20] ss:$16 sps:$4 sm:$0xff]  }
 0x30c   :  { %7187 = vmatprep.subr.bf16.mxu0 %v11159_v46  ;;  %8035 = vmatprep.subr.bf16.mxu1 %v11162_v47  ;;  %v11244_v46 = vld [vmem:[%s15095_s1 + $0x1a28] ss:$16 sps:$4 sm:$0xff]   ;;  %v11249_v47 = vld [vmem:[%s15095_s1 + $0x1a44] ss:$16 sps:$4 sm:$0xff]  }
 0x30d   :  { %7213 = vmatprep.mubr.bf16.mxu0 %v8667_v48  ;;  %8061 = vmatprep.mubr.bf16.mxu1 %v8667_v48  ;;  %v11252_v48 = vld [vmem:[%s15095_s1 + $0x1a4c] ss:$16 sps:$4 sm:$0xff]  }
 0x30f   :  { %7188 = vmatpush1.bf16.msra.mxu0 %v11157_v51  ;;  %8036 = vmatpush1.bf16.msra.mxu1 %v11160_v52  ;;  %v8698_v51 = vcombine.low %v61_v38, %v77_v39  ;;  %v14338_v52 = vld [vmem:[%s15096_s0 + $0x68] sm:$0xff]  ;;  %v11327_v39 = vld [vmem:[%s15095_s1 + $0x1be4] ss:$16 sps:$4 sm:$0xff]  }
 0x310   :  { %7189 = vmatprep.subr.bf16.mxu0 %v11165_v49  ;;  %8037 = vmatprep.subr.bf16.mxu1 %v11168_v50  ;;  %v14343_v49 = vld [vmem:[%s15096_s0 + $0xe8] sm:$0xff]  ;;  %v11247_v50 = vld [vmem:[%s15095_s1 + $0x1a40] ss:$16 sps:$4 sm:$0xff]  }
 0x311   :  { %v11322_v38 = vld [vmem:[%s15095_s1 + $0x1bc8] ss:$16 sps:$4 sm:$0xff]  }
 0x313   :  { %7190 = vmatpush1.bf16.msra.mxu0 %v11163_v53  ;;  %8038 = vmatpush1.bf16.msra.mxu1 %v11166_v54  ;;  %v11250_v53 = vld [vmem:[%s15095_s1 + $0x1a48] ss:$16 sps:$4 sm:$0xff]   ;;  %v11255_v54 = vld [vmem:[%s15095_s1 + $0x1a64] ss:$16 sps:$4 sm:$0xff]  }
 0x314   :  { %7191 = vmatprep.subr.bf16.mxu0 %v11171_v55  ;;  %8039 = vmatprep.subr.bf16.mxu1 %v11174_v56  ;;  %v11258_v55 = vld [vmem:[%s15095_s1 + $0x1a6c] ss:$16 sps:$4 sm:$0xff]   ;;  %v8669_v56 = vcombine.high %v14338_v52, %v14343_v49 }
 0x317   :  { %7192 = vmatpush1.bf16.msra.mxu0 %v11169_v59  ;;  %8040 = vmatpush1.bf16.msra.mxu1 %v11172_v60  ;;  %v11253_v59 = vld [vmem:[%s15095_s1 + $0x1a60] ss:$16 sps:$4 sm:$0xff]   ;;  %v11256_v60 = vld [vmem:[%s15095_s1 + $0x1a68] ss:$16 sps:$4 sm:$0xff]  }
 0x318   :  { %7193 = vmatprep.subr.bf16.mxu0 %v11177_v57  ;;  %8041 = vmatprep.subr.bf16.mxu1 %v11180_v58  ;;  %v11261_v57 = vld [vmem:[%s15095_s1 + $0x1a84] ss:$16 sps:$4 sm:$0xff]   ;;  %v11264_v58 = vld [vmem:[%s15095_s1 + $0x1a8c] ss:$16 sps:$4 sm:$0xff]  }
 0x31b   :  { %7194 = vmatpush1.bf16.msra.mxu0 %v11175_v61  ;;  %8042 = vmatpush1.bf16.msra.mxu1 %v11178_v62  ;;  %v11259_v61 = vld [vmem:[%s15095_s1 + $0x1a80] ss:$16 sps:$4 sm:$0xff]   ;;  %v11262_v62 = vld [vmem:[%s15095_s1 + $0x1a88] ss:$16 sps:$4 sm:$0xff]  }
 0x31c   :  { %7195 = vmatprep.subr.bf16.mxu0 %v11183_v63  ;;  %8043 = vmatprep.subr.bf16.mxu1 %v11186_v0  ;;  %v11267_v63 = vld [vmem:[%s15095_s1 + $0x1aa4] ss:$16 sps:$4 sm:$0xff]   ;;  %v11270_v0 = vld [vmem:[%s15095_s1 + $0x1aac] ss:$16 sps:$4 sm:$0xff]  }
 0x31f   :  { %7196 = vmatpush1.bf16.msra.mxu0 %v11181_v3  ;;  %8044 = vmatpush1.bf16.msra.mxu1 %v11184_v4  ;;  %v11265_v3 = vld [vmem:[%s15095_s1 + $0x1aa0] ss:$16 sps:$4 sm:$0xff]   ;;  %v11268_v4 = vld [vmem:[%s15095_s1 + $0x1aa8] ss:$16 sps:$4 sm:$0xff]  }
 0x320   :  { %7197 = vmatprep.subr.bf16.mxu0 %v11189_v1  ;;  %8045 = vmatprep.subr.bf16.mxu1 %v11192_v2  ;;  %v11273_v1 = vld [vmem:[%s15095_s1 + $0x1ac4] ss:$16 sps:$4 sm:$0xff]   ;;  %v11276_v2 = vld [vmem:[%s15095_s1 + $0x1acc] ss:$16 sps:$4 sm:$0xff]  }
 0x323   :  { %7198 = vmatpush1.bf16.msra.mxu0 %v11187_v5  ;;  %8046 = vmatpush1.bf16.msra.mxu1 %v11190_v6  ;;  %v11271_v5 = vld [vmem:[%s15095_s1 + $0x1ac0] ss:$16 sps:$4 sm:$0xff]   ;;  %v11274_v6 = vld [vmem:[%s15095_s1 + $0x1ac8] ss:$16 sps:$4 sm:$0xff]  }
 0x324   :  { %7199 = vmatprep.subr.bf16.mxu0 %v11195_v7  ;;  %8047 = vmatprep.subr.bf16.mxu1 %v11198_v8  ;;  %v11279_v7 = vld [vmem:[%s15095_s1 + $0x1ae4] ss:$16 sps:$4 sm:$0xff]   ;;  %v11282_v8 = vld [vmem:[%s15095_s1 + $0x1aec] ss:$16 sps:$4 sm:$0xff]  }
 0x327   :  { %7200 = vmatpush1.bf16.msra.mxu0 %v11193_v11  ;;  %8048 = vmatpush1.bf16.msra.mxu1 %v11196_v12  ;;  %v11277_v11 = vld [vmem:[%s15095_s1 + $0x1ae0] ss:$16 sps:$4 sm:$0xff]   ;;  %v11280_v12 = vld [vmem:[%s15095_s1 + $0x1ae8] ss:$16 sps:$4 sm:$0xff]  }
 0x328   :  { %7201 = vmatprep.subr.bf16.mxu0 %v11201_v9  ;;  %8049 = vmatprep.subr.bf16.mxu1 %v11204_v10  ;;  %v11285_v9 = vld [vmem:[%s15095_s1 + $0x1b04] ss:$16 sps:$4 sm:$0xff]   ;;  %v11288_v10 = vld [vmem:[%s15095_s1 + $0x1b0c] ss:$16 sps:$4 sm:$0xff]  }
 0x32b   :  { %7202 = vmatpush1.bf16.msra.mxu0 %v11199_v13  ;;  %8050 = vmatpush1.bf16.msra.mxu1 %v11202_v14  ;;  %v11283_v13 = vld [vmem:[%s15095_s1 + $0x1b00] ss:$16 sps:$4 sm:$0xff]   ;;  %v11286_v14 = vld [vmem:[%s15095_s1 + $0x1b08] ss:$16 sps:$4 sm:$0xff]  }
 0x32c   :  { %7203 = vmatprep.subr.bf16.mxu0 %v11207_v15  ;;  %8051 = vmatprep.subr.bf16.mxu1 %v11210_v16  ;;  %v11291_v15 = vld [vmem:[%s15095_s1 + $0x1b24] ss:$16 sps:$4 sm:$0xff]   ;;  %v11294_v16 = vld [vmem:[%s15095_s1 + $0x1b2c] ss:$16 sps:$4 sm:$0xff]  }
 0x32f   :  { %7204 = vmatpush1.bf16.msra.mxu0 %v11205_v19  ;;  %8052 = vmatpush1.bf16.msra.mxu1 %v11208_v17  ;;  %v11289_v19 = vld [vmem:[%s15095_s1 + $0x1b20] ss:$16 sps:$4 sm:$0xff]   ;;  %v11292_v17 = vld [vmem:[%s15095_s1 + $0x1b28] ss:$16 sps:$4 sm:$0xff]  }
 0x330   :  { %7205 = vmatprep.subr.bf16.mxu0 %v11213_v18  ;;  %8053 = vmatprep.subr.bf16.mxu1 %v11216_v20  ;;  %v11297_v18 = vld [vmem:[%s15095_s1 + $0x1b44] ss:$16 sps:$4 sm:$0xff]   ;;  %v11300_v20 = vld [vmem:[%s15095_s1 + $0x1b4c] ss:$16 sps:$4 sm:$0xff]  }
 0x333   :  { %7206 = vmatpush1.bf16.msra.mxu0 %v11211_v21  ;;  %8054 = vmatpush1.bf16.msra.mxu1 %v11214_v22  ;;  %v11295_v21 = vld [vmem:[%s15095_s1 + $0x1b40] ss:$16 sps:$4 sm:$0xff]   ;;  %v11298_v22 = vld [vmem:[%s15095_s1 + $0x1b48] ss:$16 sps:$4 sm:$0xff]  }
 0x334   :  { %7207 = vmatprep.subr.bf16.mxu0 %v11219_v23  ;;  %8055 = vmatprep.subr.bf16.mxu1 %v11222_v24  ;;  %v11303_v23 = vld [vmem:[%s15095_s1 + $0x1b64] ss:$16 sps:$4 sm:$0xff]   ;;  %v11306_v24 = vld [vmem:[%s15095_s1 + $0x1b6c] ss:$16 sps:$4 sm:$0xff]  }
 0x337   :  { %7208 = vmatpush1.bf16.msra.mxu0 %v11217_v26  ;;  %8056 = vmatpush1.bf16.msra.mxu1 %v11220_v25  ;;  %v11301_v26 = vld [vmem:[%s15095_s1 + $0x1b60] ss:$16 sps:$4 sm:$0xff]   ;;  %v11304_v25 = vld [vmem:[%s15095_s1 + $0x1b68] ss:$16 sps:$4 sm:$0xff]  }
 0x338   :  { %7209 = vmatprep.subr.bf16.mxu0 %v11225_v27  ;;  %8057 = vmatprep.subr.bf16.mxu1 %v11228_v28  ;;  %v11309_v27 = vld [vmem:[%s15095_s1 + $0x1b84] ss:$16 sps:$4 sm:$0xff]   ;;  %v11312_v28 = vld [vmem:[%s15095_s1 + $0x1b8c] ss:$16 sps:$4 sm:$0xff]  }
 0x33b   :  { %7210 = vmatpush1.bf16.msra.mxu0 %v11223_v29  ;;  %8058 = vmatpush1.bf16.msra.mxu1 %v11226_v30  ;;  %v11307_v29 = vld [vmem:[%s15095_s1 + $0x1b80] ss:$16 sps:$4 sm:$0xff]   ;;  %v11310_v30 = vld [vmem:[%s15095_s1 + $0x1b88] ss:$16 sps:$4 sm:$0xff]  }
 0x33c   :  { %7211 = vmatprep.subr.bf16.mxu0 %v11231_v31  ;;  %8059 = vmatprep.subr.bf16.mxu1 %v11234_v32  ;;  %v11315_v31 = vld [vmem:[%s15095_s1 + $0x1ba4] ss:$16 sps:$4 sm:$0xff]   ;;  %v11318_v32 = vld [vmem:[%s15095_s1 + $0x1bac] ss:$16 sps:$4 sm:$0xff]  }
 0x33f   :  { %7212 = vmatpush1.bf16.msra.mxu0 %v11229_v34  ;;  %8060 = vmatpush1.bf16.msra.mxu1 %v11232_v36  ;;  %v11313_v34 = vld [vmem:[%s15095_s1 + $0x1ba0] ss:$16 sps:$4 sm:$0xff]   ;;  %v11316_v36 = vld [vmem:[%s15095_s1 + $0x1ba8] ss:$16 sps:$4 sm:$0xff]  }
 0x340   :  { %7234 = vmatprep.subr.bf16.mxu0 %v11237_v33  ;;  %8082 = vmatprep.subr.bf16.mxu1 %v11240_v35  ;;  %v11321_v33 = vld [vmem:[%s15095_s1 + $0x1bc4] ss:$16 sps:$4 sm:$0xff]   ;;  %v11324_v35 = vld [vmem:[%s15095_s1 + $0x1bcc] ss:$16 sps:$4 sm:$0xff]  }
 0x342   :  { %7214 = vmatmul.mubr.bf16.vlgmr.msra.gmra.mrb[0].mxu0 %v8666_v37  ;;  %8062 = vmatmul.mubr.bf16.vlgmr.msra.gmra.mrb[0].mxu1 %v8666_v37  ;;  %v11319_v37 = vld [vmem:[%s15095_s1 + $0x1bc0] ss:$16 sps:$4 sm:$0xff]  }
 0x343   :  { %7235 = vmatpush1.bf16.msra.mxu0 %v11235_v40  ;;  %8083 = vmatpush1.bf16.msra.mxu1 %v11238_v42  ;;  %v11330_v40 = vld [vmem:[%s15095_s1 + $0x1bec] ss:$16 sps:$4 sm:$0xff]   ;;  %v11325_v42 = vld [vmem:[%s15095_s1 + $0x1be0] ss:$16 sps:$4 sm:$0xff]  }
 0x344   :  { %7236 = vmatprep.subr.bf16.mxu0 %v11243_v44  ;;  %8084 = vmatprep.subr.bf16.mxu1 %v11246_v41  ;;  %v11328_v44 = vld [vmem:[%s15095_s1 + $0x1be8] ss:$16 sps:$4 sm:$0xff]   ;;  %v11333_v41 = vld [vmem:[%s15095_s1 + $0x1c04] ss:$16 sps:$4 sm:$0xff]  }
 0x345   :  { %7223 = vmatprep.mubr.bf16.mxu0 %v8699_v43  ;;  %8071 = vmatprep.mubr.bf16.mxu1 %v8699_v43  ;;  %v11336_v43 = vld [vmem:[%s15095_s1 + $0x1c0c] ss:$16 sps:$4 sm:$0xff]  }
 0x347   :  { %7237 = vmatpush1.bf16.msra.mxu0 %v11241_v45  ;;  %8085 = vmatpush1.bf16.msra.mxu1 %v11244_v46  ;;  %v8668_v45 = vcombine.low %v14338_v52, %v14343_v49  ;;  %v62_v46 = vld [vmem:[%s15096_s0 + $0x168] sm:$0xff]  ;;  %v11339_v52 = vld [vmem:[%s15095_s1 + $0x1c24] ss:$16 sps:$4 sm:$0xff]  }
 0x348   :  { %7238 = vmatprep.subr.bf16.mxu0 %v11249_v47  ;;  %8086 = vmatprep.subr.bf16.mxu1 %v11252_v48  ;;  %v78_v47 = vld [vmem:[%s15096_s0 + $0x1e8] sm:$0xff]  ;;  %v11331_v48 = vld [vmem:[%s15095_s1 + $0x1c00] ss:$16 sps:$4 sm:$0xff]  }
 0x349   :  { %v11342_v49 = vld [vmem:[%s15095_s1 + $0x1c2c] ss:$16 sps:$4 sm:$0xff]  }
 0x34a   :  { %7224 = vmatmul.mubr.bf16.gmra.mrb[4].mxu0 %v8698_v51  ;;  %8072 = vmatmul.mubr.bf16.gmra.mrb[4].mxu1 %v8698_v51  ;;  %v11334_v51 = vld [vmem:[%s15095_s1 + $0x1c08] ss:$16 sps:$4 sm:$0xff]  }
 0x34b   :  { %7239 = vmatpush1.bf16.msra.mxu0 %v11247_v50  ;;  %8087 = vmatpush1.bf16.msra.mxu1 %v11250_v53  ;;  %v8701_v50 = vcombine.high %v62_v46, %v78_v47  ;;  %v11337_v53 = vld [vmem:[%s15095_s1 + $0x1c20] ss:$16 sps:$4 sm:$0xff]  }
 0x34c   :  { %7240 = vmatprep.subr.bf16.mxu0 %v11255_v54  ;;  %8088 = vmatprep.subr.bf16.mxu1 %v11258_v55  ;;  %v11340_v54 = vld [vmem:[%s15095_s1 + $0x1c28] ss:$16 sps:$4 sm:$0xff]   ;;  %v11345_v55 = vld [vmem:[%s15095_s1 + $0x1c44] ss:$16 sps:$4 sm:$0xff]  }
 0x34d   :  { %7266 = vmatprep.mubr.bf16.mxu0 %v8669_v56  ;;  %8114 = vmatprep.mubr.bf16.mxu1 %v8669_v56  ;;  %v11348_v56 = vld [vmem:[%s15095_s1 + $0x1c4c] ss:$16 sps:$4 sm:$0xff]  }
 0x34f   :  { %7241 = vmatpush1.bf16.msra.mxu0 %v11253_v59  ;;  %8089 = vmatpush1.bf16.msra.mxu1 %v11256_v60  ;;  %v8700_v59 = vcombine.low %v62_v46, %v78_v47  ;;  %v14550_v60 = vld [vmem:[%s15096_s0 + $0x70] sm:$0xff]  ;;  %v11418_v46 = vld [vmem:[%s15095_s1 + $0x1dc8] ss:$16 sps:$4 sm:$0xff]  }
 0x350   :  { %7242 = vmatprep.subr.bf16.mxu0 %v11261_v57  ;;  %8090 = vmatprep.subr.bf16.mxu1 %v11264_v58  ;;  %v14555_v57 = vld [vmem:[%s15096_s0 + $0xf0] sm:$0xff] }
 0x351   :  { %v11343_v58 = vld [vmem:[%s15095_s1 + $0x1c40] ss:$16 sps:$4 sm:$0xff]   ;;  %v11423_v47 = vld [vmem:[%s15095_s1 + $0x1de4] ss:$16 sps:$4 sm:$0xff]  }
 0x353   :  { %7243 = vmatpush1.bf16.msra.mxu0 %v11259_v61  ;;  %8091 = vmatpush1.bf16.msra.mxu1 %v11262_v62  ;;  %v11346_v61 = vld [vmem:[%s15095_s1 + $0x1c48] ss:$16 sps:$4 sm:$0xff]   ;;  %v11351_v62 = vld [vmem:[%s15095_s1 + $0x1c64] ss:$16 sps:$4 sm:$0xff]  }
 0x354   :  { %7244 = vmatprep.subr.bf16.mxu0 %v11267_v63  ;;  %8092 = vmatprep.subr.bf16.mxu1 %v11270_v0  ;;  %v11354_v63 = vld [vmem:[%s15095_s1 + $0x1c6c] ss:$16 sps:$4 sm:$0xff]   ;;  %v8671_v0 = vcombine.high %v14550_v60, %v14555_v57 }
 0x357   :  { %7245 = vmatpush1.bf16.msra.mxu0 %v11265_v3  ;;  %8093 = vmatpush1.bf16.msra.mxu1 %v11268_v4  ;;  %v11349_v3 = vld [vmem:[%s15095_s1 + $0x1c60] ss:$16 sps:$4 sm:$0xff]   ;;  %v11352_v4 = vld [vmem:[%s15095_s1 + $0x1c68] ss:$16 sps:$4 sm:$0xff]  }
 0x358   :  { %7246 = vmatprep.subr.bf16.mxu0 %v11273_v1  ;;  %8094 = vmatprep.subr.bf16.mxu1 %v11276_v2  ;;  %v11357_v1 = vld [vmem:[%s15095_s1 + $0x1c84] ss:$16 sps:$4 sm:$0xff]   ;;  %v11360_v2 = vld [vmem:[%s15095_s1 + $0x1c8c] ss:$16 sps:$4 sm:$0xff]  }
 0x35b   :  { %7247 = vmatpush1.bf16.msra.mxu0 %v11271_v5  ;;  %8095 = vmatpush1.bf16.msra.mxu1 %v11274_v6  ;;  %v11355_v5 = vld [vmem:[%s15095_s1 + $0x1c80] ss:$16 sps:$4 sm:$0xff]   ;;  %v11358_v6 = vld [vmem:[%s15095_s1 + $0x1c88] ss:$16 sps:$4 sm:$0xff]  }
 0x35c   :  { %7248 = vmatprep.subr.bf16.mxu0 %v11279_v7  ;;  %8096 = vmatprep.subr.bf16.mxu1 %v11282_v8  ;;  %v11363_v7 = vld [vmem:[%s15095_s1 + $0x1ca4] ss:$16 sps:$4 sm:$0xff]   ;;  %v11366_v8 = vld [vmem:[%s15095_s1 + $0x1cac] ss:$16 sps:$4 sm:$0xff]  }
 0x35f   :  { %7249 = vmatpush1.bf16.msra.mxu0 %v11277_v11  ;;  %8097 = vmatpush1.bf16.msra.mxu1 %v11280_v12  ;;  %v11361_v11 = vld [vmem:[%s15095_s1 + $0x1ca0] ss:$16 sps:$4 sm:$0xff]   ;;  %v11364_v12 = vld [vmem:[%s15095_s1 + $0x1ca8] ss:$16 sps:$4 sm:$0xff]  }
 0x360   :  { %7250 = vmatprep.subr.bf16.mxu0 %v11285_v9  ;;  %8098 = vmatprep.subr.bf16.mxu1 %v11288_v10  ;;  %v11369_v9 = vld [vmem:[%s15095_s1 + $0x1cc4] ss:$16 sps:$4 sm:$0xff]   ;;  %v11372_v10 = vld [vmem:[%s15095_s1 + $0x1ccc] ss:$16 sps:$4 sm:$0xff]  }
 0x363   :  { %7251 = vmatpush1.bf16.msra.mxu0 %v11283_v13  ;;  %8099 = vmatpush1.bf16.msra.mxu1 %v11286_v14  ;;  %v11367_v13 = vld [vmem:[%s15095_s1 + $0x1cc0] ss:$16 sps:$4 sm:$0xff]   ;;  %v11370_v14 = vld [vmem:[%s15095_s1 + $0x1cc8] ss:$16 sps:$4 sm:$0xff]  }
 0x364   :  { %7252 = vmatprep.subr.bf16.mxu0 %v11291_v15  ;;  %8100 = vmatprep.subr.bf16.mxu1 %v11294_v16  ;;  %v11375_v15 = vld [vmem:[%s15095_s1 + $0x1ce4] ss:$16 sps:$4 sm:$0xff]   ;;  %v11378_v16 = vld [vmem:[%s15095_s1 + $0x1cec] ss:$16 sps:$4 sm:$0xff]  }
 0x367   :  { %7253 = vmatpush1.bf16.msra.mxu0 %v11289_v19  ;;  %8101 = vmatpush1.bf16.msra.mxu1 %v11292_v17  ;;  %v11373_v19 = vld [vmem:[%s15095_s1 + $0x1ce0] ss:$16 sps:$4 sm:$0xff]   ;;  %v11376_v17 = vld [vmem:[%s15095_s1 + $0x1ce8] ss:$16 sps:$4 sm:$0xff]  }
 0x368   :  { %7254 = vmatprep.subr.bf16.mxu0 %v11297_v18  ;;  %8102 = vmatprep.subr.bf16.mxu1 %v11300_v20  ;;  %v11381_v18 = vld [vmem:[%s15095_s1 + $0x1d04] ss:$16 sps:$4 sm:$0xff]   ;;  %v11384_v20 = vld [vmem:[%s15095_s1 + $0x1d0c] ss:$16 sps:$4 sm:$0xff]  }
 0x36b   :  { %7255 = vmatpush1.bf16.msra.mxu0 %v11295_v21  ;;  %8103 = vmatpush1.bf16.msra.mxu1 %v11298_v22  ;;  %v11379_v21 = vld [vmem:[%s15095_s1 + $0x1d00] ss:$16 sps:$4 sm:$0xff]   ;;  %v11382_v22 = vld [vmem:[%s15095_s1 + $0x1d08] ss:$16 sps:$4 sm:$0xff]  }
 0x36c   :  { %7256 = vmatprep.subr.bf16.mxu0 %v11303_v23  ;;  %8104 = vmatprep.subr.bf16.mxu1 %v11306_v24  ;;  %v11387_v23 = vld [vmem:[%s15095_s1 + $0x1d24] ss:$16 sps:$4 sm:$0xff]   ;;  %v11390_v24 = vld [vmem:[%s15095_s1 + $0x1d2c] ss:$16 sps:$4 sm:$0xff]  }
 0x36f   :  { %7257 = vmatpush1.bf16.msra.mxu0 %v11301_v26  ;;  %8105 = vmatpush1.bf16.msra.mxu1 %v11304_v25  ;;  %v11385_v26 = vld [vmem:[%s15095_s1 + $0x1d20] ss:$16 sps:$4 sm:$0xff]   ;;  %v11388_v25 = vld [vmem:[%s15095_s1 + $0x1d28] ss:$16 sps:$4 sm:$0xff]  }
 0x370   :  { %7258 = vmatprep.subr.bf16.mxu0 %v11309_v27  ;;  %8106 = vmatprep.subr.bf16.mxu1 %v11312_v28  ;;  %v11393_v27 = vld [vmem:[%s15095_s1 + $0x1d44] ss:$16 sps:$4 sm:$0xff]   ;;  %v11396_v28 = vld [vmem:[%s15095_s1 + $0x1d4c] ss:$16 sps:$4 sm:$0xff]  }
 0x373   :  { %7259 = vmatpush1.bf16.msra.mxu0 %v11307_v29  ;;  %8107 = vmatpush1.bf16.msra.mxu1 %v11310_v30  ;;  %v11391_v29 = vld [vmem:[%s15095_s1 + $0x1d40] ss:$16 sps:$4 sm:$0xff]   ;;  %v11394_v30 = vld [vmem:[%s15095_s1 + $0x1d48] ss:$16 sps:$4 sm:$0xff]  }
 0x374   :  { %7260 = vmatprep.subr.bf16.mxu0 %v11315_v31  ;;  %8108 = vmatprep.subr.bf16.mxu1 %v11318_v32  ;;  %v11399_v31 = vld [vmem:[%s15095_s1 + $0x1d64] ss:$16 sps:$4 sm:$0xff]   ;;  %v11402_v32 = vld [vmem:[%s15095_s1 + $0x1d6c] ss:$16 sps:$4 sm:$0xff]  }
 0x377   :  { %7261 = vmatpush1.bf16.msra.mxu0 %v11313_v34  ;;  %8109 = vmatpush1.bf16.msra.mxu1 %v11316_v36  ;;  %v11397_v34 = vld [vmem:[%s15095_s1 + $0x1d60] ss:$16 sps:$4 sm:$0xff]   ;;  %v11400_v36 = vld [vmem:[%s15095_s1 + $0x1d68] ss:$16 sps:$4 sm:$0xff]  }
 0x378   :  { %7262 = vmatprep.subr.bf16.mxu0 %v11321_v33  ;;  %8110 = vmatprep.subr.bf16.mxu1 %v11324_v35  ;;  %v11405_v33 = vld [vmem:[%s15095_s1 + $0x1d84] ss:$16 sps:$4 sm:$0xff]   ;;  %v11408_v35 = vld [vmem:[%s15095_s1 + $0x1d8c] ss:$16 sps:$4 sm:$0xff]  }
 0x37b   :  { %7263 = vmatpush1.bf16.msra.mxu0 %v11319_v37  ;;  %8111 = vmatpush1.bf16.msra.mxu1 %v11322_v38  ;;  %v11403_v37 = vld [vmem:[%s15095_s1 + $0x1d80] ss:$16 sps:$4 sm:$0xff]   ;;  %v11406_v38 = vld [vmem:[%s15095_s1 + $0x1d88] ss:$16 sps:$4 sm:$0xff]  }
 0x37c   :  { %7264 = vmatprep.subr.bf16.mxu0 %v11327_v39  ;;  %8112 = vmatprep.subr.bf16.mxu1 %v11330_v40  ;;  %v11411_v39 = vld [vmem:[%s15095_s1 + $0x1da4] ss:$16 sps:$4 sm:$0xff]   ;;  %v11414_v40 = vld [vmem:[%s15095_s1 + $0x1dac] ss:$16 sps:$4 sm:$0xff]  }
 0x37f   :  { %7265 = vmatpush1.bf16.msra.mxu0 %v11325_v42  ;;  %8113 = vmatpush1.bf16.msra.mxu1 %v11328_v44  ;;  %v11409_v42 = vld [vmem:[%s15095_s1 + $0x1da0] ss:$16 sps:$4 sm:$0xff]   ;;  %v11412_v44 = vld [vmem:[%s15095_s1 + $0x1da8] ss:$16 sps:$4 sm:$0xff]  }
 0x380   :  { %7287 = vmatprep.subr.bf16.mxu0 %v11333_v41  ;;  %8135 = vmatprep.subr.bf16.mxu1 %v11336_v43  ;;  %v11417_v41 = vld [vmem:[%s15095_s1 + $0x1dc4] ss:$16 sps:$4 sm:$0xff]   ;;  %v11420_v43 = vld [vmem:[%s15095_s1 + $0x1dcc] ss:$16 sps:$4 sm:$0xff]  }
 0x382   :  { %7267 = vmatmul.mubr.bf16.vlgmr.msra.gmra.mrb[0].mxu0 %v8668_v45  ;;  %8115 = vmatmul.mubr.bf16.vlgmr.msra.gmra.mrb[0].mxu1 %v8668_v45  ;;  %v11415_v45 = vld [vmem:[%s15095_s1 + $0x1dc0] ss:$16 sps:$4 sm:$0xff]  }
 0x383   :  { %7288 = vmatpush1.bf16.msra.mxu0 %v11331_v48  ;;  %8136 = vmatpush1.bf16.msra.mxu1 %v11334_v51  ;;  %v11426_v48 = vld [vmem:[%s15095_s1 + $0x1dec] ss:$16 sps:$4 sm:$0xff]   ;;  %v11421_v51 = vld [vmem:[%s15095_s1 + $0x1de0] ss:$16 sps:$4 sm:$0xff]  }
 0x384   :  { %7289 = vmatprep.subr.bf16.mxu0 %v11339_v52  ;;  %8137 = vmatprep.subr.bf16.mxu1 %v11342_v49  ;;  %v11424_v52 = vld [vmem:[%s15095_s1 + $0x1de8] ss:$16 sps:$4 sm:$0xff]   ;;  %v11429_v49 = vld [vmem:[%s15095_s1 + $0x1e04] ss:$16 sps:$4 sm:$0xff]  }
 0x385   :  { %7276 = vmatprep.mubr.bf16.mxu0 %v8701_v50  ;;  %8124 = vmatprep.mubr.bf16.mxu1 %v8701_v50  ;;  %v11432_v50 = vld [vmem:[%s15095_s1 + $0x1e0c] ss:$16 sps:$4 sm:$0xff]  }
 0x387   :  { %7290 = vmatpush1.bf16.msra.mxu0 %v11337_v53  ;;  %8138 = vmatpush1.bf16.msra.mxu1 %v11340_v54  ;;  %v8670_v53 = vcombine.low %v14550_v60, %v14555_v57  ;;  %v63_v54 = vld [vmem:[%s15096_s0 + $0x170] sm:$0xff]  ;;  %v11438_v57 = vld [vmem:[%s15095_s1 + $0x1e2c] ss:$16 sps:$4 sm:$0xff]  }
 0x388   :  { %7291 = vmatprep.subr.bf16.mxu0 %v11345_v55  ;;  %8139 = vmatprep.subr.bf16.mxu1 %v11348_v56  ;;  %v79_v55 = vld [vmem:[%s15096_s0 + $0x1f0] sm:$0xff] }
 0x389   :  { %v11427_v56 = vld [vmem:[%s15095_s1 + $0x1e00] ss:$16 sps:$4 sm:$0xff]   ;;  %v11435_v60 = vld [vmem:[%s15095_s1 + $0x1e24] ss:$16 sps:$4 sm:$0xff]  }
 0x38a   :  { %7277 = vmatmul.mubr.bf16.gmra.mrb[4].mxu0 %v8700_v59  ;;  %8125 = vmatmul.mubr.bf16.gmra.mrb[4].mxu1 %v8700_v59  ;;  %v11430_v59 = vld [vmem:[%s15095_s1 + $0x1e08] ss:$16 sps:$4 sm:$0xff]  }
 0x38b   :  { %7292 = vmatpush1.bf16.msra.mxu0 %v11343_v58  ;;  %8140 = vmatpush1.bf16.msra.mxu1 %v11346_v61  ;;  %v8703_v58 = vcombine.high %v63_v54, %v79_v55  ;;  %v11433_v61 = vld [vmem:[%s15095_s1 + $0x1e20] ss:$16 sps:$4 sm:$0xff]  }
 0x38c   :  { %7293 = vmatprep.subr.bf16.mxu0 %v11351_v62  ;;  %8141 = vmatprep.subr.bf16.mxu1 %v11354_v63  ;;  %v11436_v62 = vld [vmem:[%s15095_s1 + $0x1e28] ss:$16 sps:$4 sm:$0xff]   ;;  %v11441_v63 = vld [vmem:[%s15095_s1 + $0x1e44] ss:$16 sps:$4 sm:$0xff]  }
 0x38d   :  { %7319 = vmatprep.mubr.bf16.mxu0 %v8671_v0  ;;  %8167 = vmatprep.mubr.bf16.mxu1 %v8671_v0  ;;  %v11444_v0 = vld [vmem:[%s15095_s1 + $0x1e4c] ss:$16 sps:$4 sm:$0xff]  }
 0x38f   :  { %7294 = vmatpush1.bf16.msra.mxu0 %v11349_v3  ;;  %8142 = vmatpush1.bf16.msra.mxu1 %v11352_v4  ;;  %v8702_v3 = vcombine.low %v63_v54, %v79_v55  ;;  %v14762_v4 = vld [vmem:[%s15096_s0 + $0x78] sm:$0xff]  ;;  %v11519_v55 = vld [vmem:[%s15095_s1 + $0x1fe4] ss:$16 sps:$4 sm:$0xff]  }
 0x390   :  { %7295 = vmatprep.subr.bf16.mxu0 %v11357_v1  ;;  %8143 = vmatprep.subr.bf16.mxu1 %v11360_v2  ;;  %v14767_v1 = vld [vmem:[%s15096_s0 + $0xf8] sm:$0xff]  ;;  %v11439_v2 = vld [vmem:[%s15095_s1 + $0x1e40] ss:$16 sps:$4 sm:$0xff]  }
 0x391   :  { %v11514_v54 = vld [vmem:[%s15095_s1 + $0x1fc8] ss:$16 sps:$4 sm:$0xff]  }
 0x393   :  { %7296 = vmatpush1.bf16.msra.mxu0 %v11355_v5  ;;  %8144 = vmatpush1.bf16.msra.mxu1 %v11358_v6  ;;  %v11442_v5 = vld [vmem:[%s15095_s1 + $0x1e48] ss:$16 sps:$4 sm:$0xff]   ;;  %v11447_v6 = vld [vmem:[%s15095_s1 + $0x1e64] ss:$16 sps:$4 sm:$0xff]  }
 0x394   :  { %7297 = vmatprep.subr.bf16.mxu0 %v11363_v7  ;;  %8145 = vmatprep.subr.bf16.mxu1 %v11366_v8  ;;  %v11450_v7 = vld [vmem:[%s15095_s1 + $0x1e6c] ss:$16 sps:$4 sm:$0xff]   ;;  %v8673_v8 = vcombine.high %v14762_v4, %v14767_v1 }
 0x397   :  { %7298 = vmatpush1.bf16.msra.mxu0 %v11361_v11  ;;  %8146 = vmatpush1.bf16.msra.mxu1 %v11364_v12  ;;  %v11445_v11 = vld [vmem:[%s15095_s1 + $0x1e60] ss:$16 sps:$4 sm:$0xff]   ;;  %v11448_v12 = vld [vmem:[%s15095_s1 + $0x1e68] ss:$16 sps:$4 sm:$0xff]  }
 0x398   :  { %7299 = vmatprep.subr.bf16.mxu0 %v11369_v9  ;;  %8147 = vmatprep.subr.bf16.mxu1 %v11372_v10  ;;  %v11453_v9 = vld [vmem:[%s15095_s1 + $0x1e84] ss:$16 sps:$4 sm:$0xff]   ;;  %v11456_v10 = vld [vmem:[%s15095_s1 + $0x1e8c] ss:$16 sps:$4 sm:$0xff]  }
 0x39b   :  { %7300 = vmatpush1.bf16.msra.mxu0 %v11367_v13  ;;  %8148 = vmatpush1.bf16.msra.mxu1 %v11370_v14  ;;  %v11451_v13 = vld [vmem:[%s15095_s1 + $0x1e80] ss:$16 sps:$4 sm:$0xff]   ;;  %v11454_v14 = vld [vmem:[%s15095_s1 + $0x1e88] ss:$16 sps:$4 sm:$0xff]  }
 0x39c   :  { %7301 = vmatprep.subr.bf16.mxu0 %v11375_v15  ;;  %8149 = vmatprep.subr.bf16.mxu1 %v11378_v16  ;;  %v11459_v15 = vld [vmem:[%s15095_s1 + $0x1ea4] ss:$16 sps:$4 sm:$0xff]   ;;  %v11462_v16 = vld [vmem:[%s15095_s1 + $0x1eac] ss:$16 sps:$4 sm:$0xff]  }
 0x39f   :  { %7302 = vmatpush1.bf16.msra.mxu0 %v11373_v19  ;;  %8150 = vmatpush1.bf16.msra.mxu1 %v11376_v17  ;;  %v11457_v19 = vld [vmem:[%s15095_s1 + $0x1ea0] ss:$16 sps:$4 sm:$0xff]   ;;  %v11460_v17 = vld [vmem:[%s15095_s1 + $0x1ea8] ss:$16 sps:$4 sm:$0xff]  }
 0x3a0   :  { %7303 = vmatprep.subr.bf16.mxu0 %v11381_v18  ;;  %8151 = vmatprep.subr.bf16.mxu1 %v11384_v20  ;;  %v11465_v18 = vld [vmem:[%s15095_s1 + $0x1ec4] ss:$16 sps:$4 sm:$0xff]   ;;  %v11468_v20 = vld [vmem:[%s15095_s1 + $0x1ecc] ss:$16 sps:$4 sm:$0xff]  }
 0x3a3   :  { %7304 = vmatpush1.bf16.msra.mxu0 %v11379_v21  ;;  %8152 = vmatpush1.bf16.msra.mxu1 %v11382_v22  ;;  %v11463_v21 = vld [vmem:[%s15095_s1 + $0x1ec0] ss:$16 sps:$4 sm:$0xff]   ;;  %v11466_v22 = vld [vmem:[%s15095_s1 + $0x1ec8] ss:$16 sps:$4 sm:$0xff]  }
 0x3a4   :  { %7305 = vmatprep.subr.bf16.mxu0 %v11387_v23  ;;  %8153 = vmatprep.subr.bf16.mxu1 %v11390_v24  ;;  %v11471_v23 = vld [vmem:[%s15095_s1 + $0x1ee4] ss:$16 sps:$4 sm:$0xff]   ;;  %v11474_v24 = vld [vmem:[%s15095_s1 + $0x1eec] ss:$16 sps:$4 sm:$0xff]  }
 0x3a7   :  { %7306 = vmatpush1.bf16.msra.mxu0 %v11385_v26  ;;  %8154 = vmatpush1.bf16.msra.mxu1 %v11388_v25  ;;  %v11469_v26 = vld [vmem:[%s15095_s1 + $0x1ee0] ss:$16 sps:$4 sm:$0xff]   ;;  %v11472_v25 = vld [vmem:[%s15095_s1 + $0x1ee8] ss:$16 sps:$4 sm:$0xff]  }
 0x3a8   :  { %7307 = vmatprep.subr.bf16.mxu0 %v11393_v27  ;;  %8155 = vmatprep.subr.bf16.mxu1 %v11396_v28  ;;  %v11477_v27 = vld [vmem:[%s15095_s1 + $0x1f04] ss:$16 sps:$4 sm:$0xff]   ;;  %v11480_v28 = vld [vmem:[%s15095_s1 + $0x1f0c] ss:$16 sps:$4 sm:$0xff]  }
 0x3ab   :  { %7308 = vmatpush1.bf16.msra.mxu0 %v11391_v29  ;;  %8156 = vmatpush1.bf16.msra.mxu1 %v11394_v30  ;;  %v11475_v29 = vld [vmem:[%s15095_s1 + $0x1f00] ss:$16 sps:$4 sm:$0xff]   ;;  %v11478_v30 = vld [vmem:[%s15095_s1 + $0x1f08] ss:$16 sps:$4 sm:$0xff]  }
 0x3ac   :  { %7309 = vmatprep.subr.bf16.mxu0 %v11399_v31  ;;  %8157 = vmatprep.subr.bf16.mxu1 %v11402_v32  ;;  %v11483_v31 = vld [vmem:[%s15095_s1 + $0x1f24] ss:$16 sps:$4 sm:$0xff]   ;;  %v11486_v32 = vld [vmem:[%s15095_s1 + $0x1f2c] ss:$16 sps:$4 sm:$0xff]  }
 0x3af   :  { %7310 = vmatpush1.bf16.msra.mxu0 %v11397_v34  ;;  %8158 = vmatpush1.bf16.msra.mxu1 %v11400_v36  ;;  %v11481_v34 = vld [vmem:[%s15095_s1 + $0x1f20] ss:$16 sps:$4 sm:$0xff]   ;;  %v11484_v36 = vld [vmem:[%s15095_s1 + $0x1f28] ss:$16 sps:$4 sm:$0xff]  }
 0x3b0   :  { %7311 = vmatprep.subr.bf16.mxu0 %v11405_v33  ;;  %8159 = vmatprep.subr.bf16.mxu1 %v11408_v35  ;;  %v11489_v33 = vld [vmem:[%s15095_s1 + $0x1f44] ss:$16 sps:$4 sm:$0xff]   ;;  %v11492_v35 = vld [vmem:[%s15095_s1 + $0x1f4c] ss:$16 sps:$4 sm:$0xff]  }
 0x3b3   :  { %7312 = vmatpush1.bf16.msra.mxu0 %v11403_v37  ;;  %8160 = vmatpush1.bf16.msra.mxu1 %v11406_v38  ;;  %v11487_v37 = vld [vmem:[%s15095_s1 + $0x1f40] ss:$16 sps:$4 sm:$0xff]   ;;  %v11490_v38 = vld [vmem:[%s15095_s1 + $0x1f48] ss:$16 sps:$4 sm:$0xff]  }
 0x3b4   :  { %7313 = vmatprep.subr.bf16.mxu0 %v11411_v39  ;;  %8161 = vmatprep.subr.bf16.mxu1 %v11414_v40  ;;  %v11495_v39 = vld [vmem:[%s15095_s1 + $0x1f64] ss:$16 sps:$4 sm:$0xff]   ;;  %v11498_v40 = vld [vmem:[%s15095_s1 + $0x1f6c] ss:$16 sps:$4 sm:$0xff]  }
 0x3b7   :  { %7314 = vmatpush1.bf16.msra.mxu0 %v11409_v42  ;;  %8162 = vmatpush1.bf16.msra.mxu1 %v11412_v44  ;;  %v11493_v42 = vld [vmem:[%s15095_s1 + $0x1f60] ss:$16 sps:$4 sm:$0xff]   ;;  %v11496_v44 = vld [vmem:[%s15095_s1 + $0x1f68] ss:$16 sps:$4 sm:$0xff]  }
 0x3b8   :  { %7315 = vmatprep.subr.bf16.mxu0 %v11417_v41  ;;  %8163 = vmatprep.subr.bf16.mxu1 %v11420_v43  ;;  %v11501_v41 = vld [vmem:[%s15095_s1 + $0x1f84] ss:$16 sps:$4 sm:$0xff]   ;;  %v11504_v43 = vld [vmem:[%s15095_s1 + $0x1f8c] ss:$16 sps:$4 sm:$0xff]  }
 0x3bb   :  { %7316 = vmatpush1.bf16.msra.mxu0 %v11415_v45  ;;  %8164 = vmatpush1.bf16.msra.mxu1 %v11418_v46  ;;  %v11499_v45 = vld [vmem:[%s15095_s1 + $0x1f80] ss:$16 sps:$4 sm:$0xff]   ;;  %v11502_v46 = vld [vmem:[%s15095_s1 + $0x1f88] ss:$16 sps:$4 sm:$0xff]  }
 0x3bc   :  { %7317 = vmatprep.subr.bf16.mxu0 %v11423_v47  ;;  %8165 = vmatprep.subr.bf16.mxu1 %v11426_v48  ;;  %v11507_v47 = vld [vmem:[%s15095_s1 + $0x1fa4] ss:$16 sps:$4 sm:$0xff]   ;;  %v11510_v48 = vld [vmem:[%s15095_s1 + $0x1fac] ss:$16 sps:$4 sm:$0xff]  }
 0x3bf   :  { %7318 = vmatpush1.bf16.msra.mxu0 %v11421_v51  ;;  %8166 = vmatpush1.bf16.msra.mxu1 %v11424_v52  ;;  %v11505_v51 = vld [vmem:[%s15095_s1 + $0x1fa0] ss:$16 sps:$4 sm:$0xff]   ;;  %v11508_v52 = vld [vmem:[%s15095_s1 + $0x1fa8] ss:$16 sps:$4 sm:$0xff]  }
 0x3c0   :  { %7340 = vmatprep.subr.bf16.mxu0 %v11429_v49  ;;  %8188 = vmatprep.subr.bf16.mxu1 %v11432_v50  ;;  %v11513_v49 = vld [vmem:[%s15095_s1 + $0x1fc4] ss:$16 sps:$4 sm:$0xff]   ;;  %v11516_v50 = vld [vmem:[%s15095_s1 + $0x1fcc] ss:$16 sps:$4 sm:$0xff]  }
 0x3c2   :  { %7320 = vmatmul.mubr.bf16.vlgmr.msra.gmra.mrb[0].mxu0 %v8670_v53  ;;  %8168 = vmatmul.mubr.bf16.vlgmr.msra.gmra.mrb[0].mxu1 %v8670_v53  ;;  %v11511_v53 = vld [vmem:[%s15095_s1 + $0x1fc0] ss:$16 sps:$4 sm:$0xff]  }
 0x3c3   :  { %7341 = vmatpush1.bf16.msra.mxu0 %v11427_v56  ;;  %8189 = vmatpush1.bf16.msra.mxu1 %v11430_v59  ;;  %v11522_v56 = vld [vmem:[%s15095_s1 + $0x1fec] ss:$16 sps:$4 sm:$0xff]   ;;  %v11517_v59 = vld [vmem:[%s15095_s1 + $0x1fe0] ss:$16 sps:$4 sm:$0xff]  }
 0x3c4   :  { %7342 = vmatprep.subr.bf16.mxu0 %v11435_v60  ;;  %8190 = vmatprep.subr.bf16.mxu1 %v11438_v57  ;;  %v11520_v60 = vld [vmem:[%s15095_s1 + $0x1fe8] ss:$16 sps:$4 sm:$0xff]  }
 0x3c5   :  { %7329 = vmatprep.mubr.bf16.mxu0 %v8703_v58  ;;  %8177 = vmatprep.mubr.bf16.mxu1 %v8703_v58  ;;  %v64_v57 = vld [vmem:[%s15096_s0 + $0x178] sm:$0xff] }
 0x3c6   :  { %v80_v58 = vld [vmem:[%s15096_s0 + $0x1f8] sm:$0xff] }
 0x3c7   :  { %7343 = vmatpush1.bf16.msra.mxu0 %v11433_v61  ;;  %8191 = vmatpush1.bf16.msra.mxu1 %v11436_v62  ;;  %v8672_v61 = vcombine.low %v14762_v4, %v14767_v1  ;;  %v8705_v62 = vcombine.high %v64_v57, %v80_v58 }
 0x3c8   :  { %7344 = vmatprep.subr.bf16.mxu0 %v11441_v63  ;;  %8192 = vmatprep.subr.bf16.mxu1 %v11444_v0  ;;  %v8704_v63 = vcombine.low %v64_v57, %v80_v58 }
 0x3ca   :  { %7330 = vmatmul.mubr.bf16.gmra.mrb[4].mxu0 %v8702_v3  ;;  %8178 = vmatmul.mubr.bf16.gmra.mrb[4].mxu1 %v8702_v3 }
 0x3cb   :  { %7345 = vmatpush1.bf16.msra.mxu0 %v11439_v2  ;;  %8193 = vmatpush1.bf16.msra.mxu1 %v11442_v5 }
 0x3cc   :  { %7346 = vmatprep.subr.bf16.mxu0 %v11447_v6  ;;  %8194 = vmatprep.subr.bf16.mxu1 %v11450_v7 }
 0x3cd   :  { %7372 = vmatprep.mubr.bf16.mxu0 %v8673_v8  ;;  %8220 = vmatprep.mubr.bf16.mxu1 %v8673_v8 }
 0x3cf   :  { %7347 = vmatpush1.bf16.msra.mxu0 %v11445_v11  ;;  %8195 = vmatpush1.bf16.msra.mxu1 %v11448_v12 }
 0x3d0   :  { %7348 = vmatprep.subr.bf16.mxu0 %v11453_v9  ;;  %8196 = vmatprep.subr.bf16.mxu1 %v11456_v10 }
 0x3d3   :  { %7349 = vmatpush1.bf16.msra.mxu0 %v11451_v13  ;;  %8197 = vmatpush1.bf16.msra.mxu1 %v11454_v14 }
 0x3d4   :  { %7350 = vmatprep.subr.bf16.mxu0 %v11459_v15  ;;  %8198 = vmatprep.subr.bf16.mxu1 %v11462_v16 }
 0x3d7   :  { %7351 = vmatpush1.bf16.msra.mxu0 %v11457_v19  ;;  %8199 = vmatpush1.bf16.msra.mxu1 %v11460_v17 }
 0x3d8   :  { %7352 = vmatprep.subr.bf16.mxu0 %v11465_v18  ;;  %8200 = vmatprep.subr.bf16.mxu1 %v11468_v20 }
 0x3db   :  { %7353 = vmatpush1.bf16.msra.mxu0 %v11463_v21  ;;  %8201 = vmatpush1.bf16.msra.mxu1 %v11466_v22 }
 0x3dc   :  { %7354 = vmatprep.subr.bf16.mxu0 %v11471_v23  ;;  %8202 = vmatprep.subr.bf16.mxu1 %v11474_v24 }
 0x3df   :  { %7355 = vmatpush1.bf16.msra.mxu0 %v11469_v26  ;;  %8203 = vmatpush1.bf16.msra.mxu1 %v11472_v25 }
 0x3e0   :  { %7356 = vmatprep.subr.bf16.mxu0 %v11477_v27  ;;  %8204 = vmatprep.subr.bf16.mxu1 %v11480_v28 }
 0x3e3   :  { %7357 = vmatpush1.bf16.msra.mxu0 %v11475_v29  ;;  %8205 = vmatpush1.bf16.msra.mxu1 %v11478_v30 }
 0x3e4   :  { %7358 = vmatprep.subr.bf16.mxu0 %v11483_v31  ;;  %8206 = vmatprep.subr.bf16.mxu1 %v11486_v32 }
 0x3e7   :  { %7359 = vmatpush1.bf16.msra.mxu0 %v11481_v34  ;;  %8207 = vmatpush1.bf16.msra.mxu1 %v11484_v36 }
 0x3e8   :  { %7360 = vmatprep.subr.bf16.mxu0 %v11489_v33  ;;  %8208 = vmatprep.subr.bf16.mxu1 %v11492_v35 }
 0x3eb   :  { %7361 = vmatpush1.bf16.msra.mxu0 %v11487_v37  ;;  %8209 = vmatpush1.bf16.msra.mxu1 %v11490_v38 }
 0x3ec   :  { %7362 = vmatprep.subr.bf16.mxu0 %v11495_v39  ;;  %8210 = vmatprep.subr.bf16.mxu1 %v11498_v40 }
 0x3ef   :  { %7363 = vmatpush1.bf16.msra.mxu0 %v11493_v42  ;;  %8211 = vmatpush1.bf16.msra.mxu1 %v11496_v44 }
 0x3f0   :  { %7364 = vmatprep.subr.bf16.mxu0 %v11501_v41  ;;  %8212 = vmatprep.subr.bf16.mxu1 %v11504_v43 }
 0x3f3   :  { %7365 = vmatpush1.bf16.msra.mxu0 %v11499_v45  ;;  %8213 = vmatpush1.bf16.msra.mxu1 %v11502_v46 }
 0x3f4   :  { %7366 = vmatprep.subr.bf16.mxu0 %v11507_v47  ;;  %8214 = vmatprep.subr.bf16.mxu1 %v11510_v48 }
 0x3f7   :  { %7367 = vmatpush1.bf16.msra.mxu0 %v11505_v51  ;;  %8215 = vmatpush1.bf16.msra.mxu1 %v11508_v52 }
 0x3f8   :  { %7368 = vmatprep.subr.bf16.mxu0 %v11513_v49  ;;  %8216 = vmatprep.subr.bf16.mxu1 %v11516_v50 }
 0x3fb   :  { %7369 = vmatpush1.bf16.msra.mxu0 %v11511_v53  ;;  %8217 = vmatpush1.bf16.msra.mxu1 %v11514_v54 }
 0x3fc   :  { %7370 = vmatprep.subr.bf16.mxu0 %v11519_v55  ;;  %8218 = vmatprep.subr.bf16.mxu1 %v11522_v56 }
 0x3ff   :  { %7371 = vmatpush1.bf16.msra.mxu0 %v11517_v59  ;;  %8219 = vmatpush1.bf16.msra.mxu1 %v11520_v60 }
 0x402   :  { %7373 = vmatmul.mubr.bf16.vlgmr.msra.gmra.mrb[0].mxu0 %v8672_v61  ;;  %8221 = vmatmul.mubr.bf16.vlgmr.msra.gmra.mrb[0].mxu1 %v8672_v61 }
 0x403   :  { %7382 = vmatprep.mubr.bf16.mxu0 %v8705_v62  ;;  %8230 = vmatprep.mubr.bf16.mxu1 %v8705_v62 }
 0x40a   :  { %7383 = vmatmul.mubr.bf16.gmra.mrb[4].mxu0 %v8704_v63  ;;  %8231 = vmatmul.mubr.bf16.gmra.mrb[4].mxu1 %v8704_v63 }
 0x4d5   :  { %v14941_v0 = vpop.f32.mrb[0].mxu0  ;;  %v14943_v3 = vpop.f32.mrb[0].mxu1 }
 0x4d6   :  { %v14945_v2 = vpop.f32.mrb[1].mxu0  ;;  %v14947_v5 = vpop.f32.mrb[1].mxu1 }
 0x4d7   :  { %v14949_v6 = vpop.f32.mrb[2].mxu0  ;;  %v14951_v4 = vpop.f32.mrb[2].mxu1 }
 0x4d8   :  { %v8250_v1 = vadd.f32 %v14949_v6, %v14941_v0  ;;  %v8268_v7 = vadd.f32 %v14951_v4, %v14943_v3  ;;  %v14957_v8 = vpop.f32.mrb[3].mxu0  ;;  %v14959_v11 = vpop.f32.mrb[3].mxu1 }
 0x4d9   :  { %v8259_v12 = vadd.f32 %v14957_v8, %v14945_v2  ;;  %v8277_v9 = vadd.f32 %v14959_v11, %v14947_v5 }
 0x4dd   :  { %v14965_v10 = vpop.f32.mrb[4].mxu0  ;;  %v14967_v13 = vpop.f32.mrb[4].mxu1 }
 0x4de   :  { %v8251_v14 = vadd.f32 %v8250_v1, %v14965_v10  ;;  %v8269_v15 = vadd.f32 %v8268_v7, %v14967_v13  ;;  %v14971_v16 = vpop.f32.mrb[5].mxu0  ;;  %v14973_v19 = vpop.f32.mrb[5].mxu1 }
 0x4df   :  { %v8260_v17 = vadd.f32 %v8259_v12, %v14971_v16  ;;  %v8278_v18 = vadd.f32 %v8277_v9, %v14973_v19  ;;  %v14977_v20 = vpop.f32.mrb[6].mxu0  ;;  %v14979_v21 = vpop.f32.mrb[6].mxu1 }
 0x4e0   :  { %v8252_v22 = vadd.f32 %v8251_v14, %v14977_v20  ;;  %v8270_v23 = vadd.f32 %v8269_v15, %v14979_v21  ;;  %v14983_v24 = vpop.f32.mrb[7].mxu0  ;;  %v14985_v26 = vpop.f32.mrb[7].mxu1 }
 0x4e1   :  { %v8261_v25 = vadd.f32 %v8260_v17, %v14983_v24  ;;  %v8279_v27 = vadd.f32 %v8278_v18, %v14985_v26 }
 0x4e2   :  { %v8253_v28 = vrot.slane %v8252_v22, 4  ;;  %v8271_v29 = vrot.slane %v8270_v23, 4 }
 0x4e3   :  { %v8262_v30 = vrot.slane %v8261_v25, 4  ;;  %v8280_v31 = vrot.slane %v8279_v27, 4 }
 0x4e4   :  { %v8254_v32 = vadd.f32 %v8253_v28, %v8252_v22  ;;  %v8272_v34 = vadd.f32 %v8271_v29, %v8270_v23 }
 0x4e5   :  { %v8263_v36 = vadd.f32 %v8262_v30, %v8261_v25  ;;  %v8281_v33 = vadd.f32 %v8280_v31, %v8279_v27 }
 0x4e6   :  { %v8255_v35 = vrot.slane %v8254_v32, 2  ;;  %v8273_v37 = vrot.slane %v8272_v34, 2 }
 0x4e7   :  { %v8264_v38 = vrot.slane %v8263_v36, 2  ;;  %v8282_v39 = vrot.slane %v8281_v33, 2 }
 0x4e8   :  { %v8256_v40 = vadd.f32 %v8255_v35, %v8254_v32  ;;  %v8274_v42 = vadd.f32 %v8273_v37, %v8272_v34 }
 0x4e9   :  { %v8265_v44 = vadd.f32 %v8264_v38, %v8263_v36  ;;  %v8283_v41 = vadd.f32 %v8282_v39, %v8281_v33 }
 0x4ea   :  { %v8257_v43 = vrot.slane %v8256_v40, 1  ;;  %v8275_v45 = vrot.slane %v8274_v42, 1 }
 0x4eb   :  { %v8266_v46 = vrot.slane %v8265_v44, 1  ;;  %v8284_v47 = vrot.slane %v8283_v41, 1 }
 0x4ec   :  { %v8258_v48 = vadd.f32 %v8257_v43, %v8256_v40  ;;  %v8276_v51 = vadd.f32 %v8275_v45, %v8274_v42 }
 0x4ed   :  { %v8267_v52 = vadd.f32 %v8266_v46, %v8265_v44  ;;  %v8285_v49 = vadd.f32 %v8284_v47, %v8283_v41 }
 0x4ee   :  { %v14989_v50 = vmul.f32 0.03125, %v8258_v48  ;;  %v14991_v53 = vmul.f32 0.03125, %v8276_v51 }
 0x4ef   :  { %v14993_v54 = vmul.f32 0.03125, %v8267_v52  ;;  %v14995_v55 = vmul.f32 0.03125, %v8285_v49 }
 0x4f0   :  { %v8290_v56 = vsub.f32 %v14941_v0, %v14989_v50  ;;  %v8294_v59 = vsub.f32 %v14949_v6, %v14989_v50  ;;  %v8298_v60 = vsub.f32 %v14965_v10, %v14989_v50  ;;  %v8302_v57 = vsub.f32 %v14977_v20, %v14989_v50 }
 0x4f1   :  { %v8292_v58 = vsub.f32 %v14943_v3, %v14991_v53  ;;  %v8296_v61 = vsub.f32 %v14951_v4, %v14991_v53  ;;  %v8300_v62 = vsub.f32 %v14967_v13, %v14991_v53  ;;  %v8304_v63 = vsub.f32 %v14979_v21, %v14991_v53 }
 0x4f2   :  { %v8330_v1 = vmul.f32 %v8290_v56, %v8290_v56  ;;  %v8334_v7 = vmul.f32 %v8294_v59, %v8294_v59  ;;  %v8338_v12 = vmul.f32 %v8298_v60, %v8298_v60  ;;  %v8342_v9 = vmul.f32 %v8302_v57, %v8302_v57 }
 0x4f3   :  { %v8332_v14 = vmul.f32 %v8292_v58, %v8292_v58  ;;  %v8336_v15 = vmul.f32 %v8296_v61, %v8296_v61  ;;  %v8340_v17 = vmul.f32 %v8300_v62, %v8300_v62  ;;  %v8291_v22 = vsub.f32 %v14945_v2, %v14993_v54 }
 0x4f4   :  { %v8346_v18 = vadd.f32 %v8334_v7, %v8330_v1  ;;  %v8295_v23 = vsub.f32 %v14957_v8, %v14993_v54  ;;  %v8299_v25 = vsub.f32 %v14971_v16, %v14993_v54  ;;  %v8303_v28 = vsub.f32 %v14983_v24, %v14993_v54 }
 0x4f5   :  { %v8364_v27 = vadd.f32 %v8336_v15, %v8332_v14  ;;  %v8293_v29 = vsub.f32 %v14947_v5, %v14995_v55  ;;  %v8297_v30 = vsub.f32 %v14959_v11, %v14995_v55  ;;  %v8344_v32 = vmul.f32 %v8304_v63, %v8304_v63 }
 0x4f6   :  { %v8347_v31 = vadd.f32 %v8346_v18, %v8338_v12  ;;  %v8331_v34 = vmul.f32 %v8291_v22, %v8291_v22  ;;  %v8335_v36 = vmul.f32 %v8295_v23, %v8295_v23  ;;  %v8339_v35 = vmul.f32 %v8299_v25, %v8299_v25 }
 0x4f7   :  { %v8365_v33 = vadd.f32 %v8364_v27, %v8340_v17  ;;  %v8301_v37 = vsub.f32 %v14973_v19, %v14995_v55  ;;  %v8305_v38 = vsub.f32 %v14985_v26, %v14995_v55  ;;  %v8333_v42 = vmul.f32 %v8293_v29, %v8293_v29 }
 0x4f8   :  { %v8348_v39 = vadd.f32 %v8347_v31, %v8342_v9  ;;  %v8355_v40 = vadd.f32 %v8335_v36, %v8331_v34  ;;  %v8337_v44 = vmul.f32 %v8297_v30, %v8297_v30  ;;  %v8343_v43 = vmul.f32 %v8303_v28, %v8303_v28 }
 0x4f9   :  { %v8366_v41 = vadd.f32 %v8365_v33, %v8344_v32  ;;  %v8341_v47 = vmul.f32 %v8301_v37, %v8301_v37  ;;  %v8345_v56 = vmul.f32 %v8305_v38, %v8305_v38 }
 0x4fa   :  { %v8349_v45 = vrot.slane %v8348_v39, 4  ;;  %v8356_v46 = vadd.f32 %v8355_v40, %v8339_v35  ;;  %v8373_v48 = vadd.f32 %v8337_v44, %v8333_v42  ;;  %v11531_v40 = vmov 1966171168  }
 0x4fb   :  { %v8367_v51 = vrot.slane %v8366_v41, 4  ;;  %v8402_v42 = vunpack.c.l.s4 %v11531_v40  ;;  %v8404_v44 = vlaneseq }
 0x4fc   :  { %v8350_v52 = vadd.f32 %v8349_v45, %v8348_v39  ;;  %v8357_v49 = vadd.f32 %v8356_v46, %v8343_v43  ;;  %v8374_v59 = vadd.f32 %v8373_v48, %v8341_v47 }
 0x4fd   :  { %v8368_v60 = vadd.f32 %v8367_v51, %v8366_v41  ;;  %v8403_v41 = vunpack.c.0.s8 %v8402_v42  ;;  %v8405_v43 = vshrl.u32 %v8404_v44, 7 }
 0x4fe   :  { %v8351_v57 = vrot.slane %v8350_v52, 2  ;;  %v8358_v58 = vrot.slane %v8357_v49, 4  ;;  %v8375_v61 = vadd.f32 %v8374_v59, %v8345_v56 }
 0x4ff   :  { %v8369_v62 = vrot.slane %v8368_v60, 2  ;;  %v8406_v47 = vsub.s32 %v8403_v41, %v8405_v43 }
 0x500   :  { %v8352_v63 = vadd.f32 %v8351_v57, %v8350_v52  ;;  %v8359_v1 = vadd.f32 %v8358_v58, %v8357_v49  ;;  %v8376_v7 = vrot.slane %v8375_v61, 4  ;;  %v8394_v57 = vld [vmem:[%s15097_s2] sm:$0xf]  ;;  %v8429_v58 = vsub.s32 0, %v8405_v43 }
 0x501   :  { %v8370_v12 = vadd.f32 %v8369_v62, %v8368_v60  ;;  %v8433_v62 = vsub.s32 1, %v8405_v43 }
 0x502   :  { %v8353_v9 = vrot.slane %v8352_v63, 1  ;;  %v8360_v14 = vrot.slane %v8359_v1, 2  ;;  %v8377_v15 = vadd.f32 %v8376_v7, %v8375_v61 }
 0x503   :  { %v8371_v17 = vrot.slane %v8370_v12, 1 }
 0x504   :  { %v8354_v18 = vadd.f32 %v8353_v9, %v8352_v63  ;;  %v8361_v22 = vadd.f32 %v8360_v14, %v8359_v1  ;;  %v8378_v23 = vrot.slane %v8377_v15, 2  ;;  %v8437_v63 = vsub.s32 2, %v8405_v43 }
 0x505   :  { %v8372_v25 = vadd.f32 %v8371_v17, %v8370_v12  ;;  %v8441_v1 = vsub.s32 3, %v8405_v43 }
 0x506   :  { %v8382_v27 = vmul.f32 0.03125, %v8354_v18  ;;  %v8362_v28 = vrot.slane %v8361_v22, 1  ;;  %v8379_v29 = vadd.f32 %v8378_v23, %v8377_v15 }
 0x507   :  { %v8384_v30 = vmul.f32 0.03125, %v8372_v25 }
 0x508   :  { %v8386_v31 = vadd.f32 1e-05, %v8382_v27  ;;  %v8363_v32 = vadd.f32 %v8362_v28, %v8361_v22  ;;  %v8380_v34 = vrot.slane %v8379_v29, 1 }
 0x509   :  { %v8388_v36 = vadd.f32 1e-05, %v8384_v30 }
 0x50a   :  { %v8383_v33 = vmul.f32 0.03125, %v8363_v32  ;;  %v8381_v35 = vadd.f32 %v8380_v34, %v8379_v29  ;;  %11523 = vrsqrt.f32 %v8386_v31 }
 0x50b   :  { %11525 = vrsqrt.f32 %v8388_v36 }
 0x50c   :  { %v8387_v37 = vadd.f32 1e-05, %v8383_v33  ;;  %v8385_v38 = vmul.f32 0.03125, %v8381_v35 }
 0x50e   :  { %11527 = vrsqrt.f32 %v8387_v37  ;;  %v8389_v39 = vadd.f32 1e-05, %v8385_v38 }
 0x510   :  { %11529 = vrsqrt.f32 %v8389_v39 }
 0x514   :  { %v11524_v45 = vpop.eup %11523 }
 0x515   :  { %v11526_v46 = vpop.eup %11525 }
 0x518   :  { %v11528_v48 = vpop.eup %11527 }
 0x519   :  { %v8399_v51 = vcombine.low %v11524_v45, %v11528_v48 }
 0x51a   :  { %v11530_v52 = vpop.eup %11529 }
 0x51b   :  { %v8407_v49 = vrot.slane %v8399_v51, %v8406_v47  ;;  %v8400_v56 = vcombine.low %v11526_v46, %v11530_v52 }
 0x51d   :  { %v8414_v59 = vrot.slane %v8400_v56, %v8406_v47 }
 0x51f   :  { %v8415_v60 = vcombine.low %v8407_v49, %v8414_v59 }
 0x521   :  { %v8422_v61 = vrot.slane %v8415_v60, %v8406_v47 }
 0x523   :  { %v8424_v7 = vmul.f32 %v8422_v61, %v8394_v57 }
 0x525   :  { %v8430_v12 = vrot.slane %v8424_v7, %v8429_v58  ;;  %v8434_v9 = vrot.slane %v8424_v7, %v8433_v62  ;;  %v8438_v14 = vrot.slane %v8424_v7, %v8437_v63  ;;  %v8442_v15 = vrot.slane %v8424_v7, %v8441_v1 }
 0x527   :  { %v8447_v17 = vmul.f32 %v8430_v12, %v14989_v50  ;;  %v8448_v18 = vmul.f32 %v8434_v9, %v14993_v54  ;;  %v8449_v22 = vmul.f32 %v8438_v14, %v14991_v53  ;;  %v8450_v23 = vmul.f32 %v8442_v15, %v14995_v55 }
 0x528   :  { %v8481_v25 = vmul.f32 %v8430_v12, %v14941_v0  ;;  %v8482_v27 = vmul.f32 %v8434_v9, %v14945_v2  ;;  %v8483_v28 = vmul.f32 %v8438_v14, %v14943_v3  ;;  %v8484_v29 = vmul.f32 %v8442_v15, %v14947_v5 }
 0x529   :  { %v8455_v30 = vcombine.low %v8447_v17, %v8448_v18  ;;  %v8456_v31 = vcombine.low %v8449_v22, %v8450_v23  ;;  %v8485_v32 = vmul.f32 %v8430_v12, %v14949_v6  ;;  %v8486_v50 = vmul.f32 %v8434_v9, %v14957_v8 }
 0x52a   :  { %v8487_v54 = vmul.f32 %v8438_v14, %v14951_v4  ;;  %v8488_v53 = vmul.f32 %v8442_v15, %v14959_v11  ;;  %v8489_v55 = vmul.f32 %v8430_v12, %v14965_v10  ;;  %v8490_v0 = vmul.f32 %v8434_v9, %v14971_v16  ;;  %v8425_v11 = vld [vmem:[%s15098_s3] sm:$0xf] }
 0x52b   :  { %v8463_v34 = vrot.slane %v8455_v30, %v8406_v47  ;;  %v8470_v2 = vrot.slane %v8456_v31, %v8406_v47  ;;  %v8491_v3 = vmul.f32 %v8438_v14, %v14967_v13  ;;  %v8492_v5 = vmul.f32 %v8442_v15, %v14973_v19 }
 0x52c   :  { %v8493_v36 = vmul.f32 %v8430_v12, %v14977_v20  ;;  %v8494_v6 = vmul.f32 %v8434_v9, %v14983_v24  ;;  %v8495_v8 = vmul.f32 %v8438_v14, %v14979_v21  ;;  %v8496_v4 = vmul.f32 %v8442_v15, %v14985_v26 }
 0x52d   :  { %v8471_v33 = vcombine.low %v8463_v34, %v8470_v2 }
 0x52f   :  { %v8478_v10 = vrot.slane %v8471_v33, %v8406_v47 }
 0x531   :  { %v8480_v16 = vsub.f32 %v8425_v11, %v8478_v10 }
 0x533   :  { %v8501_v35 = vrot.slane %v8480_v16, %v8429_v58  ;;  %v8505_v37 = vrot.slane %v8480_v16, %v8433_v62  ;;  %v8509_v13 = vrot.slane %v8480_v16, %v8437_v63  ;;  %v8513_v38 = vrot.slane %v8480_v16, %v8441_v1 }
 0x535   :  { %v8518_v19 = vadd.f32 %v8501_v35, %v8481_v25  ;;  %v8519_v39 = vadd.f32 %v8505_v37, %v8482_v27  ;;  %v8520_v20 = vadd.f32 %v8509_v13, %v8483_v28  ;;  %v8521_v40 = vadd.f32 %v8513_v38, %v8484_v29 }
 0x536   :  { %v8522_v24 = vadd.f32 %v8501_v35, %v8485_v32  ;;  %v8523_v42 = vadd.f32 %v8505_v37, %v8486_v50  ;;  %v8524_v21 = vadd.f32 %v8509_v13, %v8487_v54  ;;  %v8525_v44 = vadd.f32 %v8513_v38, %v8488_v53 }
 0x537   :  { %v8526_v26 = vadd.f32 %v8501_v35, %v8489_v55  ;;  %v8527_v41 = vadd.f32 %v8505_v37, %v8490_v0  ;;  %v8528_v43 = vadd.f32 %v8509_v13, %v8491_v3  ;;  %v8529_v45 = vadd.f32 %v8513_v38, %v8492_v5 }
 0x538   :  { %v8530_v46 = vadd.f32 %v8501_v35, %v8493_v36  ;;  %v8531_v48 = vadd.f32 %v8505_v37, %v8494_v6  ;;  %v8532_v47 = vadd.f32 %v8509_v13, %v8495_v8  ;;  %v8533_v51 = vadd.f32 %v8513_v38, %v8496_v4 }
 0x539   :  { %vm8534_vm0 = vcmp.gt.f32.partialorder %v8518_v19, 0.0  ;;  %vm8535_vm1 = vcmp.gt.f32.partialorder %v8519_v39, 0.0  ;;  %vm8536_vm2 = vcmp.gt.f32.partialorder %v8520_v20, 0.0  ;;  %vm8537_vm3 = vcmp.gt.f32.partialorder %v8521_v40, 0.0 }
 0x53a   :  { %vm8538_vm4 = vcmp.gt.f32.partialorder %v8522_v24, 0.0  ;;  %vm8539_vm5 = vcmp.gt.f32.partialorder %v8523_v42, 0.0  ;;  %vm8540_vm6 = vcmp.gt.f32.partialorder %v8524_v21, 0.0  ;;  %vm8541_vm7 = vcmp.gt.f32.partialorder %v8525_v44, 0.0 }
 0x53b   :  { %vm8542_vm8 = vcmp.gt.f32.partialorder %v8526_v26, 0.0  ;;  %vm8543_vm9 = vcmp.gt.f32.partialorder %v8527_v41, 0.0  ;;  %vm8544_vm10 = vcmp.gt.f32.partialorder %v8528_v43, 0.0  ;;  %vm8545_vm11 = vcmp.gt.f32.partialorder %v8529_v45, 0.0 }
 0x53c   :  { %vm8546_vm12 = vcmp.gt.f32.partialorder %v8530_v46, 0.0  ;;  %vm8547_vm13 = vcmp.gt.f32.partialorder %v8531_v48, 0.0  ;;  %vm8548_vm14 = vcmp.gt.f32.partialorder %v8532_v47, 0.0  ;;  %vm8549_vm15 = vcmp.gt.f32.partialorder %v8533_v51, 0.0 }
 0x53d   :  { %v8550_v52 = vmul.f32 0.2, %v8518_v19  ;;  %v8551_v49 = vmul.f32 0.2, %v8519_v39  ;;  %v8552_v56 = vmul.f32 0.2, %v8520_v20 }
 0x53e   :  { %v8553_v59 = vmul.f32 0.2, %v8521_v40  ;;  %v8554_v60 = vmul.f32 0.2, %v8522_v24  ;;  %v8555_v57 = vmul.f32 0.2, %v8523_v42 }
 0x53f   :  { %v8556_v58 = vmul.f32 0.2, %v8524_v21  ;;  %v8557_v61 = vmul.f32 0.2, %v8525_v44  ;;  %v8558_v62 = vmul.f32 0.2, %v8526_v26  ;;  %v8566_v63 = vsel %vm8534_vm0, %v8518_v19, %v8550_v52 }
 0x540   :  { %v8559_v1 = vmul.f32 0.2, %v8527_v41  ;;  %v8560_v7 = vmul.f32 0.2, %v8528_v43  ;;  %v8561_v12 = vmul.f32 0.2, %v8529_v45  ;;  %v8567_v9 = vsel %vm8535_vm1, %v8519_v39, %v8551_v49 }
 0x541   :  { %v8562_v14 = vmul.f32 0.2, %v8530_v46  ;;  %v8563_v15 = vmul.f32 0.2, %v8531_v48  ;;  %v8564_v17 = vmul.f32 0.2, %v8532_v47  ;;  %v8568_v18 = vsel %vm8536_vm2, %v8520_v20, %v8552_v56 }
 0x542   :  { %v8565_v22 = vmul.f32 0.2, %v8533_v51  ;;  %v8569_v23 = vsel %vm8537_vm3, %v8521_v40, %v8553_v59  ;;  %v8570_v25 = vsel %vm8538_vm4, %v8522_v24, %v8554_v60  ;;  %v8571_v27 = vsel %vm8539_vm5, %v8523_v42, %v8555_v57 }
 0x543   :  { %v8572_v28 = vsel %vm8540_vm6, %v8524_v21, %v8556_v58  ;;  %v8573_v29 = vsel %vm8541_vm7, %v8525_v44, %v8557_v61  ;;  %v8574_v30 = vsel %vm8542_vm8, %v8526_v26, %v8558_v62  ;;  %v8575_v31 = vsel %vm8543_vm9, %v8527_v41, %v8559_v1 }
 0x544   :  { %v8576_v32 = vsel %vm8544_vm10, %v8528_v43, %v8560_v7  ;;  %v8577_v50 = vsel %vm8545_vm11, %v8529_v45, %v8561_v12  ;;  %v8578_v54 = vsel %vm8546_vm12, %v8530_v46, %v8562_v14  ;;  %v8579_v53 = vsel %vm8547_vm13, %v8531_v48, %v8563_v15 }
 0x545   :  { %v8580_v55 = vsel %vm8548_vm14, %v8532_v47, %v8564_v17  ;;  %v8581_v0 = vsel %vm8549_vm15, %v8533_v51, %v8565_v22  ;;  %v9738_v34 = vpack.c.bf16 %v8567_v9, %v8566_v63  ;;  %v9739_v2 = vpack.c.bf16 %v8569_v23, %v8568_v18 }
 0x546   :  { %v9740_v3 = vpack.c.bf16 %v8571_v27, %v8570_v25  ;;  %v9741_v5 = vpack.c.bf16 %v8573_v29, %v8572_v28  ;;  %v9742_v36 = vpack.c.bf16 %v8575_v31, %v8574_v30  ;;  %v9743_v6 = vpack.c.bf16 %v8577_v50, %v8576_v32 }
 0x547   :  { %v9744_v8 = vpack.c.bf16 %v8579_v53, %v8578_v54  ;;  %v9745_v4 = vpack.c.bf16 %v8581_v0, %v8580_v55  ;;  %8630 = vst [vmem:[%s15099_s4] sm:$0xff] %v9738_v34  ;;  %8631 = vst [vmem:[%s15099_s4 + $0x8] sm:$0xff] %v9739_v2 }
 0x548   :  { %8632 = vst [vmem:[%s15099_s4 + $0x10] sm:$0xff] %v9740_v3  ;;  %8633 = vst [vmem:[%s15099_s4 + $0x18] sm:$0xff] %v9741_v5 }
 0x549   :  { %8634 = vst [vmem:[%s15099_s4 + $0x20] sm:$0xff] %v9742_v36  ;;  %8635 = vst [vmem:[%s15099_s4 + $0x28] sm:$0xff] %v9743_v6 }
 0x54a   :  { %8636 = vst [vmem:[%s15099_s4 + $0x30] sm:$0xff] %v9744_v8  ;;  %8637 = vst [vmem:[%s15099_s4 + $0x38] sm:$0xff] %v9745_v4 }

</bundles_post_ra>
